<compile_context>
chip_gen: v7x
topology: tpu7x:2x2x1
jax: 0.10.0
libtpu: 0.0.40
codegen_flags: <defaults>
</compile_context>

<pallas_src>
import jax
import jax.numpy as jnp
from jax.experimental import pallas as pl
from jax.experimental.pallas import tpu as pltpu

_SUBLANE = 8
_LANE = 128
# Per-block VMEM budget measured in *padded* bytes (f32 minor dims tile to
# (8,128)).  4 blocks live at once (input + output, each double-buffered):
# 4 * 6 MB = 24 MB, under the 32 MiB scoped-VMEM limit we request below.
_MAX_BLOCK_VMEM_BYTES = 6 * 1024 * 1024
_VMEM_LIMIT_BYTES = 32 * 1024 * 1024  # safe on v5e/v6e (128 MiB phys) and v7x (64 MiB phys)


def _relu_kernel(x_ref, o_ref):
    # Pure VPU elementwise max on the whole VMEM tile; DMA dominates.
    o_ref[...] = jnp.maximum(x_ref[...], jnp.zeros((), x_ref.dtype))


def _padded_plane_bytes(h, w, itemsize):
    """VMEM footprint of one (h, w) minor-dim slice after (8,128) tiling."""
    return pl.cdiv(h, _SUBLANE) * _SUBLANE * pl.cdiv(w, _LANE) * _LANE * itemsize


def relu_pallas(x: jax.Array) -> jax.Array:
    """ReLU matching torch.nn.ReLU(inplace=True) forward semantics."""
    if x.ndim != 4:
        # TODO(synk): non-NCHW ranks are left to XLA (which fuses the max into
        # neighbours); the module only ever sees a 4-D tensor.
        return jnp.maximum(x, jnp.zeros((), x.dtype))

    n, c, h, w = x.shape
    itemsize = jnp.dtype(x.dtype).itemsize
    per_channel = n * _padded_plane_bytes(h, w, itemsize)

    # Split the channel dim into the fewest blocks whose padded VMEM footprint
    # fits the budget.  For [1, 1344, 14, 14] f32 this picks 2 blocks of 672
    # channels (~5.5 MB padded each), so the output DMA of block 0 overlaps
    # the input DMA of block 1 while keeping per-step overhead to 2 steps.
    num_blocks = None
    for g in range(1, c + 1):
        if c % g == 0 and (c // g) * per_channel <= _MAX_BLOCK_VMEM_BYTES:
            num_blocks = g
            break
    if num_blocks is None:
        # A single (n, 1, h, w) slice already exceeds the budget; let XLA
        # handle it rather than risk a VMEM OOM.
        return jnp.maximum(x, jnp.zeros((), x.dtype))

    cb = c // num_blocks

    # Block keeps the full (H, W) minor dims -> satisfies the (8,128) rule
    # without any wrapper-side reshape / relayout around the custom call.
    spec = pl.BlockSpec((n, cb, h, w), lambda i: (0, i, 0, 0))

    return pl.pallas_call(
        _relu_kernel,
        out_shape=jax.ShapeDtypeStruct(x.shape, x.dtype),
        grid=(num_blocks,),
        in_specs=[spec],
        out_specs=spec,
        # ReLU is safely in-place: reuse the input's HBM buffer for the output
        # (pair with donate_argnums at the jit boundary).
        input_output_aliases={0: 0},
        cost_estimate=pl.CostEstimate(
            flops=int(x.size),
            transcendentals=0,
            bytes_accessed=int(2 * x.size * itemsize),
        ),
        # Channel blocks are independent; "parallel" is harmless (no claim of
        # an automatic v7x dual-TensorCore split is made).
        compiler_params=pltpu.CompilerParams(
            dimension_semantics=("parallel",),
            vmem_limit_bytes=_VMEM_LIMIT_BYTES,
        ),
    )(x)


if __name__ == "__main__":
    key = jax.random.PRNGKey(0)
    # Shape implied by the module's forward: [1, 1344, 14, 14] (NCHW), fp32.
    x = jax.random.normal(key, (1, 1344, 14, 14), dtype=jnp.float32)

    # Compute the reference BEFORE calling the kernel: the input buffer is
    # donated (in-place ReLU), so x must not be needed afterwards.
    ref = jnp.maximum(x, 0.0)
    jax.block_until_ready(ref)

    relu_fn = jax.jit(relu_pallas, donate_argnums=0)
    y = relu_fn(x)
    jax.block_until_ready(y)

    assert y.shape == ref.shape and y.dtype == ref.dtype
    assert jnp.array_equal(y, ref), "Pallas ReLU mismatch"
    print("KERNEL_OK")
</pallas_src>

<mosaic_0001>
module attributes {stable_mosaic.version = 11 : i64} {
  func.func @_relu_kernel(%arg0: i32, %arg1: memref<1x672x14x14xf32, #tpu.memory_space<vmem>>, %arg2: memref<1x672x14x14xf32, #tpu.memory_space<vmem>>) attributes {dimension_semantics = [#tpu.dimension_semantics<parallel>], iteration_bounds = array<i64: 2>, scalar_prefetch = 0 : i64, scratch_operands = 0 : i64, tpu.core_type = #tpu.core_type<tc>, window_params = [{transform_indices = @transform_0, window_bounds = array<i64: 1, 672, 14, 14>}, {transform_indices = @transform_1, window_bounds = array<i64: 1, 672, 14, 14>}]} {
    %c0 = arith.constant 0 : index
    %c0_0 = arith.constant 0 : index
    %c0_1 = arith.constant 0 : index
    %c0_2 = arith.constant 0 : index
    %0 = vector.load %arg1[%c0, %c0_0, %c0_1, %c0_2] : memref<1x672x14x14xf32, #tpu.memory_space<vmem>>, vector<1x672x14x14xf32>
    %cst = arith.constant 0.000000e+00 : f32
    %1 = vector.broadcast %cst : f32 to vector<1x672x14x14xf32>
    %2 = arith.maximumf %0, %1 : vector<1x672x14x14xf32>
    %c0_3 = arith.constant 0 : index
    %c0_4 = arith.constant 0 : index
    %c0_5 = arith.constant 0 : index
    %c0_6 = arith.constant 0 : index
    %3 = vector.load %arg2[%c0_3, %c0_4, %c0_5, %c0_6] : memref<1x672x14x14xf32, #tpu.memory_space<vmem>>, vector<1x672x14x14xf32>
    tpu.vector_store %arg2[%c0_3, %c0_4, %c0_5, %c0_6], %2 {strides = array<i32>} : memref<1x672x14x14xf32, #tpu.memory_space<vmem>>, vector<1x672x14x14xf32>,
    return
  }
  func.func @transform_0(%arg0: i32) -> (i32, i32, i32, i32) {
    %c0_i32 = arith.constant 0 : i32
    %c0_i32_0 = arith.constant 0 : i32
    %c0_i32_1 = arith.constant 0 : i32
    %c0_i32_2 = arith.constant 0 : i32
    return %c0_i32, %arg0, %c0_i32_0, %c0_i32_1 : i32, i32, i32, i32
  }
  func.func @transform_1(%arg0: i32) -> (i32, i32, i32, i32) {
    %c0_i32 = arith.constant 0 : i32
    %c0_i32_0 = arith.constant 0 : i32
    %c0_i32_1 = arith.constant 0 : i32
    %c0_i32_2 = arith.constant 0 : i32
    return %c0_i32, %arg0, %c0_i32_0, %c0_i32_1 : i32, i32, i32, i32
  }
}

</mosaic_0001>

<bundles_post_ra>
// kernel: relu_pallas.1
= control target key start
LH: loop header
LB: loop body
LE: loop exit
PB: predicated region body
PF: predicated region fallthrough
CT: control target
= control target key end

     0   :  { %s4260_s6 = smov 0   ;;  %s12734_s0 = inlined_call_operand.vmem [shape: f32[1,1344,14,14], index: 0, kind: input, shape index: {}, may-alias: {0,1}]   ;;  %s12735_s1 = inlined_call_operand.vmem [shape: f32[1,1344,14,14], index: 1, kind: output, shape index: {}, may-alias: {0,1}]  }
   0x1 LB: > { %s4217_s7 = sadd.s32 4294967295, %s4248_s6   ;;  %p4221_p0 = scmp.ge.s32.totalorder %s4248_s6, 1  ;;  %s4248_s6 = sphi %s4260_s6, %s11_s6  }
   0x2   : > { %p89_p1 = scmp.lt.s32.totalorder %s4248_s6, 3 }
   0x4   : > { %p90_p2 = pnand %p4221_p0, %p89_p1 }
   0x6   : > { %93 = sbr.rel (%p90_p2) target bundleno = 1514 (0x5ea), region = 24 }
   0xd   : > { %s111_s8 = smul.u32 672, %s4217_s7  ;;  %vm2813_vm0 = vcmask 113664   ;;  %vm2815_vm1 = vcmask 111616  }
   0xf   : > { %p112_p3 = scmp.lt.s32.totalorder %s111_s8, 1343 }
  0x11   : > { %s15630_s8 = smov (!%p112_p3, %s111_s8), 1343 }
  0x12   : > { %s4228_s9 = sshll.u32 %s15630_s8, 4 }
  0x13   : > { %s4276_s12 = scalar_lea.vmem %s12734_s0, %s4228_s9  ;;  %s5055_s15 = scalar_lea.vmem %s12735_s1, %s4228_s9 }
  0x14   : > { %v4279_v0 = vld [vmem:[%s4276_s12] sm:$0xff]  ;;  %v4282_v1 = vld [vmem:[%s4276_s12 + $0x8] sm:$0x3f]  ;;  %v4285_v2 = vld [vmem:[%s4276_s12 + $0x10] sm:$0xff] }
  0x15   : > { %v4288_v3 = vld [vmem:[%s4276_s12 + $0x18] sm:$0x3f]  ;;  %v4291_v4 = vld [vmem:[%s4276_s12 + $0x20] sm:$0xff]  ;;  %v4294_v5 = vld [vmem:[%s4276_s12 + $0x28] sm:$0x3f] }
  0x16   : > { %v4297_v6 = vld [vmem:[%s4276_s12 + $0x30] sm:$0xff]  ;;  %v4300_v7 = vld [vmem:[%s4276_s12 + $0x38] sm:$0x3f]  ;;  %v4303_v8 = vld [vmem:[%s4276_s12 + $0x40] sm:$0xff] }
  0x17   : > { %v4306_v9 = vld [vmem:[%s4276_s12 + $0x48] sm:$0x3f]  ;;  %v4309_v10 = vld [vmem:[%s4276_s12 + $0x50] sm:$0xff]  ;;  %v4312_v11 = vld [vmem:[%s4276_s12 + $0x58] sm:$0x3f] }
  0x18   : > { %v4315_v12 = vld [vmem:[%s4276_s12 + $0x60] sm:$0xff]  ;;  %v4318_v13 = vld [vmem:[%s4276_s12 + $0x68] sm:$0x3f]  ;;  %v4321_v14 = vld [vmem:[%s4276_s12 + $0x70] sm:$0xff] }
  0x19   : > { %v4324_v15 = vld [vmem:[%s4276_s12 + $0x78] sm:$0x3f]  ;;  %v4327_v16 = vld [vmem:[%s4276_s12 + $0x80] sm:$0xff]  ;;  %v4330_v17 = vld [vmem:[%s4276_s12 + $0x88] sm:$0x3f] }
  0x1a   : > { %v4333_v18 = vld [vmem:[%s4276_s12 + $0x90] sm:$0xff]  ;;  %v4336_v19 = vld [vmem:[%s4276_s12 + $0x98] sm:$0x3f]  ;;  %v4339_v20 = vld [vmem:[%s4276_s12 + $0xa0] sm:$0xff] }
  0x1b   : > { %v4342_v21 = vld [vmem:[%s4276_s12 + $0xa8] sm:$0x3f]  ;;  %v4345_v22 = vld [vmem:[%s4276_s12 + $0xb0] sm:$0xff]  ;;  %v4351_v26 = vld [vmem:[%s4276_s12 + $0xb8] sm:$0x3f] }
  0x1c   : > { %v4354_v27 = vld [vmem:[%s4276_s12 + $0xc0] sm:$0xff]  ;;  %v4357_v28 = vld [vmem:[%s4276_s12 + $0xc8] sm:$0x3f]  ;;  %v4360_v29 = vld [vmem:[%s4276_s12 + $0xd0] sm:$0xff] }
  0x1d   : > { %v4367_v34 = vld [vmem:[%s4276_s12 + $0xd8] sm:$0x3f]  ;;  %v4370_v35 = vld [vmem:[%s4276_s12 + $0xe0] sm:$0xff]  ;;  %v4373_v36 = vld [vmem:[%s4276_s12 + $0xe8] sm:$0x3f] }
  0x1e   : > { %v4376_v37 = vld [vmem:[%s4276_s12 + $0xf0] sm:$0xff]  ;;  %v4383_v42 = vld [vmem:[%s4276_s12 + $0xf8] sm:$0x3f]  ;;  %v4386_v43 = vld [vmem:[%s4276_s12 + $0x100] sm:$0xff] }
  0x1f   : > { %12869 = vst [vmem:[#allocation2_spill] sm:$0xff] %v4376_v37  ;;  %12870 = vst [vmem:[#allocation3_spill] sm:$0xff] %v4383_v42  ;;  %v4389_v44 = vld [vmem:[%s4276_s12 + $0x108] sm:$0x3f]  ;;  %v4392_v45 = vld [vmem:[%s4276_s12 + $0x110] sm:$0xff] }
  0x20   : > { %12871 = vst [vmem:[#allocation4_spill] sm:$0xff] %v4386_v43  ;;  %12872 = vst [vmem:[#allocation5_spill] sm:$0xff] %v4389_v44  ;;  %v4399_v50 = vld [vmem:[%s4276_s12 + $0x118] sm:$0x3f]  ;;  %v4402_v51 = vld [vmem:[%s4276_s12 + $0x120] sm:$0xff] }
  0x21   : > { %12873 = vst [vmem:[#allocation6_spill] sm:$0xff] %v4392_v45  ;;  %12874 = vst [vmem:[#allocation7_spill] sm:$0xff] %v4399_v50  ;;  %v4405_v52 = vld [vmem:[%s4276_s12 + $0x128] sm:$0x3f]  ;;  %v4408_v53 = vld [vmem:[%s4276_s12 + $0x130] sm:$0xff] }
  0x22   : > { %12875 = vst [vmem:[#allocation8_spill] sm:$0xff] %v4402_v51  ;;  %12876 = vst [vmem:[#allocation9_spill] sm:$0xff] %v4405_v52  ;;  %v4415_v58 = vld [vmem:[%s4276_s12 + $0x138] sm:$0x3f]  ;;  %v4418_v59 = vld [vmem:[%s4276_s12 + $0x140] sm:$0xff] }
  0x23   : > { %12877 = vst [vmem:[#allocation10_spill] sm:$0xff] %v4408_v53  ;;  %12878 = vst [vmem:[#allocation11_spill] sm:$0xff] %v4415_v58  ;;  %v4421_v60 = vld [vmem:[%s4276_s12 + $0x148] sm:$0x3f]  ;;  %v4424_v61 = vld [vmem:[%s4276_s12 + $0x150] sm:$0xff] }
  0x24   : > { %12879 = vst [vmem:[#allocation12_spill] sm:$0xff] %v4418_v59  ;;  %12880 = vst [vmem:[#allocation13_spill] sm:$0xff] %v4421_v60  ;;  %v4431_v55 = vld [vmem:[%s4276_s12 + $0x158] sm:$0x3f]  ;;  %v4434_v54 = vld [vmem:[%s4276_s12 + $0x160] sm:$0xff] }
  0x25   : > { %12881 = vst [vmem:[#allocation14_spill] sm:$0xff] %v4424_v61  ;;  %12882 = vst [vmem:[#allocation15_spill] sm:$0xff] %v4431_v55  ;;  %v4437_v49 = vld [vmem:[%s4276_s12 + $0x168] sm:$0x3f]  ;;  %v4440_v48 = vld [vmem:[%s4276_s12 + $0x170] sm:$0xff] }
  0x26   : > { %12883 = vst [vmem:[#allocation16_spill] sm:$0xff] %v4434_v54  ;;  %12884 = vst [vmem:[#allocation17_spill] sm:$0xff] %v4437_v49  ;;  %v4447_v47 = vld [vmem:[%s4276_s12 + $0x178] sm:$0x3f]  ;;  %v4450_v46 = vld [vmem:[%s4276_s12 + $0x180] sm:$0xff] }
  0x27   : > { %12885 = vst [vmem:[#allocation18_spill] sm:$0xff] %v4440_v48  ;;  %12886 = vst [vmem:[#allocation19_spill] sm:$0xff] %v4447_v47  ;;  %v4453_v41 = vld [vmem:[%s4276_s12 + $0x188] sm:$0x3f]  ;;  %v4456_v40 = vld [vmem:[%s4276_s12 + $0x190] sm:$0xff] }
  0x28   : > { %12887 = vst [vmem:[#allocation20_spill] sm:$0xff] %v4450_v46  ;;  %12888 = vst [vmem:[#allocation21_spill] sm:$0xff] %v4453_v41  ;;  %v4463_v39 = vld [vmem:[%s4276_s12 + $0x198] sm:$0x3f]  ;;  %v4466_v38 = vld [vmem:[%s4276_s12 + $0x1a0] sm:$0xff] }
  0x29   : > { %12889 = vst [vmem:[#allocation22_spill] sm:$0xff] %v4456_v40  ;;  %12890 = vst [vmem:[#allocation23_spill] sm:$0xff] %v4463_v39  ;;  %v4469_v33 = vld [vmem:[%s4276_s12 + $0x1a8] sm:$0x3f]  ;;  %v4472_v32 = vld [vmem:[%s4276_s12 + $0x1b0] sm:$0xff] }
  0x2a   : > { %12891 = vst [vmem:[#allocation24_spill] sm:$0xff] %v4466_v38  ;;  %12892 = vst [vmem:[#allocation25_spill] sm:$0xff] %v4469_v33  ;;  %v4479_v31 = vld [vmem:[%s4276_s12 + $0x1b8] sm:$0x3f]  ;;  %v4482_v30 = vld [vmem:[%s4276_s12 + $0x1c0] sm:$0xff] }
  0x2b   : > { %12893 = vst [vmem:[#allocation26_spill] sm:$0xff] %v4472_v32  ;;  %12894 = vst [vmem:[#allocation27_spill] sm:$0xff] %v4479_v31  ;;  %v4485_v25 = vld [vmem:[%s4276_s12 + $0x1c8] sm:$0x3f]  ;;  %v4488_v24 = vld [vmem:[%s4276_s12 + $0x1d0] sm:$0xff] }
  0x2c   : > { %12895 = vst [vmem:[#allocation28_spill] sm:$0xff] %v4482_v30  ;;  %12896 = vst [vmem:[#allocation29_spill] sm:$0xff] %v4485_v25  ;;  %v4495_v23 = vld [vmem:[%s4276_s12 + $0x1d8] sm:$0x3f]  ;;  %v4498_v45 = vld [vmem:[%s4276_s12 + $0x1e0] sm:$0xff] }
  0x2d   : > { %12897 = vst [vmem:[#allocation30_spill] sm:$0xff] %v4488_v24  ;;  %12898 = vst [vmem:[#allocation31_spill] sm:$0xff] %v4495_v23  ;;  %v4501_v44 = vld [vmem:[%s4276_s12 + $0x1e8] sm:$0x3f]  ;;  %v4504_v43 = vld [vmem:[%s4276_s12 + $0x1f0] sm:$0xff] }
  0x2e   : > { %12899 = vst [vmem:[#allocation32_spill] sm:$0xff] %v4498_v45  ;;  %12900 = vst [vmem:[#allocation33_spill] sm:$0xff] %v4501_v44  ;;  %v4511_v53 = vld [vmem:[%s4276_s12 + $0x1f8] sm:$0x3f]  ;;  %v4514_v52 = vld [vmem:[%s4276_s12 + $0x200] sm:$0xff] }
  0x2f   : > { %12901 = vst [vmem:[#allocation34_spill] sm:$0xff] %v4504_v43  ;;  %12902 = vst [vmem:[#allocation35_spill] sm:$0xff] %v4511_v53  ;;  %v4517_v51 = vld [vmem:[%s4276_s12 + $0x208] sm:$0x3f]  ;;  %v4520_v50 = vld [vmem:[%s4276_s12 + $0x210] sm:$0xff] }
  0x30   : > { %12903 = vst [vmem:[#allocation36_spill] sm:$0xff] %v4514_v52  ;;  %12904 = vst [vmem:[#allocation37_spill] sm:$0xff] %v4517_v51  ;;  %v4527_v61 = vld [vmem:[%s4276_s12 + $0x218] sm:$0x3f]  ;;  %v4530_v60 = vld [vmem:[%s4276_s12 + $0x220] sm:$0xff] }
  0x31   : > { %12905 = vst [vmem:[#allocation38_spill] sm:$0xff] %v4520_v50  ;;  %12906 = vst [vmem:[#allocation39_spill] sm:$0xff] %v4527_v61  ;;  %v4533_v59 = vld [vmem:[%s4276_s12 + $0x228] sm:$0x3f]  ;;  %v4536_v58 = vld [vmem:[%s4276_s12 + $0x230] sm:$0xff] }
  0x32   : > { %12907 = vst [vmem:[#allocation40_spill] sm:$0xff] %v4530_v60  ;;  %12908 = vst [vmem:[#allocation41_spill] sm:$0xff] %v4533_v59  ;;  %v4543_v48 = vld [vmem:[%s4276_s12 + $0x238] sm:$0x3f]  ;;  %v4546_v49 = vld [vmem:[%s4276_s12 + $0x240] sm:$0xff] }
  0x33   : > { %12909 = vst [vmem:[#allocation42_spill] sm:$0xff] %v4536_v58  ;;  %12910 = vst [vmem:[#allocation43_spill] sm:$0xff] %v4543_v48  ;;  %v4549_v54 = vld [vmem:[%s4276_s12 + $0x248] sm:$0x3f]  ;;  %v4552_v55 = vld [vmem:[%s4276_s12 + $0x250] sm:$0xff] }
  0x34   : > { %12911 = vst [vmem:[#allocation44_spill] sm:$0xff] %v4546_v49  ;;  %12912 = vst [vmem:[#allocation45_spill] sm:$0xff] %v4549_v54  ;;  %v4559_v40 = vld [vmem:[%s4276_s12 + $0x258] sm:$0x3f]  ;;  %v4562_v41 = vld [vmem:[%s4276_s12 + $0x260] sm:$0xff] }
  0x35   : > { %12913 = vst [vmem:[#allocation46_spill] sm:$0xff] %v4552_v55  ;;  %12914 = vst [vmem:[#allocation47_spill] sm:$0xff] %v4559_v40  ;;  %v4565_v46 = vld [vmem:[%s4276_s12 + $0x268] sm:$0x3f]  ;;  %v4568_v47 = vld [vmem:[%s4276_s12 + $0x270] sm:$0xff] }
  0x36   : > { %12915 = vst [vmem:[#allocation48_spill] sm:$0xff] %v4562_v41  ;;  %12916 = vst [vmem:[#allocation49_spill] sm:$0xff] %v4565_v46  ;;  %v4575_v32 = vld [vmem:[%s4276_s12 + $0x278] sm:$0x3f]  ;;  %v4578_v33 = vld [vmem:[%s4276_s12 + $0x280] sm:$0xff] }
  0x37   : > { %12917 = vst [vmem:[#allocation50_spill] sm:$0xff] %v4568_v47  ;;  %12918 = vst [vmem:[#allocation51_spill] sm:$0xff] %v4575_v32  ;;  %v4581_v38 = vld [vmem:[%s4276_s12 + $0x288] sm:$0x3f]  ;;  %v4584_v39 = vld [vmem:[%s4276_s12 + $0x290] sm:$0xff] }
  0x38   : > { %12919 = vst [vmem:[#allocation52_spill] sm:$0xff] %v4578_v33  ;;  %12920 = vst [vmem:[#allocation53_spill] sm:$0xff] %v4581_v38  ;;  %v4591_v24 = vld [vmem:[%s4276_s12 + $0x298] sm:$0x3f]  ;;  %v4594_v25 = vld [vmem:[%s4276_s12 + $0x2a0] sm:$0xff] }
  0x39   : > { %12921 = vst [vmem:[#allocation54_spill] sm:$0xff] %v4584_v39  ;;  %12922 = vst [vmem:[#allocation55_spill] sm:$0xff] %v4591_v24  ;;  %v4597_v30 = vld [vmem:[%s4276_s12 + $0x2a8] sm:$0x3f]  ;;  %v4600_v31 = vld [vmem:[%s4276_s12 + $0x2b0] sm:$0xff] }
  0x3a   : > { %12923 = vst [vmem:[#allocation56_spill] sm:$0xff] %v4594_v25  ;;  %12924 = vst [vmem:[#allocation57_spill] sm:$0xff] %v4597_v30  ;;  %v4607_v43 = vld [vmem:[%s4276_s12 + $0x2b8] sm:$0x3f]  ;;  %v4610_v44 = vld [vmem:[%s4276_s12 + $0x2c0] sm:$0xff] }
  0x3b   : > { %12925 = vst [vmem:[#allocation58_spill] sm:$0xff] %v4600_v31  ;;  %12926 = vst [vmem:[#allocation59_spill] sm:$0xff] %v4607_v43  ;;  %v4613_v45 = vld [vmem:[%s4276_s12 + $0x2c8] sm:$0x3f]  ;;  %v4616_v23 = vld [vmem:[%s4276_s12 + $0x2d0] sm:$0xff] }
  0x3c   : > { %12927 = vst [vmem:[#allocation60_spill] sm:$0xff] %v4610_v44  ;;  %12928 = vst [vmem:[#allocation61_spill] sm:$0xff] %v4613_v45  ;;  %v4623_v50 = vld [vmem:[%s4276_s12 + $0x2d8] sm:$0x3f]  ;;  %v4626_v51 = vld [vmem:[%s4276_s12 + $0x2e0] sm:$0xff] }
  0x3d   : > { %12929 = vst [vmem:[#allocation62_spill] sm:$0xff] %v4616_v23  ;;  %12930 = vst [vmem:[#allocation63_spill] sm:$0xff] %v4623_v50  ;;  %v4629_v52 = vld [vmem:[%s4276_s12 + $0x2e8] sm:$0x3f]  ;;  %v4632_v53 = vld [vmem:[%s4276_s12 + $0x2f0] sm:$0xff] }
  0x3e   : > { %12931 = vst [vmem:[#allocation64_spill] sm:$0xff] %v4626_v51  ;;  %12932 = vst [vmem:[#allocation65_spill] sm:$0xff] %v4629_v52  ;;  %v4639_v58 = vld [vmem:[%s4276_s12 + $0x2f8] sm:$0x3f]  ;;  %v4642_v59 = vld [vmem:[%s4276_s12 + $0x300] sm:$0xff] }
  0x3f   : > { %12933 = vst [vmem:[#allocation66_spill] sm:$0xff] %v4632_v53  ;;  %12934 = vst [vmem:[#allocation67_spill] sm:$0xff] %v4639_v58  ;;  %v4645_v60 = vld [vmem:[%s4276_s12 + $0x308] sm:$0x3f]  ;;  %v4648_v61 = vld [vmem:[%s4276_s12 + $0x310] sm:$0xff] }
  0x40   : > { %12935 = vst [vmem:[#allocation68_spill] sm:$0xff] %v4642_v59  ;;  %12936 = vst [vmem:[#allocation69_spill] sm:$0xff] %v4645_v60  ;;  %v4655_v55 = vld [vmem:[%s4276_s12 + $0x318] sm:$0x3f]  ;;  %v4658_v54 = vld [vmem:[%s4276_s12 + $0x320] sm:$0xff] }
  0x41   : > { %12937 = vst [vmem:[#allocation70_spill] sm:$0xff] %v4648_v61  ;;  %12938 = vst [vmem:[#allocation71_spill] sm:$0xff] %v4655_v55  ;;  %v4661_v49 = vld [vmem:[%s4276_s12 + $0x328] sm:$0x3f]  ;;  %v4664_v48 = vld [vmem:[%s4276_s12 + $0x330] sm:$0xff] }
  0x42   : > { %12939 = vst [vmem:[#allocation72_spill] sm:$0xff] %v4658_v54  ;;  %12940 = vst [vmem:[#allocation73_spill] sm:$0xff] %v4661_v49  ;;  %v4671_v47 = vld [vmem:[%s4276_s12 + $0x338] sm:$0x3f]  ;;  %v4674_v46 = vld [vmem:[%s4276_s12 + $0x340] sm:$0xff] }
  0x43   : > { %12941 = vst [vmem:[#allocation74_spill] sm:$0xff] %v4664_v48  ;;  %12942 = vst [vmem:[#allocation75_spill] sm:$0xff] %v4671_v47  ;;  %v4677_v41 = vld [vmem:[%s4276_s12 + $0x348] sm:$0x3f]  ;;  %v4680_v40 = vld [vmem:[%s4276_s12 + $0x350] sm:$0xff] }
  0x44   : > { %12943 = vst [vmem:[#allocation76_spill] sm:$0xff] %v4674_v46  ;;  %12944 = vst [vmem:[#allocation77_spill] sm:$0xff] %v4677_v41  ;;  %v4687_v39 = vld [vmem:[%s4276_s12 + $0x358] sm:$0x3f]  ;;  %v4690_v38 = vld [vmem:[%s4276_s12 + $0x360] sm:$0xff] }
  0x45   : > { %12945 = vst [vmem:[#allocation78_spill] sm:$0xff] %v4680_v40  ;;  %12946 = vst [vmem:[#allocation79_spill] sm:$0xff] %v4687_v39  ;;  %v4693_v33 = vld [vmem:[%s4276_s12 + $0x368] sm:$0x3f]  ;;  %v4696_v32 = vld [vmem:[%s4276_s12 + $0x370] sm:$0xff] }
  0x46   : > { %12947 = vst [vmem:[#allocation80_spill] sm:$0xff] %v4690_v38  ;;  %12948 = vst [vmem:[#allocation81_spill] sm:$0xff] %v4693_v33  ;;  %v4703_v31 = vld [vmem:[%s4276_s12 + $0x378] sm:$0x3f]  ;;  %v4706_v30 = vld [vmem:[%s4276_s12 + $0x380] sm:$0xff] }
  0x47   : > { %12949 = vst [vmem:[#allocation82_spill] sm:$0xff] %v4696_v32  ;;  %12950 = vst [vmem:[#allocation83_spill] sm:$0xff] %v4703_v31  ;;  %v4709_v25 = vld [vmem:[%s4276_s12 + $0x388] sm:$0x3f]  ;;  %v4712_v24 = vld [vmem:[%s4276_s12 + $0x390] sm:$0xff] }
  0x48   : > { %12951 = vst [vmem:[#allocation84_spill] sm:$0xff] %v4706_v30  ;;  %12952 = vst [vmem:[#allocation85_spill] sm:$0xff] %v4709_v25  ;;  %v4719_v23 = vld [vmem:[%s4276_s12 + $0x398] sm:$0x3f]  ;;  %v4722_v45 = vld [vmem:[%s4276_s12 + $0x3a0] sm:$0xff] }
  0x49   : > { %12953 = vst [vmem:[#allocation86_spill] sm:$0xff] %v4712_v24  ;;  %12954 = vst [vmem:[#allocation87_spill] sm:$0xff] %v4719_v23  ;;  %v4725_v44 = vld [vmem:[%s4276_s12 + $0x3a8] sm:$0x3f]  ;;  %v4728_v43 = vld [vmem:[%s4276_s12 + $0x3b0] sm:$0xff] }
  0x4a   : > { %12955 = vst [vmem:[#allocation88_spill] sm:$0xff] %v4722_v45  ;;  %12956 = vst [vmem:[#allocation89_spill] sm:$0xff] %v4725_v44  ;;  %v4735_v53 = vld [vmem:[%s4276_s12 + $0x3b8] sm:$0x3f]  ;;  %v4738_v52 = vld [vmem:[%s4276_s12 + $0x3c0] sm:$0xff] }
  0x4b   : > { %12957 = vst [vmem:[#allocation90_spill] sm:$0xff] %v4728_v43  ;;  %12958 = vst [vmem:[#allocation91_spill] sm:$0xff] %v4735_v53  ;;  %v4741_v51 = vld [vmem:[%s4276_s12 + $0x3c8] sm:$0x3f]  ;;  %v4744_v50 = vld [vmem:[%s4276_s12 + $0x3d0] sm:$0xff] }
  0x4c   : > { %12959 = vst [vmem:[#allocation92_spill] sm:$0xff] %v4738_v52  ;;  %12960 = vst [vmem:[#allocation93_spill] sm:$0xff] %v4741_v51  ;;  %v4751_v61 = vld [vmem:[%s4276_s12 + $0x3d8] sm:$0x3f]  ;;  %v4754_v60 = vld [vmem:[%s4276_s12 + $0x3e0] sm:$0xff] }
  0x4d   : > { %12961 = vst [vmem:[#allocation94_spill] sm:$0xff] %v4744_v50  ;;  %12962 = vst [vmem:[#allocation95_spill] sm:$0xff] %v4751_v61  ;;  %v4757_v59 = vld [vmem:[%s4276_s12 + $0x3e8] sm:$0x3f]  ;;  %v4760_v58 = vld [vmem:[%s4276_s12 + $0x3f0] sm:$0xff] }
  0x4e   : > { %12963 = vst [vmem:[#allocation96_spill] sm:$0xff] %v4754_v60  ;;  %12964 = vst [vmem:[#allocation97_spill] sm:$0xff] %v4757_v59  ;;  %v4767_v48 = vld [vmem:[%s4276_s12 + $0x3f8] sm:$0x3f]  ;;  %v4770_v49 = vld [vmem:[%s4276_s12 + $0x400] sm:$0xff] }
  0x4f   : > { %12965 = vst [vmem:[#allocation98_spill] sm:$0xff] %v4760_v58  ;;  %12966 = vst [vmem:[#allocation99_spill] sm:$0xff] %v4767_v48  ;;  %v4773_v54 = vld [vmem:[%s4276_s12 + $0x408] sm:$0x3f]  ;;  %v4776_v55 = vld [vmem:[%s4276_s12 + $0x410] sm:$0xff] }
  0x50   : > { %12967 = vst [vmem:[#allocation100_spill] sm:$0xff] %v4770_v49  ;;  %12968 = vst [vmem:[#allocation101_spill] sm:$0xff] %v4773_v54  ;;  %v4783_v40 = vld [vmem:[%s4276_s12 + $0x418] sm:$0x3f]  ;;  %v4786_v41 = vld [vmem:[%s4276_s12 + $0x420] sm:$0xff] }
  0x51   : > { %12969 = vst [vmem:[#allocation102_spill] sm:$0xff] %v4776_v55  ;;  %12970 = vst [vmem:[#allocation103_spill] sm:$0xff] %v4783_v40  ;;  %v4789_v46 = vld [vmem:[%s4276_s12 + $0x428] sm:$0x3f]  ;;  %v4792_v47 = vld [vmem:[%s4276_s12 + $0x430] sm:$0xff] }
  0x52   : > { %12971 = vst [vmem:[#allocation104_spill] sm:$0xff] %v4786_v41  ;;  %12972 = vst [vmem:[#allocation105_spill] sm:$0xff] %v4789_v46  ;;  %v4799_v32 = vld [vmem:[%s4276_s12 + $0x438] sm:$0x3f]  ;;  %v4802_v33 = vld [vmem:[%s4276_s12 + $0x440] sm:$0xff] }
  0x53   : > { %12973 = vst [vmem:[#allocation106_spill] sm:$0xff] %v4792_v47  ;;  %12974 = vst [vmem:[#allocation107_spill] sm:$0xff] %v4799_v32  ;;  %v4805_v38 = vld [vmem:[%s4276_s12 + $0x448] sm:$0x3f]  ;;  %v4808_v39 = vld [vmem:[%s4276_s12 + $0x450] sm:$0xff] }
  0x54   : > { %12975 = vst [vmem:[#allocation108_spill] sm:$0xff] %v4802_v33  ;;  %12976 = vst [vmem:[#allocation109_spill] sm:$0xff] %v4805_v38  ;;  %v4815_v24 = vld [vmem:[%s4276_s12 + $0x458] sm:$0x3f]  ;;  %v4818_v25 = vld [vmem:[%s4276_s12 + $0x460] sm:$0xff] }
  0x55   : > { %12977 = vst [vmem:[#allocation110_spill] sm:$0xff] %v4808_v39  ;;  %12978 = vst [vmem:[#allocation111_spill] sm:$0xff] %v4815_v24  ;;  %v4821_v30 = vld [vmem:[%s4276_s12 + $0x468] sm:$0x3f]  ;;  %v4824_v31 = vld [vmem:[%s4276_s12 + $0x470] sm:$0xff] }
  0x56   : > { %12979 = vst [vmem:[#allocation112_spill] sm:$0xff] %v4818_v25  ;;  %12980 = vst [vmem:[#allocation113_spill] sm:$0xff] %v4821_v30  ;;  %v4831_v43 = vld [vmem:[%s4276_s12 + $0x478] sm:$0x3f]  ;;  %v4834_v44 = vld [vmem:[%s4276_s12 + $0x480] sm:$0xff] }
  0x57   : > { %12981 = vst [vmem:[#allocation114_spill] sm:$0xff] %v4824_v31  ;;  %12982 = vst [vmem:[#allocation115_spill] sm:$0xff] %v4831_v43  ;;  %v4837_v45 = vld [vmem:[%s4276_s12 + $0x488] sm:$0x3f]  ;;  %v4840_v23 = vld [vmem:[%s4276_s12 + $0x490] sm:$0xff] }
  0x58   : > { %12983 = vst [vmem:[#allocation116_spill] sm:$0xff] %v4834_v44  ;;  %12984 = vst [vmem:[#allocation117_spill] sm:$0xff] %v4837_v45  ;;  %v4847_v50 = vld [vmem:[%s4276_s12 + $0x498] sm:$0x3f]  ;;  %v4850_v51 = vld [vmem:[%s4276_s12 + $0x4a0] sm:$0xff] }
  0x59   : > { %12985 = vst [vmem:[#allocation118_spill] sm:$0xff] %v4840_v23  ;;  %12986 = vst [vmem:[#allocation119_spill] sm:$0xff] %v4847_v50  ;;  %v4853_v52 = vld [vmem:[%s4276_s12 + $0x4a8] sm:$0x3f]  ;;  %v4856_v53 = vld [vmem:[%s4276_s12 + $0x4b0] sm:$0xff] }
  0x5a   : > { %12987 = vst [vmem:[#allocation120_spill] sm:$0xff] %v4850_v51  ;;  %12988 = vst [vmem:[#allocation121_spill] sm:$0xff] %v4853_v52  ;;  %v4863_v58 = vld [vmem:[%s4276_s12 + $0x4b8] sm:$0x3f]  ;;  %v4866_v59 = vld [vmem:[%s4276_s12 + $0x4c0] sm:$0xff] }
  0x5b   : > { %12989 = vst [vmem:[#allocation122_spill] sm:$0xff] %v4856_v53  ;;  %12990 = vst [vmem:[#allocation123_spill] sm:$0xff] %v4863_v58  ;;  %v4869_v60 = vld [vmem:[%s4276_s12 + $0x4c8] sm:$0x3f]  ;;  %v4872_v61 = vld [vmem:[%s4276_s12 + $0x4d0] sm:$0xff] }
  0x5c   : > { %12991 = vst [vmem:[#allocation124_spill] sm:$0xff] %v4866_v59  ;;  %12992 = vst [vmem:[#allocation125_spill] sm:$0xff] %v4869_v60  ;;  %v4879_v55 = vld [vmem:[%s4276_s12 + $0x4d8] sm:$0x3f]  ;;  %v4882_v54 = vld [vmem:[%s4276_s12 + $0x4e0] sm:$0xff] }
  0x5d   : > { %12993 = vst [vmem:[#allocation126_spill] sm:$0xff] %v4872_v61  ;;  %12994 = vst [vmem:[#allocation127_spill] sm:$0xff] %v4879_v55  ;;  %v4885_v49 = vld [vmem:[%s4276_s12 + $0x4e8] sm:$0x3f]  ;;  %v4888_v48 = vld [vmem:[%s4276_s12 + $0x4f0] sm:$0xff] }
  0x5e   : > { %12995 = vst [vmem:[#allocation128_spill] sm:$0xff] %v4882_v54  ;;  %12996 = vst [vmem:[#allocation129_spill] sm:$0xff] %v4885_v49  ;;  %v4895_v47 = vld [vmem:[%s4276_s12 + $0x4f8] sm:$0x3f]  ;;  %v4898_v46 = vld [vmem:[%s4276_s12 + $0x500] sm:$0xff] }
  0x5f   : > { %12997 = vst [vmem:[#allocation130_spill] sm:$0xff] %v4888_v48  ;;  %v4901_v41 = vld [vmem:[%s4276_s12 + $0x508] sm:$0x3f]  ;;  %v4904_v40 = vld [vmem:[%s4276_s12 + $0x510] sm:$0xff]  ;;  %v4911_v39 = vld [vmem:[%s4276_s12 + $0x518] sm:$0x3f] }
  0x60   : > { %12998 = vst [vmem:[#allocation131_spill] sm:$0xff] %v4901_v41  ;;  %12999 = vst [vmem:[#allocation132_spill] sm:$0xff] %v4904_v40  ;;  %v4914_v38 = vld [vmem:[%s4276_s12 + $0x520] sm:$0xff]  ;;  %v4917_v33 = vld [vmem:[%s4276_s12 + $0x528] sm:$0x3f] }
  0x61   : > { %v4920_v32 = vld [vmem:[%s4276_s12 + $0x530] sm:$0xff]  ;;  %v4927_v31 = vld [vmem:[%s4276_s12 + $0x538] sm:$0x3f]  ;;  %v4930_v30 = vld [vmem:[%s4276_s12 + $0x540] sm:$0xff] }
  0x62   : > { %v4933_v25 = vld [vmem:[%s4276_s12 + $0x548] sm:$0x3f]  ;;  %v4936_v24 = vld [vmem:[%s4276_s12 + $0x550] sm:$0xff]  ;;  %v4943_v23 = vld [vmem:[%s4276_s12 + $0x558] sm:$0x3f] }
  0x63   : > { %13000 = vst [vmem:[#allocation133_spill] sm:$0xff] %v4936_v24  ;;  %v4946_v45 = vld [vmem:[%s4276_s12 + $0x560] sm:$0xff]  ;;  %v4949_v44 = vld [vmem:[%s4276_s12 + $0x568] sm:$0x3f]  ;;  %v4952_v43 = vld [vmem:[%s4276_s12 + $0x570] sm:$0xff] }
  0x64   : > { %v4959_v63 = vld [vmem:[%s4276_s12 + $0x578] sm:$0x3f]  ;;  %v4962_v53 = vld [vmem:[%s4276_s12 + $0x580] sm:$0xff]  ;;  %v4965_v52 = vld [vmem:[%s4276_s12 + $0x588] sm:$0x3f] }
  0x65   : > { %v4968_v51 = vld [vmem:[%s4276_s12 + $0x590] sm:$0xff]  ;;  %v4975_v61 = vld [vmem:[%s4276_s12 + $0x598] sm:$0x3f]  ;;  %v4978_v60 = vld [vmem:[%s4276_s12 + $0x5a0] sm:$0xff] }
  0x66   : > { %v4981_v59 = vld [vmem:[%s4276_s12 + $0x5a8] sm:$0x3f]  ;;  %v4984_v58 = vld [vmem:[%s4276_s12 + $0x5b0] sm:$0xff]  ;;  %v4991_v54 = vld [vmem:[%s4276_s12 + $0x5b8] sm:$0x3f] }
  0x67   : > { %v4994_v57 = vld [vmem:[%s4276_s12 + $0x5c0] sm:$0xff]  ;;  %v4997_v42 = vld [vmem:[%s4276_s12 + $0x5c8] sm:$0x3f]  ;;  %v5000_v48 = vld [vmem:[%s4276_s12 + $0x5d0] sm:$0xff] }
  0x68   : > { %v5019_v24 = vld [vmem:[%s4276_s12 + $0x5f8] sm:$0x3f]  ;;  %v5022_v49 = vld [vmem:[%s4276_s12 + $0x600] sm:$0xff]  ;;  %v5025_v55 = vld [vmem:[%s4276_s12 + $0x608] sm:$0x3f] }
  0x69   : > { %13001 = vst [vmem:[#allocation134_spill] sm:$0xff] %v5019_v24  ;;  %13002 = vst [vmem:[#allocation135_spill] sm:$0xff] %v5022_v49  ;;  %v5028_v37 = vld [vmem:[%s4276_s12 + $0x610] sm:$0xff]  ;;  %v5035_v62 = vld [vmem:[%s4276_s12 + $0x618] sm:$0x3f] }
  0x6a   : > { %13003 = vst [vmem:[#allocation136_spill] sm:$0xff] %v5025_v55  ;;  %13004 = vst [vmem:[#allocation137_spill] sm:$0xff] %v5028_v37  ;;  %v5038_v55 = vld [vmem:[%s4276_s12 + $0x620] sm:$0xff]  ;;  %v5041_v37 = vld [vmem:[%s4276_s12 + $0x628] sm:$0x3f] }
  0x6b   : > { %13005 = vst [vmem:[#allocation138_spill] sm:$0xff] %v5035_v62  ;;  %13006 = vst [vmem:[#allocation139_spill] sm:$0xff] %v5038_v55  ;;  %v5044_v56 = vld [vmem:[%s4276_s12 + $0x630] sm:$0xff]  ;;  %v5061_v50 = vld [vmem:[%s4276_s12 + $0x640] sm:$0xff] }
  0x6c   : > { %13007 = vst [vmem:[#allocation140_spill] sm:$0xff] %v5041_v37  ;;  %13008 = vst [vmem:[#allocation141_spill] sm:$0xff] %v5044_v56  ;;  %v5058_v56 = vld [vmem:[%s4276_s12 + $0x638] sm:$0x3f]  ;;  %v5064_v41 = vld [vmem:[%s4276_s12 + $0x648] sm:$0x3f] }
  0x6d   : > { %13009 = vst [vmem:[#allocation142_spill] sm:$0xff] %v5058_v56  ;;  %13010 = vst [vmem:[#allocation143_spill] sm:$0xff] %v5061_v50  ;;  %v5067_v40 = vld [vmem:[%s4276_s12 + $0x650] sm:$0xff]  ;;  %v5070_v62 = vld [vmem:[%s4276_s12 + $0x658] sm:$0x3f] }
  0x6e   : > { %13011 = vst [vmem:[#allocation144_spill] sm:$0xff] %v5064_v41  ;;  %13012 = vst [vmem:[#allocation145_spill] sm:$0xff] %v5067_v40  ;;  %v5073_v37 = vld [vmem:[%s4276_s12 + $0x660] sm:$0xff]  ;;  %v5076_v55 = vld [vmem:[%s4276_s12 + $0x668] sm:$0x3f] }
  0x6f   : > { %13013 = vst [vmem:[#allocation146_spill] sm:$0xff] %v5070_v62  ;;  %13014 = vst [vmem:[#allocation147_spill] sm:$0xff] %v5073_v37  ;;  %v5079_v56 = vld [vmem:[%s4276_s12 + $0x670] sm:$0xff]  ;;  %v5082_v50 = vld [vmem:[%s4276_s12 + $0x678] sm:$0x3f] }
  0x70   : > { %13015 = vst [vmem:[#allocation148_spill] sm:$0xff] %v5076_v55  ;;  %13016 = vst [vmem:[#allocation149_spill] sm:$0xff] %v5079_v56  ;;  %v5085_v41 = vld [vmem:[%s4276_s12 + $0x680] sm:$0xff]  ;;  %v5088_v40 = vld [vmem:[%s4276_s12 + $0x688] sm:$0x3f] }
  0x71   : > { %13017 = vst [vmem:[#allocation150_spill] sm:$0xff] %v5082_v50  ;;  %13018 = vst [vmem:[#allocation151_spill] sm:$0xff] %v5085_v41  ;;  %v5091_v62 = vld [vmem:[%s4276_s12 + $0x690] sm:$0xff]  ;;  %v5094_v37 = vld [vmem:[%s4276_s12 + $0x698] sm:$0x3f] }
  0x72   : > { %13019 = vst [vmem:[#allocation152_spill] sm:$0xff] %v5088_v40  ;;  %13020 = vst [vmem:[#allocation153_spill] sm:$0xff] %v5091_v62  ;;  %v5097_v55 = vld [vmem:[%s4276_s12 + $0x6a0] sm:$0xff]  ;;  %v5100_v56 = vld [vmem:[%s4276_s12 + $0x6a8] sm:$0x3f] }
  0x73   : > { %13021 = vst [vmem:[#allocation154_spill] sm:$0xff] %v5094_v37  ;;  %13022 = vst [vmem:[#allocation155_spill] sm:$0xff] %v5097_v55  ;;  %v5103_v50 = vld [vmem:[%s4276_s12 + $0x6b0] sm:$0xff]  ;;  %v5106_v41 = vld [vmem:[%s4276_s12 + $0x6b8] sm:$0x3f] }
  0x74   : > { %13023 = vst [vmem:[#allocation156_spill] sm:$0xff] %v5100_v56  ;;  %13024 = vst [vmem:[#allocation157_spill] sm:$0xff] %v5103_v50  ;;  %v5109_v40 = vld [vmem:[%s4276_s12 + $0x6c0] sm:$0xff]  ;;  %v5112_v62 = vld [vmem:[%s4276_s12 + $0x6c8] sm:$0x3f] }
  0x75   : > { %13025 = vst [vmem:[#allocation158_spill] sm:$0xff] %v5106_v41  ;;  %13026 = vst [vmem:[#allocation159_spill] sm:$0xff] %v5109_v40  ;;  %v5115_v37 = vld [vmem:[%s4276_s12 + $0x6d0] sm:$0xff]  ;;  %v5118_v55 = vld [vmem:[%s4276_s12 + $0x6d8] sm:$0x3f] }
  0x76   : > { %13027 = vst [vmem:[#allocation160_spill] sm:$0xff] %v5112_v62  ;;  %13028 = vst [vmem:[#allocation161_spill] sm:$0xff] %v5115_v37  ;;  %v5121_v56 = vld [vmem:[%s4276_s12 + $0x6e0] sm:$0xff]  ;;  %v5124_v50 = vld [vmem:[%s4276_s12 + $0x6e8] sm:$0x3f] }
  0x77   : > { %13029 = vst [vmem:[#allocation162_spill] sm:$0xff] %v5118_v55  ;;  %13030 = vst [vmem:[#allocation163_spill] sm:$0xff] %v5121_v56  ;;  %v5127_v41 = vld [vmem:[%s4276_s12 + $0x6f0] sm:$0xff]  ;;  %v5130_v40 = vld [vmem:[%s4276_s12 + $0x6f8] sm:$0x3f] }
  0x78   : > { %13031 = vst [vmem:[#allocation164_spill] sm:$0xff] %v5124_v50  ;;  %13032 = vst [vmem:[#allocation165_spill] sm:$0xff] %v5127_v41  ;;  %v5133_v62 = vld [vmem:[%s4276_s12 + $0x700] sm:$0xff]  ;;  %v5136_v37 = vld [vmem:[%s4276_s12 + $0x708] sm:$0x3f] }
  0x79   : > { %13033 = vst [vmem:[#allocation166_spill] sm:$0xff] %v5130_v40  ;;  %13034 = vst [vmem:[#allocation167_spill] sm:$0xff] %v5133_v62  ;;  %v5139_v55 = vld [vmem:[%s4276_s12 + $0x710] sm:$0xff]  ;;  %v5142_v56 = vld [vmem:[%s4276_s12 + $0x718] sm:$0x3f] }
  0x7a   : > { %13035 = vst [vmem:[#allocation168_spill] sm:$0xff] %v5136_v37  ;;  %13036 = vst [vmem:[#allocation169_spill] sm:$0xff] %v5139_v55  ;;  %v5145_v50 = vld [vmem:[%s4276_s12 + $0x720] sm:$0xff]  ;;  %v5148_v41 = vld [vmem:[%s4276_s12 + $0x728] sm:$0x3f] }
  0x7b   : > { %13037 = vst [vmem:[#allocation170_spill] sm:$0xff] %v5142_v56  ;;  %13038 = vst [vmem:[#allocation171_spill] sm:$0xff] %v5145_v50  ;;  %v5151_v40 = vld [vmem:[%s4276_s12 + $0x730] sm:$0xff]  ;;  %v5154_v62 = vld [vmem:[%s4276_s12 + $0x738] sm:$0x3f] }
  0x7c   : > { %13039 = vst [vmem:[#allocation172_spill] sm:$0xff] %v5148_v41  ;;  %13040 = vst [vmem:[#allocation173_spill] sm:$0xff] %v5151_v40  ;;  %v5157_v37 = vld [vmem:[%s4276_s12 + $0x740] sm:$0xff]  ;;  %v5160_v55 = vld [vmem:[%s4276_s12 + $0x748] sm:$0x3f] }
  0x7d   : > { %13041 = vst [vmem:[#allocation174_spill] sm:$0xff] %v5154_v62  ;;  %13042 = vst [vmem:[#allocation175_spill] sm:$0xff] %v5157_v37  ;;  %v5163_v56 = vld [vmem:[%s4276_s12 + $0x750] sm:$0xff]  ;;  %v5166_v50 = vld [vmem:[%s4276_s12 + $0x758] sm:$0x3f] }
  0x7e   : > { %13043 = vst [vmem:[#allocation176_spill] sm:$0xff] %v5160_v55  ;;  %13044 = vst [vmem:[#allocation177_spill] sm:$0xff] %v5163_v56  ;;  %v5169_v41 = vld [vmem:[%s4276_s12 + $0x760] sm:$0xff]  ;;  %v5172_v40 = vld [vmem:[%s4276_s12 + $0x768] sm:$0x3f] }
  0x7f   : > { %13045 = vst [vmem:[#allocation178_spill] sm:$0xff] %v5166_v50  ;;  %13046 = vst [vmem:[#allocation179_spill] sm:$0xff] %v5169_v41  ;;  %v5175_v62 = vld [vmem:[%s4276_s12 + $0x770] sm:$0xff]  ;;  %v5178_v37 = vld [vmem:[%s4276_s12 + $0x778] sm:$0x3f] }
  0x80   : > { %13047 = vst [vmem:[#allocation180_spill] sm:$0xff] %v5172_v40  ;;  %13048 = vst [vmem:[#allocation181_spill] sm:$0xff] %v5175_v62  ;;  %v5181_v55 = vld [vmem:[%s4276_s12 + $0x780] sm:$0xff]  ;;  %v5184_v56 = vld [vmem:[%s4276_s12 + $0x788] sm:$0x3f] }
  0x81   : > { %13049 = vst [vmem:[#allocation182_spill] sm:$0xff] %v5178_v37  ;;  %13050 = vst [vmem:[#allocation183_spill] sm:$0xff] %v5181_v55  ;;  %v5187_v50 = vld [vmem:[%s4276_s12 + $0x790] sm:$0xff]  ;;  %v5190_v41 = vld [vmem:[%s4276_s12 + $0x798] sm:$0x3f] }
  0x82   : > { %13051 = vst [vmem:[#allocation184_spill] sm:$0xff] %v5184_v56  ;;  %13052 = vst [vmem:[#allocation185_spill] sm:$0xff] %v5187_v50  ;;  %v5193_v40 = vld [vmem:[%s4276_s12 + $0x7a0] sm:$0xff]  ;;  %v5196_v62 = vld [vmem:[%s4276_s12 + $0x7a8] sm:$0x3f] }
  0x83   : > { %13053 = vst [vmem:[#allocation186_spill] sm:$0xff] %v5190_v41  ;;  %13054 = vst [vmem:[#allocation187_spill] sm:$0xff] %v5193_v40  ;;  %v5199_v37 = vld [vmem:[%s4276_s12 + $0x7b0] sm:$0xff]  ;;  %v5202_v55 = vld [vmem:[%s4276_s12 + $0x7b8] sm:$0x3f] }
  0x84   : > { %13055 = vst [vmem:[#allocation188_spill] sm:$0xff] %v5196_v62  ;;  %13056 = vst [vmem:[#allocation189_spill] sm:$0xff] %v5199_v37  ;;  %v5205_v56 = vld [vmem:[%s4276_s12 + $0x7c0] sm:$0xff]  ;;  %v5208_v50 = vld [vmem:[%s4276_s12 + $0x7c8] sm:$0x3f] }
  0x85   : > { %13057 = vst [vmem:[#allocation190_spill] sm:$0xff] %v5202_v55  ;;  %13058 = vst [vmem:[#allocation191_spill] sm:$0xff] %v5205_v56  ;;  %v5211_v41 = vld [vmem:[%s4276_s12 + $0x7d0] sm:$0xff]  ;;  %v5214_v40 = vld [vmem:[%s4276_s12 + $0x7d8] sm:$0x3f] }
  0x86   : > { %13059 = vst [vmem:[#allocation192_spill] sm:$0xff] %v5208_v50  ;;  %13060 = vst [vmem:[#allocation193_spill] sm:$0xff] %v5211_v41  ;;  %v5217_v62 = vld [vmem:[%s4276_s12 + $0x7e0] sm:$0xff]  ;;  %v5220_v37 = vld [vmem:[%s4276_s12 + $0x7e8] sm:$0x3f] }
  0x87   : > { %13061 = vst [vmem:[#allocation194_spill] sm:$0xff] %v5214_v40  ;;  %13062 = vst [vmem:[#allocation195_spill] sm:$0xff] %v5217_v62  ;;  %v5223_v55 = vld [vmem:[%s4276_s12 + $0x7f0] sm:$0xff]  ;;  %v5226_v56 = vld [vmem:[%s4276_s12 + $0x7f8] sm:$0x3f] }
  0x88   : > { %13063 = vst [vmem:[#allocation196_spill] sm:$0xff] %v5220_v37  ;;  %13064 = vst [vmem:[#allocation197_spill] sm:$0xff] %v5223_v55  ;;  %v5229_v50 = vld [vmem:[%s4276_s12 + $0x800] sm:$0xff]  ;;  %v5232_v41 = vld [vmem:[%s4276_s12 + $0x808] sm:$0x3f] }
  0x89   : > { %13065 = vst [vmem:[#allocation198_spill] sm:$0xff] %v5226_v56  ;;  %13066 = vst [vmem:[#allocation199_spill] sm:$0xff] %v5229_v50  ;;  %v5235_v40 = vld [vmem:[%s4276_s12 + $0x810] sm:$0xff]  ;;  %v5238_v62 = vld [vmem:[%s4276_s12 + $0x818] sm:$0x3f] }
  0x8a   : > { %13067 = vst [vmem:[#allocation200_spill] sm:$0xff] %v5232_v41  ;;  %13068 = vst [vmem:[#allocation201_spill] sm:$0xff] %v5235_v40  ;;  %v5241_v37 = vld [vmem:[%s4276_s12 + $0x820] sm:$0xff]  ;;  %v5244_v55 = vld [vmem:[%s4276_s12 + $0x828] sm:$0x3f] }
  0x8b   : > { %13069 = vst [vmem:[#allocation202_spill] sm:$0xff] %v5238_v62  ;;  %13070 = vst [vmem:[#allocation203_spill] sm:$0xff] %v5241_v37  ;;  %v5247_v56 = vld [vmem:[%s4276_s12 + $0x830] sm:$0xff]  ;;  %v5250_v50 = vld [vmem:[%s4276_s12 + $0x838] sm:$0x3f] }
  0x8c   : > { %13071 = vst [vmem:[#allocation204_spill] sm:$0xff] %v5244_v55  ;;  %13072 = vst [vmem:[#allocation205_spill] sm:$0xff] %v5247_v56  ;;  %v5253_v41 = vld [vmem:[%s4276_s12 + $0x840] sm:$0xff]  ;;  %v5256_v40 = vld [vmem:[%s4276_s12 + $0x848] sm:$0x3f] }
  0x8d   : > { %13073 = vst [vmem:[#allocation206_spill] sm:$0xff] %v5250_v50  ;;  %13074 = vst [vmem:[#allocation207_spill] sm:$0xff] %v5253_v41  ;;  %v5259_v62 = vld [vmem:[%s4276_s12 + $0x850] sm:$0xff]  ;;  %v5262_v37 = vld [vmem:[%s4276_s12 + $0x858] sm:$0x3f] }
  0x8e   : > { %13075 = vst [vmem:[#allocation208_spill] sm:$0xff] %v5256_v40  ;;  %13076 = vst [vmem:[#allocation209_spill] sm:$0xff] %v5259_v62  ;;  %v5265_v55 = vld [vmem:[%s4276_s12 + $0x860] sm:$0xff]  ;;  %v5268_v56 = vld [vmem:[%s4276_s12 + $0x868] sm:$0x3f] }
  0x8f   : > { %13077 = vst [vmem:[#allocation210_spill] sm:$0xff] %v5262_v37  ;;  %13078 = vst [vmem:[#allocation211_spill] sm:$0xff] %v5265_v55  ;;  %v5271_v50 = vld [vmem:[%s4276_s12 + $0x870] sm:$0xff]  ;;  %v5274_v41 = vld [vmem:[%s4276_s12 + $0x878] sm:$0x3f] }
  0x90   : > { %13079 = vst [vmem:[#allocation212_spill] sm:$0xff] %v5268_v56  ;;  %13080 = vst [vmem:[#allocation213_spill] sm:$0xff] %v5271_v50  ;;  %v5277_v40 = vld [vmem:[%s4276_s12 + $0x880] sm:$0xff]  ;;  %v5280_v62 = vld [vmem:[%s4276_s12 + $0x888] sm:$0x3f] }
  0x91   : > { %13081 = vst [vmem:[#allocation214_spill] sm:$0xff] %v5274_v41  ;;  %13082 = vst [vmem:[#allocation215_spill] sm:$0xff] %v5277_v40  ;;  %v5283_v37 = vld [vmem:[%s4276_s12 + $0x890] sm:$0xff]  ;;  %v5286_v55 = vld [vmem:[%s4276_s12 + $0x898] sm:$0x3f] }
  0x92   : > { %13083 = vst [vmem:[#allocation216_spill] sm:$0xff] %v5280_v62  ;;  %13084 = vst [vmem:[#allocation217_spill] sm:$0xff] %v5283_v37  ;;  %v5289_v56 = vld [vmem:[%s4276_s12 + $0x8a0] sm:$0xff]  ;;  %v5292_v50 = vld [vmem:[%s4276_s12 + $0x8a8] sm:$0x3f] }
  0x93   : > { %13085 = vst [vmem:[#allocation218_spill] sm:$0xff] %v5286_v55  ;;  %13086 = vst [vmem:[#allocation219_spill] sm:$0xff] %v5289_v56  ;;  %v5295_v41 = vld [vmem:[%s4276_s12 + $0x8b0] sm:$0xff]  ;;  %v5298_v40 = vld [vmem:[%s4276_s12 + $0x8b8] sm:$0x3f] }
  0x94   : > { %13087 = vst [vmem:[#allocation220_spill] sm:$0xff] %v5292_v50  ;;  %13088 = vst [vmem:[#allocation221_spill] sm:$0xff] %v5295_v41  ;;  %v5301_v62 = vld [vmem:[%s4276_s12 + $0x8c0] sm:$0xff]  ;;  %v5304_v37 = vld [vmem:[%s4276_s12 + $0x8c8] sm:$0x3f] }
  0x95   : > { %13089 = vst [vmem:[#allocation222_spill] sm:$0xff] %v5298_v40  ;;  %13090 = vst [vmem:[#allocation223_spill] sm:$0xff] %v5301_v62  ;;  %v5307_v55 = vld [vmem:[%s4276_s12 + $0x8d0] sm:$0xff]  ;;  %v5310_v56 = vld [vmem:[%s4276_s12 + $0x8d8] sm:$0x3f] }
  0x96   : > { %13091 = vst [vmem:[#allocation224_spill] sm:$0xff] %v5304_v37  ;;  %13092 = vst [vmem:[#allocation225_spill] sm:$0xff] %v5307_v55  ;;  %v5313_v50 = vld [vmem:[%s4276_s12 + $0x8e0] sm:$0xff]  ;;  %v5316_v41 = vld [vmem:[%s4276_s12 + $0x8e8] sm:$0x3f] }
  0x97   : > { %13093 = vst [vmem:[#allocation226_spill] sm:$0xff] %v5310_v56  ;;  %13094 = vst [vmem:[#allocation227_spill] sm:$0xff] %v5313_v50  ;;  %v5319_v40 = vld [vmem:[%s4276_s12 + $0x8f0] sm:$0xff]  ;;  %v5322_v62 = vld [vmem:[%s4276_s12 + $0x8f8] sm:$0x3f] }
  0x98   : > { %13095 = vst [vmem:[#allocation228_spill] sm:$0xff] %v5316_v41  ;;  %13096 = vst [vmem:[#allocation229_spill] sm:$0xff] %v5319_v40  ;;  %v5325_v37 = vld [vmem:[%s4276_s12 + $0x900] sm:$0xff]  ;;  %v5328_v55 = vld [vmem:[%s4276_s12 + $0x908] sm:$0x3f] }
  0x99   : > { %13097 = vst [vmem:[#allocation230_spill] sm:$0xff] %v5322_v62  ;;  %13098 = vst [vmem:[#allocation231_spill] sm:$0xff] %v5325_v37  ;;  %v5331_v56 = vld [vmem:[%s4276_s12 + $0x910] sm:$0xff]  ;;  %v5334_v50 = vld [vmem:[%s4276_s12 + $0x918] sm:$0x3f] }
  0x9a   : > { %13099 = vst [vmem:[#allocation232_spill] sm:$0xff] %v5328_v55  ;;  %13100 = vst [vmem:[#allocation233_spill] sm:$0xff] %v5331_v56  ;;  %v5337_v41 = vld [vmem:[%s4276_s12 + $0x920] sm:$0xff]  ;;  %v5340_v40 = vld [vmem:[%s4276_s12 + $0x928] sm:$0x3f] }
  0x9b   : > { %13101 = vst [vmem:[#allocation234_spill] sm:$0xff] %v5334_v50  ;;  %13102 = vst [vmem:[#allocation235_spill] sm:$0xff] %v5337_v41  ;;  %v5343_v62 = vld [vmem:[%s4276_s12 + $0x930] sm:$0xff]  ;;  %v5346_v37 = vld [vmem:[%s4276_s12 + $0x938] sm:$0x3f] }
  0x9c   : > { %13103 = vst [vmem:[#allocation236_spill] sm:$0xff] %v5340_v40  ;;  %13104 = vst [vmem:[#allocation237_spill] sm:$0xff] %v5343_v62  ;;  %v5349_v55 = vld [vmem:[%s4276_s12 + $0x940] sm:$0xff]  ;;  %v5352_v56 = vld [vmem:[%s4276_s12 + $0x948] sm:$0x3f] }
  0x9d   : > { %13105 = vst [vmem:[#allocation238_spill] sm:$0xff] %v5346_v37  ;;  %13106 = vst [vmem:[#allocation239_spill] sm:$0xff] %v5349_v55  ;;  %v5355_v50 = vld [vmem:[%s4276_s12 + $0x950] sm:$0xff]  ;;  %v5358_v41 = vld [vmem:[%s4276_s12 + $0x958] sm:$0x3f] }
  0x9e   : > { %13107 = vst [vmem:[#allocation240_spill] sm:$0xff] %v5352_v56  ;;  %13108 = vst [vmem:[#allocation241_spill] sm:$0xff] %v5355_v50  ;;  %v5361_v40 = vld [vmem:[%s4276_s12 + $0x960] sm:$0xff]  ;;  %v5364_v62 = vld [vmem:[%s4276_s12 + $0x968] sm:$0x3f] }
  0x9f   : > { %13109 = vst [vmem:[#allocation242_spill] sm:$0xff] %v5358_v41  ;;  %13110 = vst [vmem:[#allocation243_spill] sm:$0xff] %v5361_v40  ;;  %v5367_v37 = vld [vmem:[%s4276_s12 + $0x970] sm:$0xff]  ;;  %v5370_v55 = vld [vmem:[%s4276_s12 + $0x978] sm:$0x3f] }
  0xa0   : > { %13111 = vst [vmem:[#allocation244_spill] sm:$0xff] %v5364_v62  ;;  %13112 = vst [vmem:[#allocation245_spill] sm:$0xff] %v5367_v37  ;;  %v5373_v56 = vld [vmem:[%s4276_s12 + $0x980] sm:$0xff]  ;;  %v5376_v50 = vld [vmem:[%s4276_s12 + $0x988] sm:$0x3f] }
  0xa1   : > { %13113 = vst [vmem:[#allocation246_spill] sm:$0xff] %v5370_v55  ;;  %13114 = vst [vmem:[#allocation247_spill] sm:$0xff] %v5373_v56  ;;  %v5379_v41 = vld [vmem:[%s4276_s12 + $0x990] sm:$0xff]  ;;  %v5382_v40 = vld [vmem:[%s4276_s12 + $0x998] sm:$0x3f] }
  0xa2   : > { %13115 = vst [vmem:[#allocation248_spill] sm:$0xff] %v5376_v50  ;;  %13116 = vst [vmem:[#allocation249_spill] sm:$0xff] %v5379_v41  ;;  %v5385_v62 = vld [vmem:[%s4276_s12 + $0x9a0] sm:$0xff]  ;;  %v5388_v37 = vld [vmem:[%s4276_s12 + $0x9a8] sm:$0x3f] }
  0xa3   : > { %13117 = vst [vmem:[#allocation250_spill] sm:$0xff] %v5382_v40  ;;  %13118 = vst [vmem:[#allocation251_spill] sm:$0xff] %v5385_v62  ;;  %v5391_v55 = vld [vmem:[%s4276_s12 + $0x9b0] sm:$0xff]  ;;  %v5394_v56 = vld [vmem:[%s4276_s12 + $0x9b8] sm:$0x3f] }
  0xa4   : > { %13119 = vst [vmem:[#allocation252_spill] sm:$0xff] %v5388_v37  ;;  %13120 = vst [vmem:[#allocation253_spill] sm:$0xff] %v5391_v55  ;;  %v5397_v50 = vld [vmem:[%s4276_s12 + $0x9c0] sm:$0xff]  ;;  %v5400_v41 = vld [vmem:[%s4276_s12 + $0x9c8] sm:$0x3f] }
  0xa5   : > { %13121 = vst [vmem:[#allocation254_spill] sm:$0xff] %v5394_v56  ;;  %13122 = vst [vmem:[#allocation255_spill] sm:$0xff] %v5397_v50  ;;  %v5403_v40 = vld [vmem:[%s4276_s12 + $0x9d0] sm:$0xff]  ;;  %v5406_v62 = vld [vmem:[%s4276_s12 + $0x9d8] sm:$0x3f] }
  0xa6   : > { %13123 = vst [vmem:[#allocation256_spill] sm:$0xff] %v5400_v41  ;;  %13124 = vst [vmem:[#allocation257_spill] sm:$0xff] %v5403_v40  ;;  %v5409_v37 = vld [vmem:[%s4276_s12 + $0x9e0] sm:$0xff]  ;;  %v5412_v55 = vld [vmem:[%s4276_s12 + $0x9e8] sm:$0x3f] }
  0xa7   : > { %13125 = vst [vmem:[#allocation258_spill] sm:$0xff] %v5406_v62  ;;  %13126 = vst [vmem:[#allocation259_spill] sm:$0xff] %v5409_v37  ;;  %v5415_v56 = vld [vmem:[%s4276_s12 + $0x9f0] sm:$0xff]  ;;  %v5418_v50 = vld [vmem:[%s4276_s12 + $0x9f8] sm:$0x3f] }
  0xa8   : > { %13127 = vst [vmem:[#allocation260_spill] sm:$0xff] %v5412_v55  ;;  %13128 = vst [vmem:[#allocation261_spill] sm:$0xff] %v5415_v56  ;;  %v5421_v41 = vld [vmem:[%s4276_s12 + $0xa00] sm:$0xff]  ;;  %v5424_v40 = vld [vmem:[%s4276_s12 + $0xa08] sm:$0x3f] }
  0xa9   : > { %13129 = vst [vmem:[#allocation262_spill] sm:$0xff] %v5418_v50  ;;  %13130 = vst [vmem:[#allocation263_spill] sm:$0xff] %v5421_v41  ;;  %v5427_v62 = vld [vmem:[%s4276_s12 + $0xa10] sm:$0xff]  ;;  %v5430_v37 = vld [vmem:[%s4276_s12 + $0xa18] sm:$0x3f] }
  0xaa   : > { %13131 = vst [vmem:[#allocation264_spill] sm:$0xff] %v5424_v40  ;;  %13132 = vst [vmem:[#allocation265_spill] sm:$0xff] %v5427_v62  ;;  %v5433_v55 = vld [vmem:[%s4276_s12 + $0xa20] sm:$0xff]  ;;  %v5436_v56 = vld [vmem:[%s4276_s12 + $0xa28] sm:$0x3f] }
  0xab   : > { %13133 = vst [vmem:[#allocation266_spill] sm:$0xff] %v5430_v37  ;;  %13134 = vst [vmem:[#allocation267_spill] sm:$0xff] %v5433_v55  ;;  %v5439_v50 = vld [vmem:[%s4276_s12 + $0xa30] sm:$0xff]  ;;  %v5442_v41 = vld [vmem:[%s4276_s12 + $0xa38] sm:$0x3f] }
  0xac   : > { %13135 = vst [vmem:[#allocation268_spill] sm:$0xff] %v5436_v56  ;;  %13136 = vst [vmem:[#allocation269_spill] sm:$0xff] %v5439_v50  ;;  %v5445_v40 = vld [vmem:[%s4276_s12 + $0xa40] sm:$0xff]  ;;  %v5448_v62 = vld [vmem:[%s4276_s12 + $0xa48] sm:$0x3f] }
  0xad   : > { %13137 = vst [vmem:[#allocation270_spill] sm:$0xff] %v5442_v41  ;;  %13138 = vst [vmem:[#allocation271_spill] sm:$0xff] %v5445_v40  ;;  %v5451_v37 = vld [vmem:[%s4276_s12 + $0xa50] sm:$0xff]  ;;  %v5454_v55 = vld [vmem:[%s4276_s12 + $0xa58] sm:$0x3f] }
  0xae   : > { %13139 = vst [vmem:[#allocation272_spill] sm:$0xff] %v5448_v62  ;;  %13140 = vst [vmem:[#allocation273_spill] sm:$0xff] %v5451_v37  ;;  %v5457_v56 = vld [vmem:[%s4276_s12 + $0xa60] sm:$0xff]  ;;  %v5460_v50 = vld [vmem:[%s4276_s12 + $0xa68] sm:$0x3f] }
  0xaf   : > { %13141 = vst [vmem:[#allocation274_spill] sm:$0xff] %v5454_v55  ;;  %13142 = vst [vmem:[#allocation275_spill] sm:$0xff] %v5457_v56  ;;  %v5463_v41 = vld [vmem:[%s4276_s12 + $0xa70] sm:$0xff]  ;;  %v5466_v40 = vld [vmem:[%s4276_s12 + $0xa78] sm:$0x3f] }
  0xb0   : > { %13143 = vst [vmem:[#allocation276_spill] sm:$0xff] %v5460_v50  ;;  %13144 = vst [vmem:[#allocation277_spill] sm:$0xff] %v5463_v41  ;;  %v5469_v62 = vld [vmem:[%s4276_s12 + $0xa80] sm:$0xff]  ;;  %v5472_v37 = vld [vmem:[%s4276_s12 + $0xa88] sm:$0x3f] }
  0xb1   : > { %13145 = vst [vmem:[#allocation278_spill] sm:$0xff] %v5466_v40  ;;  %13146 = vst [vmem:[#allocation279_spill] sm:$0xff] %v5469_v62  ;;  %v5475_v55 = vld [vmem:[%s4276_s12 + $0xa90] sm:$0xff]  ;;  %v5478_v56 = vld [vmem:[%s4276_s12 + $0xa98] sm:$0x3f] }
  0xb2   : > { %13147 = vst [vmem:[#allocation280_spill] sm:$0xff] %v5472_v37  ;;  %13148 = vst [vmem:[#allocation281_spill] sm:$0xff] %v5475_v55  ;;  %v5481_v50 = vld [vmem:[%s4276_s12 + $0xaa0] sm:$0xff]  ;;  %v5484_v41 = vld [vmem:[%s4276_s12 + $0xaa8] sm:$0x3f] }
  0xb3   : > { %13149 = vst [vmem:[#allocation282_spill] sm:$0xff] %v5478_v56  ;;  %13150 = vst [vmem:[#allocation283_spill] sm:$0xff] %v5481_v50  ;;  %v5487_v40 = vld [vmem:[%s4276_s12 + $0xab0] sm:$0xff]  ;;  %v5490_v62 = vld [vmem:[%s4276_s12 + $0xab8] sm:$0x3f] }
  0xb4   : > { %13151 = vst [vmem:[#allocation284_spill] sm:$0xff] %v5484_v41  ;;  %13152 = vst [vmem:[#allocation285_spill] sm:$0xff] %v5487_v40  ;;  %v5493_v37 = vld [vmem:[%s4276_s12 + $0xac0] sm:$0xff]  ;;  %v5496_v55 = vld [vmem:[%s4276_s12 + $0xac8] sm:$0x3f] }
  0xb5   : > { %13153 = vst [vmem:[#allocation286_spill] sm:$0xff] %v5490_v62  ;;  %13154 = vst [vmem:[#allocation287_spill] sm:$0xff] %v5493_v37  ;;  %v5499_v56 = vld [vmem:[%s4276_s12 + $0xad0] sm:$0xff]  ;;  %v5502_v50 = vld [vmem:[%s4276_s12 + $0xad8] sm:$0x3f] }
  0xb6   : > { %13155 = vst [vmem:[#allocation288_spill] sm:$0xff] %v5496_v55  ;;  %13156 = vst [vmem:[#allocation289_spill] sm:$0xff] %v5499_v56  ;;  %v5505_v41 = vld [vmem:[%s4276_s12 + $0xae0] sm:$0xff]  ;;  %v5508_v40 = vld [vmem:[%s4276_s12 + $0xae8] sm:$0x3f] }
  0xb7   : > { %13157 = vst [vmem:[#allocation290_spill] sm:$0xff] %v5502_v50  ;;  %13158 = vst [vmem:[#allocation291_spill] sm:$0xff] %v5505_v41  ;;  %v5511_v62 = vld [vmem:[%s4276_s12 + $0xaf0] sm:$0xff]  ;;  %v5514_v37 = vld [vmem:[%s4276_s12 + $0xaf8] sm:$0x3f] }
  0xb8   : > { %13159 = vst [vmem:[#allocation292_spill] sm:$0xff] %v5508_v40  ;;  %13160 = vst [vmem:[#allocation293_spill] sm:$0xff] %v5511_v62  ;;  %v5517_v55 = vld [vmem:[%s4276_s12 + $0xb00] sm:$0xff]  ;;  %v5520_v56 = vld [vmem:[%s4276_s12 + $0xb08] sm:$0x3f] }
  0xb9   : > { %13161 = vst [vmem:[#allocation294_spill] sm:$0xff] %v5514_v37  ;;  %13162 = vst [vmem:[#allocation295_spill] sm:$0xff] %v5517_v55  ;;  %v5523_v50 = vld [vmem:[%s4276_s12 + $0xb10] sm:$0xff]  ;;  %v5526_v41 = vld [vmem:[%s4276_s12 + $0xb18] sm:$0x3f] }
  0xba   : > { %13163 = vst [vmem:[#allocation296_spill] sm:$0xff] %v5520_v56  ;;  %13164 = vst [vmem:[#allocation297_spill] sm:$0xff] %v5523_v50  ;;  %v5529_v40 = vld [vmem:[%s4276_s12 + $0xb20] sm:$0xff]  ;;  %v5532_v62 = vld [vmem:[%s4276_s12 + $0xb28] sm:$0x3f] }
  0xbb   : > { %13165 = vst [vmem:[#allocation298_spill] sm:$0xff] %v5526_v41  ;;  %13166 = vst [vmem:[#allocation299_spill] sm:$0xff] %v5529_v40  ;;  %v5535_v37 = vld [vmem:[%s4276_s12 + $0xb30] sm:$0xff]  ;;  %v5538_v55 = vld [vmem:[%s4276_s12 + $0xb38] sm:$0x3f] }
  0xbc   : > { %13167 = vst [vmem:[#allocation300_spill] sm:$0xff] %v5532_v62  ;;  %13168 = vst [vmem:[#allocation301_spill] sm:$0xff] %v5535_v37  ;;  %v5541_v56 = vld [vmem:[%s4276_s12 + $0xb40] sm:$0xff]  ;;  %v5544_v50 = vld [vmem:[%s4276_s12 + $0xb48] sm:$0x3f] }
  0xbd   : > { %13169 = vst [vmem:[#allocation302_spill] sm:$0xff] %v5538_v55  ;;  %13170 = vst [vmem:[#allocation303_spill] sm:$0xff] %v5541_v56  ;;  %v5547_v41 = vld [vmem:[%s4276_s12 + $0xb50] sm:$0xff]  ;;  %v5550_v40 = vld [vmem:[%s4276_s12 + $0xb58] sm:$0x3f] }
  0xbe   : > { %13171 = vst [vmem:[#allocation304_spill] sm:$0xff] %v5544_v50  ;;  %13172 = vst [vmem:[#allocation305_spill] sm:$0xff] %v5547_v41  ;;  %v5553_v62 = vld [vmem:[%s4276_s12 + $0xb60] sm:$0xff]  ;;  %v5556_v37 = vld [vmem:[%s4276_s12 + $0xb68] sm:$0x3f] }
  0xbf   : > { %13173 = vst [vmem:[#allocation306_spill] sm:$0xff] %v5550_v40  ;;  %13174 = vst [vmem:[#allocation307_spill] sm:$0xff] %v5553_v62  ;;  %v5559_v55 = vld [vmem:[%s4276_s12 + $0xb70] sm:$0xff]  ;;  %v5562_v56 = vld [vmem:[%s4276_s12 + $0xb78] sm:$0x3f] }
  0xc0   : > { %13175 = vst [vmem:[#allocation308_spill] sm:$0xff] %v5556_v37  ;;  %13176 = vst [vmem:[#allocation309_spill] sm:$0xff] %v5559_v55  ;;  %v5565_v50 = vld [vmem:[%s4276_s12 + $0xb80] sm:$0xff]  ;;  %v5568_v41 = vld [vmem:[%s4276_s12 + $0xb88] sm:$0x3f] }
  0xc1   : > { %13177 = vst [vmem:[#allocation310_spill] sm:$0xff] %v5562_v56  ;;  %13178 = vst [vmem:[#allocation311_spill] sm:$0xff] %v5565_v50  ;;  %v5571_v40 = vld [vmem:[%s4276_s12 + $0xb90] sm:$0xff]  ;;  %v5574_v62 = vld [vmem:[%s4276_s12 + $0xb98] sm:$0x3f] }
  0xc2   : > { %13179 = vst [vmem:[#allocation312_spill] sm:$0xff] %v5568_v41  ;;  %13180 = vst [vmem:[#allocation313_spill] sm:$0xff] %v5571_v40  ;;  %v5577_v37 = vld [vmem:[%s4276_s12 + $0xba0] sm:$0xff]  ;;  %v5580_v55 = vld [vmem:[%s4276_s12 + $0xba8] sm:$0x3f] }
  0xc3   : > { %13181 = vst [vmem:[#allocation314_spill] sm:$0xff] %v5574_v62  ;;  %13182 = vst [vmem:[#allocation315_spill] sm:$0xff] %v5577_v37  ;;  %v5583_v56 = vld [vmem:[%s4276_s12 + $0xbb0] sm:$0xff]  ;;  %v5586_v50 = vld [vmem:[%s4276_s12 + $0xbb8] sm:$0x3f] }
  0xc4   : > { %13183 = vst [vmem:[#allocation316_spill] sm:$0xff] %v5580_v55  ;;  %13184 = vst [vmem:[#allocation317_spill] sm:$0xff] %v5583_v56  ;;  %v5589_v41 = vld [vmem:[%s4276_s12 + $0xbc0] sm:$0xff]  ;;  %v5592_v40 = vld [vmem:[%s4276_s12 + $0xbc8] sm:$0x3f] }
  0xc5   : > { %13185 = vst [vmem:[#allocation318_spill] sm:$0xff] %v5586_v50  ;;  %13186 = vst [vmem:[#allocation319_spill] sm:$0xff] %v5589_v41  ;;  %v5595_v62 = vld [vmem:[%s4276_s12 + $0xbd0] sm:$0xff]  ;;  %v5598_v37 = vld [vmem:[%s4276_s12 + $0xbd8] sm:$0x3f] }
  0xc6   : > { %13187 = vst [vmem:[#allocation320_spill] sm:$0xff] %v5592_v40  ;;  %13188 = vst [vmem:[#allocation321_spill] sm:$0xff] %v5595_v62  ;;  %v5601_v55 = vld [vmem:[%s4276_s12 + $0xbe0] sm:$0xff]  ;;  %v5604_v56 = vld [vmem:[%s4276_s12 + $0xbe8] sm:$0x3f] }
  0xc7   : > { %13189 = vst [vmem:[#allocation322_spill] sm:$0xff] %v5598_v37  ;;  %13190 = vst [vmem:[#allocation323_spill] sm:$0xff] %v5601_v55  ;;  %v5607_v50 = vld [vmem:[%s4276_s12 + $0xbf0] sm:$0xff]  ;;  %v5610_v41 = vld [vmem:[%s4276_s12 + $0xbf8] sm:$0x3f] }
  0xc8   : > { %13191 = vst [vmem:[#allocation324_spill] sm:$0xff] %v5604_v56  ;;  %13192 = vst [vmem:[#allocation325_spill] sm:$0xff] %v5607_v50  ;;  %v5613_v40 = vld [vmem:[%s4276_s12 + $0xc00] sm:$0xff]  ;;  %v5616_v62 = vld [vmem:[%s4276_s12 + $0xc08] sm:$0x3f] }
  0xc9   : > { %13193 = vst [vmem:[#allocation326_spill] sm:$0xff] %v5610_v41  ;;  %13194 = vst [vmem:[#allocation327_spill] sm:$0xff] %v5613_v40  ;;  %v5619_v37 = vld [vmem:[%s4276_s12 + $0xc10] sm:$0xff]  ;;  %v5622_v55 = vld [vmem:[%s4276_s12 + $0xc18] sm:$0x3f] }
  0xca   : > { %13195 = vst [vmem:[#allocation328_spill] sm:$0xff] %v5616_v62  ;;  %13196 = vst [vmem:[#allocation329_spill] sm:$0xff] %v5619_v37  ;;  %v5625_v56 = vld [vmem:[%s4276_s12 + $0xc20] sm:$0xff]  ;;  %v5628_v50 = vld [vmem:[%s4276_s12 + $0xc28] sm:$0x3f] }
  0xcb   : > { %13197 = vst [vmem:[#allocation330_spill] sm:$0xff] %v5622_v55  ;;  %13198 = vst [vmem:[#allocation331_spill] sm:$0xff] %v5625_v56  ;;  %v5631_v41 = vld [vmem:[%s4276_s12 + $0xc30] sm:$0xff]  ;;  %v5634_v40 = vld [vmem:[%s4276_s12 + $0xc38] sm:$0x3f] }
  0xcc   : > { %13199 = vst [vmem:[#allocation332_spill] sm:$0xff] %v5628_v50  ;;  %13200 = vst [vmem:[#allocation333_spill] sm:$0xff] %v5631_v41  ;;  %v5637_v62 = vld [vmem:[%s4276_s12 + $0xc40] sm:$0xff]  ;;  %v5640_v37 = vld [vmem:[%s4276_s12 + $0xc48] sm:$0x3f] }
  0xcd   : > { %13201 = vst [vmem:[#allocation334_spill] sm:$0xff] %v5634_v40  ;;  %13202 = vst [vmem:[#allocation335_spill] sm:$0xff] %v5637_v62  ;;  %v5643_v55 = vld [vmem:[%s4276_s12 + $0xc50] sm:$0xff]  ;;  %v5646_v56 = vld [vmem:[%s4276_s12 + $0xc58] sm:$0x3f] }
  0xce   : > { %13203 = vst [vmem:[#allocation336_spill] sm:$0xff] %v5640_v37  ;;  %13204 = vst [vmem:[#allocation337_spill] sm:$0xff] %v5643_v55  ;;  %v5649_v50 = vld [vmem:[%s4276_s12 + $0xc60] sm:$0xff]  ;;  %v5652_v41 = vld [vmem:[%s4276_s12 + $0xc68] sm:$0x3f] }
  0xcf   : > { %13205 = vst [vmem:[#allocation338_spill] sm:$0xff] %v5646_v56  ;;  %13206 = vst [vmem:[#allocation339_spill] sm:$0xff] %v5649_v50  ;;  %v5655_v40 = vld [vmem:[%s4276_s12 + $0xc70] sm:$0xff]  ;;  %v5658_v62 = vld [vmem:[%s4276_s12 + $0xc78] sm:$0x3f] }
  0xd0   : > { %13207 = vst [vmem:[#allocation340_spill] sm:$0xff] %v5652_v41  ;;  %13208 = vst [vmem:[#allocation341_spill] sm:$0xff] %v5655_v40  ;;  %v5661_v37 = vld [vmem:[%s4276_s12 + $0xc80] sm:$0xff]  ;;  %v5664_v55 = vld [vmem:[%s4276_s12 + $0xc88] sm:$0x3f] }
  0xd1   : > { %13209 = vst [vmem:[#allocation342_spill] sm:$0xff] %v5658_v62  ;;  %13210 = vst [vmem:[#allocation343_spill] sm:$0xff] %v5661_v37  ;;  %v5667_v56 = vld [vmem:[%s4276_s12 + $0xc90] sm:$0xff]  ;;  %v5670_v50 = vld [vmem:[%s4276_s12 + $0xc98] sm:$0x3f] }
  0xd2   : > { %13211 = vst [vmem:[#allocation344_spill] sm:$0xff] %v5664_v55  ;;  %13212 = vst [vmem:[#allocation345_spill] sm:$0xff] %v5667_v56  ;;  %v5673_v41 = vld [vmem:[%s4276_s12 + $0xca0] sm:$0xff]  ;;  %v5676_v40 = vld [vmem:[%s4276_s12 + $0xca8] sm:$0x3f] }
  0xd3   : > { %13213 = vst [vmem:[#allocation346_spill] sm:$0xff] %v5670_v50  ;;  %13214 = vst [vmem:[#allocation347_spill] sm:$0xff] %v5673_v41  ;;  %v5679_v62 = vld [vmem:[%s4276_s12 + $0xcb0] sm:$0xff]  ;;  %v5682_v37 = vld [vmem:[%s4276_s12 + $0xcb8] sm:$0x3f] }
  0xd4   : > { %13215 = vst [vmem:[#allocation348_spill] sm:$0xff] %v5676_v40  ;;  %13216 = vst [vmem:[#allocation349_spill] sm:$0xff] %v5679_v62  ;;  %v5685_v55 = vld [vmem:[%s4276_s12 + $0xcc0] sm:$0xff]  ;;  %v5688_v56 = vld [vmem:[%s4276_s12 + $0xcc8] sm:$0x3f] }
  0xd5   : > { %13217 = vst [vmem:[#allocation350_spill] sm:$0xff] %v5682_v37  ;;  %13218 = vst [vmem:[#allocation351_spill] sm:$0xff] %v5685_v55  ;;  %v5691_v50 = vld [vmem:[%s4276_s12 + $0xcd0] sm:$0xff]  ;;  %v5694_v41 = vld [vmem:[%s4276_s12 + $0xcd8] sm:$0x3f] }
  0xd6   : > { %13219 = vst [vmem:[#allocation352_spill] sm:$0xff] %v5688_v56  ;;  %13220 = vst [vmem:[#allocation353_spill] sm:$0xff] %v5691_v50  ;;  %v5697_v40 = vld [vmem:[%s4276_s12 + $0xce0] sm:$0xff]  ;;  %v5700_v62 = vld [vmem:[%s4276_s12 + $0xce8] sm:$0x3f] }
  0xd7   : > { %13221 = vst [vmem:[#allocation354_spill] sm:$0xff] %v5694_v41  ;;  %13222 = vst [vmem:[#allocation355_spill] sm:$0xff] %v5697_v40  ;;  %v5703_v37 = vld [vmem:[%s4276_s12 + $0xcf0] sm:$0xff]  ;;  %v5706_v55 = vld [vmem:[%s4276_s12 + $0xcf8] sm:$0x3f] }
  0xd8   : > { %13223 = vst [vmem:[#allocation356_spill] sm:$0xff] %v5700_v62  ;;  %13224 = vst [vmem:[#allocation357_spill] sm:$0xff] %v5703_v37  ;;  %v5709_v56 = vld [vmem:[%s4276_s12 + $0xd00] sm:$0xff]  ;;  %v5712_v50 = vld [vmem:[%s4276_s12 + $0xd08] sm:$0x3f] }
  0xd9   : > { %13225 = vst [vmem:[#allocation358_spill] sm:$0xff] %v5706_v55  ;;  %13226 = vst [vmem:[#allocation359_spill] sm:$0xff] %v5709_v56  ;;  %v5715_v41 = vld [vmem:[%s4276_s12 + $0xd10] sm:$0xff]  ;;  %v5718_v40 = vld [vmem:[%s4276_s12 + $0xd18] sm:$0x3f] }
  0xda   : > { %13227 = vst [vmem:[#allocation360_spill] sm:$0xff] %v5712_v50  ;;  %13228 = vst [vmem:[#allocation361_spill] sm:$0xff] %v5715_v41  ;;  %v5721_v62 = vld [vmem:[%s4276_s12 + $0xd20] sm:$0xff]  ;;  %v5724_v37 = vld [vmem:[%s4276_s12 + $0xd28] sm:$0x3f] }
  0xdb   : > { %13229 = vst [vmem:[#allocation362_spill] sm:$0xff] %v5718_v40  ;;  %13230 = vst [vmem:[#allocation363_spill] sm:$0xff] %v5721_v62  ;;  %v5727_v55 = vld [vmem:[%s4276_s12 + $0xd30] sm:$0xff]  ;;  %v5730_v56 = vld [vmem:[%s4276_s12 + $0xd38] sm:$0x3f] }
  0xdc   : > { %13231 = vst [vmem:[#allocation364_spill] sm:$0xff] %v5724_v37  ;;  %13232 = vst [vmem:[#allocation365_spill] sm:$0xff] %v5727_v55  ;;  %v5733_v50 = vld [vmem:[%s4276_s12 + $0xd40] sm:$0xff]  ;;  %v5736_v41 = vld [vmem:[%s4276_s12 + $0xd48] sm:$0x3f] }
  0xdd   : > { %13233 = vst [vmem:[#allocation366_spill] sm:$0xff] %v5730_v56  ;;  %13234 = vst [vmem:[#allocation367_spill] sm:$0xff] %v5733_v50  ;;  %v5739_v40 = vld [vmem:[%s4276_s12 + $0xd50] sm:$0xff]  ;;  %v5742_v62 = vld [vmem:[%s4276_s12 + $0xd58] sm:$0x3f] }
  0xde   : > { %13235 = vst [vmem:[#allocation368_spill] sm:$0xff] %v5736_v41  ;;  %13236 = vst [vmem:[#allocation369_spill] sm:$0xff] %v5739_v40  ;;  %v5745_v37 = vld [vmem:[%s4276_s12 + $0xd60] sm:$0xff]  ;;  %v5748_v55 = vld [vmem:[%s4276_s12 + $0xd68] sm:$0x3f] }
  0xdf   : > { %13237 = vst [vmem:[#allocation370_spill] sm:$0xff] %v5742_v62  ;;  %13238 = vst [vmem:[#allocation371_spill] sm:$0xff] %v5745_v37  ;;  %v5751_v56 = vld [vmem:[%s4276_s12 + $0xd70] sm:$0xff]  ;;  %v5754_v50 = vld [vmem:[%s4276_s12 + $0xd78] sm:$0x3f] }
  0xe0   : > { %13239 = vst [vmem:[#allocation372_spill] sm:$0xff] %v5748_v55  ;;  %13240 = vst [vmem:[#allocation373_spill] sm:$0xff] %v5751_v56  ;;  %v5757_v41 = vld [vmem:[%s4276_s12 + $0xd80] sm:$0xff]  ;;  %v5760_v40 = vld [vmem:[%s4276_s12 + $0xd88] sm:$0x3f] }
  0xe1   : > { %13241 = vst [vmem:[#allocation374_spill] sm:$0xff] %v5754_v50  ;;  %13242 = vst [vmem:[#allocation375_spill] sm:$0xff] %v5757_v41  ;;  %v5763_v62 = vld [vmem:[%s4276_s12 + $0xd90] sm:$0xff]  ;;  %v5766_v37 = vld [vmem:[%s4276_s12 + $0xd98] sm:$0x3f] }
  0xe2   : > { %13243 = vst [vmem:[#allocation376_spill] sm:$0xff] %v5760_v40  ;;  %13244 = vst [vmem:[#allocation377_spill] sm:$0xff] %v5763_v62  ;;  %v5769_v55 = vld [vmem:[%s4276_s12 + $0xda0] sm:$0xff]  ;;  %v5772_v56 = vld [vmem:[%s4276_s12 + $0xda8] sm:$0x3f] }
  0xe3   : > { %13245 = vst [vmem:[#allocation378_spill] sm:$0xff] %v5766_v37  ;;  %13246 = vst [vmem:[#allocation379_spill] sm:$0xff] %v5769_v55  ;;  %v5775_v50 = vld [vmem:[%s4276_s12 + $0xdb0] sm:$0xff]  ;;  %v5778_v41 = vld [vmem:[%s4276_s12 + $0xdb8] sm:$0x3f] }
  0xe4   : > { %13247 = vst [vmem:[#allocation380_spill] sm:$0xff] %v5772_v56  ;;  %13248 = vst [vmem:[#allocation381_spill] sm:$0xff] %v5775_v50  ;;  %v5781_v40 = vld [vmem:[%s4276_s12 + $0xdc0] sm:$0xff]  ;;  %v5784_v62 = vld [vmem:[%s4276_s12 + $0xdc8] sm:$0x3f] }
  0xe5   : > { %13249 = vst [vmem:[#allocation382_spill] sm:$0xff] %v5778_v41  ;;  %13250 = vst [vmem:[#allocation383_spill] sm:$0xff] %v5781_v40  ;;  %v5787_v37 = vld [vmem:[%s4276_s12 + $0xdd0] sm:$0xff]  ;;  %v5790_v55 = vld [vmem:[%s4276_s12 + $0xdd8] sm:$0x3f] }
  0xe6   : > { %13251 = vst [vmem:[#allocation384_spill] sm:$0xff] %v5784_v62  ;;  %13252 = vst [vmem:[#allocation385_spill] sm:$0xff] %v5787_v37  ;;  %v5793_v56 = vld [vmem:[%s4276_s12 + $0xde0] sm:$0xff]  ;;  %v5796_v50 = vld [vmem:[%s4276_s12 + $0xde8] sm:$0x3f] }
  0xe7   : > { %13253 = vst [vmem:[#allocation386_spill] sm:$0xff] %v5790_v55  ;;  %13254 = vst [vmem:[#allocation387_spill] sm:$0xff] %v5793_v56  ;;  %v5799_v41 = vld [vmem:[%s4276_s12 + $0xdf0] sm:$0xff]  ;;  %v5802_v40 = vld [vmem:[%s4276_s12 + $0xdf8] sm:$0x3f] }
  0xe8   : > { %13255 = vst [vmem:[#allocation388_spill] sm:$0xff] %v5796_v50  ;;  %13256 = vst [vmem:[#allocation389_spill] sm:$0xff] %v5799_v41  ;;  %v5805_v62 = vld [vmem:[%s4276_s12 + $0xe00] sm:$0xff]  ;;  %v5808_v37 = vld [vmem:[%s4276_s12 + $0xe08] sm:$0x3f] }
  0xe9   : > { %13257 = vst [vmem:[#allocation390_spill] sm:$0xff] %v5802_v40  ;;  %13258 = vst [vmem:[#allocation391_spill] sm:$0xff] %v5805_v62  ;;  %v5811_v55 = vld [vmem:[%s4276_s12 + $0xe10] sm:$0xff]  ;;  %v5814_v56 = vld [vmem:[%s4276_s12 + $0xe18] sm:$0x3f] }
  0xea   : > { %13259 = vst [vmem:[#allocation392_spill] sm:$0xff] %v5808_v37  ;;  %13260 = vst [vmem:[#allocation393_spill] sm:$0xff] %v5811_v55  ;;  %v5817_v50 = vld [vmem:[%s4276_s12 + $0xe20] sm:$0xff]  ;;  %v5820_v41 = vld [vmem:[%s4276_s12 + $0xe28] sm:$0x3f] }
  0xeb   : > { %13261 = vst [vmem:[#allocation394_spill] sm:$0xff] %v5814_v56  ;;  %13262 = vst [vmem:[#allocation395_spill] sm:$0xff] %v5817_v50  ;;  %v5823_v40 = vld [vmem:[%s4276_s12 + $0xe30] sm:$0xff]  ;;  %v5826_v62 = vld [vmem:[%s4276_s12 + $0xe38] sm:$0x3f] }
  0xec   : > { %13263 = vst [vmem:[#allocation396_spill] sm:$0xff] %v5820_v41  ;;  %13264 = vst [vmem:[#allocation397_spill] sm:$0xff] %v5823_v40  ;;  %v5829_v37 = vld [vmem:[%s4276_s12 + $0xe40] sm:$0xff]  ;;  %v5832_v55 = vld [vmem:[%s4276_s12 + $0xe48] sm:$0x3f] }
  0xed   : > { %13265 = vst [vmem:[#allocation398_spill] sm:$0xff] %v5826_v62  ;;  %13266 = vst [vmem:[#allocation399_spill] sm:$0xff] %v5829_v37  ;;  %v5835_v56 = vld [vmem:[%s4276_s12 + $0xe50] sm:$0xff]  ;;  %v5838_v50 = vld [vmem:[%s4276_s12 + $0xe58] sm:$0x3f] }
  0xee   : > { %13267 = vst [vmem:[#allocation400_spill] sm:$0xff] %v5832_v55  ;;  %13268 = vst [vmem:[#allocation401_spill] sm:$0xff] %v5835_v56  ;;  %v5841_v41 = vld [vmem:[%s4276_s12 + $0xe60] sm:$0xff]  ;;  %v5844_v40 = vld [vmem:[%s4276_s12 + $0xe68] sm:$0x3f] }
  0xef   : > { %13269 = vst [vmem:[#allocation402_spill] sm:$0xff] %v5838_v50  ;;  %13270 = vst [vmem:[#allocation403_spill] sm:$0xff] %v5841_v41  ;;  %v5847_v62 = vld [vmem:[%s4276_s12 + $0xe70] sm:$0xff]  ;;  %v5850_v37 = vld [vmem:[%s4276_s12 + $0xe78] sm:$0x3f] }
  0xf0   : > { %13271 = vst [vmem:[#allocation404_spill] sm:$0xff] %v5844_v40  ;;  %13272 = vst [vmem:[#allocation405_spill] sm:$0xff] %v5847_v62  ;;  %v5853_v55 = vld [vmem:[%s4276_s12 + $0xe80] sm:$0xff]  ;;  %v5856_v56 = vld [vmem:[%s4276_s12 + $0xe88] sm:$0x3f] }
  0xf1   : > { %13273 = vst [vmem:[#allocation406_spill] sm:$0xff] %v5850_v37  ;;  %13274 = vst [vmem:[#allocation407_spill] sm:$0xff] %v5853_v55  ;;  %v5859_v50 = vld [vmem:[%s4276_s12 + $0xe90] sm:$0xff]  ;;  %v5862_v41 = vld [vmem:[%s4276_s12 + $0xe98] sm:$0x3f] }
  0xf2   : > { %13275 = vst [vmem:[#allocation408_spill] sm:$0xff] %v5856_v56  ;;  %13276 = vst [vmem:[#allocation409_spill] sm:$0xff] %v5859_v50  ;;  %v5865_v40 = vld [vmem:[%s4276_s12 + $0xea0] sm:$0xff]  ;;  %v5868_v62 = vld [vmem:[%s4276_s12 + $0xea8] sm:$0x3f] }
  0xf3   : > { %13277 = vst [vmem:[#allocation410_spill] sm:$0xff] %v5862_v41  ;;  %13278 = vst [vmem:[#allocation411_spill] sm:$0xff] %v5865_v40  ;;  %v5871_v37 = vld [vmem:[%s4276_s12 + $0xeb0] sm:$0xff]  ;;  %v5874_v55 = vld [vmem:[%s4276_s12 + $0xeb8] sm:$0x3f] }
  0xf4   : > { %13279 = vst [vmem:[#allocation412_spill] sm:$0xff] %v5868_v62  ;;  %13280 = vst [vmem:[#allocation413_spill] sm:$0xff] %v5871_v37  ;;  %v5877_v56 = vld [vmem:[%s4276_s12 + $0xec0] sm:$0xff]  ;;  %v5880_v50 = vld [vmem:[%s4276_s12 + $0xec8] sm:$0x3f] }
  0xf5   : > { %13281 = vst [vmem:[#allocation414_spill] sm:$0xff] %v5874_v55  ;;  %13282 = vst [vmem:[#allocation415_spill] sm:$0xff] %v5877_v56  ;;  %v5883_v41 = vld [vmem:[%s4276_s12 + $0xed0] sm:$0xff]  ;;  %v5886_v40 = vld [vmem:[%s4276_s12 + $0xed8] sm:$0x3f] }
  0xf6   : > { %13283 = vst [vmem:[#allocation416_spill] sm:$0xff] %v5880_v50  ;;  %13284 = vst [vmem:[#allocation417_spill] sm:$0xff] %v5883_v41  ;;  %v5889_v62 = vld [vmem:[%s4276_s12 + $0xee0] sm:$0xff]  ;;  %v5892_v37 = vld [vmem:[%s4276_s12 + $0xee8] sm:$0x3f] }
  0xf7   : > { %13285 = vst [vmem:[#allocation418_spill] sm:$0xff] %v5886_v40  ;;  %13286 = vst [vmem:[#allocation419_spill] sm:$0xff] %v5889_v62  ;;  %v5895_v55 = vld [vmem:[%s4276_s12 + $0xef0] sm:$0xff]  ;;  %v5898_v56 = vld [vmem:[%s4276_s12 + $0xef8] sm:$0x3f] }
  0xf8   : > { %13287 = vst [vmem:[#allocation420_spill] sm:$0xff] %v5892_v37  ;;  %13288 = vst [vmem:[#allocation421_spill] sm:$0xff] %v5895_v55  ;;  %v5901_v50 = vld [vmem:[%s4276_s12 + $0xf00] sm:$0xff]  ;;  %v5904_v41 = vld [vmem:[%s4276_s12 + $0xf08] sm:$0x3f] }
  0xf9   : > { %13289 = vst [vmem:[#allocation422_spill] sm:$0xff] %v5898_v56  ;;  %13290 = vst [vmem:[#allocation423_spill] sm:$0xff] %v5901_v50  ;;  %v5907_v40 = vld [vmem:[%s4276_s12 + $0xf10] sm:$0xff]  ;;  %v5910_v62 = vld [vmem:[%s4276_s12 + $0xf18] sm:$0x3f] }
  0xfa   : > { %13291 = vst [vmem:[#allocation424_spill] sm:$0xff] %v5904_v41  ;;  %13292 = vst [vmem:[#allocation425_spill] sm:$0xff] %v5907_v40  ;;  %v5913_v37 = vld [vmem:[%s4276_s12 + $0xf20] sm:$0xff]  ;;  %v5916_v55 = vld [vmem:[%s4276_s12 + $0xf28] sm:$0x3f] }
  0xfb   : > { %13293 = vst [vmem:[#allocation426_spill] sm:$0xff] %v5910_v62  ;;  %13294 = vst [vmem:[#allocation427_spill] sm:$0xff] %v5913_v37  ;;  %v5919_v56 = vld [vmem:[%s4276_s12 + $0xf30] sm:$0xff]  ;;  %v5922_v50 = vld [vmem:[%s4276_s12 + $0xf38] sm:$0x3f] }
  0xfc   : > { %13295 = vst [vmem:[#allocation428_spill] sm:$0xff] %v5916_v55  ;;  %13296 = vst [vmem:[#allocation429_spill] sm:$0xff] %v5919_v56  ;;  %v5925_v41 = vld [vmem:[%s4276_s12 + $0xf40] sm:$0xff]  ;;  %v5928_v40 = vld [vmem:[%s4276_s12 + $0xf48] sm:$0x3f] }
  0xfd   : > { %13297 = vst [vmem:[#allocation430_spill] sm:$0xff] %v5922_v50  ;;  %13298 = vst [vmem:[#allocation431_spill] sm:$0xff] %v5925_v41  ;;  %v5931_v62 = vld [vmem:[%s4276_s12 + $0xf50] sm:$0xff]  ;;  %v5934_v37 = vld [vmem:[%s4276_s12 + $0xf58] sm:$0x3f] }
  0xfe   : > { %13299 = vst [vmem:[#allocation432_spill] sm:$0xff] %v5928_v40  ;;  %13300 = vst [vmem:[#allocation433_spill] sm:$0xff] %v5931_v62  ;;  %v5937_v55 = vld [vmem:[%s4276_s12 + $0xf60] sm:$0xff]  ;;  %v5940_v56 = vld [vmem:[%s4276_s12 + $0xf68] sm:$0x3f] }
  0xff   : > { %13301 = vst [vmem:[#allocation434_spill] sm:$0xff] %v5934_v37  ;;  %13302 = vst [vmem:[#allocation435_spill] sm:$0xff] %v5937_v55  ;;  %v5943_v50 = vld [vmem:[%s4276_s12 + $0xf70] sm:$0xff]  ;;  %v5946_v41 = vld [vmem:[%s4276_s12 + $0xf78] sm:$0x3f] }
 0x100   : > { %13303 = vst [vmem:[#allocation436_spill] sm:$0xff] %v5940_v56  ;;  %13304 = vst [vmem:[#allocation437_spill] sm:$0xff] %v5943_v50  ;;  %v5949_v40 = vld [vmem:[%s4276_s12 + $0xf80] sm:$0xff]  ;;  %v5952_v62 = vld [vmem:[%s4276_s12 + $0xf88] sm:$0x3f] }
 0x101   : > { %13305 = vst [vmem:[#allocation438_spill] sm:$0xff] %v5946_v41  ;;  %13306 = vst [vmem:[#allocation439_spill] sm:$0xff] %v5949_v40  ;;  %v5955_v37 = vld [vmem:[%s4276_s12 + $0xf90] sm:$0xff]  ;;  %v5958_v55 = vld [vmem:[%s4276_s12 + $0xf98] sm:$0x3f] }
 0x102   : > { %13307 = vst [vmem:[#allocation440_spill] sm:$0xff] %v5952_v62  ;;  %13308 = vst [vmem:[#allocation441_spill] sm:$0xff] %v5955_v37  ;;  %v5961_v56 = vld [vmem:[%s4276_s12 + $0xfa0] sm:$0xff]  ;;  %v5964_v50 = vld [vmem:[%s4276_s12 + $0xfa8] sm:$0x3f] }
 0x103   : > { %13309 = vst [vmem:[#allocation442_spill] sm:$0xff] %v5958_v55  ;;  %13310 = vst [vmem:[#allocation443_spill] sm:$0xff] %v5961_v56  ;;  %v5967_v41 = vld [vmem:[%s4276_s12 + $0xfb0] sm:$0xff]  ;;  %v5970_v40 = vld [vmem:[%s4276_s12 + $0xfb8] sm:$0x3f] }
 0x104   : > { %13311 = vst [vmem:[#allocation444_spill] sm:$0xff] %v5964_v50  ;;  %13312 = vst [vmem:[#allocation445_spill] sm:$0xff] %v5967_v41  ;;  %v5973_v62 = vld [vmem:[%s4276_s12 + $0xfc0] sm:$0xff]  ;;  %v5976_v37 = vld [vmem:[%s4276_s12 + $0xfc8] sm:$0x3f] }
 0x105   : > { %13313 = vst [vmem:[#allocation446_spill] sm:$0xff] %v5970_v40  ;;  %13314 = vst [vmem:[#allocation447_spill] sm:$0xff] %v5973_v62  ;;  %v5979_v55 = vld [vmem:[%s4276_s12 + $0xfd0] sm:$0xff]  ;;  %v5982_v56 = vld [vmem:[%s4276_s12 + $0xfd8] sm:$0x3f] }
 0x106   : > { %13315 = vst [vmem:[#allocation448_spill] sm:$0xff] %v5976_v37  ;;  %13316 = vst [vmem:[#allocation449_spill] sm:$0xff] %v5979_v55  ;;  %v5985_v50 = vld [vmem:[%s4276_s12 + $0xfe0] sm:$0xff]  ;;  %v5988_v41 = vld [vmem:[%s4276_s12 + $0xfe8] sm:$0x3f] }
 0x107   : > { %13317 = vst [vmem:[#allocation450_spill] sm:$0xff] %v5982_v56  ;;  %13318 = vst [vmem:[#allocation451_spill] sm:$0xff] %v5985_v50  ;;  %v5991_v40 = vld [vmem:[%s4276_s12 + $0xff0] sm:$0xff]  ;;  %v5994_v62 = vld [vmem:[%s4276_s12 + $0xff8] sm:$0x3f] }
 0x108   : > { %13319 = vst [vmem:[#allocation452_spill] sm:$0xff] %v5988_v41  ;;  %13320 = vst [vmem:[#allocation453_spill] sm:$0xff] %v5991_v40  ;;  %v5997_v37 = vld [vmem:[%s4276_s12 + $0x1000] sm:$0xff]  ;;  %v6000_v55 = vld [vmem:[%s4276_s12 + $0x1008] sm:$0x3f] }
 0x109   : > { %13321 = vst [vmem:[#allocation454_spill] sm:$0xff] %v5994_v62  ;;  %13322 = vst [vmem:[#allocation455_spill] sm:$0xff] %v5997_v37  ;;  %v6003_v56 = vld [vmem:[%s4276_s12 + $0x1010] sm:$0xff]  ;;  %v6006_v50 = vld [vmem:[%s4276_s12 + $0x1018] sm:$0x3f] }
 0x10a   : > { %13323 = vst [vmem:[#allocation456_spill] sm:$0xff] %v6000_v55  ;;  %13324 = vst [vmem:[#allocation457_spill] sm:$0xff] %v6003_v56  ;;  %v6009_v41 = vld [vmem:[%s4276_s12 + $0x1020] sm:$0xff]  ;;  %v6012_v40 = vld [vmem:[%s4276_s12 + $0x1028] sm:$0x3f] }
 0x10b   : > { %13325 = vst [vmem:[#allocation458_spill] sm:$0xff] %v6006_v50  ;;  %13326 = vst [vmem:[#allocation459_spill] sm:$0xff] %v6009_v41  ;;  %v6015_v62 = vld [vmem:[%s4276_s12 + $0x1030] sm:$0xff]  ;;  %v6018_v37 = vld [vmem:[%s4276_s12 + $0x1038] sm:$0x3f] }
 0x10c   : > { %13327 = vst [vmem:[#allocation460_spill] sm:$0xff] %v6012_v40  ;;  %13328 = vst [vmem:[#allocation461_spill] sm:$0xff] %v6015_v62  ;;  %v6021_v55 = vld [vmem:[%s4276_s12 + $0x1040] sm:$0xff]  ;;  %v6024_v56 = vld [vmem:[%s4276_s12 + $0x1048] sm:$0x3f] }
 0x10d   : > { %13329 = vst [vmem:[#allocation462_spill] sm:$0xff] %v6018_v37  ;;  %13330 = vst [vmem:[#allocation463_spill] sm:$0xff] %v6021_v55  ;;  %v6027_v50 = vld [vmem:[%s4276_s12 + $0x1050] sm:$0xff]  ;;  %v6030_v41 = vld [vmem:[%s4276_s12 + $0x1058] sm:$0x3f] }
 0x10e   : > { %13331 = vst [vmem:[#allocation464_spill] sm:$0xff] %v6024_v56  ;;  %13332 = vst [vmem:[#allocation465_spill] sm:$0xff] %v6027_v50  ;;  %v6033_v40 = vld [vmem:[%s4276_s12 + $0x1060] sm:$0xff]  ;;  %v6036_v62 = vld [vmem:[%s4276_s12 + $0x1068] sm:$0x3f] }
 0x10f   : > { %13333 = vst [vmem:[#allocation466_spill] sm:$0xff] %v6030_v41  ;;  %13334 = vst [vmem:[#allocation467_spill] sm:$0xff] %v6033_v40  ;;  %v6039_v37 = vld [vmem:[%s4276_s12 + $0x1070] sm:$0xff]  ;;  %v6042_v55 = vld [vmem:[%s4276_s12 + $0x1078] sm:$0x3f] }
 0x110   : > { %13335 = vst [vmem:[#allocation468_spill] sm:$0xff] %v6036_v62  ;;  %13336 = vst [vmem:[#allocation469_spill] sm:$0xff] %v6039_v37  ;;  %v6045_v56 = vld [vmem:[%s4276_s12 + $0x1080] sm:$0xff]  ;;  %v6048_v50 = vld [vmem:[%s4276_s12 + $0x1088] sm:$0x3f] }
 0x111   : > { %13337 = vst [vmem:[#allocation470_spill] sm:$0xff] %v6042_v55  ;;  %13338 = vst [vmem:[#allocation471_spill] sm:$0xff] %v6045_v56  ;;  %v6051_v41 = vld [vmem:[%s4276_s12 + $0x1090] sm:$0xff]  ;;  %v6054_v40 = vld [vmem:[%s4276_s12 + $0x1098] sm:$0x3f] }
 0x112   : > { %13339 = vst [vmem:[#allocation472_spill] sm:$0xff] %v6048_v50  ;;  %13340 = vst [vmem:[#allocation473_spill] sm:$0xff] %v6051_v41  ;;  %v6057_v62 = vld [vmem:[%s4276_s12 + $0x10a0] sm:$0xff]  ;;  %v6060_v37 = vld [vmem:[%s4276_s12 + $0x10a8] sm:$0x3f] }
 0x113   : > { %13341 = vst [vmem:[#allocation474_spill] sm:$0xff] %v6054_v40  ;;  %13342 = vst [vmem:[#allocation475_spill] sm:$0xff] %v6057_v62  ;;  %v6063_v55 = vld [vmem:[%s4276_s12 + $0x10b0] sm:$0xff]  ;;  %v6066_v56 = vld [vmem:[%s4276_s12 + $0x10b8] sm:$0x3f] }
 0x114   : > { %13343 = vst [vmem:[#allocation476_spill] sm:$0xff] %v6060_v37  ;;  %13344 = vst [vmem:[#allocation477_spill] sm:$0xff] %v6063_v55  ;;  %v6069_v50 = vld [vmem:[%s4276_s12 + $0x10c0] sm:$0xff]  ;;  %v6072_v41 = vld [vmem:[%s4276_s12 + $0x10c8] sm:$0x3f] }
 0x115   : > { %13345 = vst [vmem:[#allocation478_spill] sm:$0xff] %v6066_v56  ;;  %13346 = vst [vmem:[#allocation479_spill] sm:$0xff] %v6069_v50  ;;  %v6075_v40 = vld [vmem:[%s4276_s12 + $0x10d0] sm:$0xff]  ;;  %v6078_v62 = vld [vmem:[%s4276_s12 + $0x10d8] sm:$0x3f] }
 0x116   : > { %13347 = vst [vmem:[#allocation480_spill] sm:$0xff] %v6072_v41  ;;  %13348 = vst [vmem:[#allocation481_spill] sm:$0xff] %v6075_v40  ;;  %v6081_v37 = vld [vmem:[%s4276_s12 + $0x10e0] sm:$0xff]  ;;  %v6084_v55 = vld [vmem:[%s4276_s12 + $0x10e8] sm:$0x3f] }
 0x117   : > { %13349 = vst [vmem:[#allocation482_spill] sm:$0xff] %v6078_v62  ;;  %13350 = vst [vmem:[#allocation483_spill] sm:$0xff] %v6081_v37  ;;  %v6087_v56 = vld [vmem:[%s4276_s12 + $0x10f0] sm:$0xff]  ;;  %v6090_v50 = vld [vmem:[%s4276_s12 + $0x10f8] sm:$0x3f] }
 0x118   : > { %13351 = vst [vmem:[#allocation484_spill] sm:$0xff] %v6084_v55  ;;  %13352 = vst [vmem:[#allocation485_spill] sm:$0xff] %v6087_v56  ;;  %v6093_v41 = vld [vmem:[%s4276_s12 + $0x1100] sm:$0xff]  ;;  %v6096_v40 = vld [vmem:[%s4276_s12 + $0x1108] sm:$0x3f] }
 0x119   : > { %13353 = vst [vmem:[#allocation486_spill] sm:$0xff] %v6090_v50  ;;  %13354 = vst [vmem:[#allocation487_spill] sm:$0xff] %v6093_v41  ;;  %v6099_v62 = vld [vmem:[%s4276_s12 + $0x1110] sm:$0xff]  ;;  %v6102_v37 = vld [vmem:[%s4276_s12 + $0x1118] sm:$0x3f] }
 0x11a   : > { %13355 = vst [vmem:[#allocation488_spill] sm:$0xff] %v6096_v40  ;;  %13356 = vst [vmem:[#allocation489_spill] sm:$0xff] %v6099_v62  ;;  %v6105_v55 = vld [vmem:[%s4276_s12 + $0x1120] sm:$0xff]  ;;  %v6108_v56 = vld [vmem:[%s4276_s12 + $0x1128] sm:$0x3f] }
 0x11b   : > { %13357 = vst [vmem:[#allocation490_spill] sm:$0xff] %v6102_v37  ;;  %13358 = vst [vmem:[#allocation491_spill] sm:$0xff] %v6105_v55  ;;  %v6111_v50 = vld [vmem:[%s4276_s12 + $0x1130] sm:$0xff]  ;;  %v6114_v41 = vld [vmem:[%s4276_s12 + $0x1138] sm:$0x3f] }
 0x11c   : > { %13359 = vst [vmem:[#allocation492_spill] sm:$0xff] %v6108_v56  ;;  %13360 = vst [vmem:[#allocation493_spill] sm:$0xff] %v6111_v50  ;;  %v6117_v40 = vld [vmem:[%s4276_s12 + $0x1140] sm:$0xff]  ;;  %v6120_v62 = vld [vmem:[%s4276_s12 + $0x1148] sm:$0x3f] }
 0x11d   : > { %13361 = vst [vmem:[#allocation494_spill] sm:$0xff] %v6114_v41  ;;  %13362 = vst [vmem:[#allocation495_spill] sm:$0xff] %v6117_v40  ;;  %v6123_v37 = vld [vmem:[%s4276_s12 + $0x1150] sm:$0xff]  ;;  %v6126_v55 = vld [vmem:[%s4276_s12 + $0x1158] sm:$0x3f] }
 0x11e   : > { %13363 = vst [vmem:[#allocation496_spill] sm:$0xff] %v6120_v62  ;;  %13364 = vst [vmem:[#allocation497_spill] sm:$0xff] %v6123_v37  ;;  %v6129_v56 = vld [vmem:[%s4276_s12 + $0x1160] sm:$0xff]  ;;  %v6132_v50 = vld [vmem:[%s4276_s12 + $0x1168] sm:$0x3f] }
 0x11f   : > { %13365 = vst [vmem:[#allocation498_spill] sm:$0xff] %v6126_v55  ;;  %13366 = vst [vmem:[#allocation499_spill] sm:$0xff] %v6129_v56  ;;  %v6135_v41 = vld [vmem:[%s4276_s12 + $0x1170] sm:$0xff]  ;;  %v6138_v40 = vld [vmem:[%s4276_s12 + $0x1178] sm:$0x3f] }
 0x120   : > { %13367 = vst [vmem:[#allocation500_spill] sm:$0xff] %v6132_v50  ;;  %13368 = vst [vmem:[#allocation501_spill] sm:$0xff] %v6135_v41  ;;  %v6141_v62 = vld [vmem:[%s4276_s12 + $0x1180] sm:$0xff]  ;;  %v6144_v37 = vld [vmem:[%s4276_s12 + $0x1188] sm:$0x3f] }
 0x121   : > { %13369 = vst [vmem:[#allocation502_spill] sm:$0xff] %v6138_v40  ;;  %13370 = vst [vmem:[#allocation503_spill] sm:$0xff] %v6141_v62  ;;  %v6147_v55 = vld [vmem:[%s4276_s12 + $0x1190] sm:$0xff]  ;;  %v6150_v56 = vld [vmem:[%s4276_s12 + $0x1198] sm:$0x3f] }
 0x122   : > { %13371 = vst [vmem:[#allocation504_spill] sm:$0xff] %v6144_v37  ;;  %13372 = vst [vmem:[#allocation505_spill] sm:$0xff] %v6147_v55  ;;  %v6153_v50 = vld [vmem:[%s4276_s12 + $0x11a0] sm:$0xff]  ;;  %v6156_v41 = vld [vmem:[%s4276_s12 + $0x11a8] sm:$0x3f] }
 0x123   : > { %13373 = vst [vmem:[#allocation506_spill] sm:$0xff] %v6150_v56  ;;  %13374 = vst [vmem:[#allocation507_spill] sm:$0xff] %v6153_v50  ;;  %v6159_v40 = vld [vmem:[%s4276_s12 + $0x11b0] sm:$0xff]  ;;  %v6162_v62 = vld [vmem:[%s4276_s12 + $0x11b8] sm:$0x3f] }
 0x124   : > { %13375 = vst [vmem:[#allocation508_spill] sm:$0xff] %v6156_v41  ;;  %13376 = vst [vmem:[#allocation509_spill] sm:$0xff] %v6159_v40  ;;  %v6165_v37 = vld [vmem:[%s4276_s12 + $0x11c0] sm:$0xff]  ;;  %v6168_v55 = vld [vmem:[%s4276_s12 + $0x11c8] sm:$0x3f] }
 0x125   : > { %13377 = vst [vmem:[#allocation510_spill] sm:$0xff] %v6162_v62  ;;  %13378 = vst [vmem:[#allocation511_spill] sm:$0xff] %v6165_v37  ;;  %v6171_v56 = vld [vmem:[%s4276_s12 + $0x11d0] sm:$0xff]  ;;  %v6174_v50 = vld [vmem:[%s4276_s12 + $0x11d8] sm:$0x3f] }
 0x126   : > { %13379 = vst [vmem:[#allocation512_spill] sm:$0xff] %v6168_v55  ;;  %13380 = vst [vmem:[#allocation513_spill] sm:$0xff] %v6171_v56  ;;  %v6177_v41 = vld [vmem:[%s4276_s12 + $0x11e0] sm:$0xff]  ;;  %v6180_v40 = vld [vmem:[%s4276_s12 + $0x11e8] sm:$0x3f] }
 0x127   : > { %13381 = vst [vmem:[#allocation514_spill] sm:$0xff] %v6174_v50  ;;  %13382 = vst [vmem:[#allocation515_spill] sm:$0xff] %v6177_v41  ;;  %v6183_v62 = vld [vmem:[%s4276_s12 + $0x11f0] sm:$0xff]  ;;  %v6186_v37 = vld [vmem:[%s4276_s12 + $0x11f8] sm:$0x3f] }
 0x128   : > { %13383 = vst [vmem:[#allocation516_spill] sm:$0xff] %v6180_v40  ;;  %13384 = vst [vmem:[#allocation517_spill] sm:$0xff] %v6183_v62  ;;  %v6189_v55 = vld [vmem:[%s4276_s12 + $0x1200] sm:$0xff]  ;;  %v6192_v56 = vld [vmem:[%s4276_s12 + $0x1208] sm:$0x3f] }
 0x129   : > { %13385 = vst [vmem:[#allocation518_spill] sm:$0xff] %v6186_v37  ;;  %13386 = vst [vmem:[#allocation519_spill] sm:$0xff] %v6189_v55  ;;  %v6195_v50 = vld [vmem:[%s4276_s12 + $0x1210] sm:$0xff]  ;;  %v6198_v41 = vld [vmem:[%s4276_s12 + $0x1218] sm:$0x3f] }
 0x12a   : > { %13387 = vst [vmem:[#allocation520_spill] sm:$0xff] %v6192_v56  ;;  %13388 = vst [vmem:[#allocation521_spill] sm:$0xff] %v6195_v50  ;;  %v6201_v40 = vld [vmem:[%s4276_s12 + $0x1220] sm:$0xff]  ;;  %v6204_v62 = vld [vmem:[%s4276_s12 + $0x1228] sm:$0x3f] }
 0x12b   : > { %13389 = vst [vmem:[#allocation522_spill] sm:$0xff] %v6198_v41  ;;  %13390 = vst [vmem:[#allocation523_spill] sm:$0xff] %v6201_v40  ;;  %v6207_v37 = vld [vmem:[%s4276_s12 + $0x1230] sm:$0xff]  ;;  %v6210_v55 = vld [vmem:[%s4276_s12 + $0x1238] sm:$0x3f] }
 0x12c   : > { %13391 = vst [vmem:[#allocation524_spill] sm:$0xff] %v6204_v62  ;;  %13392 = vst [vmem:[#allocation525_spill] sm:$0xff] %v6207_v37  ;;  %v6213_v56 = vld [vmem:[%s4276_s12 + $0x1240] sm:$0xff]  ;;  %v6216_v50 = vld [vmem:[%s4276_s12 + $0x1248] sm:$0x3f] }
 0x12d   : > { %13393 = vst [vmem:[#allocation526_spill] sm:$0xff] %v6210_v55  ;;  %13394 = vst [vmem:[#allocation527_spill] sm:$0xff] %v6213_v56  ;;  %v6219_v41 = vld [vmem:[%s4276_s12 + $0x1250] sm:$0xff]  ;;  %v6222_v40 = vld [vmem:[%s4276_s12 + $0x1258] sm:$0x3f] }
 0x12e   : > { %13395 = vst [vmem:[#allocation528_spill] sm:$0xff] %v6216_v50  ;;  %13396 = vst [vmem:[#allocation529_spill] sm:$0xff] %v6219_v41  ;;  %v6225_v62 = vld [vmem:[%s4276_s12 + $0x1260] sm:$0xff]  ;;  %v6228_v37 = vld [vmem:[%s4276_s12 + $0x1268] sm:$0x3f] }
 0x12f   : > { %13397 = vst [vmem:[#allocation530_spill] sm:$0xff] %v6222_v40  ;;  %13398 = vst [vmem:[#allocation531_spill] sm:$0xff] %v6225_v62  ;;  %v6231_v55 = vld [vmem:[%s4276_s12 + $0x1270] sm:$0xff]  ;;  %v6234_v56 = vld [vmem:[%s4276_s12 + $0x1278] sm:$0x3f] }
 0x130   : > { %13399 = vst [vmem:[#allocation532_spill] sm:$0xff] %v6228_v37  ;;  %13400 = vst [vmem:[#allocation533_spill] sm:$0xff] %v6231_v55  ;;  %v6237_v50 = vld [vmem:[%s4276_s12 + $0x1280] sm:$0xff]  ;;  %v6240_v41 = vld [vmem:[%s4276_s12 + $0x1288] sm:$0x3f] }
 0x131   : > { %13401 = vst [vmem:[#allocation534_spill] sm:$0xff] %v6234_v56  ;;  %13402 = vst [vmem:[#allocation535_spill] sm:$0xff] %v6237_v50  ;;  %v6243_v40 = vld [vmem:[%s4276_s12 + $0x1290] sm:$0xff]  ;;  %v6246_v62 = vld [vmem:[%s4276_s12 + $0x1298] sm:$0x3f] }
 0x132   : > { %13403 = vst [vmem:[#allocation536_spill] sm:$0xff] %v6240_v41  ;;  %13404 = vst [vmem:[#allocation537_spill] sm:$0xff] %v6243_v40  ;;  %v6249_v37 = vld [vmem:[%s4276_s12 + $0x12a0] sm:$0xff]  ;;  %v6252_v55 = vld [vmem:[%s4276_s12 + $0x12a8] sm:$0x3f] }
 0x133   : > { %13405 = vst [vmem:[#allocation538_spill] sm:$0xff] %v6246_v62  ;;  %13406 = vst [vmem:[#allocation539_spill] sm:$0xff] %v6249_v37  ;;  %v6255_v56 = vld [vmem:[%s4276_s12 + $0x12b0] sm:$0xff]  ;;  %v6258_v50 = vld [vmem:[%s4276_s12 + $0x12b8] sm:$0x3f] }
 0x134   : > { %13407 = vst [vmem:[#allocation540_spill] sm:$0xff] %v6252_v55  ;;  %13408 = vst [vmem:[#allocation541_spill] sm:$0xff] %v6255_v56  ;;  %v6261_v41 = vld [vmem:[%s4276_s12 + $0x12c0] sm:$0xff]  ;;  %v6264_v40 = vld [vmem:[%s4276_s12 + $0x12c8] sm:$0x3f] }
 0x135   : > { %13409 = vst [vmem:[#allocation542_spill] sm:$0xff] %v6258_v50  ;;  %13410 = vst [vmem:[#allocation543_spill] sm:$0xff] %v6261_v41  ;;  %v6267_v62 = vld [vmem:[%s4276_s12 + $0x12d0] sm:$0xff]  ;;  %v6270_v37 = vld [vmem:[%s4276_s12 + $0x12d8] sm:$0x3f] }
 0x136   : > { %13411 = vst [vmem:[#allocation544_spill] sm:$0xff] %v6264_v40  ;;  %13412 = vst [vmem:[#allocation545_spill] sm:$0xff] %v6267_v62  ;;  %v6273_v55 = vld [vmem:[%s4276_s12 + $0x12e0] sm:$0xff]  ;;  %v6276_v56 = vld [vmem:[%s4276_s12 + $0x12e8] sm:$0x3f] }
 0x137   : > { %13413 = vst [vmem:[#allocation546_spill] sm:$0xff] %v6270_v37  ;;  %13414 = vst [vmem:[#allocation547_spill] sm:$0xff] %v6273_v55  ;;  %v6279_v50 = vld [vmem:[%s4276_s12 + $0x12f0] sm:$0xff]  ;;  %v6282_v41 = vld [vmem:[%s4276_s12 + $0x12f8] sm:$0x3f] }
 0x138   : > { %13415 = vst [vmem:[#allocation548_spill] sm:$0xff] %v6276_v56  ;;  %13416 = vst [vmem:[#allocation549_spill] sm:$0xff] %v6279_v50  ;;  %v6285_v40 = vld [vmem:[%s4276_s12 + $0x1300] sm:$0xff]  ;;  %v6288_v62 = vld [vmem:[%s4276_s12 + $0x1308] sm:$0x3f] }
 0x139   : > { %13417 = vst [vmem:[#allocation550_spill] sm:$0xff] %v6282_v41  ;;  %13418 = vst [vmem:[#allocation551_spill] sm:$0xff] %v6285_v40  ;;  %v6291_v37 = vld [vmem:[%s4276_s12 + $0x1310] sm:$0xff]  ;;  %v6294_v55 = vld [vmem:[%s4276_s12 + $0x1318] sm:$0x3f] }
 0x13a   : > { %13419 = vst [vmem:[#allocation552_spill] sm:$0xff] %v6288_v62  ;;  %13420 = vst [vmem:[#allocation553_spill] sm:$0xff] %v6291_v37  ;;  %v6297_v56 = vld [vmem:[%s4276_s12 + $0x1320] sm:$0xff]  ;;  %v6300_v50 = vld [vmem:[%s4276_s12 + $0x1328] sm:$0x3f] }
 0x13b   : > { %13421 = vst [vmem:[#allocation554_spill] sm:$0xff] %v6294_v55  ;;  %13422 = vst [vmem:[#allocation555_spill] sm:$0xff] %v6297_v56  ;;  %v6303_v41 = vld [vmem:[%s4276_s12 + $0x1330] sm:$0xff]  ;;  %v6306_v40 = vld [vmem:[%s4276_s12 + $0x1338] sm:$0x3f] }
 0x13c   : > { %13423 = vst [vmem:[#allocation556_spill] sm:$0xff] %v6300_v50  ;;  %13424 = vst [vmem:[#allocation557_spill] sm:$0xff] %v6303_v41  ;;  %v6309_v62 = vld [vmem:[%s4276_s12 + $0x1340] sm:$0xff]  ;;  %v6312_v37 = vld [vmem:[%s4276_s12 + $0x1348] sm:$0x3f] }
 0x13d   : > { %13425 = vst [vmem:[#allocation558_spill] sm:$0xff] %v6306_v40  ;;  %13426 = vst [vmem:[#allocation559_spill] sm:$0xff] %v6309_v62  ;;  %v6315_v55 = vld [vmem:[%s4276_s12 + $0x1350] sm:$0xff]  ;;  %v6318_v56 = vld [vmem:[%s4276_s12 + $0x1358] sm:$0x3f] }
 0x13e   : > { %13427 = vst [vmem:[#allocation560_spill] sm:$0xff] %v6312_v37  ;;  %13428 = vst [vmem:[#allocation561_spill] sm:$0xff] %v6315_v55  ;;  %v6321_v50 = vld [vmem:[%s4276_s12 + $0x1360] sm:$0xff]  ;;  %v6324_v41 = vld [vmem:[%s4276_s12 + $0x1368] sm:$0x3f] }
 0x13f   : > { %13429 = vst [vmem:[#allocation562_spill] sm:$0xff] %v6318_v56  ;;  %13430 = vst [vmem:[#allocation563_spill] sm:$0xff] %v6321_v50  ;;  %v6327_v40 = vld [vmem:[%s4276_s12 + $0x1370] sm:$0xff]  ;;  %v6330_v62 = vld [vmem:[%s4276_s12 + $0x1378] sm:$0x3f] }
 0x140   : > { %13431 = vst [vmem:[#allocation564_spill] sm:$0xff] %v6324_v41  ;;  %13432 = vst [vmem:[#allocation565_spill] sm:$0xff] %v6327_v40  ;;  %v6333_v37 = vld [vmem:[%s4276_s12 + $0x1380] sm:$0xff]  ;;  %v6336_v55 = vld [vmem:[%s4276_s12 + $0x1388] sm:$0x3f] }
 0x141   : > { %13433 = vst [vmem:[#allocation566_spill] sm:$0xff] %v6330_v62  ;;  %13434 = vst [vmem:[#allocation567_spill] sm:$0xff] %v6333_v37  ;;  %v6339_v56 = vld [vmem:[%s4276_s12 + $0x1390] sm:$0xff]  ;;  %v6342_v50 = vld [vmem:[%s4276_s12 + $0x1398] sm:$0x3f] }
 0x142   : > { %13435 = vst [vmem:[#allocation568_spill] sm:$0xff] %v6336_v55  ;;  %13436 = vst [vmem:[#allocation569_spill] sm:$0xff] %v6339_v56  ;;  %v6345_v41 = vld [vmem:[%s4276_s12 + $0x13a0] sm:$0xff]  ;;  %v6348_v40 = vld [vmem:[%s4276_s12 + $0x13a8] sm:$0x3f] }
 0x143   : > { %13437 = vst [vmem:[#allocation570_spill] sm:$0xff] %v6342_v50  ;;  %13438 = vst [vmem:[#allocation571_spill] sm:$0xff] %v6345_v41  ;;  %v6351_v62 = vld [vmem:[%s4276_s12 + $0x13b0] sm:$0xff]  ;;  %v6354_v37 = vld [vmem:[%s4276_s12 + $0x13b8] sm:$0x3f] }
 0x144   : > { %13439 = vst [vmem:[#allocation572_spill] sm:$0xff] %v6348_v40  ;;  %13440 = vst [vmem:[#allocation573_spill] sm:$0xff] %v6351_v62  ;;  %v6357_v55 = vld [vmem:[%s4276_s12 + $0x13c0] sm:$0xff]  ;;  %v6360_v56 = vld [vmem:[%s4276_s12 + $0x13c8] sm:$0x3f] }
 0x145   : > { %13441 = vst [vmem:[#allocation574_spill] sm:$0xff] %v6354_v37  ;;  %13442 = vst [vmem:[#allocation575_spill] sm:$0xff] %v6357_v55  ;;  %v6363_v50 = vld [vmem:[%s4276_s12 + $0x13d0] sm:$0xff]  ;;  %v6366_v41 = vld [vmem:[%s4276_s12 + $0x13d8] sm:$0x3f] }
 0x146   : > { %13443 = vst [vmem:[#allocation576_spill] sm:$0xff] %v6360_v56  ;;  %13444 = vst [vmem:[#allocation577_spill] sm:$0xff] %v6363_v50  ;;  %v6369_v40 = vld [vmem:[%s4276_s12 + $0x13e0] sm:$0xff]  ;;  %v6372_v62 = vld [vmem:[%s4276_s12 + $0x13e8] sm:$0x3f] }
 0x147   : > { %13445 = vst [vmem:[#allocation578_spill] sm:$0xff] %v6366_v41  ;;  %13446 = vst [vmem:[#allocation579_spill] sm:$0xff] %v6369_v40  ;;  %v6375_v37 = vld [vmem:[%s4276_s12 + $0x13f0] sm:$0xff]  ;;  %v6378_v55 = vld [vmem:[%s4276_s12 + $0x13f8] sm:$0x3f] }
 0x148   : > { %13447 = vst [vmem:[#allocation580_spill] sm:$0xff] %v6372_v62  ;;  %13448 = vst [vmem:[#allocation581_spill] sm:$0xff] %v6375_v37  ;;  %v6381_v56 = vld [vmem:[%s4276_s12 + $0x1400] sm:$0xff]  ;;  %v6384_v50 = vld [vmem:[%s4276_s12 + $0x1408] sm:$0x3f] }
 0x149   : > { %13449 = vst [vmem:[#allocation582_spill] sm:$0xff] %v6378_v55  ;;  %13450 = vst [vmem:[#allocation583_spill] sm:$0xff] %v6381_v56  ;;  %v6387_v41 = vld [vmem:[%s4276_s12 + $0x1410] sm:$0xff]  ;;  %v6390_v40 = vld [vmem:[%s4276_s12 + $0x1418] sm:$0x3f] }
 0x14a   : > { %13451 = vst [vmem:[#allocation584_spill] sm:$0xff] %v6384_v50  ;;  %13452 = vst [vmem:[#allocation585_spill] sm:$0xff] %v6387_v41  ;;  %v6393_v62 = vld [vmem:[%s4276_s12 + $0x1420] sm:$0xff]  ;;  %v6396_v37 = vld [vmem:[%s4276_s12 + $0x1428] sm:$0x3f] }
 0x14b   : > { %13453 = vst [vmem:[#allocation586_spill] sm:$0xff] %v6390_v40  ;;  %13454 = vst [vmem:[#allocation587_spill] sm:$0xff] %v6393_v62  ;;  %v6399_v55 = vld [vmem:[%s4276_s12 + $0x1430] sm:$0xff]  ;;  %v6402_v56 = vld [vmem:[%s4276_s12 + $0x1438] sm:$0x3f] }
 0x14c   : > { %13455 = vst [vmem:[#allocation588_spill] sm:$0xff] %v6396_v37  ;;  %13456 = vst [vmem:[#allocation589_spill] sm:$0xff] %v6399_v55  ;;  %v6405_v50 = vld [vmem:[%s4276_s12 + $0x1440] sm:$0xff]  ;;  %v6408_v41 = vld [vmem:[%s4276_s12 + $0x1448] sm:$0x3f] }
 0x14d   : > { %13457 = vst [vmem:[#allocation590_spill] sm:$0xff] %v6402_v56  ;;  %13458 = vst [vmem:[#allocation591_spill] sm:$0xff] %v6405_v50  ;;  %v6411_v40 = vld [vmem:[%s4276_s12 + $0x1450] sm:$0xff]  ;;  %v6414_v62 = vld [vmem:[%s4276_s12 + $0x1458] sm:$0x3f] }
 0x14e   : > { %13459 = vst [vmem:[#allocation592_spill] sm:$0xff] %v6408_v41  ;;  %13460 = vst [vmem:[#allocation593_spill] sm:$0xff] %v6411_v40  ;;  %v6417_v37 = vld [vmem:[%s4276_s12 + $0x1460] sm:$0xff]  ;;  %v6420_v55 = vld [vmem:[%s4276_s12 + $0x1468] sm:$0x3f] }
 0x14f   : > { %13461 = vst [vmem:[#allocation594_spill] sm:$0xff] %v6414_v62  ;;  %13462 = vst [vmem:[#allocation595_spill] sm:$0xff] %v6417_v37  ;;  %v6423_v56 = vld [vmem:[%s4276_s12 + $0x1470] sm:$0xff]  ;;  %v6426_v50 = vld [vmem:[%s4276_s12 + $0x1478] sm:$0x3f] }
 0x150   : > { %13463 = vst [vmem:[#allocation596_spill] sm:$0xff] %v6420_v55  ;;  %13464 = vst [vmem:[#allocation597_spill] sm:$0xff] %v6423_v56  ;;  %v6429_v41 = vld [vmem:[%s4276_s12 + $0x1480] sm:$0xff]  ;;  %v6432_v40 = vld [vmem:[%s4276_s12 + $0x1488] sm:$0x3f] }
 0x151   : > { %13465 = vst [vmem:[#allocation598_spill] sm:$0xff] %v6426_v50  ;;  %13466 = vst [vmem:[#allocation599_spill] sm:$0xff] %v6429_v41  ;;  %v6435_v62 = vld [vmem:[%s4276_s12 + $0x1490] sm:$0xff]  ;;  %v6438_v37 = vld [vmem:[%s4276_s12 + $0x1498] sm:$0x3f] }
 0x152   : > { %13467 = vst [vmem:[#allocation600_spill] sm:$0xff] %v6432_v40  ;;  %13468 = vst [vmem:[#allocation601_spill] sm:$0xff] %v6435_v62  ;;  %v6441_v55 = vld [vmem:[%s4276_s12 + $0x14a0] sm:$0xff]  ;;  %v6444_v56 = vld [vmem:[%s4276_s12 + $0x14a8] sm:$0x3f] }
 0x153   : > { %13469 = vst [vmem:[#allocation602_spill] sm:$0xff] %v6438_v37  ;;  %13470 = vst [vmem:[#allocation603_spill] sm:$0xff] %v6441_v55  ;;  %v6447_v50 = vld [vmem:[%s4276_s12 + $0x14b0] sm:$0xff]  ;;  %v6450_v41 = vld [vmem:[%s4276_s12 + $0x14b8] sm:$0x3f] }
 0x154   : > { %13471 = vst [vmem:[#allocation604_spill] sm:$0xff] %v6444_v56  ;;  %13472 = vst [vmem:[#allocation605_spill] sm:$0xff] %v6447_v50  ;;  %v6453_v40 = vld [vmem:[%s4276_s12 + $0x14c0] sm:$0xff]  ;;  %v6456_v62 = vld [vmem:[%s4276_s12 + $0x14c8] sm:$0x3f] }
 0x155   : > { %13473 = vst [vmem:[#allocation606_spill] sm:$0xff] %v6450_v41  ;;  %13474 = vst [vmem:[#allocation607_spill] sm:$0xff] %v6453_v40  ;;  %v6459_v37 = vld [vmem:[%s4276_s12 + $0x14d0] sm:$0xff]  ;;  %v6462_v55 = vld [vmem:[%s4276_s12 + $0x14d8] sm:$0x3f] }
 0x156   : > { %13475 = vst [vmem:[#allocation608_spill] sm:$0xff] %v6456_v62  ;;  %13476 = vst [vmem:[#allocation609_spill] sm:$0xff] %v6459_v37  ;;  %v6465_v56 = vld [vmem:[%s4276_s12 + $0x14e0] sm:$0xff]  ;;  %v6468_v50 = vld [vmem:[%s4276_s12 + $0x14e8] sm:$0x3f] }
 0x157   : > { %13477 = vst [vmem:[#allocation610_spill] sm:$0xff] %v6462_v55  ;;  %13478 = vst [vmem:[#allocation611_spill] sm:$0xff] %v6465_v56  ;;  %v6471_v41 = vld [vmem:[%s4276_s12 + $0x14f0] sm:$0xff]  ;;  %v6474_v40 = vld [vmem:[%s4276_s12 + $0x14f8] sm:$0x3f] }
 0x158   : > { %13479 = vst [vmem:[#allocation612_spill] sm:$0xff] %v6468_v50  ;;  %13480 = vst [vmem:[#allocation613_spill] sm:$0xff] %v6471_v41  ;;  %v6477_v62 = vld [vmem:[%s4276_s12 + $0x1500] sm:$0xff]  ;;  %v6480_v37 = vld [vmem:[%s4276_s12 + $0x1508] sm:$0x3f] }
 0x159   : > { %13481 = vst [vmem:[#allocation614_spill] sm:$0xff] %v6474_v40  ;;  %13482 = vst [vmem:[#allocation615_spill] sm:$0xff] %v6477_v62  ;;  %v6483_v55 = vld [vmem:[%s4276_s12 + $0x1510] sm:$0xff]  ;;  %v6486_v56 = vld [vmem:[%s4276_s12 + $0x1518] sm:$0x3f] }
 0x15a   : > { %13483 = vst [vmem:[#allocation616_spill] sm:$0xff] %v6480_v37  ;;  %13484 = vst [vmem:[#allocation617_spill] sm:$0xff] %v6483_v55  ;;  %v6489_v50 = vld [vmem:[%s4276_s12 + $0x1520] sm:$0xff]  ;;  %v6492_v41 = vld [vmem:[%s4276_s12 + $0x1528] sm:$0x3f] }
 0x15b   : > { %13485 = vst [vmem:[#allocation618_spill] sm:$0xff] %v6486_v56  ;;  %13486 = vst [vmem:[#allocation619_spill] sm:$0xff] %v6489_v50  ;;  %v6495_v40 = vld [vmem:[%s4276_s12 + $0x1530] sm:$0xff]  ;;  %v6498_v62 = vld [vmem:[%s4276_s12 + $0x1538] sm:$0x3f] }
 0x15c   : > { %13487 = vst [vmem:[#allocation620_spill] sm:$0xff] %v6492_v41  ;;  %13488 = vst [vmem:[#allocation621_spill] sm:$0xff] %v6495_v40  ;;  %v6501_v37 = vld [vmem:[%s4276_s12 + $0x1540] sm:$0xff]  ;;  %v6504_v55 = vld [vmem:[%s4276_s12 + $0x1548] sm:$0x3f] }
 0x15d   : > { %13489 = vst [vmem:[#allocation622_spill] sm:$0xff] %v6498_v62  ;;  %13490 = vst [vmem:[#allocation623_spill] sm:$0xff] %v6501_v37  ;;  %v6507_v56 = vld [vmem:[%s4276_s12 + $0x1550] sm:$0xff]  ;;  %v6510_v50 = vld [vmem:[%s4276_s12 + $0x1558] sm:$0x3f] }
 0x15e   : > { %13491 = vst [vmem:[#allocation624_spill] sm:$0xff] %v6504_v55  ;;  %13492 = vst [vmem:[#allocation625_spill] sm:$0xff] %v6507_v56  ;;  %v6513_v41 = vld [vmem:[%s4276_s12 + $0x1560] sm:$0xff]  ;;  %v6516_v40 = vld [vmem:[%s4276_s12 + $0x1568] sm:$0x3f] }
 0x15f   : > { %13493 = vst [vmem:[#allocation626_spill] sm:$0xff] %v6510_v50  ;;  %13494 = vst [vmem:[#allocation627_spill] sm:$0xff] %v6513_v41  ;;  %v6519_v62 = vld [vmem:[%s4276_s12 + $0x1570] sm:$0xff]  ;;  %v6522_v37 = vld [vmem:[%s4276_s12 + $0x1578] sm:$0x3f] }
 0x160   : > { %13495 = vst [vmem:[#allocation628_spill] sm:$0xff] %v6516_v40  ;;  %13496 = vst [vmem:[#allocation629_spill] sm:$0xff] %v6519_v62  ;;  %v6525_v55 = vld [vmem:[%s4276_s12 + $0x1580] sm:$0xff]  ;;  %v6528_v56 = vld [vmem:[%s4276_s12 + $0x1588] sm:$0x3f] }
 0x161   : > { %13497 = vst [vmem:[#allocation630_spill] sm:$0xff] %v6522_v37  ;;  %13498 = vst [vmem:[#allocation631_spill] sm:$0xff] %v6525_v55  ;;  %v6531_v50 = vld [vmem:[%s4276_s12 + $0x1590] sm:$0xff]  ;;  %v6534_v41 = vld [vmem:[%s4276_s12 + $0x1598] sm:$0x3f] }
 0x162   : > { %13499 = vst [vmem:[#allocation632_spill] sm:$0xff] %v6528_v56  ;;  %13500 = vst [vmem:[#allocation633_spill] sm:$0xff] %v6531_v50  ;;  %v6537_v40 = vld [vmem:[%s4276_s12 + $0x15a0] sm:$0xff]  ;;  %v6540_v62 = vld [vmem:[%s4276_s12 + $0x15a8] sm:$0x3f] }
 0x163   : > { %13501 = vst [vmem:[#allocation634_spill] sm:$0xff] %v6534_v41  ;;  %13502 = vst [vmem:[#allocation635_spill] sm:$0xff] %v6537_v40  ;;  %v6543_v37 = vld [vmem:[%s4276_s12 + $0x15b0] sm:$0xff]  ;;  %v6546_v55 = vld [vmem:[%s4276_s12 + $0x15b8] sm:$0x3f] }
 0x164   : > { %13503 = vst [vmem:[#allocation636_spill] sm:$0xff] %v6540_v62  ;;  %13504 = vst [vmem:[#allocation637_spill] sm:$0xff] %v6543_v37  ;;  %v6549_v56 = vld [vmem:[%s4276_s12 + $0x15c0] sm:$0xff]  ;;  %v6552_v50 = vld [vmem:[%s4276_s12 + $0x15c8] sm:$0x3f] }
 0x165   : > { %13505 = vst [vmem:[#allocation638_spill] sm:$0xff] %v6546_v55  ;;  %13506 = vst [vmem:[#allocation639_spill] sm:$0xff] %v6549_v56  ;;  %v6555_v41 = vld [vmem:[%s4276_s12 + $0x15d0] sm:$0xff]  ;;  %v6558_v40 = vld [vmem:[%s4276_s12 + $0x15d8] sm:$0x3f] }
 0x166   : > { %13507 = vst [vmem:[#allocation640_spill] sm:$0xff] %v6552_v50  ;;  %13508 = vst [vmem:[#allocation641_spill] sm:$0xff] %v6555_v41  ;;  %v6561_v62 = vld [vmem:[%s4276_s12 + $0x15e0] sm:$0xff]  ;;  %v6564_v37 = vld [vmem:[%s4276_s12 + $0x15e8] sm:$0x3f] }
 0x167   : > { %13509 = vst [vmem:[#allocation642_spill] sm:$0xff] %v6558_v40  ;;  %13510 = vst [vmem:[#allocation643_spill] sm:$0xff] %v6561_v62  ;;  %v6567_v55 = vld [vmem:[%s4276_s12 + $0x15f0] sm:$0xff]  ;;  %v6570_v56 = vld [vmem:[%s4276_s12 + $0x15f8] sm:$0x3f] }
 0x168   : > { %13511 = vst [vmem:[#allocation644_spill] sm:$0xff] %v6564_v37  ;;  %13512 = vst [vmem:[#allocation645_spill] sm:$0xff] %v6567_v55  ;;  %v6573_v50 = vld [vmem:[%s4276_s12 + $0x1600] sm:$0xff]  ;;  %v6576_v41 = vld [vmem:[%s4276_s12 + $0x1608] sm:$0x3f] }
 0x169   : > { %13513 = vst [vmem:[#allocation646_spill] sm:$0xff] %v6570_v56  ;;  %13514 = vst [vmem:[#allocation647_spill] sm:$0xff] %v6573_v50  ;;  %v6579_v40 = vld [vmem:[%s4276_s12 + $0x1610] sm:$0xff]  ;;  %v6582_v62 = vld [vmem:[%s4276_s12 + $0x1618] sm:$0x3f] }
 0x16a   : > { %13515 = vst [vmem:[#allocation648_spill] sm:$0xff] %v6576_v41  ;;  %13516 = vst [vmem:[#allocation649_spill] sm:$0xff] %v6579_v40  ;;  %v6585_v37 = vld [vmem:[%s4276_s12 + $0x1620] sm:$0xff]  ;;  %v6588_v55 = vld [vmem:[%s4276_s12 + $0x1628] sm:$0x3f] }
 0x16b   : > { %13517 = vst [vmem:[#allocation650_spill] sm:$0xff] %v6582_v62  ;;  %13518 = vst [vmem:[#allocation651_spill] sm:$0xff] %v6585_v37  ;;  %v6591_v56 = vld [vmem:[%s4276_s12 + $0x1630] sm:$0xff]  ;;  %v6594_v50 = vld [vmem:[%s4276_s12 + $0x1638] sm:$0x3f] }
 0x16c   : > { %13519 = vst [vmem:[#allocation652_spill] sm:$0xff] %v6588_v55  ;;  %13520 = vst [vmem:[#allocation653_spill] sm:$0xff] %v6591_v56  ;;  %v6597_v41 = vld [vmem:[%s4276_s12 + $0x1640] sm:$0xff]  ;;  %v6600_v40 = vld [vmem:[%s4276_s12 + $0x1648] sm:$0x3f] }
 0x16d   : > { %13521 = vst [vmem:[#allocation654_spill] sm:$0xff] %v6594_v50  ;;  %13522 = vst [vmem:[#allocation655_spill] sm:$0xff] %v6597_v41  ;;  %v6603_v62 = vld [vmem:[%s4276_s12 + $0x1650] sm:$0xff]  ;;  %v6606_v37 = vld [vmem:[%s4276_s12 + $0x1658] sm:$0x3f] }
 0x16e   : > { %13523 = vst [vmem:[#allocation656_spill] sm:$0xff] %v6600_v40  ;;  %13524 = vst [vmem:[#allocation657_spill] sm:$0xff] %v6603_v62  ;;  %v6609_v55 = vld [vmem:[%s4276_s12 + $0x1660] sm:$0xff]  ;;  %v6612_v56 = vld [vmem:[%s4276_s12 + $0x1668] sm:$0x3f] }
 0x16f   : > { %13525 = vst [vmem:[#allocation658_spill] sm:$0xff] %v6606_v37  ;;  %13526 = vst [vmem:[#allocation659_spill] sm:$0xff] %v6609_v55  ;;  %v6615_v50 = vld [vmem:[%s4276_s12 + $0x1670] sm:$0xff]  ;;  %v6618_v41 = vld [vmem:[%s4276_s12 + $0x1678] sm:$0x3f] }
 0x170   : > { %13527 = vst [vmem:[#allocation660_spill] sm:$0xff] %v6612_v56  ;;  %13528 = vst [vmem:[#allocation661_spill] sm:$0xff] %v6615_v50  ;;  %v6621_v40 = vld [vmem:[%s4276_s12 + $0x1680] sm:$0xff]  ;;  %v6624_v62 = vld [vmem:[%s4276_s12 + $0x1688] sm:$0x3f] }
 0x171   : > { %13529 = vst [vmem:[#allocation662_spill] sm:$0xff] %v6618_v41  ;;  %13530 = vst [vmem:[#allocation663_spill] sm:$0xff] %v6621_v40  ;;  %v6627_v37 = vld [vmem:[%s4276_s12 + $0x1690] sm:$0xff]  ;;  %v6630_v55 = vld [vmem:[%s4276_s12 + $0x1698] sm:$0x3f] }
 0x172   : > { %13531 = vst [vmem:[#allocation664_spill] sm:$0xff] %v6624_v62  ;;  %13532 = vst [vmem:[#allocation665_spill] sm:$0xff] %v6627_v37  ;;  %v6633_v56 = vld [vmem:[%s4276_s12 + $0x16a0] sm:$0xff]  ;;  %v6636_v50 = vld [vmem:[%s4276_s12 + $0x16a8] sm:$0x3f] }
 0x173   : > { %13533 = vst [vmem:[#allocation666_spill] sm:$0xff] %v6630_v55  ;;  %13534 = vst [vmem:[#allocation667_spill] sm:$0xff] %v6633_v56  ;;  %v6639_v41 = vld [vmem:[%s4276_s12 + $0x16b0] sm:$0xff]  ;;  %v6642_v40 = vld [vmem:[%s4276_s12 + $0x16b8] sm:$0x3f] }
 0x174   : > { %13535 = vst [vmem:[#allocation668_spill] sm:$0xff] %v6636_v50  ;;  %13536 = vst [vmem:[#allocation669_spill] sm:$0xff] %v6639_v41  ;;  %v6645_v62 = vld [vmem:[%s4276_s12 + $0x16c0] sm:$0xff]  ;;  %v6648_v37 = vld [vmem:[%s4276_s12 + $0x16c8] sm:$0x3f] }
 0x175   : > { %13537 = vst [vmem:[#allocation670_spill] sm:$0xff] %v6642_v40  ;;  %13538 = vst [vmem:[#allocation671_spill] sm:$0xff] %v6645_v62  ;;  %v6651_v55 = vld [vmem:[%s4276_s12 + $0x16d0] sm:$0xff]  ;;  %v6654_v56 = vld [vmem:[%s4276_s12 + $0x16d8] sm:$0x3f] }
 0x176   : > { %13539 = vst [vmem:[#allocation672_spill] sm:$0xff] %v6648_v37  ;;  %13540 = vst [vmem:[#allocation673_spill] sm:$0xff] %v6651_v55  ;;  %v6657_v50 = vld [vmem:[%s4276_s12 + $0x16e0] sm:$0xff]  ;;  %v6660_v41 = vld [vmem:[%s4276_s12 + $0x16e8] sm:$0x3f] }
 0x177   : > { %13541 = vst [vmem:[#allocation674_spill] sm:$0xff] %v6654_v56  ;;  %13542 = vst [vmem:[#allocation675_spill] sm:$0xff] %v6657_v50  ;;  %v6663_v40 = vld [vmem:[%s4276_s12 + $0x16f0] sm:$0xff]  ;;  %v6666_v62 = vld [vmem:[%s4276_s12 + $0x16f8] sm:$0x3f] }
 0x178   : > { %13543 = vst [vmem:[#allocation676_spill] sm:$0xff] %v6660_v41  ;;  %13544 = vst [vmem:[#allocation677_spill] sm:$0xff] %v6663_v40  ;;  %v6669_v37 = vld [vmem:[%s4276_s12 + $0x1700] sm:$0xff]  ;;  %v6672_v55 = vld [vmem:[%s4276_s12 + $0x1708] sm:$0x3f] }
 0x179   : > { %13545 = vst [vmem:[#allocation678_spill] sm:$0xff] %v6666_v62  ;;  %13546 = vst [vmem:[#allocation679_spill] sm:$0xff] %v6669_v37  ;;  %v6675_v56 = vld [vmem:[%s4276_s12 + $0x1710] sm:$0xff]  ;;  %v6678_v50 = vld [vmem:[%s4276_s12 + $0x1718] sm:$0x3f] }
 0x17a   : > { %13547 = vst [vmem:[#allocation680_spill] sm:$0xff] %v6672_v55  ;;  %13548 = vst [vmem:[#allocation681_spill] sm:$0xff] %v6675_v56  ;;  %v6681_v41 = vld [vmem:[%s4276_s12 + $0x1720] sm:$0xff]  ;;  %v6684_v40 = vld [vmem:[%s4276_s12 + $0x1728] sm:$0x3f] }
 0x17b   : > { %13549 = vst [vmem:[#allocation682_spill] sm:$0xff] %v6678_v50  ;;  %13550 = vst [vmem:[#allocation683_spill] sm:$0xff] %v6681_v41  ;;  %v6687_v62 = vld [vmem:[%s4276_s12 + $0x1730] sm:$0xff]  ;;  %v6690_v37 = vld [vmem:[%s4276_s12 + $0x1738] sm:$0x3f] }
 0x17c   : > { %13551 = vst [vmem:[#allocation684_spill] sm:$0xff] %v6684_v40  ;;  %13552 = vst [vmem:[#allocation685_spill] sm:$0xff] %v6687_v62  ;;  %v6693_v55 = vld [vmem:[%s4276_s12 + $0x1740] sm:$0xff]  ;;  %v6696_v56 = vld [vmem:[%s4276_s12 + $0x1748] sm:$0x3f] }
 0x17d   : > { %13553 = vst [vmem:[#allocation686_spill] sm:$0xff] %v6690_v37  ;;  %13554 = vst [vmem:[#allocation687_spill] sm:$0xff] %v6693_v55  ;;  %v6699_v50 = vld [vmem:[%s4276_s12 + $0x1750] sm:$0xff]  ;;  %v6702_v41 = vld [vmem:[%s4276_s12 + $0x1758] sm:$0x3f] }
 0x17e   : > { %13555 = vst [vmem:[#allocation688_spill] sm:$0xff] %v6696_v56  ;;  %13556 = vst [vmem:[#allocation689_spill] sm:$0xff] %v6699_v50  ;;  %v6705_v40 = vld [vmem:[%s4276_s12 + $0x1760] sm:$0xff]  ;;  %v6708_v62 = vld [vmem:[%s4276_s12 + $0x1768] sm:$0x3f] }
 0x17f   : > { %13557 = vst [vmem:[#allocation690_spill] sm:$0xff] %v6702_v41  ;;  %13558 = vst [vmem:[#allocation691_spill] sm:$0xff] %v6705_v40  ;;  %v6711_v37 = vld [vmem:[%s4276_s12 + $0x1770] sm:$0xff]  ;;  %v6714_v55 = vld [vmem:[%s4276_s12 + $0x1778] sm:$0x3f] }
 0x180   : > { %13559 = vst [vmem:[#allocation692_spill] sm:$0xff] %v6708_v62  ;;  %13560 = vst [vmem:[#allocation693_spill] sm:$0xff] %v6711_v37  ;;  %v6717_v56 = vld [vmem:[%s4276_s12 + $0x1780] sm:$0xff]  ;;  %v6720_v50 = vld [vmem:[%s4276_s12 + $0x1788] sm:$0x3f] }
 0x181   : > { %13561 = vst [vmem:[#allocation694_spill] sm:$0xff] %v6714_v55  ;;  %13562 = vst [vmem:[#allocation695_spill] sm:$0xff] %v6717_v56  ;;  %v6723_v41 = vld [vmem:[%s4276_s12 + $0x1790] sm:$0xff]  ;;  %v6726_v40 = vld [vmem:[%s4276_s12 + $0x1798] sm:$0x3f] }
 0x182   : > { %13563 = vst [vmem:[#allocation696_spill] sm:$0xff] %v6720_v50  ;;  %13564 = vst [vmem:[#allocation697_spill] sm:$0xff] %v6723_v41  ;;  %v6729_v62 = vld [vmem:[%s4276_s12 + $0x17a0] sm:$0xff]  ;;  %v6732_v37 = vld [vmem:[%s4276_s12 + $0x17a8] sm:$0x3f] }
 0x183   : > { %13565 = vst [vmem:[#allocation698_spill] sm:$0xff] %v6726_v40  ;;  %13566 = vst [vmem:[#allocation699_spill] sm:$0xff] %v6729_v62  ;;  %v6735_v55 = vld [vmem:[%s4276_s12 + $0x17b0] sm:$0xff]  ;;  %v6738_v56 = vld [vmem:[%s4276_s12 + $0x17b8] sm:$0x3f] }
 0x184   : > { %13567 = vst [vmem:[#allocation700_spill] sm:$0xff] %v6732_v37  ;;  %13568 = vst [vmem:[#allocation701_spill] sm:$0xff] %v6735_v55  ;;  %v6741_v50 = vld [vmem:[%s4276_s12 + $0x17c0] sm:$0xff]  ;;  %v6744_v41 = vld [vmem:[%s4276_s12 + $0x17c8] sm:$0x3f] }
 0x185   : > { %13569 = vst [vmem:[#allocation702_spill] sm:$0xff] %v6738_v56  ;;  %13570 = vst [vmem:[#allocation703_spill] sm:$0xff] %v6741_v50  ;;  %v6747_v40 = vld [vmem:[%s4276_s12 + $0x17d0] sm:$0xff]  ;;  %v6750_v62 = vld [vmem:[%s4276_s12 + $0x17d8] sm:$0x3f] }
 0x186   : > { %13571 = vst [vmem:[#allocation704_spill] sm:$0xff] %v6744_v41  ;;  %13572 = vst [vmem:[#allocation705_spill] sm:$0xff] %v6747_v40  ;;  %v6753_v37 = vld [vmem:[%s4276_s12 + $0x17e0] sm:$0xff]  ;;  %v6756_v55 = vld [vmem:[%s4276_s12 + $0x17e8] sm:$0x3f] }
 0x187   : > { %13573 = vst [vmem:[#allocation706_spill] sm:$0xff] %v6750_v62  ;;  %13574 = vst [vmem:[#allocation707_spill] sm:$0xff] %v6753_v37  ;;  %v6759_v56 = vld [vmem:[%s4276_s12 + $0x17f0] sm:$0xff]  ;;  %v6762_v50 = vld [vmem:[%s4276_s12 + $0x17f8] sm:$0x3f] }
 0x188   : > { %13575 = vst [vmem:[#allocation708_spill] sm:$0xff] %v6756_v55  ;;  %13576 = vst [vmem:[#allocation709_spill] sm:$0xff] %v6759_v56  ;;  %v6765_v41 = vld [vmem:[%s4276_s12 + $0x1800] sm:$0xff]  ;;  %v6768_v40 = vld [vmem:[%s4276_s12 + $0x1808] sm:$0x3f] }
 0x189   : > { %13577 = vst [vmem:[#allocation710_spill] sm:$0xff] %v6762_v50  ;;  %13578 = vst [vmem:[#allocation711_spill] sm:$0xff] %v6765_v41  ;;  %v6771_v62 = vld [vmem:[%s4276_s12 + $0x1810] sm:$0xff]  ;;  %v6774_v37 = vld [vmem:[%s4276_s12 + $0x1818] sm:$0x3f] }
 0x18a   : > { %13579 = vst [vmem:[#allocation712_spill] sm:$0xff] %v6768_v40  ;;  %13580 = vst [vmem:[#allocation713_spill] sm:$0xff] %v6771_v62  ;;  %v6777_v55 = vld [vmem:[%s4276_s12 + $0x1820] sm:$0xff]  ;;  %v6780_v56 = vld [vmem:[%s4276_s12 + $0x1828] sm:$0x3f] }
 0x18b   : > { %13581 = vst [vmem:[#allocation714_spill] sm:$0xff] %v6774_v37  ;;  %13582 = vst [vmem:[#allocation715_spill] sm:$0xff] %v6777_v55  ;;  %v6783_v50 = vld [vmem:[%s4276_s12 + $0x1830] sm:$0xff]  ;;  %v6786_v41 = vld [vmem:[%s4276_s12 + $0x1838] sm:$0x3f] }
 0x18c   : > { %13583 = vst [vmem:[#allocation716_spill] sm:$0xff] %v6780_v56  ;;  %13584 = vst [vmem:[#allocation717_spill] sm:$0xff] %v6783_v50  ;;  %v6789_v40 = vld [vmem:[%s4276_s12 + $0x1840] sm:$0xff]  ;;  %v6792_v62 = vld [vmem:[%s4276_s12 + $0x1848] sm:$0x3f] }
 0x18d   : > { %13585 = vst [vmem:[#allocation718_spill] sm:$0xff] %v6786_v41  ;;  %13586 = vst [vmem:[#allocation719_spill] sm:$0xff] %v6789_v40  ;;  %v6795_v37 = vld [vmem:[%s4276_s12 + $0x1850] sm:$0xff]  ;;  %v6798_v55 = vld [vmem:[%s4276_s12 + $0x1858] sm:$0x3f] }
 0x18e   : > { %13587 = vst [vmem:[#allocation720_spill] sm:$0xff] %v6792_v62  ;;  %13588 = vst [vmem:[#allocation721_spill] sm:$0xff] %v6795_v37  ;;  %v6801_v56 = vld [vmem:[%s4276_s12 + $0x1860] sm:$0xff]  ;;  %v6804_v50 = vld [vmem:[%s4276_s12 + $0x1868] sm:$0x3f] }
 0x18f   : > { %13589 = vst [vmem:[#allocation722_spill] sm:$0xff] %v6798_v55  ;;  %13590 = vst [vmem:[#allocation723_spill] sm:$0xff] %v6801_v56  ;;  %v6807_v41 = vld [vmem:[%s4276_s12 + $0x1870] sm:$0xff]  ;;  %v6810_v40 = vld [vmem:[%s4276_s12 + $0x1878] sm:$0x3f] }
 0x190   : > { %13591 = vst [vmem:[#allocation724_spill] sm:$0xff] %v6804_v50  ;;  %13592 = vst [vmem:[#allocation725_spill] sm:$0xff] %v6807_v41  ;;  %v6813_v62 = vld [vmem:[%s4276_s12 + $0x1880] sm:$0xff]  ;;  %v6816_v37 = vld [vmem:[%s4276_s12 + $0x1888] sm:$0x3f] }
 0x191   : > { %13593 = vst [vmem:[#allocation726_spill] sm:$0xff] %v6810_v40  ;;  %13594 = vst [vmem:[#allocation727_spill] sm:$0xff] %v6813_v62  ;;  %v6819_v55 = vld [vmem:[%s4276_s12 + $0x1890] sm:$0xff]  ;;  %v6822_v56 = vld [vmem:[%s4276_s12 + $0x1898] sm:$0x3f] }
 0x192   : > { %13595 = vst [vmem:[#allocation728_spill] sm:$0xff] %v6816_v37  ;;  %13596 = vst [vmem:[#allocation729_spill] sm:$0xff] %v6819_v55  ;;  %v6825_v50 = vld [vmem:[%s4276_s12 + $0x18a0] sm:$0xff]  ;;  %v6828_v41 = vld [vmem:[%s4276_s12 + $0x18a8] sm:$0x3f] }
 0x193   : > { %13597 = vst [vmem:[#allocation730_spill] sm:$0xff] %v6822_v56  ;;  %13598 = vst [vmem:[#allocation731_spill] sm:$0xff] %v6825_v50  ;;  %v6831_v40 = vld [vmem:[%s4276_s12 + $0x18b0] sm:$0xff]  ;;  %v6834_v62 = vld [vmem:[%s4276_s12 + $0x18b8] sm:$0x3f] }
 0x194   : > { %13599 = vst [vmem:[#allocation732_spill] sm:$0xff] %v6828_v41  ;;  %13600 = vst [vmem:[#allocation733_spill] sm:$0xff] %v6831_v40  ;;  %v6837_v37 = vld [vmem:[%s4276_s12 + $0x18c0] sm:$0xff]  ;;  %v6840_v55 = vld [vmem:[%s4276_s12 + $0x18c8] sm:$0x3f] }
 0x195   : > { %13601 = vst [vmem:[#allocation734_spill] sm:$0xff] %v6834_v62  ;;  %13602 = vst [vmem:[#allocation735_spill] sm:$0xff] %v6837_v37  ;;  %v6843_v56 = vld [vmem:[%s4276_s12 + $0x18d0] sm:$0xff]  ;;  %v6846_v50 = vld [vmem:[%s4276_s12 + $0x18d8] sm:$0x3f] }
 0x196   : > { %13603 = vst [vmem:[#allocation736_spill] sm:$0xff] %v6840_v55  ;;  %13604 = vst [vmem:[#allocation737_spill] sm:$0xff] %v6843_v56  ;;  %v6849_v41 = vld [vmem:[%s4276_s12 + $0x18e0] sm:$0xff]  ;;  %v6852_v40 = vld [vmem:[%s4276_s12 + $0x18e8] sm:$0x3f] }
 0x197   : > { %13605 = vst [vmem:[#allocation738_spill] sm:$0xff] %v6846_v50  ;;  %13606 = vst [vmem:[#allocation739_spill] sm:$0xff] %v6849_v41  ;;  %v6855_v62 = vld [vmem:[%s4276_s12 + $0x18f0] sm:$0xff]  ;;  %v6858_v37 = vld [vmem:[%s4276_s12 + $0x18f8] sm:$0x3f] }
 0x198   : > { %13607 = vst [vmem:[#allocation740_spill] sm:$0xff] %v6852_v40  ;;  %13608 = vst [vmem:[#allocation741_spill] sm:$0xff] %v6855_v62  ;;  %v6861_v55 = vld [vmem:[%s4276_s12 + $0x1900] sm:$0xff]  ;;  %v6864_v56 = vld [vmem:[%s4276_s12 + $0x1908] sm:$0x3f] }
 0x199   : > { %13609 = vst [vmem:[#allocation742_spill] sm:$0xff] %v6858_v37  ;;  %13610 = vst [vmem:[#allocation743_spill] sm:$0xff] %v6861_v55  ;;  %v6867_v50 = vld [vmem:[%s4276_s12 + $0x1910] sm:$0xff]  ;;  %v6870_v41 = vld [vmem:[%s4276_s12 + $0x1918] sm:$0x3f] }
 0x19a   : > { %13611 = vst [vmem:[#allocation744_spill] sm:$0xff] %v6864_v56  ;;  %13612 = vst [vmem:[#allocation745_spill] sm:$0xff] %v6867_v50  ;;  %v6873_v40 = vld [vmem:[%s4276_s12 + $0x1920] sm:$0xff]  ;;  %v6876_v62 = vld [vmem:[%s4276_s12 + $0x1928] sm:$0x3f] }
 0x19b   : > { %13613 = vst [vmem:[#allocation746_spill] sm:$0xff] %v6870_v41  ;;  %13614 = vst [vmem:[#allocation747_spill] sm:$0xff] %v6873_v40  ;;  %v6879_v37 = vld [vmem:[%s4276_s12 + $0x1930] sm:$0xff]  ;;  %v6882_v55 = vld [vmem:[%s4276_s12 + $0x1938] sm:$0x3f] }
 0x19c   : > { %13615 = vst [vmem:[#allocation748_spill] sm:$0xff] %v6876_v62  ;;  %13616 = vst [vmem:[#allocation749_spill] sm:$0xff] %v6879_v37  ;;  %v6885_v56 = vld [vmem:[%s4276_s12 + $0x1940] sm:$0xff]  ;;  %v6888_v50 = vld [vmem:[%s4276_s12 + $0x1948] sm:$0x3f] }
 0x19d   : > { %13617 = vst [vmem:[#allocation750_spill] sm:$0xff] %v6882_v55  ;;  %13618 = vst [vmem:[#allocation751_spill] sm:$0xff] %v6885_v56  ;;  %v6891_v41 = vld [vmem:[%s4276_s12 + $0x1950] sm:$0xff]  ;;  %v6894_v40 = vld [vmem:[%s4276_s12 + $0x1958] sm:$0x3f] }
 0x19e   : > { %13619 = vst [vmem:[#allocation752_spill] sm:$0xff] %v6888_v50  ;;  %13620 = vst [vmem:[#allocation753_spill] sm:$0xff] %v6891_v41  ;;  %v6897_v62 = vld [vmem:[%s4276_s12 + $0x1960] sm:$0xff]  ;;  %v6900_v37 = vld [vmem:[%s4276_s12 + $0x1968] sm:$0x3f] }
 0x19f   : > { %13621 = vst [vmem:[#allocation754_spill] sm:$0xff] %v6894_v40  ;;  %13622 = vst [vmem:[#allocation755_spill] sm:$0xff] %v6897_v62  ;;  %v6903_v55 = vld [vmem:[%s4276_s12 + $0x1970] sm:$0xff]  ;;  %v6906_v56 = vld [vmem:[%s4276_s12 + $0x1978] sm:$0x3f] }
 0x1a0   : > { %13623 = vst [vmem:[#allocation756_spill] sm:$0xff] %v6900_v37  ;;  %13624 = vst [vmem:[#allocation757_spill] sm:$0xff] %v6903_v55  ;;  %v6909_v50 = vld [vmem:[%s4276_s12 + $0x1980] sm:$0xff]  ;;  %v6912_v41 = vld [vmem:[%s4276_s12 + $0x1988] sm:$0x3f] }
 0x1a1   : > { %13625 = vst [vmem:[#allocation758_spill] sm:$0xff] %v6906_v56  ;;  %13626 = vst [vmem:[#allocation759_spill] sm:$0xff] %v6909_v50  ;;  %v6915_v40 = vld [vmem:[%s4276_s12 + $0x1990] sm:$0xff]  ;;  %v6918_v62 = vld [vmem:[%s4276_s12 + $0x1998] sm:$0x3f] }
 0x1a2   : > { %13627 = vst [vmem:[#allocation760_spill] sm:$0xff] %v6912_v41  ;;  %13628 = vst [vmem:[#allocation761_spill] sm:$0xff] %v6915_v40  ;;  %v6921_v37 = vld [vmem:[%s4276_s12 + $0x19a0] sm:$0xff]  ;;  %v6924_v55 = vld [vmem:[%s4276_s12 + $0x19a8] sm:$0x3f] }
 0x1a3   : > { %13629 = vst [vmem:[#allocation762_spill] sm:$0xff] %v6918_v62  ;;  %13630 = vst [vmem:[#allocation763_spill] sm:$0xff] %v6921_v37  ;;  %v6927_v56 = vld [vmem:[%s4276_s12 + $0x19b0] sm:$0xff]  ;;  %v6930_v50 = vld [vmem:[%s4276_s12 + $0x19b8] sm:$0x3f] }
 0x1a4   : > { %13631 = vst [vmem:[#allocation764_spill] sm:$0xff] %v6924_v55  ;;  %13632 = vst [vmem:[#allocation765_spill] sm:$0xff] %v6927_v56  ;;  %v6933_v41 = vld [vmem:[%s4276_s12 + $0x19c0] sm:$0xff]  ;;  %v6936_v40 = vld [vmem:[%s4276_s12 + $0x19c8] sm:$0x3f] }
 0x1a5   : > { %13633 = vst [vmem:[#allocation766_spill] sm:$0xff] %v6930_v50  ;;  %13634 = vst [vmem:[#allocation767_spill] sm:$0xff] %v6933_v41  ;;  %v6939_v62 = vld [vmem:[%s4276_s12 + $0x19d0] sm:$0xff]  ;;  %v6942_v37 = vld [vmem:[%s4276_s12 + $0x19d8] sm:$0x3f] }
 0x1a6   : > { %13635 = vst [vmem:[#allocation768_spill] sm:$0xff] %v6936_v40  ;;  %13636 = vst [vmem:[#allocation769_spill] sm:$0xff] %v6939_v62  ;;  %v6945_v55 = vld [vmem:[%s4276_s12 + $0x19e0] sm:$0xff]  ;;  %v6948_v56 = vld [vmem:[%s4276_s12 + $0x19e8] sm:$0x3f] }
 0x1a7   : > { %13637 = vst [vmem:[#allocation770_spill] sm:$0xff] %v6942_v37  ;;  %13638 = vst [vmem:[#allocation771_spill] sm:$0xff] %v6945_v55  ;;  %v6951_v50 = vld [vmem:[%s4276_s12 + $0x19f0] sm:$0xff]  ;;  %v6954_v41 = vld [vmem:[%s4276_s12 + $0x19f8] sm:$0x3f] }
 0x1a8   : > { %13639 = vst [vmem:[#allocation772_spill] sm:$0xff] %v6948_v56  ;;  %13640 = vst [vmem:[#allocation773_spill] sm:$0xff] %v6951_v50  ;;  %v6957_v40 = vld [vmem:[%s4276_s12 + $0x1a00] sm:$0xff]  ;;  %v6960_v62 = vld [vmem:[%s4276_s12 + $0x1a08] sm:$0x3f] }
 0x1a9   : > { %13641 = vst [vmem:[#allocation774_spill] sm:$0xff] %v6954_v41  ;;  %13642 = vst [vmem:[#allocation775_spill] sm:$0xff] %v6957_v40  ;;  %v6963_v37 = vld [vmem:[%s4276_s12 + $0x1a10] sm:$0xff]  ;;  %v6966_v55 = vld [vmem:[%s4276_s12 + $0x1a18] sm:$0x3f] }
 0x1aa   : > { %13643 = vst [vmem:[#allocation776_spill] sm:$0xff] %v6960_v62  ;;  %13644 = vst [vmem:[#allocation777_spill] sm:$0xff] %v6963_v37  ;;  %v6969_v56 = vld [vmem:[%s4276_s12 + $0x1a20] sm:$0xff]  ;;  %v6972_v50 = vld [vmem:[%s4276_s12 + $0x1a28] sm:$0x3f] }
 0x1ab   : > { %13645 = vst [vmem:[#allocation778_spill] sm:$0xff] %v6966_v55  ;;  %13646 = vst [vmem:[#allocation779_spill] sm:$0xff] %v6969_v56  ;;  %v6975_v41 = vld [vmem:[%s4276_s12 + $0x1a30] sm:$0xff]  ;;  %v6978_v40 = vld [vmem:[%s4276_s12 + $0x1a38] sm:$0x3f] }
 0x1ac   : > { %13647 = vst [vmem:[#allocation780_spill] sm:$0xff] %v6972_v50  ;;  %13648 = vst [vmem:[#allocation781_spill] sm:$0xff] %v6975_v41  ;;  %v6981_v62 = vld [vmem:[%s4276_s12 + $0x1a40] sm:$0xff]  ;;  %v6984_v37 = vld [vmem:[%s4276_s12 + $0x1a48] sm:$0x3f] }
 0x1ad   : > { %13649 = vst [vmem:[#allocation782_spill] sm:$0xff] %v6978_v40  ;;  %13650 = vst [vmem:[#allocation783_spill] sm:$0xff] %v6981_v62  ;;  %v6987_v55 = vld [vmem:[%s4276_s12 + $0x1a50] sm:$0xff]  ;;  %v6990_v56 = vld [vmem:[%s4276_s12 + $0x1a58] sm:$0x3f] }
 0x1ae   : > { %13651 = vst [vmem:[#allocation784_spill] sm:$0xff] %v6984_v37  ;;  %13652 = vst [vmem:[#allocation785_spill] sm:$0xff] %v6987_v55  ;;  %v6993_v50 = vld [vmem:[%s4276_s12 + $0x1a60] sm:$0xff]  ;;  %v6996_v41 = vld [vmem:[%s4276_s12 + $0x1a68] sm:$0x3f] }
 0x1af   : > { %13653 = vst [vmem:[#allocation786_spill] sm:$0xff] %v6990_v56  ;;  %13654 = vst [vmem:[#allocation787_spill] sm:$0xff] %v6993_v50  ;;  %v6999_v40 = vld [vmem:[%s4276_s12 + $0x1a70] sm:$0xff]  ;;  %v7002_v62 = vld [vmem:[%s4276_s12 + $0x1a78] sm:$0x3f] }
 0x1b0   : > { %13655 = vst [vmem:[#allocation788_spill] sm:$0xff] %v6996_v41  ;;  %13656 = vst [vmem:[#allocation789_spill] sm:$0xff] %v6999_v40  ;;  %v7005_v37 = vld [vmem:[%s4276_s12 + $0x1a80] sm:$0xff]  ;;  %v7008_v55 = vld [vmem:[%s4276_s12 + $0x1a88] sm:$0x3f] }
 0x1b1   : > { %13657 = vst [vmem:[#allocation790_spill] sm:$0xff] %v7002_v62  ;;  %13658 = vst [vmem:[#allocation791_spill] sm:$0xff] %v7005_v37  ;;  %v7011_v56 = vld [vmem:[%s4276_s12 + $0x1a90] sm:$0xff]  ;;  %v7014_v50 = vld [vmem:[%s4276_s12 + $0x1a98] sm:$0x3f] }
 0x1b2   : > { %13659 = vst [vmem:[#allocation792_spill] sm:$0xff] %v7008_v55  ;;  %13660 = vst [vmem:[#allocation793_spill] sm:$0xff] %v7011_v56  ;;  %v7017_v41 = vld [vmem:[%s4276_s12 + $0x1aa0] sm:$0xff]  ;;  %v7020_v40 = vld [vmem:[%s4276_s12 + $0x1aa8] sm:$0x3f] }
 0x1b3   : > { %13661 = vst [vmem:[#allocation794_spill] sm:$0xff] %v7014_v50  ;;  %13662 = vst [vmem:[#allocation795_spill] sm:$0xff] %v7017_v41  ;;  %v7023_v62 = vld [vmem:[%s4276_s12 + $0x1ab0] sm:$0xff]  ;;  %v7026_v37 = vld [vmem:[%s4276_s12 + $0x1ab8] sm:$0x3f] }
 0x1b4   : > { %13663 = vst [vmem:[#allocation796_spill] sm:$0xff] %v7020_v40  ;;  %13664 = vst [vmem:[#allocation797_spill] sm:$0xff] %v7023_v62  ;;  %v7029_v55 = vld [vmem:[%s4276_s12 + $0x1ac0] sm:$0xff]  ;;  %v7032_v56 = vld [vmem:[%s4276_s12 + $0x1ac8] sm:$0x3f] }
 0x1b5   : > { %13665 = vst [vmem:[#allocation798_spill] sm:$0xff] %v7026_v37  ;;  %13666 = vst [vmem:[#allocation799_spill] sm:$0xff] %v7029_v55  ;;  %v7035_v50 = vld [vmem:[%s4276_s12 + $0x1ad0] sm:$0xff]  ;;  %v7038_v41 = vld [vmem:[%s4276_s12 + $0x1ad8] sm:$0x3f] }
 0x1b6   : > { %13667 = vst [vmem:[#allocation800_spill] sm:$0xff] %v7032_v56  ;;  %13668 = vst [vmem:[#allocation801_spill] sm:$0xff] %v7035_v50  ;;  %v7041_v40 = vld [vmem:[%s4276_s12 + $0x1ae0] sm:$0xff]  ;;  %v7044_v62 = vld [vmem:[%s4276_s12 + $0x1ae8] sm:$0x3f] }
 0x1b7   : > { %13669 = vst [vmem:[#allocation802_spill] sm:$0xff] %v7038_v41  ;;  %13670 = vst [vmem:[#allocation803_spill] sm:$0xff] %v7041_v40  ;;  %v7047_v37 = vld [vmem:[%s4276_s12 + $0x1af0] sm:$0xff]  ;;  %v7050_v55 = vld [vmem:[%s4276_s12 + $0x1af8] sm:$0x3f] }
 0x1b8   : > { %13671 = vst [vmem:[#allocation804_spill] sm:$0xff] %v7044_v62  ;;  %13672 = vst [vmem:[#allocation805_spill] sm:$0xff] %v7047_v37  ;;  %v7053_v56 = vld [vmem:[%s4276_s12 + $0x1b00] sm:$0xff]  ;;  %v7056_v50 = vld [vmem:[%s4276_s12 + $0x1b08] sm:$0x3f] }
 0x1b9   : > { %13673 = vst [vmem:[#allocation806_spill] sm:$0xff] %v7050_v55  ;;  %13674 = vst [vmem:[#allocation807_spill] sm:$0xff] %v7053_v56  ;;  %v7059_v41 = vld [vmem:[%s4276_s12 + $0x1b10] sm:$0xff]  ;;  %v7062_v40 = vld [vmem:[%s4276_s12 + $0x1b18] sm:$0x3f] }
 0x1ba   : > { %13675 = vst [vmem:[#allocation808_spill] sm:$0xff] %v7056_v50  ;;  %13676 = vst [vmem:[#allocation809_spill] sm:$0xff] %v7059_v41  ;;  %v7065_v62 = vld [vmem:[%s4276_s12 + $0x1b20] sm:$0xff]  ;;  %v7068_v37 = vld [vmem:[%s4276_s12 + $0x1b28] sm:$0x3f] }
 0x1bb   : > { %13677 = vst [vmem:[#allocation810_spill] sm:$0xff] %v7062_v40  ;;  %13678 = vst [vmem:[#allocation811_spill] sm:$0xff] %v7065_v62  ;;  %v7071_v55 = vld [vmem:[%s4276_s12 + $0x1b30] sm:$0xff]  ;;  %v7074_v56 = vld [vmem:[%s4276_s12 + $0x1b38] sm:$0x3f] }
 0x1bc   : > { %13679 = vst [vmem:[#allocation812_spill] sm:$0xff] %v7068_v37  ;;  %13680 = vst [vmem:[#allocation813_spill] sm:$0xff] %v7071_v55  ;;  %v7077_v50 = vld [vmem:[%s4276_s12 + $0x1b40] sm:$0xff]  ;;  %v7080_v41 = vld [vmem:[%s4276_s12 + $0x1b48] sm:$0x3f] }
 0x1bd   : > { %13681 = vst [vmem:[#allocation814_spill] sm:$0xff] %v7074_v56  ;;  %13682 = vst [vmem:[#allocation815_spill] sm:$0xff] %v7077_v50  ;;  %v7083_v40 = vld [vmem:[%s4276_s12 + $0x1b50] sm:$0xff]  ;;  %v7086_v62 = vld [vmem:[%s4276_s12 + $0x1b58] sm:$0x3f] }
 0x1be   : > { %13683 = vst [vmem:[#allocation816_spill] sm:$0xff] %v7080_v41  ;;  %13684 = vst [vmem:[#allocation817_spill] sm:$0xff] %v7083_v40  ;;  %v7089_v37 = vld [vmem:[%s4276_s12 + $0x1b60] sm:$0xff]  ;;  %v7092_v55 = vld [vmem:[%s4276_s12 + $0x1b68] sm:$0x3f] }
 0x1bf   : > { %13685 = vst [vmem:[#allocation818_spill] sm:$0xff] %v7086_v62  ;;  %13686 = vst [vmem:[#allocation819_spill] sm:$0xff] %v7089_v37  ;;  %v7095_v56 = vld [vmem:[%s4276_s12 + $0x1b70] sm:$0xff]  ;;  %v7098_v50 = vld [vmem:[%s4276_s12 + $0x1b78] sm:$0x3f] }
 0x1c0   : > { %13687 = vst [vmem:[#allocation820_spill] sm:$0xff] %v7092_v55  ;;  %13688 = vst [vmem:[#allocation821_spill] sm:$0xff] %v7095_v56  ;;  %v7101_v41 = vld [vmem:[%s4276_s12 + $0x1b80] sm:$0xff]  ;;  %v7104_v40 = vld [vmem:[%s4276_s12 + $0x1b88] sm:$0x3f] }
 0x1c1   : > { %13689 = vst [vmem:[#allocation822_spill] sm:$0xff] %v7098_v50  ;;  %13690 = vst [vmem:[#allocation823_spill] sm:$0xff] %v7101_v41  ;;  %v7107_v62 = vld [vmem:[%s4276_s12 + $0x1b90] sm:$0xff]  ;;  %v7110_v37 = vld [vmem:[%s4276_s12 + $0x1b98] sm:$0x3f] }
 0x1c2   : > { %13691 = vst [vmem:[#allocation824_spill] sm:$0xff] %v7104_v40  ;;  %13692 = vst [vmem:[#allocation825_spill] sm:$0xff] %v7107_v62  ;;  %v7113_v55 = vld [vmem:[%s4276_s12 + $0x1ba0] sm:$0xff]  ;;  %v7116_v56 = vld [vmem:[%s4276_s12 + $0x1ba8] sm:$0x3f] }
 0x1c3   : > { %13693 = vst [vmem:[#allocation826_spill] sm:$0xff] %v7110_v37  ;;  %13694 = vst [vmem:[#allocation827_spill] sm:$0xff] %v7113_v55  ;;  %v7119_v50 = vld [vmem:[%s4276_s12 + $0x1bb0] sm:$0xff]  ;;  %v7122_v41 = vld [vmem:[%s4276_s12 + $0x1bb8] sm:$0x3f] }
 0x1c4   : > { %13695 = vst [vmem:[#allocation828_spill] sm:$0xff] %v7116_v56  ;;  %13696 = vst [vmem:[#allocation829_spill] sm:$0xff] %v7119_v50  ;;  %v7125_v40 = vld [vmem:[%s4276_s12 + $0x1bc0] sm:$0xff]  ;;  %v7128_v62 = vld [vmem:[%s4276_s12 + $0x1bc8] sm:$0x3f] }
 0x1c5   : > { %13697 = vst [vmem:[#allocation830_spill] sm:$0xff] %v7122_v41  ;;  %13698 = vst [vmem:[#allocation831_spill] sm:$0xff] %v7125_v40  ;;  %v7131_v37 = vld [vmem:[%s4276_s12 + $0x1bd0] sm:$0xff]  ;;  %v7134_v55 = vld [vmem:[%s4276_s12 + $0x1bd8] sm:$0x3f] }
 0x1c6   : > { %13699 = vst [vmem:[#allocation832_spill] sm:$0xff] %v7128_v62  ;;  %13700 = vst [vmem:[#allocation833_spill] sm:$0xff] %v7131_v37  ;;  %v7137_v56 = vld [vmem:[%s4276_s12 + $0x1be0] sm:$0xff]  ;;  %v7140_v50 = vld [vmem:[%s4276_s12 + $0x1be8] sm:$0x3f] }
 0x1c7   : > { %13701 = vst [vmem:[#allocation834_spill] sm:$0xff] %v7134_v55  ;;  %13702 = vst [vmem:[#allocation835_spill] sm:$0xff] %v7137_v56  ;;  %v7143_v41 = vld [vmem:[%s4276_s12 + $0x1bf0] sm:$0xff]  ;;  %v7146_v40 = vld [vmem:[%s4276_s12 + $0x1bf8] sm:$0x3f] }
 0x1c8   : > { %13703 = vst [vmem:[#allocation836_spill] sm:$0xff] %v7140_v50  ;;  %13704 = vst [vmem:[#allocation837_spill] sm:$0xff] %v7143_v41  ;;  %v7149_v62 = vld [vmem:[%s4276_s12 + $0x1c00] sm:$0xff]  ;;  %v7152_v37 = vld [vmem:[%s4276_s12 + $0x1c08] sm:$0x3f] }
 0x1c9   : > { %13705 = vst [vmem:[#allocation838_spill] sm:$0xff] %v7146_v40  ;;  %13706 = vst [vmem:[#allocation839_spill] sm:$0xff] %v7149_v62  ;;  %v7155_v55 = vld [vmem:[%s4276_s12 + $0x1c10] sm:$0xff]  ;;  %v7158_v56 = vld [vmem:[%s4276_s12 + $0x1c18] sm:$0x3f] }
 0x1ca   : > { %13707 = vst [vmem:[#allocation840_spill] sm:$0xff] %v7152_v37  ;;  %13708 = vst [vmem:[#allocation841_spill] sm:$0xff] %v7155_v55  ;;  %v7161_v50 = vld [vmem:[%s4276_s12 + $0x1c20] sm:$0xff]  ;;  %v7164_v41 = vld [vmem:[%s4276_s12 + $0x1c28] sm:$0x3f] }
 0x1cb   : > { %13709 = vst [vmem:[#allocation842_spill] sm:$0xff] %v7158_v56  ;;  %13710 = vst [vmem:[#allocation843_spill] sm:$0xff] %v7161_v50  ;;  %v7167_v40 = vld [vmem:[%s4276_s12 + $0x1c30] sm:$0xff]  ;;  %v7170_v62 = vld [vmem:[%s4276_s12 + $0x1c38] sm:$0x3f] }
 0x1cc   : > { %13711 = vst [vmem:[#allocation844_spill] sm:$0xff] %v7164_v41  ;;  %13712 = vst [vmem:[#allocation845_spill] sm:$0xff] %v7167_v40  ;;  %v7173_v37 = vld [vmem:[%s4276_s12 + $0x1c40] sm:$0xff]  ;;  %v7176_v55 = vld [vmem:[%s4276_s12 + $0x1c48] sm:$0x3f] }
 0x1cd   : > { %13713 = vst [vmem:[#allocation846_spill] sm:$0xff] %v7170_v62  ;;  %13714 = vst [vmem:[#allocation847_spill] sm:$0xff] %v7173_v37  ;;  %v7179_v56 = vld [vmem:[%s4276_s12 + $0x1c50] sm:$0xff]  ;;  %v7182_v50 = vld [vmem:[%s4276_s12 + $0x1c58] sm:$0x3f] }
 0x1ce   : > { %13715 = vst [vmem:[#allocation848_spill] sm:$0xff] %v7176_v55  ;;  %13716 = vst [vmem:[#allocation849_spill] sm:$0xff] %v7179_v56  ;;  %v7185_v41 = vld [vmem:[%s4276_s12 + $0x1c60] sm:$0xff]  ;;  %v7188_v40 = vld [vmem:[%s4276_s12 + $0x1c68] sm:$0x3f] }
 0x1cf   : > { %13717 = vst [vmem:[#allocation850_spill] sm:$0xff] %v7182_v50  ;;  %13718 = vst [vmem:[#allocation851_spill] sm:$0xff] %v7185_v41  ;;  %v7191_v62 = vld [vmem:[%s4276_s12 + $0x1c70] sm:$0xff]  ;;  %v7194_v37 = vld [vmem:[%s4276_s12 + $0x1c78] sm:$0x3f] }
 0x1d0   : > { %13719 = vst [vmem:[#allocation852_spill] sm:$0xff] %v7188_v40  ;;  %13720 = vst [vmem:[#allocation853_spill] sm:$0xff] %v7191_v62  ;;  %v7197_v55 = vld [vmem:[%s4276_s12 + $0x1c80] sm:$0xff]  ;;  %v7200_v56 = vld [vmem:[%s4276_s12 + $0x1c88] sm:$0x3f] }
 0x1d1   : > { %13721 = vst [vmem:[#allocation854_spill] sm:$0xff] %v7194_v37  ;;  %13722 = vst [vmem:[#allocation855_spill] sm:$0xff] %v7197_v55  ;;  %v7203_v50 = vld [vmem:[%s4276_s12 + $0x1c90] sm:$0xff]  ;;  %v7206_v41 = vld [vmem:[%s4276_s12 + $0x1c98] sm:$0x3f] }
 0x1d2   : > { %13723 = vst [vmem:[#allocation856_spill] sm:$0xff] %v7200_v56  ;;  %13724 = vst [vmem:[#allocation857_spill] sm:$0xff] %v7203_v50  ;;  %v7209_v40 = vld [vmem:[%s4276_s12 + $0x1ca0] sm:$0xff]  ;;  %v7212_v62 = vld [vmem:[%s4276_s12 + $0x1ca8] sm:$0x3f] }
 0x1d3   : > { %13725 = vst [vmem:[#allocation858_spill] sm:$0xff] %v7206_v41  ;;  %13726 = vst [vmem:[#allocation859_spill] sm:$0xff] %v7209_v40  ;;  %v7215_v37 = vld [vmem:[%s4276_s12 + $0x1cb0] sm:$0xff]  ;;  %v7218_v55 = vld [vmem:[%s4276_s12 + $0x1cb8] sm:$0x3f] }
 0x1d4   : > { %13727 = vst [vmem:[#allocation860_spill] sm:$0xff] %v7212_v62  ;;  %13728 = vst [vmem:[#allocation861_spill] sm:$0xff] %v7215_v37  ;;  %v7221_v56 = vld [vmem:[%s4276_s12 + $0x1cc0] sm:$0xff]  ;;  %v7224_v50 = vld [vmem:[%s4276_s12 + $0x1cc8] sm:$0x3f] }
 0x1d5   : > { %13729 = vst [vmem:[#allocation862_spill] sm:$0xff] %v7218_v55  ;;  %13730 = vst [vmem:[#allocation863_spill] sm:$0xff] %v7221_v56  ;;  %v7227_v41 = vld [vmem:[%s4276_s12 + $0x1cd0] sm:$0xff]  ;;  %v7230_v40 = vld [vmem:[%s4276_s12 + $0x1cd8] sm:$0x3f] }
 0x1d6   : > { %13731 = vst [vmem:[#allocation864_spill] sm:$0xff] %v7224_v50  ;;  %13732 = vst [vmem:[#allocation865_spill] sm:$0xff] %v7227_v41  ;;  %v7233_v62 = vld [vmem:[%s4276_s12 + $0x1ce0] sm:$0xff]  ;;  %v7236_v37 = vld [vmem:[%s4276_s12 + $0x1ce8] sm:$0x3f] }
 0x1d7   : > { %13733 = vst [vmem:[#allocation866_spill] sm:$0xff] %v7230_v40  ;;  %13734 = vst [vmem:[#allocation867_spill] sm:$0xff] %v7233_v62  ;;  %v7239_v55 = vld [vmem:[%s4276_s12 + $0x1cf0] sm:$0xff]  ;;  %v7242_v56 = vld [vmem:[%s4276_s12 + $0x1cf8] sm:$0x3f] }
 0x1d8   : > { %13735 = vst [vmem:[#allocation868_spill] sm:$0xff] %v7236_v37  ;;  %13736 = vst [vmem:[#allocation869_spill] sm:$0xff] %v7239_v55  ;;  %v7245_v50 = vld [vmem:[%s4276_s12 + $0x1d00] sm:$0xff]  ;;  %v7248_v41 = vld [vmem:[%s4276_s12 + $0x1d08] sm:$0x3f] }
 0x1d9   : > { %13737 = vst [vmem:[#allocation870_spill] sm:$0xff] %v7242_v56  ;;  %13738 = vst [vmem:[#allocation871_spill] sm:$0xff] %v7245_v50  ;;  %v7251_v40 = vld [vmem:[%s4276_s12 + $0x1d10] sm:$0xff]  ;;  %v7254_v62 = vld [vmem:[%s4276_s12 + $0x1d18] sm:$0x3f] }
 0x1da   : > { %13739 = vst [vmem:[#allocation872_spill] sm:$0xff] %v7248_v41  ;;  %13740 = vst [vmem:[#allocation873_spill] sm:$0xff] %v7251_v40  ;;  %v7257_v37 = vld [vmem:[%s4276_s12 + $0x1d20] sm:$0xff]  ;;  %v7260_v55 = vld [vmem:[%s4276_s12 + $0x1d28] sm:$0x3f] }
 0x1db   : > { %13741 = vst [vmem:[#allocation874_spill] sm:$0xff] %v7254_v62  ;;  %13742 = vst [vmem:[#allocation875_spill] sm:$0xff] %v7257_v37  ;;  %v7263_v56 = vld [vmem:[%s4276_s12 + $0x1d30] sm:$0xff]  ;;  %v7266_v50 = vld [vmem:[%s4276_s12 + $0x1d38] sm:$0x3f] }
 0x1dc   : > { %13743 = vst [vmem:[#allocation876_spill] sm:$0xff] %v7260_v55  ;;  %13744 = vst [vmem:[#allocation877_spill] sm:$0xff] %v7263_v56  ;;  %v7269_v41 = vld [vmem:[%s4276_s12 + $0x1d40] sm:$0xff]  ;;  %v7272_v40 = vld [vmem:[%s4276_s12 + $0x1d48] sm:$0x3f] }
 0x1dd   : > { %13745 = vst [vmem:[#allocation878_spill] sm:$0xff] %v7266_v50  ;;  %13746 = vst [vmem:[#allocation879_spill] sm:$0xff] %v7269_v41  ;;  %v7275_v62 = vld [vmem:[%s4276_s12 + $0x1d50] sm:$0xff]  ;;  %v7278_v37 = vld [vmem:[%s4276_s12 + $0x1d58] sm:$0x3f] }
 0x1de   : > { %13747 = vst [vmem:[#allocation880_spill] sm:$0xff] %v7272_v40  ;;  %13748 = vst [vmem:[#allocation881_spill] sm:$0xff] %v7275_v62  ;;  %v7281_v55 = vld [vmem:[%s4276_s12 + $0x1d60] sm:$0xff]  ;;  %v7284_v56 = vld [vmem:[%s4276_s12 + $0x1d68] sm:$0x3f] }
 0x1df   : > { %13749 = vst [vmem:[#allocation882_spill] sm:$0xff] %v7278_v37  ;;  %13750 = vst [vmem:[#allocation883_spill] sm:$0xff] %v7281_v55  ;;  %v7287_v50 = vld [vmem:[%s4276_s12 + $0x1d70] sm:$0xff]  ;;  %v7290_v41 = vld [vmem:[%s4276_s12 + $0x1d78] sm:$0x3f] }
 0x1e0   : > { %13751 = vst [vmem:[#allocation884_spill] sm:$0xff] %v7284_v56  ;;  %13752 = vst [vmem:[#allocation885_spill] sm:$0xff] %v7287_v50  ;;  %v7293_v40 = vld [vmem:[%s4276_s12 + $0x1d80] sm:$0xff]  ;;  %v7296_v62 = vld [vmem:[%s4276_s12 + $0x1d88] sm:$0x3f] }
 0x1e1   : > { %13753 = vst [vmem:[#allocation886_spill] sm:$0xff] %v7290_v41  ;;  %13754 = vst [vmem:[#allocation887_spill] sm:$0xff] %v7293_v40  ;;  %v7299_v37 = vld [vmem:[%s4276_s12 + $0x1d90] sm:$0xff]  ;;  %v7302_v55 = vld [vmem:[%s4276_s12 + $0x1d98] sm:$0x3f] }
 0x1e2   : > { %13755 = vst [vmem:[#allocation888_spill] sm:$0xff] %v7296_v62  ;;  %13756 = vst [vmem:[#allocation889_spill] sm:$0xff] %v7299_v37  ;;  %v7305_v56 = vld [vmem:[%s4276_s12 + $0x1da0] sm:$0xff]  ;;  %v7308_v50 = vld [vmem:[%s4276_s12 + $0x1da8] sm:$0x3f] }
 0x1e3   : > { %13757 = vst [vmem:[#allocation890_spill] sm:$0xff] %v7302_v55  ;;  %13758 = vst [vmem:[#allocation891_spill] sm:$0xff] %v7305_v56  ;;  %v7311_v41 = vld [vmem:[%s4276_s12 + $0x1db0] sm:$0xff]  ;;  %v7314_v40 = vld [vmem:[%s4276_s12 + $0x1db8] sm:$0x3f] }
 0x1e4   : > { %13759 = vst [vmem:[#allocation892_spill] sm:$0xff] %v7308_v50  ;;  %13760 = vst [vmem:[#allocation893_spill] sm:$0xff] %v7311_v41  ;;  %v7317_v62 = vld [vmem:[%s4276_s12 + $0x1dc0] sm:$0xff]  ;;  %v7320_v37 = vld [vmem:[%s4276_s12 + $0x1dc8] sm:$0x3f] }
 0x1e5   : > { %13761 = vst [vmem:[#allocation894_spill] sm:$0xff] %v7314_v40  ;;  %13762 = vst [vmem:[#allocation895_spill] sm:$0xff] %v7317_v62  ;;  %v7323_v55 = vld [vmem:[%s4276_s12 + $0x1dd0] sm:$0xff]  ;;  %v7326_v56 = vld [vmem:[%s4276_s12 + $0x1dd8] sm:$0x3f] }
 0x1e6   : > { %13763 = vst [vmem:[#allocation896_spill] sm:$0xff] %v7320_v37  ;;  %13764 = vst [vmem:[#allocation897_spill] sm:$0xff] %v7323_v55  ;;  %v7329_v50 = vld [vmem:[%s4276_s12 + $0x1de0] sm:$0xff]  ;;  %v7332_v41 = vld [vmem:[%s4276_s12 + $0x1de8] sm:$0x3f] }
 0x1e7   : > { %13765 = vst [vmem:[#allocation898_spill] sm:$0xff] %v7326_v56  ;;  %13766 = vst [vmem:[#allocation899_spill] sm:$0xff] %v7329_v50  ;;  %v7335_v40 = vld [vmem:[%s4276_s12 + $0x1df0] sm:$0xff]  ;;  %v7338_v62 = vld [vmem:[%s4276_s12 + $0x1df8] sm:$0x3f] }
 0x1e8   : > { %13767 = vst [vmem:[#allocation900_spill] sm:$0xff] %v7332_v41  ;;  %13768 = vst [vmem:[#allocation901_spill] sm:$0xff] %v7335_v40  ;;  %v7341_v37 = vld [vmem:[%s4276_s12 + $0x1e00] sm:$0xff]  ;;  %v7344_v55 = vld [vmem:[%s4276_s12 + $0x1e08] sm:$0x3f] }
 0x1e9   : > { %13769 = vst [vmem:[#allocation902_spill] sm:$0xff] %v7338_v62  ;;  %13770 = vst [vmem:[#allocation903_spill] sm:$0xff] %v7341_v37  ;;  %v7347_v56 = vld [vmem:[%s4276_s12 + $0x1e10] sm:$0xff]  ;;  %v7350_v50 = vld [vmem:[%s4276_s12 + $0x1e18] sm:$0x3f] }
 0x1ea   : > { %13771 = vst [vmem:[#allocation904_spill] sm:$0xff] %v7344_v55  ;;  %13772 = vst [vmem:[#allocation905_spill] sm:$0xff] %v7347_v56  ;;  %v7353_v41 = vld [vmem:[%s4276_s12 + $0x1e20] sm:$0xff]  ;;  %v7356_v40 = vld [vmem:[%s4276_s12 + $0x1e28] sm:$0x3f] }
 0x1eb   : > { %13773 = vst [vmem:[#allocation906_spill] sm:$0xff] %v7350_v50  ;;  %13774 = vst [vmem:[#allocation907_spill] sm:$0xff] %v7353_v41  ;;  %v7359_v62 = vld [vmem:[%s4276_s12 + $0x1e30] sm:$0xff]  ;;  %v7362_v37 = vld [vmem:[%s4276_s12 + $0x1e38] sm:$0x3f] }
 0x1ec   : > { %13775 = vst [vmem:[#allocation908_spill] sm:$0xff] %v7356_v40  ;;  %13776 = vst [vmem:[#allocation909_spill] sm:$0xff] %v7359_v62  ;;  %v7365_v55 = vld [vmem:[%s4276_s12 + $0x1e40] sm:$0xff]  ;;  %v7368_v56 = vld [vmem:[%s4276_s12 + $0x1e48] sm:$0x3f] }
 0x1ed   : > { %13777 = vst [vmem:[#allocation910_spill] sm:$0xff] %v7362_v37  ;;  %13778 = vst [vmem:[#allocation911_spill] sm:$0xff] %v7365_v55  ;;  %v7371_v50 = vld [vmem:[%s4276_s12 + $0x1e50] sm:$0xff]  ;;  %v7374_v41 = vld [vmem:[%s4276_s12 + $0x1e58] sm:$0x3f] }
 0x1ee   : > { %13779 = vst [vmem:[#allocation912_spill] sm:$0xff] %v7368_v56  ;;  %13780 = vst [vmem:[#allocation913_spill] sm:$0xff] %v7371_v50  ;;  %v7377_v40 = vld [vmem:[%s4276_s12 + $0x1e60] sm:$0xff]  ;;  %v7380_v62 = vld [vmem:[%s4276_s12 + $0x1e68] sm:$0x3f] }
 0x1ef   : > { %13781 = vst [vmem:[#allocation914_spill] sm:$0xff] %v7374_v41  ;;  %13782 = vst [vmem:[#allocation915_spill] sm:$0xff] %v7377_v40  ;;  %v7383_v37 = vld [vmem:[%s4276_s12 + $0x1e70] sm:$0xff]  ;;  %v7386_v55 = vld [vmem:[%s4276_s12 + $0x1e78] sm:$0x3f] }
 0x1f0   : > { %13783 = vst [vmem:[#allocation916_spill] sm:$0xff] %v7380_v62  ;;  %13784 = vst [vmem:[#allocation917_spill] sm:$0xff] %v7383_v37  ;;  %v7389_v56 = vld [vmem:[%s4276_s12 + $0x1e80] sm:$0xff]  ;;  %v7392_v50 = vld [vmem:[%s4276_s12 + $0x1e88] sm:$0x3f] }
 0x1f1   : > { %13785 = vst [vmem:[#allocation918_spill] sm:$0xff] %v7386_v55  ;;  %13786 = vst [vmem:[#allocation919_spill] sm:$0xff] %v7389_v56  ;;  %v7395_v41 = vld [vmem:[%s4276_s12 + $0x1e90] sm:$0xff]  ;;  %v7398_v40 = vld [vmem:[%s4276_s12 + $0x1e98] sm:$0x3f] }
 0x1f2   : > { %13787 = vst [vmem:[#allocation920_spill] sm:$0xff] %v7392_v50  ;;  %13788 = vst [vmem:[#allocation921_spill] sm:$0xff] %v7395_v41  ;;  %v7401_v62 = vld [vmem:[%s4276_s12 + $0x1ea0] sm:$0xff]  ;;  %v7404_v37 = vld [vmem:[%s4276_s12 + $0x1ea8] sm:$0x3f] }
 0x1f3   : > { %13789 = vst [vmem:[#allocation922_spill] sm:$0xff] %v7398_v40  ;;  %13790 = vst [vmem:[#allocation923_spill] sm:$0xff] %v7401_v62  ;;  %v7407_v55 = vld [vmem:[%s4276_s12 + $0x1eb0] sm:$0xff]  ;;  %v7410_v56 = vld [vmem:[%s4276_s12 + $0x1eb8] sm:$0x3f] }
 0x1f4   : > { %13791 = vst [vmem:[#allocation924_spill] sm:$0xff] %v7404_v37  ;;  %13792 = vst [vmem:[#allocation925_spill] sm:$0xff] %v7407_v55  ;;  %v7413_v50 = vld [vmem:[%s4276_s12 + $0x1ec0] sm:$0xff]  ;;  %v7416_v41 = vld [vmem:[%s4276_s12 + $0x1ec8] sm:$0x3f] }
 0x1f5   : > { %13793 = vst [vmem:[#allocation926_spill] sm:$0xff] %v7410_v56  ;;  %13794 = vst [vmem:[#allocation927_spill] sm:$0xff] %v7413_v50  ;;  %v7419_v40 = vld [vmem:[%s4276_s12 + $0x1ed0] sm:$0xff]  ;;  %v7422_v62 = vld [vmem:[%s4276_s12 + $0x1ed8] sm:$0x3f] }
 0x1f6   : > { %13795 = vst [vmem:[#allocation928_spill] sm:$0xff] %v7416_v41  ;;  %13796 = vst [vmem:[#allocation929_spill] sm:$0xff] %v7419_v40  ;;  %v7425_v37 = vld [vmem:[%s4276_s12 + $0x1ee0] sm:$0xff]  ;;  %v7428_v55 = vld [vmem:[%s4276_s12 + $0x1ee8] sm:$0x3f] }
 0x1f7   : > { %13797 = vst [vmem:[#allocation930_spill] sm:$0xff] %v7422_v62  ;;  %13798 = vst [vmem:[#allocation931_spill] sm:$0xff] %v7425_v37  ;;  %v7431_v56 = vld [vmem:[%s4276_s12 + $0x1ef0] sm:$0xff]  ;;  %v7434_v50 = vld [vmem:[%s4276_s12 + $0x1ef8] sm:$0x3f] }
 0x1f8   : > { %13799 = vst [vmem:[#allocation932_spill] sm:$0xff] %v7428_v55  ;;  %13800 = vst [vmem:[#allocation933_spill] sm:$0xff] %v7431_v56  ;;  %v7437_v41 = vld [vmem:[%s4276_s12 + $0x1f00] sm:$0xff]  ;;  %v7440_v40 = vld [vmem:[%s4276_s12 + $0x1f08] sm:$0x3f] }
 0x1f9   : > { %13801 = vst [vmem:[#allocation934_spill] sm:$0xff] %v7434_v50  ;;  %13802 = vst [vmem:[#allocation935_spill] sm:$0xff] %v7437_v41  ;;  %v7443_v62 = vld [vmem:[%s4276_s12 + $0x1f10] sm:$0xff]  ;;  %v7446_v37 = vld [vmem:[%s4276_s12 + $0x1f18] sm:$0x3f] }
 0x1fa   : > { %13803 = vst [vmem:[#allocation936_spill] sm:$0xff] %v7440_v40  ;;  %13804 = vst [vmem:[#allocation937_spill] sm:$0xff] %v7443_v62  ;;  %v7449_v55 = vld [vmem:[%s4276_s12 + $0x1f20] sm:$0xff]  ;;  %v7452_v56 = vld [vmem:[%s4276_s12 + $0x1f28] sm:$0x3f] }
 0x1fb   : > { %13805 = vst [vmem:[#allocation938_spill] sm:$0xff] %v7446_v37  ;;  %13806 = vst [vmem:[#allocation939_spill] sm:$0xff] %v7449_v55  ;;  %v7455_v50 = vld [vmem:[%s4276_s12 + $0x1f30] sm:$0xff]  ;;  %v7458_v41 = vld [vmem:[%s4276_s12 + $0x1f38] sm:$0x3f] }
 0x1fc   : > { %13807 = vst [vmem:[#allocation940_spill] sm:$0xff] %v7452_v56  ;;  %13808 = vst [vmem:[#allocation941_spill] sm:$0xff] %v7455_v50  ;;  %v7461_v40 = vld [vmem:[%s4276_s12 + $0x1f40] sm:$0xff]  ;;  %v7464_v62 = vld [vmem:[%s4276_s12 + $0x1f48] sm:$0x3f] }
 0x1fd   : > { %13809 = vst [vmem:[#allocation942_spill] sm:$0xff] %v7458_v41  ;;  %13810 = vst [vmem:[#allocation943_spill] sm:$0xff] %v7461_v40  ;;  %v7467_v37 = vld [vmem:[%s4276_s12 + $0x1f50] sm:$0xff]  ;;  %v7470_v55 = vld [vmem:[%s4276_s12 + $0x1f58] sm:$0x3f] }
 0x1fe   : > { %13811 = vst [vmem:[#allocation944_spill] sm:$0xff] %v7464_v62  ;;  %13812 = vst [vmem:[#allocation945_spill] sm:$0xff] %v7467_v37  ;;  %v7473_v56 = vld [vmem:[%s4276_s12 + $0x1f60] sm:$0xff]  ;;  %v7476_v50 = vld [vmem:[%s4276_s12 + $0x1f68] sm:$0x3f] }
 0x1ff   : > { %13813 = vst [vmem:[#allocation946_spill] sm:$0xff] %v7470_v55  ;;  %13814 = vst [vmem:[#allocation947_spill] sm:$0xff] %v7473_v56  ;;  %v7479_v41 = vld [vmem:[%s4276_s12 + $0x1f70] sm:$0xff]  ;;  %v7482_v40 = vld [vmem:[%s4276_s12 + $0x1f78] sm:$0x3f] }
 0x200   : > { %13815 = vst [vmem:[#allocation948_spill] sm:$0xff] %v7476_v50  ;;  %13816 = vst [vmem:[#allocation949_spill] sm:$0xff] %v7479_v41  ;;  %v7485_v62 = vld [vmem:[%s4276_s12 + $0x1f80] sm:$0xff]  ;;  %v7488_v37 = vld [vmem:[%s4276_s12 + $0x1f88] sm:$0x3f] }
 0x201   : > { %13817 = vst [vmem:[#allocation950_spill] sm:$0xff] %v7482_v40  ;;  %13818 = vst [vmem:[#allocation951_spill] sm:$0xff] %v7485_v62  ;;  %v7491_v55 = vld [vmem:[%s4276_s12 + $0x1f90] sm:$0xff]  ;;  %v7494_v56 = vld [vmem:[%s4276_s12 + $0x1f98] sm:$0x3f] }
 0x202   : > { %13819 = vst [vmem:[#allocation952_spill] sm:$0xff] %v7488_v37  ;;  %13820 = vst [vmem:[#allocation953_spill] sm:$0xff] %v7491_v55  ;;  %v7497_v50 = vld [vmem:[%s4276_s12 + $0x1fa0] sm:$0xff]  ;;  %v7500_v41 = vld [vmem:[%s4276_s12 + $0x1fa8] sm:$0x3f] }
 0x203   : > { %13821 = vst [vmem:[#allocation954_spill] sm:$0xff] %v7494_v56  ;;  %13822 = vst [vmem:[#allocation955_spill] sm:$0xff] %v7497_v50  ;;  %v7503_v40 = vld [vmem:[%s4276_s12 + $0x1fb0] sm:$0xff]  ;;  %v7506_v62 = vld [vmem:[%s4276_s12 + $0x1fb8] sm:$0x3f] }
 0x204   : > { %13823 = vst [vmem:[#allocation956_spill] sm:$0xff] %v7500_v41  ;;  %13824 = vst [vmem:[#allocation957_spill] sm:$0xff] %v7503_v40  ;;  %v7509_v37 = vld [vmem:[%s4276_s12 + $0x1fc0] sm:$0xff]  ;;  %v7512_v55 = vld [vmem:[%s4276_s12 + $0x1fc8] sm:$0x3f] }
 0x205   : > { %13825 = vst [vmem:[#allocation958_spill] sm:$0xff] %v7506_v62  ;;  %13826 = vst [vmem:[#allocation959_spill] sm:$0xff] %v7509_v37  ;;  %v7515_v56 = vld [vmem:[%s4276_s12 + $0x1fd0] sm:$0xff]  ;;  %v7518_v50 = vld [vmem:[%s4276_s12 + $0x1fd8] sm:$0x3f] }
 0x206   : > { %13827 = vst [vmem:[#allocation960_spill] sm:$0xff] %v7512_v55  ;;  %13828 = vst [vmem:[#allocation961_spill] sm:$0xff] %v7515_v56  ;;  %v7521_v41 = vld [vmem:[%s4276_s12 + $0x1fe0] sm:$0xff]  ;;  %v7524_v40 = vld [vmem:[%s4276_s12 + $0x1fe8] sm:$0x3f] }
 0x207   : > { %13829 = vst [vmem:[#allocation962_spill] sm:$0xff] %v7518_v50  ;;  %13830 = vst [vmem:[#allocation963_spill] sm:$0xff] %v7521_v41  ;;  %v7527_v62 = vld [vmem:[%s4276_s12 + $0x1ff0] sm:$0xff]  ;;  %v7530_v37 = vld [vmem:[%s4276_s12 + $0x1ff8] sm:$0x3f] }
 0x208   : > { %13831 = vst [vmem:[#allocation964_spill] sm:$0xff] %v7524_v40  ;;  %13832 = vst [vmem:[#allocation965_spill] sm:$0xff] %v7527_v62  ;;  %v7533_v55 = vld [vmem:[%s4276_s12 + $0x2000] sm:$0xff]  ;;  %v7536_v56 = vld [vmem:[%s4276_s12 + $0x2008] sm:$0x3f] }
 0x209   : > { %13833 = vst [vmem:[#allocation966_spill] sm:$0xff] %v7530_v37  ;;  %13834 = vst [vmem:[#allocation967_spill] sm:$0xff] %v7533_v55  ;;  %v7539_v50 = vld [vmem:[%s4276_s12 + $0x2010] sm:$0xff]  ;;  %v7542_v41 = vld [vmem:[%s4276_s12 + $0x2018] sm:$0x3f] }
 0x20a   : > { %13835 = vst [vmem:[#allocation968_spill] sm:$0xff] %v7536_v56  ;;  %13836 = vst [vmem:[#allocation969_spill] sm:$0xff] %v7539_v50  ;;  %v7545_v40 = vld [vmem:[%s4276_s12 + $0x2020] sm:$0xff]  ;;  %v7548_v62 = vld [vmem:[%s4276_s12 + $0x2028] sm:$0x3f] }
 0x20b   : > { %13837 = vst [vmem:[#allocation970_spill] sm:$0xff] %v7542_v41  ;;  %13838 = vst [vmem:[#allocation971_spill] sm:$0xff] %v7545_v40  ;;  %v7551_v37 = vld [vmem:[%s4276_s12 + $0x2030] sm:$0xff]  ;;  %v7554_v55 = vld [vmem:[%s4276_s12 + $0x2038] sm:$0x3f] }
 0x20c   : > { %13839 = vst [vmem:[#allocation972_spill] sm:$0xff] %v7548_v62  ;;  %13840 = vst [vmem:[#allocation973_spill] sm:$0xff] %v7551_v37  ;;  %v7557_v56 = vld [vmem:[%s4276_s12 + $0x2040] sm:$0xff]  ;;  %v7560_v50 = vld [vmem:[%s4276_s12 + $0x2048] sm:$0x3f] }
 0x20d   : > { %13841 = vst [vmem:[#allocation974_spill] sm:$0xff] %v7554_v55  ;;  %13842 = vst [vmem:[#allocation975_spill] sm:$0xff] %v7557_v56  ;;  %v7563_v41 = vld [vmem:[%s4276_s12 + $0x2050] sm:$0xff]  ;;  %v7566_v40 = vld [vmem:[%s4276_s12 + $0x2058] sm:$0x3f] }
 0x20e   : > { %13843 = vst [vmem:[#allocation976_spill] sm:$0xff] %v7560_v50  ;;  %13844 = vst [vmem:[#allocation977_spill] sm:$0xff] %v7563_v41  ;;  %v7569_v62 = vld [vmem:[%s4276_s12 + $0x2060] sm:$0xff]  ;;  %v7572_v37 = vld [vmem:[%s4276_s12 + $0x2068] sm:$0x3f] }
 0x20f   : > { %13845 = vst [vmem:[#allocation978_spill] sm:$0xff] %v7566_v40  ;;  %13846 = vst [vmem:[#allocation979_spill] sm:$0xff] %v7569_v62  ;;  %v7575_v55 = vld [vmem:[%s4276_s12 + $0x2070] sm:$0xff]  ;;  %v7578_v56 = vld [vmem:[%s4276_s12 + $0x2078] sm:$0x3f] }
 0x210   : > { %13847 = vst [vmem:[#allocation980_spill] sm:$0xff] %v7572_v37  ;;  %13848 = vst [vmem:[#allocation981_spill] sm:$0xff] %v7575_v55  ;;  %v7581_v50 = vld [vmem:[%s4276_s12 + $0x2080] sm:$0xff]  ;;  %v7584_v41 = vld [vmem:[%s4276_s12 + $0x2088] sm:$0x3f] }
 0x211   : > { %13849 = vst [vmem:[#allocation982_spill] sm:$0xff] %v7578_v56  ;;  %13850 = vst [vmem:[#allocation983_spill] sm:$0xff] %v7581_v50  ;;  %v7587_v40 = vld [vmem:[%s4276_s12 + $0x2090] sm:$0xff]  ;;  %v7590_v62 = vld [vmem:[%s4276_s12 + $0x2098] sm:$0x3f] }
 0x212   : > { %13851 = vst [vmem:[#allocation984_spill] sm:$0xff] %v7584_v41  ;;  %13852 = vst [vmem:[#allocation985_spill] sm:$0xff] %v7587_v40  ;;  %v7593_v37 = vld [vmem:[%s4276_s12 + $0x20a0] sm:$0xff]  ;;  %v7596_v55 = vld [vmem:[%s4276_s12 + $0x20a8] sm:$0x3f] }
 0x213   : > { %13853 = vst [vmem:[#allocation986_spill] sm:$0xff] %v7590_v62  ;;  %13854 = vst [vmem:[#allocation987_spill] sm:$0xff] %v7593_v37  ;;  %v7599_v56 = vld [vmem:[%s4276_s12 + $0x20b0] sm:$0xff]  ;;  %v7602_v50 = vld [vmem:[%s4276_s12 + $0x20b8] sm:$0x3f] }
 0x214   : > { %13855 = vst [vmem:[#allocation988_spill] sm:$0xff] %v7596_v55  ;;  %13856 = vst [vmem:[#allocation989_spill] sm:$0xff] %v7599_v56  ;;  %v7605_v41 = vld [vmem:[%s4276_s12 + $0x20c0] sm:$0xff]  ;;  %v7608_v40 = vld [vmem:[%s4276_s12 + $0x20c8] sm:$0x3f] }
 0x215   : > { %13857 = vst [vmem:[#allocation990_spill] sm:$0xff] %v7602_v50  ;;  %13858 = vst [vmem:[#allocation991_spill] sm:$0xff] %v7605_v41  ;;  %v7611_v62 = vld [vmem:[%s4276_s12 + $0x20d0] sm:$0xff]  ;;  %v7614_v37 = vld [vmem:[%s4276_s12 + $0x20d8] sm:$0x3f] }
 0x216   : > { %13859 = vst [vmem:[#allocation992_spill] sm:$0xff] %v7608_v40  ;;  %13860 = vst [vmem:[#allocation993_spill] sm:$0xff] %v7611_v62  ;;  %v7617_v55 = vld [vmem:[%s4276_s12 + $0x20e0] sm:$0xff]  ;;  %v7620_v56 = vld [vmem:[%s4276_s12 + $0x20e8] sm:$0x3f] }
 0x217   : > { %13861 = vst [vmem:[#allocation994_spill] sm:$0xff] %v7614_v37  ;;  %13862 = vst [vmem:[#allocation995_spill] sm:$0xff] %v7617_v55  ;;  %v7623_v50 = vld [vmem:[%s4276_s12 + $0x20f0] sm:$0xff]  ;;  %v7626_v41 = vld [vmem:[%s4276_s12 + $0x20f8] sm:$0x3f] }
 0x218   : > { %13863 = vst [vmem:[#allocation996_spill] sm:$0xff] %v7620_v56  ;;  %13864 = vst [vmem:[#allocation997_spill] sm:$0xff] %v7623_v50  ;;  %v7629_v40 = vld [vmem:[%s4276_s12 + $0x2100] sm:$0xff]  ;;  %v7632_v62 = vld [vmem:[%s4276_s12 + $0x2108] sm:$0x3f] }
 0x219   : > { %13865 = vst [vmem:[#allocation998_spill] sm:$0xff] %v7626_v41  ;;  %13866 = vst [vmem:[#allocation999_spill] sm:$0xff] %v7629_v40  ;;  %v7635_v37 = vld [vmem:[%s4276_s12 + $0x2110] sm:$0xff]  ;;  %v7638_v55 = vld [vmem:[%s4276_s12 + $0x2118] sm:$0x3f] }
 0x21a   : > { %13867 = vst [vmem:[#allocation1000_spill] sm:$0xff] %v7632_v62  ;;  %13868 = vst [vmem:[#allocation1001_spill] sm:$0xff] %v7635_v37  ;;  %v7641_v56 = vld [vmem:[%s4276_s12 + $0x2120] sm:$0xff]  ;;  %v7644_v50 = vld [vmem:[%s4276_s12 + $0x2128] sm:$0x3f] }
 0x21b   : > { %13869 = vst [vmem:[#allocation1002_spill] sm:$0xff] %v7638_v55  ;;  %13870 = vst [vmem:[#allocation1003_spill] sm:$0xff] %v7641_v56  ;;  %v7647_v41 = vld [vmem:[%s4276_s12 + $0x2130] sm:$0xff]  ;;  %v7650_v40 = vld [vmem:[%s4276_s12 + $0x2138] sm:$0x3f] }
 0x21c   : > { %13871 = vst [vmem:[#allocation1004_spill] sm:$0xff] %v7644_v50  ;;  %13872 = vst [vmem:[#allocation1005_spill] sm:$0xff] %v7647_v41  ;;  %v7653_v62 = vld [vmem:[%s4276_s12 + $0x2140] sm:$0xff]  ;;  %v7656_v37 = vld [vmem:[%s4276_s12 + $0x2148] sm:$0x3f] }
 0x21d   : > { %13873 = vst [vmem:[#allocation1006_spill] sm:$0xff] %v7650_v40  ;;  %13874 = vst [vmem:[#allocation1007_spill] sm:$0xff] %v7653_v62  ;;  %v7659_v55 = vld [vmem:[%s4276_s12 + $0x2150] sm:$0xff]  ;;  %v7662_v56 = vld [vmem:[%s4276_s12 + $0x2158] sm:$0x3f] }
 0x21e   : > { %13875 = vst [vmem:[#allocation1008_spill] sm:$0xff] %v7656_v37  ;;  %13876 = vst [vmem:[#allocation1009_spill] sm:$0xff] %v7659_v55  ;;  %v7665_v50 = vld [vmem:[%s4276_s12 + $0x2160] sm:$0xff]  ;;  %v7668_v41 = vld [vmem:[%s4276_s12 + $0x2168] sm:$0x3f] }
 0x21f   : > { %13877 = vst [vmem:[#allocation1010_spill] sm:$0xff] %v7662_v56  ;;  %13878 = vst [vmem:[#allocation1011_spill] sm:$0xff] %v7665_v50  ;;  %v7671_v40 = vld [vmem:[%s4276_s12 + $0x2170] sm:$0xff]  ;;  %v7674_v62 = vld [vmem:[%s4276_s12 + $0x2178] sm:$0x3f] }
 0x220   : > { %13879 = vst [vmem:[#allocation1012_spill] sm:$0xff] %v7668_v41  ;;  %13880 = vst [vmem:[#allocation1013_spill] sm:$0xff] %v7671_v40  ;;  %v7677_v37 = vld [vmem:[%s4276_s12 + $0x2180] sm:$0xff]  ;;  %v7680_v55 = vld [vmem:[%s4276_s12 + $0x2188] sm:$0x3f] }
 0x221   : > { %13881 = vst [vmem:[#allocation1014_spill] sm:$0xff] %v7674_v62  ;;  %13882 = vst [vmem:[#allocation1015_spill] sm:$0xff] %v7677_v37  ;;  %v7683_v56 = vld [vmem:[%s4276_s12 + $0x2190] sm:$0xff]  ;;  %v7686_v50 = vld [vmem:[%s4276_s12 + $0x2198] sm:$0x3f] }
 0x222   : > { %13883 = vst [vmem:[#allocation1016_spill] sm:$0xff] %v7680_v55  ;;  %13884 = vst [vmem:[#allocation1017_spill] sm:$0xff] %v7683_v56  ;;  %v7689_v41 = vld [vmem:[%s4276_s12 + $0x21a0] sm:$0xff]  ;;  %v7692_v40 = vld [vmem:[%s4276_s12 + $0x21a8] sm:$0x3f] }
 0x223   : > { %13885 = vst [vmem:[#allocation1018_spill] sm:$0xff] %v7686_v50  ;;  %13886 = vst [vmem:[#allocation1019_spill] sm:$0xff] %v7689_v41  ;;  %v7695_v62 = vld [vmem:[%s4276_s12 + $0x21b0] sm:$0xff]  ;;  %v7698_v37 = vld [vmem:[%s4276_s12 + $0x21b8] sm:$0x3f] }
 0x224   : > { %13887 = vst [vmem:[#allocation1020_spill] sm:$0xff] %v7692_v40  ;;  %13888 = vst [vmem:[#allocation1021_spill] sm:$0xff] %v7695_v62  ;;  %v7701_v55 = vld [vmem:[%s4276_s12 + $0x21c0] sm:$0xff]  ;;  %v7704_v56 = vld [vmem:[%s4276_s12 + $0x21c8] sm:$0x3f] }
 0x225   : > { %13889 = vst [vmem:[#allocation1022_spill] sm:$0xff] %v7698_v37  ;;  %13890 = vst [vmem:[#allocation1023_spill] sm:$0xff] %v7701_v55  ;;  %v7707_v50 = vld [vmem:[%s4276_s12 + $0x21d0] sm:$0xff]  ;;  %v7710_v41 = vld [vmem:[%s4276_s12 + $0x21d8] sm:$0x3f] }
 0x226   : > { %13891 = vst [vmem:[#allocation1024_spill] sm:$0xff] %v7704_v56  ;;  %13892 = vst [vmem:[#allocation1025_spill] sm:$0xff] %v7707_v50  ;;  %v7713_v40 = vld [vmem:[%s4276_s12 + $0x21e0] sm:$0xff]  ;;  %v7716_v62 = vld [vmem:[%s4276_s12 + $0x21e8] sm:$0x3f] }
 0x227   : > { %13893 = vst [vmem:[#allocation1026_spill] sm:$0xff] %v7710_v41  ;;  %13894 = vst [vmem:[#allocation1027_spill] sm:$0xff] %v7713_v40  ;;  %v7719_v37 = vld [vmem:[%s4276_s12 + $0x21f0] sm:$0xff]  ;;  %v7722_v55 = vld [vmem:[%s4276_s12 + $0x21f8] sm:$0x3f] }
 0x228   : > { %13895 = vst [vmem:[#allocation1028_spill] sm:$0xff] %v7716_v62  ;;  %13896 = vst [vmem:[#allocation1029_spill] sm:$0xff] %v7719_v37  ;;  %v7725_v56 = vld [vmem:[%s4276_s12 + $0x2200] sm:$0xff]  ;;  %v7728_v50 = vld [vmem:[%s4276_s12 + $0x2208] sm:$0x3f] }
 0x229   : > { %13897 = vst [vmem:[#allocation1030_spill] sm:$0xff] %v7722_v55  ;;  %13898 = vst [vmem:[#allocation1031_spill] sm:$0xff] %v7725_v56  ;;  %v7731_v41 = vld [vmem:[%s4276_s12 + $0x2210] sm:$0xff]  ;;  %v7734_v40 = vld [vmem:[%s4276_s12 + $0x2218] sm:$0x3f] }
 0x22a   : > { %13899 = vst [vmem:[#allocation1032_spill] sm:$0xff] %v7728_v50  ;;  %13900 = vst [vmem:[#allocation1033_spill] sm:$0xff] %v7731_v41  ;;  %v7737_v62 = vld [vmem:[%s4276_s12 + $0x2220] sm:$0xff]  ;;  %v7740_v37 = vld [vmem:[%s4276_s12 + $0x2228] sm:$0x3f] }
 0x22b   : > { %13901 = vst [vmem:[#allocation1034_spill] sm:$0xff] %v7734_v40  ;;  %13902 = vst [vmem:[#allocation1035_spill] sm:$0xff] %v7737_v62  ;;  %v7743_v55 = vld [vmem:[%s4276_s12 + $0x2230] sm:$0xff]  ;;  %v7746_v56 = vld [vmem:[%s4276_s12 + $0x2238] sm:$0x3f] }
 0x22c   : > { %13903 = vst [vmem:[#allocation1036_spill] sm:$0xff] %v7740_v37  ;;  %13904 = vst [vmem:[#allocation1037_spill] sm:$0xff] %v7743_v55  ;;  %v7749_v50 = vld [vmem:[%s4276_s12 + $0x2240] sm:$0xff]  ;;  %v7752_v41 = vld [vmem:[%s4276_s12 + $0x2248] sm:$0x3f] }
 0x22d   : > { %13905 = vst [vmem:[#allocation1038_spill] sm:$0xff] %v7746_v56  ;;  %13906 = vst [vmem:[#allocation1039_spill] sm:$0xff] %v7749_v50  ;;  %v7755_v40 = vld [vmem:[%s4276_s12 + $0x2250] sm:$0xff]  ;;  %v7758_v62 = vld [vmem:[%s4276_s12 + $0x2258] sm:$0x3f] }
 0x22e   : > { %13907 = vst [vmem:[#allocation1040_spill] sm:$0xff] %v7752_v41  ;;  %13908 = vst [vmem:[#allocation1041_spill] sm:$0xff] %v7755_v40  ;;  %v7761_v37 = vld [vmem:[%s4276_s12 + $0x2260] sm:$0xff]  ;;  %v7764_v55 = vld [vmem:[%s4276_s12 + $0x2268] sm:$0x3f] }
 0x22f   : > { %13909 = vst [vmem:[#allocation1042_spill] sm:$0xff] %v7758_v62  ;;  %13910 = vst [vmem:[#allocation1043_spill] sm:$0xff] %v7761_v37  ;;  %v7767_v56 = vld [vmem:[%s4276_s12 + $0x2270] sm:$0xff]  ;;  %v7770_v50 = vld [vmem:[%s4276_s12 + $0x2278] sm:$0x3f] }
 0x230   : > { %13911 = vst [vmem:[#allocation1044_spill] sm:$0xff] %v7764_v55  ;;  %13912 = vst [vmem:[#allocation1045_spill] sm:$0xff] %v7767_v56  ;;  %v7773_v41 = vld [vmem:[%s4276_s12 + $0x2280] sm:$0xff]  ;;  %v7776_v40 = vld [vmem:[%s4276_s12 + $0x2288] sm:$0x3f] }
 0x231   : > { %13913 = vst [vmem:[#allocation1046_spill] sm:$0xff] %v7770_v50  ;;  %13914 = vst [vmem:[#allocation1047_spill] sm:$0xff] %v7773_v41  ;;  %v7779_v62 = vld [vmem:[%s4276_s12 + $0x2290] sm:$0xff]  ;;  %v7782_v37 = vld [vmem:[%s4276_s12 + $0x2298] sm:$0x3f] }
 0x232   : > { %13915 = vst [vmem:[#allocation1048_spill] sm:$0xff] %v7776_v40  ;;  %13916 = vst [vmem:[#allocation1049_spill] sm:$0xff] %v7779_v62  ;;  %v7785_v55 = vld [vmem:[%s4276_s12 + $0x22a0] sm:$0xff]  ;;  %v7788_v56 = vld [vmem:[%s4276_s12 + $0x22a8] sm:$0x3f] }
 0x233   : > { %13917 = vst [vmem:[#allocation1050_spill] sm:$0xff] %v7782_v37  ;;  %13918 = vst [vmem:[#allocation1051_spill] sm:$0xff] %v7785_v55  ;;  %v7791_v50 = vld [vmem:[%s4276_s12 + $0x22b0] sm:$0xff]  ;;  %v7794_v41 = vld [vmem:[%s4276_s12 + $0x22b8] sm:$0x3f] }
 0x234   : > { %13919 = vst [vmem:[#allocation1052_spill] sm:$0xff] %v7788_v56  ;;  %13920 = vst [vmem:[#allocation1053_spill] sm:$0xff] %v7791_v50  ;;  %v7797_v40 = vld [vmem:[%s4276_s12 + $0x22c0] sm:$0xff]  ;;  %v7800_v62 = vld [vmem:[%s4276_s12 + $0x22c8] sm:$0x3f] }
 0x235   : > { %13921 = vst [vmem:[#allocation1054_spill] sm:$0xff] %v7794_v41  ;;  %13922 = vst [vmem:[#allocation1055_spill] sm:$0xff] %v7797_v40  ;;  %v7803_v37 = vld [vmem:[%s4276_s12 + $0x22d0] sm:$0xff]  ;;  %v7806_v55 = vld [vmem:[%s4276_s12 + $0x22d8] sm:$0x3f] }
 0x236   : > { %13923 = vst [vmem:[#allocation1056_spill] sm:$0xff] %v7800_v62  ;;  %13924 = vst [vmem:[#allocation1057_spill] sm:$0xff] %v7803_v37  ;;  %v7809_v56 = vld [vmem:[%s4276_s12 + $0x22e0] sm:$0xff]  ;;  %v7812_v50 = vld [vmem:[%s4276_s12 + $0x22e8] sm:$0x3f] }
 0x237   : > { %13925 = vst [vmem:[#allocation1058_spill] sm:$0xff] %v7806_v55  ;;  %13926 = vst [vmem:[#allocation1059_spill] sm:$0xff] %v7809_v56  ;;  %v7815_v41 = vld [vmem:[%s4276_s12 + $0x22f0] sm:$0xff]  ;;  %v7818_v40 = vld [vmem:[%s4276_s12 + $0x22f8] sm:$0x3f] }
 0x238   : > { %13927 = vst [vmem:[#allocation1060_spill] sm:$0xff] %v7812_v50  ;;  %13928 = vst [vmem:[#allocation1061_spill] sm:$0xff] %v7815_v41  ;;  %v7821_v62 = vld [vmem:[%s4276_s12 + $0x2300] sm:$0xff]  ;;  %v7824_v37 = vld [vmem:[%s4276_s12 + $0x2308] sm:$0x3f] }
 0x239   : > { %13929 = vst [vmem:[#allocation1062_spill] sm:$0xff] %v7818_v40  ;;  %13930 = vst [vmem:[#allocation1063_spill] sm:$0xff] %v7821_v62  ;;  %v7827_v55 = vld [vmem:[%s4276_s12 + $0x2310] sm:$0xff]  ;;  %v7830_v56 = vld [vmem:[%s4276_s12 + $0x2318] sm:$0x3f] }
 0x23a   : > { %13931 = vst [vmem:[#allocation1064_spill] sm:$0xff] %v7824_v37  ;;  %13932 = vst [vmem:[#allocation1065_spill] sm:$0xff] %v7827_v55  ;;  %v7833_v50 = vld [vmem:[%s4276_s12 + $0x2320] sm:$0xff]  ;;  %v7836_v41 = vld [vmem:[%s4276_s12 + $0x2328] sm:$0x3f] }
 0x23b   : > { %13933 = vst [vmem:[#allocation1066_spill] sm:$0xff] %v7830_v56  ;;  %13934 = vst [vmem:[#allocation1067_spill] sm:$0xff] %v7833_v50  ;;  %v7839_v40 = vld [vmem:[%s4276_s12 + $0x2330] sm:$0xff]  ;;  %v7842_v62 = vld [vmem:[%s4276_s12 + $0x2338] sm:$0x3f] }
 0x23c   : > { %13935 = vst [vmem:[#allocation1068_spill] sm:$0xff] %v7836_v41  ;;  %13936 = vst [vmem:[#allocation1069_spill] sm:$0xff] %v7839_v40  ;;  %v7845_v37 = vld [vmem:[%s4276_s12 + $0x2340] sm:$0xff]  ;;  %v7848_v55 = vld [vmem:[%s4276_s12 + $0x2348] sm:$0x3f] }
 0x23d   : > { %13937 = vst [vmem:[#allocation1070_spill] sm:$0xff] %v7842_v62  ;;  %13938 = vst [vmem:[#allocation1071_spill] sm:$0xff] %v7845_v37  ;;  %v7851_v56 = vld [vmem:[%s4276_s12 + $0x2350] sm:$0xff]  ;;  %v7854_v50 = vld [vmem:[%s4276_s12 + $0x2358] sm:$0x3f] }
 0x23e   : > { %13939 = vst [vmem:[#allocation1072_spill] sm:$0xff] %v7848_v55  ;;  %13940 = vst [vmem:[#allocation1073_spill] sm:$0xff] %v7851_v56  ;;  %v7857_v41 = vld [vmem:[%s4276_s12 + $0x2360] sm:$0xff]  ;;  %v7860_v40 = vld [vmem:[%s4276_s12 + $0x2368] sm:$0x3f] }
 0x23f   : > { %13941 = vst [vmem:[#allocation1074_spill] sm:$0xff] %v7854_v50  ;;  %13942 = vst [vmem:[#allocation1075_spill] sm:$0xff] %v7857_v41  ;;  %v7863_v62 = vld [vmem:[%s4276_s12 + $0x2370] sm:$0xff]  ;;  %v7866_v37 = vld [vmem:[%s4276_s12 + $0x2378] sm:$0x3f] }
 0x240   : > { %13943 = vst [vmem:[#allocation1076_spill] sm:$0xff] %v7860_v40  ;;  %13944 = vst [vmem:[#allocation1077_spill] sm:$0xff] %v7863_v62  ;;  %v7869_v55 = vld [vmem:[%s4276_s12 + $0x2380] sm:$0xff]  ;;  %v7872_v56 = vld [vmem:[%s4276_s12 + $0x2388] sm:$0x3f] }
 0x241   : > { %13945 = vst [vmem:[#allocation1078_spill] sm:$0xff] %v7866_v37  ;;  %13946 = vst [vmem:[#allocation1079_spill] sm:$0xff] %v7869_v55  ;;  %v7875_v50 = vld [vmem:[%s4276_s12 + $0x2390] sm:$0xff]  ;;  %v7878_v41 = vld [vmem:[%s4276_s12 + $0x2398] sm:$0x3f] }
 0x242   : > { %13947 = vst [vmem:[#allocation1080_spill] sm:$0xff] %v7872_v56  ;;  %13948 = vst [vmem:[#allocation1081_spill] sm:$0xff] %v7875_v50  ;;  %v7881_v40 = vld [vmem:[%s4276_s12 + $0x23a0] sm:$0xff]  ;;  %v7884_v62 = vld [vmem:[%s4276_s12 + $0x23a8] sm:$0x3f] }
 0x243   : > { %13949 = vst [vmem:[#allocation1082_spill] sm:$0xff] %v7878_v41  ;;  %13950 = vst [vmem:[#allocation1083_spill] sm:$0xff] %v7881_v40  ;;  %v7887_v37 = vld [vmem:[%s4276_s12 + $0x23b0] sm:$0xff]  ;;  %v7890_v55 = vld [vmem:[%s4276_s12 + $0x23b8] sm:$0x3f] }
 0x244   : > { %13951 = vst [vmem:[#allocation1084_spill] sm:$0xff] %v7884_v62  ;;  %13952 = vst [vmem:[#allocation1085_spill] sm:$0xff] %v7887_v37  ;;  %v7893_v56 = vld [vmem:[%s4276_s12 + $0x23c0] sm:$0xff]  ;;  %v7896_v50 = vld [vmem:[%s4276_s12 + $0x23c8] sm:$0x3f] }
 0x245   : > { %13953 = vst [vmem:[#allocation1086_spill] sm:$0xff] %v7890_v55  ;;  %13954 = vst [vmem:[#allocation1087_spill] sm:$0xff] %v7893_v56  ;;  %v7899_v41 = vld [vmem:[%s4276_s12 + $0x23d0] sm:$0xff]  ;;  %v7902_v40 = vld [vmem:[%s4276_s12 + $0x23d8] sm:$0x3f] }
 0x246   : > { %13955 = vst [vmem:[#allocation1088_spill] sm:$0xff] %v7896_v50  ;;  %13956 = vst [vmem:[#allocation1089_spill] sm:$0xff] %v7899_v41  ;;  %v7905_v62 = vld [vmem:[%s4276_s12 + $0x23e0] sm:$0xff]  ;;  %v7908_v37 = vld [vmem:[%s4276_s12 + $0x23e8] sm:$0x3f] }
 0x247   : > { %13957 = vst [vmem:[#allocation1090_spill] sm:$0xff] %v7902_v40  ;;  %13958 = vst [vmem:[#allocation1091_spill] sm:$0xff] %v7905_v62  ;;  %v7911_v55 = vld [vmem:[%s4276_s12 + $0x23f0] sm:$0xff]  ;;  %v7914_v56 = vld [vmem:[%s4276_s12 + $0x23f8] sm:$0x3f] }
 0x248   : > { %13959 = vst [vmem:[#allocation1092_spill] sm:$0xff] %v7908_v37  ;;  %13960 = vst [vmem:[#allocation1093_spill] sm:$0xff] %v7911_v55  ;;  %v7917_v50 = vld [vmem:[%s4276_s12 + $0x2400] sm:$0xff]  ;;  %v7920_v41 = vld [vmem:[%s4276_s12 + $0x2408] sm:$0x3f] }
 0x249   : > { %13961 = vst [vmem:[#allocation1094_spill] sm:$0xff] %v7914_v56  ;;  %13962 = vst [vmem:[#allocation1095_spill] sm:$0xff] %v7917_v50  ;;  %v7923_v40 = vld [vmem:[%s4276_s12 + $0x2410] sm:$0xff]  ;;  %v7926_v62 = vld [vmem:[%s4276_s12 + $0x2418] sm:$0x3f] }
 0x24a   : > { %13963 = vst [vmem:[#allocation1096_spill] sm:$0xff] %v7920_v41  ;;  %13964 = vst [vmem:[#allocation1097_spill] sm:$0xff] %v7923_v40  ;;  %v7929_v37 = vld [vmem:[%s4276_s12 + $0x2420] sm:$0xff]  ;;  %v7932_v55 = vld [vmem:[%s4276_s12 + $0x2428] sm:$0x3f] }
 0x24b   : > { %13965 = vst [vmem:[#allocation1098_spill] sm:$0xff] %v7926_v62  ;;  %13966 = vst [vmem:[#allocation1099_spill] sm:$0xff] %v7929_v37  ;;  %v7935_v56 = vld [vmem:[%s4276_s12 + $0x2430] sm:$0xff]  ;;  %v7938_v50 = vld [vmem:[%s4276_s12 + $0x2438] sm:$0x3f] }
 0x24c   : > { %13967 = vst [vmem:[#allocation1100_spill] sm:$0xff] %v7932_v55  ;;  %13968 = vst [vmem:[#allocation1101_spill] sm:$0xff] %v7935_v56  ;;  %v7941_v41 = vld [vmem:[%s4276_s12 + $0x2440] sm:$0xff]  ;;  %v7944_v40 = vld [vmem:[%s4276_s12 + $0x2448] sm:$0x3f] }
 0x24d   : > { %13969 = vst [vmem:[#allocation1102_spill] sm:$0xff] %v7938_v50  ;;  %13970 = vst [vmem:[#allocation1103_spill] sm:$0xff] %v7941_v41  ;;  %v7947_v62 = vld [vmem:[%s4276_s12 + $0x2450] sm:$0xff]  ;;  %v7950_v37 = vld [vmem:[%s4276_s12 + $0x2458] sm:$0x3f] }
 0x24e   : > { %13971 = vst [vmem:[#allocation1104_spill] sm:$0xff] %v7944_v40  ;;  %13972 = vst [vmem:[#allocation1105_spill] sm:$0xff] %v7947_v62  ;;  %v7953_v55 = vld [vmem:[%s4276_s12 + $0x2460] sm:$0xff]  ;;  %v7956_v56 = vld [vmem:[%s4276_s12 + $0x2468] sm:$0x3f] }
 0x24f   : > { %13973 = vst [vmem:[#allocation1106_spill] sm:$0xff] %v7950_v37  ;;  %13974 = vst [vmem:[#allocation1107_spill] sm:$0xff] %v7953_v55  ;;  %v7959_v50 = vld [vmem:[%s4276_s12 + $0x2470] sm:$0xff]  ;;  %v7962_v41 = vld [vmem:[%s4276_s12 + $0x2478] sm:$0x3f] }
 0x250   : > { %13975 = vst [vmem:[#allocation1108_spill] sm:$0xff] %v7956_v56  ;;  %13976 = vst [vmem:[#allocation1109_spill] sm:$0xff] %v7959_v50  ;;  %v7965_v40 = vld [vmem:[%s4276_s12 + $0x2480] sm:$0xff]  ;;  %v7968_v62 = vld [vmem:[%s4276_s12 + $0x2488] sm:$0x3f] }
 0x251   : > { %13977 = vst [vmem:[#allocation1110_spill] sm:$0xff] %v7962_v41  ;;  %13978 = vst [vmem:[#allocation1111_spill] sm:$0xff] %v7965_v40  ;;  %v7971_v37 = vld [vmem:[%s4276_s12 + $0x2490] sm:$0xff]  ;;  %v7974_v55 = vld [vmem:[%s4276_s12 + $0x2498] sm:$0x3f] }
 0x252   : > { %13979 = vst [vmem:[#allocation1112_spill] sm:$0xff] %v7968_v62  ;;  %13980 = vst [vmem:[#allocation1113_spill] sm:$0xff] %v7971_v37  ;;  %v7977_v56 = vld [vmem:[%s4276_s12 + $0x24a0] sm:$0xff]  ;;  %v7980_v50 = vld [vmem:[%s4276_s12 + $0x24a8] sm:$0x3f] }
 0x253   : > { %13981 = vst [vmem:[#allocation1114_spill] sm:$0xff] %v7974_v55  ;;  %13982 = vst [vmem:[#allocation1115_spill] sm:$0xff] %v7977_v56  ;;  %v7983_v41 = vld [vmem:[%s4276_s12 + $0x24b0] sm:$0xff]  ;;  %v7986_v40 = vld [vmem:[%s4276_s12 + $0x24b8] sm:$0x3f] }
 0x254   : > { %13983 = vst [vmem:[#allocation1116_spill] sm:$0xff] %v7980_v50  ;;  %13984 = vst [vmem:[#allocation1117_spill] sm:$0xff] %v7983_v41  ;;  %v7989_v62 = vld [vmem:[%s4276_s12 + $0x24c0] sm:$0xff]  ;;  %v7992_v37 = vld [vmem:[%s4276_s12 + $0x24c8] sm:$0x3f] }
 0x255   : > { %13985 = vst [vmem:[#allocation1118_spill] sm:$0xff] %v7986_v40  ;;  %13986 = vst [vmem:[#allocation1119_spill] sm:$0xff] %v7989_v62  ;;  %v7995_v55 = vld [vmem:[%s4276_s12 + $0x24d0] sm:$0xff]  ;;  %v7998_v56 = vld [vmem:[%s4276_s12 + $0x24d8] sm:$0x3f] }
 0x256   : > { %13987 = vst [vmem:[#allocation1120_spill] sm:$0xff] %v7992_v37  ;;  %13988 = vst [vmem:[#allocation1121_spill] sm:$0xff] %v7995_v55  ;;  %v8001_v50 = vld [vmem:[%s4276_s12 + $0x24e0] sm:$0xff]  ;;  %v8004_v41 = vld [vmem:[%s4276_s12 + $0x24e8] sm:$0x3f] }
 0x257   : > { %13989 = vst [vmem:[#allocation1122_spill] sm:$0xff] %v7998_v56  ;;  %13990 = vst [vmem:[#allocation1123_spill] sm:$0xff] %v8001_v50  ;;  %v8007_v40 = vld [vmem:[%s4276_s12 + $0x24f0] sm:$0xff]  ;;  %v8010_v62 = vld [vmem:[%s4276_s12 + $0x24f8] sm:$0x3f] }
 0x258   : > { %13991 = vst [vmem:[#allocation1124_spill] sm:$0xff] %v8004_v41  ;;  %13992 = vst [vmem:[#allocation1125_spill] sm:$0xff] %v8007_v40  ;;  %v8013_v37 = vld [vmem:[%s4276_s12 + $0x2500] sm:$0xff]  ;;  %v8016_v55 = vld [vmem:[%s4276_s12 + $0x2508] sm:$0x3f] }
 0x259   : > { %13993 = vst [vmem:[#allocation1126_spill] sm:$0xff] %v8010_v62  ;;  %13994 = vst [vmem:[#allocation1127_spill] sm:$0xff] %v8013_v37  ;;  %v8019_v56 = vld [vmem:[%s4276_s12 + $0x2510] sm:$0xff]  ;;  %v8022_v50 = vld [vmem:[%s4276_s12 + $0x2518] sm:$0x3f] }
 0x25a   : > { %13995 = vst [vmem:[#allocation1128_spill] sm:$0xff] %v8016_v55  ;;  %13996 = vst [vmem:[#allocation1129_spill] sm:$0xff] %v8019_v56  ;;  %v8025_v41 = vld [vmem:[%s4276_s12 + $0x2520] sm:$0xff]  ;;  %v8028_v40 = vld [vmem:[%s4276_s12 + $0x2528] sm:$0x3f] }
 0x25b   : > { %13997 = vst [vmem:[#allocation1130_spill] sm:$0xff] %v8022_v50  ;;  %13998 = vst [vmem:[#allocation1131_spill] sm:$0xff] %v8025_v41  ;;  %v8031_v62 = vld [vmem:[%s4276_s12 + $0x2530] sm:$0xff]  ;;  %v8034_v37 = vld [vmem:[%s4276_s12 + $0x2538] sm:$0x3f] }
 0x25c   : > { %13999 = vst [vmem:[#allocation1132_spill] sm:$0xff] %v8028_v40  ;;  %14000 = vst [vmem:[#allocation1133_spill] sm:$0xff] %v8031_v62  ;;  %v8037_v55 = vld [vmem:[%s4276_s12 + $0x2540] sm:$0xff]  ;;  %v8040_v56 = vld [vmem:[%s4276_s12 + $0x2548] sm:$0x3f] }
 0x25d   : > { %14001 = vst [vmem:[#allocation1134_spill] sm:$0xff] %v8034_v37  ;;  %14002 = vst [vmem:[#allocation1135_spill] sm:$0xff] %v8037_v55  ;;  %v8043_v50 = vld [vmem:[%s4276_s12 + $0x2550] sm:$0xff]  ;;  %v8046_v41 = vld [vmem:[%s4276_s12 + $0x2558] sm:$0x3f] }
 0x25e   : > { %14003 = vst [vmem:[#allocation1136_spill] sm:$0xff] %v8040_v56  ;;  %14004 = vst [vmem:[#allocation1137_spill] sm:$0xff] %v8043_v50  ;;  %v8049_v40 = vld [vmem:[%s4276_s12 + $0x2560] sm:$0xff]  ;;  %v8052_v62 = vld [vmem:[%s4276_s12 + $0x2568] sm:$0x3f] }
 0x25f   : > { %14005 = vst [vmem:[#allocation1138_spill] sm:$0xff] %v8046_v41  ;;  %14006 = vst [vmem:[#allocation1139_spill] sm:$0xff] %v8049_v40  ;;  %v8055_v37 = vld [vmem:[%s4276_s12 + $0x2570] sm:$0xff]  ;;  %v8058_v55 = vld [vmem:[%s4276_s12 + $0x2578] sm:$0x3f] }
 0x260   : > { %14007 = vst [vmem:[#allocation1140_spill] sm:$0xff] %v8052_v62  ;;  %14008 = vst [vmem:[#allocation1141_spill] sm:$0xff] %v8055_v37  ;;  %v8061_v56 = vld [vmem:[%s4276_s12 + $0x2580] sm:$0xff]  ;;  %v8064_v50 = vld [vmem:[%s4276_s12 + $0x2588] sm:$0x3f] }
 0x261   : > { %14009 = vst [vmem:[#allocation1142_spill] sm:$0xff] %v8058_v55  ;;  %14010 = vst [vmem:[#allocation1143_spill] sm:$0xff] %v8061_v56  ;;  %v8067_v41 = vld [vmem:[%s4276_s12 + $0x2590] sm:$0xff]  ;;  %v8070_v40 = vld [vmem:[%s4276_s12 + $0x2598] sm:$0x3f] }
 0x262   : > { %14011 = vst [vmem:[#allocation1144_spill] sm:$0xff] %v8064_v50  ;;  %14012 = vst [vmem:[#allocation1145_spill] sm:$0xff] %v8067_v41  ;;  %v8073_v62 = vld [vmem:[%s4276_s12 + $0x25a0] sm:$0xff]  ;;  %v8076_v37 = vld [vmem:[%s4276_s12 + $0x25a8] sm:$0x3f] }
 0x263   : > { %14013 = vst [vmem:[#allocation1146_spill] sm:$0xff] %v8070_v40  ;;  %14014 = vst [vmem:[#allocation1147_spill] sm:$0xff] %v8073_v62  ;;  %v8079_v55 = vld [vmem:[%s4276_s12 + $0x25b0] sm:$0xff]  ;;  %v8082_v56 = vld [vmem:[%s4276_s12 + $0x25b8] sm:$0x3f] }
 0x264   : > { %14015 = vst [vmem:[#allocation1148_spill] sm:$0xff] %v8076_v37  ;;  %14016 = vst [vmem:[#allocation1149_spill] sm:$0xff] %v8079_v55  ;;  %v8085_v50 = vld [vmem:[%s4276_s12 + $0x25c0] sm:$0xff]  ;;  %v8088_v41 = vld [vmem:[%s4276_s12 + $0x25c8] sm:$0x3f] }
 0x265   : > { %14017 = vst [vmem:[#allocation1150_spill] sm:$0xff] %v8082_v56  ;;  %14018 = vst [vmem:[#allocation1151_spill] sm:$0xff] %v8085_v50  ;;  %v8091_v40 = vld [vmem:[%s4276_s12 + $0x25d0] sm:$0xff]  ;;  %v8094_v62 = vld [vmem:[%s4276_s12 + $0x25d8] sm:$0x3f] }
 0x266   : > { %14019 = vst [vmem:[#allocation1152_spill] sm:$0xff] %v8088_v41  ;;  %14020 = vst [vmem:[#allocation1153_spill] sm:$0xff] %v8091_v40  ;;  %v8097_v37 = vld [vmem:[%s4276_s12 + $0x25e0] sm:$0xff]  ;;  %v8100_v55 = vld [vmem:[%s4276_s12 + $0x25e8] sm:$0x3f] }
 0x267   : > { %14021 = vst [vmem:[#allocation1154_spill] sm:$0xff] %v8094_v62  ;;  %14022 = vst [vmem:[#allocation1155_spill] sm:$0xff] %v8097_v37  ;;  %v8103_v56 = vld [vmem:[%s4276_s12 + $0x25f0] sm:$0xff]  ;;  %v8106_v50 = vld [vmem:[%s4276_s12 + $0x25f8] sm:$0x3f] }
 0x268   : > { %14023 = vst [vmem:[#allocation1156_spill] sm:$0xff] %v8100_v55  ;;  %14024 = vst [vmem:[#allocation1157_spill] sm:$0xff] %v8103_v56  ;;  %v8109_v41 = vld [vmem:[%s4276_s12 + $0x2600] sm:$0xff]  ;;  %v8112_v40 = vld [vmem:[%s4276_s12 + $0x2608] sm:$0x3f] }
 0x269   : > { %14025 = vst [vmem:[#allocation1158_spill] sm:$0xff] %v8106_v50  ;;  %14026 = vst [vmem:[#allocation1159_spill] sm:$0xff] %v8109_v41  ;;  %v8115_v62 = vld [vmem:[%s4276_s12 + $0x2610] sm:$0xff]  ;;  %v8118_v37 = vld [vmem:[%s4276_s12 + $0x2618] sm:$0x3f] }
 0x26a   : > { %14027 = vst [vmem:[#allocation1160_spill] sm:$0xff] %v8112_v40  ;;  %14028 = vst [vmem:[#allocation1161_spill] sm:$0xff] %v8115_v62  ;;  %v8121_v55 = vld [vmem:[%s4276_s12 + $0x2620] sm:$0xff]  ;;  %v8124_v56 = vld [vmem:[%s4276_s12 + $0x2628] sm:$0x3f] }
 0x26b   : > { %14029 = vst [vmem:[#allocation1162_spill] sm:$0xff] %v8118_v37  ;;  %14030 = vst [vmem:[#allocation1163_spill] sm:$0xff] %v8121_v55  ;;  %v8127_v50 = vld [vmem:[%s4276_s12 + $0x2630] sm:$0xff]  ;;  %v8130_v41 = vld [vmem:[%s4276_s12 + $0x2638] sm:$0x3f] }
 0x26c   : > { %14031 = vst [vmem:[#allocation1164_spill] sm:$0xff] %v8124_v56  ;;  %14032 = vst [vmem:[#allocation1165_spill] sm:$0xff] %v8127_v50  ;;  %v8133_v40 = vld [vmem:[%s4276_s12 + $0x2640] sm:$0xff]  ;;  %v8136_v62 = vld [vmem:[%s4276_s12 + $0x2648] sm:$0x3f] }
 0x26d   : > { %14033 = vst [vmem:[#allocation1166_spill] sm:$0xff] %v8130_v41  ;;  %14034 = vst [vmem:[#allocation1167_spill] sm:$0xff] %v8133_v40  ;;  %v8139_v37 = vld [vmem:[%s4276_s12 + $0x2650] sm:$0xff]  ;;  %v8142_v55 = vld [vmem:[%s4276_s12 + $0x2658] sm:$0x3f] }
 0x26e   : > { %14035 = vst [vmem:[#allocation1168_spill] sm:$0xff] %v8136_v62  ;;  %14036 = vst [vmem:[#allocation1169_spill] sm:$0xff] %v8139_v37  ;;  %v8145_v56 = vld [vmem:[%s4276_s12 + $0x2660] sm:$0xff]  ;;  %v8148_v50 = vld [vmem:[%s4276_s12 + $0x2668] sm:$0x3f] }
 0x26f   : > { %14037 = vst [vmem:[#allocation1170_spill] sm:$0xff] %v8142_v55  ;;  %14038 = vst [vmem:[#allocation1171_spill] sm:$0xff] %v8145_v56  ;;  %v8151_v41 = vld [vmem:[%s4276_s12 + $0x2670] sm:$0xff]  ;;  %v8154_v40 = vld [vmem:[%s4276_s12 + $0x2678] sm:$0x3f] }
 0x270   : > { %14039 = vst [vmem:[#allocation1172_spill] sm:$0xff] %v8148_v50  ;;  %14040 = vst [vmem:[#allocation1173_spill] sm:$0xff] %v8151_v41  ;;  %v8157_v62 = vld [vmem:[%s4276_s12 + $0x2680] sm:$0xff]  ;;  %v8160_v37 = vld [vmem:[%s4276_s12 + $0x2688] sm:$0x3f] }
 0x271   : > { %14041 = vst [vmem:[#allocation1174_spill] sm:$0xff] %v8154_v40  ;;  %14042 = vst [vmem:[#allocation1175_spill] sm:$0xff] %v8157_v62  ;;  %v8163_v55 = vld [vmem:[%s4276_s12 + $0x2690] sm:$0xff]  ;;  %v8166_v56 = vld [vmem:[%s4276_s12 + $0x2698] sm:$0x3f] }
 0x272   : > { %14043 = vst [vmem:[#allocation1176_spill] sm:$0xff] %v8160_v37  ;;  %14044 = vst [vmem:[#allocation1177_spill] sm:$0xff] %v8163_v55  ;;  %v8169_v50 = vld [vmem:[%s4276_s12 + $0x26a0] sm:$0xff]  ;;  %v8172_v41 = vld [vmem:[%s4276_s12 + $0x26a8] sm:$0x3f] }
 0x273   : > { %14045 = vst [vmem:[#allocation1178_spill] sm:$0xff] %v8166_v56  ;;  %14046 = vst [vmem:[#allocation1179_spill] sm:$0xff] %v8169_v50  ;;  %v8175_v40 = vld [vmem:[%s4276_s12 + $0x26b0] sm:$0xff]  ;;  %v8178_v62 = vld [vmem:[%s4276_s12 + $0x26b8] sm:$0x3f] }
 0x274   : > { %14047 = vst [vmem:[#allocation1180_spill] sm:$0xff] %v8172_v41  ;;  %14048 = vst [vmem:[#allocation1181_spill] sm:$0xff] %v8175_v40  ;;  %v8181_v37 = vld [vmem:[%s4276_s12 + $0x26c0] sm:$0xff]  ;;  %v8184_v55 = vld [vmem:[%s4276_s12 + $0x26c8] sm:$0x3f] }
 0x275   : > { %14049 = vst [vmem:[#allocation1182_spill] sm:$0xff] %v8178_v62  ;;  %14050 = vst [vmem:[#allocation1183_spill] sm:$0xff] %v8181_v37  ;;  %v8187_v56 = vld [vmem:[%s4276_s12 + $0x26d0] sm:$0xff]  ;;  %v8190_v50 = vld [vmem:[%s4276_s12 + $0x26d8] sm:$0x3f] }
 0x276   : > { %14051 = vst [vmem:[#allocation1184_spill] sm:$0xff] %v8184_v55  ;;  %14052 = vst [vmem:[#allocation1185_spill] sm:$0xff] %v8187_v56  ;;  %v8193_v41 = vld [vmem:[%s4276_s12 + $0x26e0] sm:$0xff]  ;;  %v8196_v40 = vld [vmem:[%s4276_s12 + $0x26e8] sm:$0x3f] }
 0x277   : > { %14053 = vst [vmem:[#allocation1186_spill] sm:$0xff] %v8190_v50  ;;  %14054 = vst [vmem:[#allocation1187_spill] sm:$0xff] %v8193_v41  ;;  %v8199_v62 = vld [vmem:[%s4276_s12 + $0x26f0] sm:$0xff]  ;;  %v8202_v37 = vld [vmem:[%s4276_s12 + $0x26f8] sm:$0x3f] }
 0x278   : > { %14055 = vst [vmem:[#allocation1188_spill] sm:$0xff] %v8196_v40  ;;  %14056 = vst [vmem:[#allocation1189_spill] sm:$0xff] %v8199_v62  ;;  %v8205_v55 = vld [vmem:[%s4276_s12 + $0x2700] sm:$0xff]  ;;  %v8208_v56 = vld [vmem:[%s4276_s12 + $0x2708] sm:$0x3f] }
 0x279   : > { %14057 = vst [vmem:[#allocation1190_spill] sm:$0xff] %v8202_v37  ;;  %14058 = vst [vmem:[#allocation1191_spill] sm:$0xff] %v8205_v55  ;;  %v8211_v50 = vld [vmem:[%s4276_s12 + $0x2710] sm:$0xff]  ;;  %v8214_v41 = vld [vmem:[%s4276_s12 + $0x2718] sm:$0x3f] }
 0x27a   : > { %14059 = vst [vmem:[#allocation1192_spill] sm:$0xff] %v8208_v56  ;;  %14060 = vst [vmem:[#allocation1193_spill] sm:$0xff] %v8211_v50  ;;  %v8217_v40 = vld [vmem:[%s4276_s12 + $0x2720] sm:$0xff]  ;;  %v8220_v62 = vld [vmem:[%s4276_s12 + $0x2728] sm:$0x3f] }
 0x27b   : > { %14061 = vst [vmem:[#allocation1194_spill] sm:$0xff] %v8214_v41  ;;  %14062 = vst [vmem:[#allocation1195_spill] sm:$0xff] %v8217_v40  ;;  %v8223_v37 = vld [vmem:[%s4276_s12 + $0x2730] sm:$0xff]  ;;  %v8226_v55 = vld [vmem:[%s4276_s12 + $0x2738] sm:$0x3f] }
 0x27c   : > { %14063 = vst [vmem:[#allocation1196_spill] sm:$0xff] %v8220_v62  ;;  %14064 = vst [vmem:[#allocation1197_spill] sm:$0xff] %v8223_v37  ;;  %v8229_v56 = vld [vmem:[%s4276_s12 + $0x2740] sm:$0xff]  ;;  %v8232_v50 = vld [vmem:[%s4276_s12 + $0x2748] sm:$0x3f] }
 0x27d   : > { %14065 = vst [vmem:[#allocation1198_spill] sm:$0xff] %v8226_v55  ;;  %14066 = vst [vmem:[#allocation1199_spill] sm:$0xff] %v8229_v56  ;;  %v8235_v41 = vld [vmem:[%s4276_s12 + $0x2750] sm:$0xff]  ;;  %v8238_v40 = vld [vmem:[%s4276_s12 + $0x2758] sm:$0x3f] }
 0x27e   : > { %14067 = vst [vmem:[#allocation1200_spill] sm:$0xff] %v8232_v50  ;;  %14068 = vst [vmem:[#allocation1201_spill] sm:$0xff] %v8235_v41  ;;  %v8241_v62 = vld [vmem:[%s4276_s12 + $0x2760] sm:$0xff]  ;;  %v8244_v37 = vld [vmem:[%s4276_s12 + $0x2768] sm:$0x3f] }
 0x27f   : > { %14069 = vst [vmem:[#allocation1202_spill] sm:$0xff] %v8238_v40  ;;  %14070 = vst [vmem:[#allocation1203_spill] sm:$0xff] %v8241_v62  ;;  %v8247_v55 = vld [vmem:[%s4276_s12 + $0x2770] sm:$0xff]  ;;  %v8250_v56 = vld [vmem:[%s4276_s12 + $0x2778] sm:$0x3f] }
 0x280   : > { %14071 = vst [vmem:[#allocation1204_spill] sm:$0xff] %v8244_v37  ;;  %14072 = vst [vmem:[#allocation1205_spill] sm:$0xff] %v8247_v55  ;;  %v8253_v50 = vld [vmem:[%s4276_s12 + $0x2780] sm:$0xff]  ;;  %v8256_v41 = vld [vmem:[%s4276_s12 + $0x2788] sm:$0x3f] }
 0x281   : > { %14073 = vst [vmem:[#allocation1206_spill] sm:$0xff] %v8250_v56  ;;  %14074 = vst [vmem:[#allocation1207_spill] sm:$0xff] %v8253_v50  ;;  %v8259_v40 = vld [vmem:[%s4276_s12 + $0x2790] sm:$0xff]  ;;  %v8262_v62 = vld [vmem:[%s4276_s12 + $0x2798] sm:$0x3f] }
 0x282   : > { %14075 = vst [vmem:[#allocation1208_spill] sm:$0xff] %v8256_v41  ;;  %14076 = vst [vmem:[#allocation1209_spill] sm:$0xff] %v8259_v40  ;;  %v8265_v37 = vld [vmem:[%s4276_s12 + $0x27a0] sm:$0xff]  ;;  %v8268_v55 = vld [vmem:[%s4276_s12 + $0x27a8] sm:$0x3f] }
 0x283   : > { %14077 = vst [vmem:[#allocation1210_spill] sm:$0xff] %v8262_v62  ;;  %14078 = vst [vmem:[#allocation1211_spill] sm:$0xff] %v8265_v37  ;;  %v8271_v56 = vld [vmem:[%s4276_s12 + $0x27b0] sm:$0xff]  ;;  %v8274_v50 = vld [vmem:[%s4276_s12 + $0x27b8] sm:$0x3f] }
 0x284   : > { %14079 = vst [vmem:[#allocation1212_spill] sm:$0xff] %v8268_v55  ;;  %14080 = vst [vmem:[#allocation1213_spill] sm:$0xff] %v8271_v56  ;;  %v8277_v41 = vld [vmem:[%s4276_s12 + $0x27c0] sm:$0xff]  ;;  %v8280_v40 = vld [vmem:[%s4276_s12 + $0x27c8] sm:$0x3f] }
 0x285   : > { %14081 = vst [vmem:[#allocation1214_spill] sm:$0xff] %v8274_v50  ;;  %14082 = vst [vmem:[#allocation1215_spill] sm:$0xff] %v8277_v41  ;;  %v8283_v62 = vld [vmem:[%s4276_s12 + $0x27d0] sm:$0xff]  ;;  %v8286_v37 = vld [vmem:[%s4276_s12 + $0x27d8] sm:$0x3f] }
 0x286   : > { %14083 = vst [vmem:[#allocation1216_spill] sm:$0xff] %v8280_v40  ;;  %14084 = vst [vmem:[#allocation1217_spill] sm:$0xff] %v8283_v62  ;;  %v8289_v55 = vld [vmem:[%s4276_s12 + $0x27e0] sm:$0xff]  ;;  %v8292_v56 = vld [vmem:[%s4276_s12 + $0x27e8] sm:$0x3f] }
 0x287   : > { %14085 = vst [vmem:[#allocation1218_spill] sm:$0xff] %v8286_v37  ;;  %14086 = vst [vmem:[#allocation1219_spill] sm:$0xff] %v8289_v55  ;;  %v8295_v50 = vld [vmem:[%s4276_s12 + $0x27f0] sm:$0xff]  ;;  %v8298_v41 = vld [vmem:[%s4276_s12 + $0x27f8] sm:$0x3f] }
 0x288   : > { %14087 = vst [vmem:[#allocation1220_spill] sm:$0xff] %v8292_v56  ;;  %14088 = vst [vmem:[#allocation1221_spill] sm:$0xff] %v8295_v50  ;;  %v8301_v40 = vld [vmem:[%s4276_s12 + $0x2800] sm:$0xff]  ;;  %v8304_v62 = vld [vmem:[%s4276_s12 + $0x2808] sm:$0x3f] }
 0x289   : > { %14089 = vst [vmem:[#allocation1222_spill] sm:$0xff] %v8298_v41  ;;  %14090 = vst [vmem:[#allocation1223_spill] sm:$0xff] %v8301_v40  ;;  %v8307_v37 = vld [vmem:[%s4276_s12 + $0x2810] sm:$0xff]  ;;  %v8310_v55 = vld [vmem:[%s4276_s12 + $0x2818] sm:$0x3f] }
 0x28a   : > { %14091 = vst [vmem:[#allocation1224_spill] sm:$0xff] %v8304_v62  ;;  %14092 = vst [vmem:[#allocation1225_spill] sm:$0xff] %v8307_v37  ;;  %v8313_v56 = vld [vmem:[%s4276_s12 + $0x2820] sm:$0xff]  ;;  %v8316_v50 = vld [vmem:[%s4276_s12 + $0x2828] sm:$0x3f] }
 0x28b   : > { %14093 = vst [vmem:[#allocation1226_spill] sm:$0xff] %v8310_v55  ;;  %14094 = vst [vmem:[#allocation1227_spill] sm:$0xff] %v8313_v56  ;;  %v8319_v41 = vld [vmem:[%s4276_s12 + $0x2830] sm:$0xff]  ;;  %v8322_v40 = vld [vmem:[%s4276_s12 + $0x2838] sm:$0x3f] }
 0x28c   : > { %14095 = vst [vmem:[#allocation1228_spill] sm:$0xff] %v8316_v50  ;;  %14096 = vst [vmem:[#allocation1229_spill] sm:$0xff] %v8319_v41  ;;  %v8325_v62 = vld [vmem:[%s4276_s12 + $0x2840] sm:$0xff]  ;;  %v8328_v37 = vld [vmem:[%s4276_s12 + $0x2848] sm:$0x3f] }
 0x28d   : > { %14097 = vst [vmem:[#allocation1230_spill] sm:$0xff] %v8322_v40  ;;  %14098 = vst [vmem:[#allocation1231_spill] sm:$0xff] %v8325_v62  ;;  %v8331_v55 = vld [vmem:[%s4276_s12 + $0x2850] sm:$0xff]  ;;  %v8334_v56 = vld [vmem:[%s4276_s12 + $0x2858] sm:$0x3f] }
 0x28e   : > { %14099 = vst [vmem:[#allocation1232_spill] sm:$0xff] %v8328_v37  ;;  %14100 = vst [vmem:[#allocation1233_spill] sm:$0xff] %v8331_v55  ;;  %v8337_v50 = vld [vmem:[%s4276_s12 + $0x2860] sm:$0xff]  ;;  %v8340_v41 = vld [vmem:[%s4276_s12 + $0x2868] sm:$0x3f] }
 0x28f   : > { %14101 = vst [vmem:[#allocation1234_spill] sm:$0xff] %v8334_v56  ;;  %14102 = vst [vmem:[#allocation1235_spill] sm:$0xff] %v8337_v50  ;;  %v8343_v40 = vld [vmem:[%s4276_s12 + $0x2870] sm:$0xff]  ;;  %v8346_v62 = vld [vmem:[%s4276_s12 + $0x2878] sm:$0x3f] }
 0x290   : > { %14103 = vst [vmem:[#allocation1236_spill] sm:$0xff] %v8340_v41  ;;  %14104 = vst [vmem:[#allocation1237_spill] sm:$0xff] %v8343_v40  ;;  %v8349_v37 = vld [vmem:[%s4276_s12 + $0x2880] sm:$0xff]  ;;  %v8352_v55 = vld [vmem:[%s4276_s12 + $0x2888] sm:$0x3f] }
 0x291   : > { %14105 = vst [vmem:[#allocation1238_spill] sm:$0xff] %v8346_v62  ;;  %14106 = vst [vmem:[#allocation1239_spill] sm:$0xff] %v8349_v37  ;;  %v8355_v56 = vld [vmem:[%s4276_s12 + $0x2890] sm:$0xff]  ;;  %v8358_v50 = vld [vmem:[%s4276_s12 + $0x2898] sm:$0x3f] }
 0x292   : > { %14107 = vst [vmem:[#allocation1240_spill] sm:$0xff] %v8352_v55  ;;  %14108 = vst [vmem:[#allocation1241_spill] sm:$0xff] %v8355_v56  ;;  %v8361_v41 = vld [vmem:[%s4276_s12 + $0x28a0] sm:$0xff]  ;;  %v8364_v40 = vld [vmem:[%s4276_s12 + $0x28a8] sm:$0x3f] }
 0x293   : > { %14109 = vst [vmem:[#allocation1242_spill] sm:$0xff] %v8358_v50  ;;  %14110 = vst [vmem:[#allocation1243_spill] sm:$0xff] %v8361_v41  ;;  %v8367_v62 = vld [vmem:[%s4276_s12 + $0x28b0] sm:$0xff]  ;;  %v8370_v37 = vld [vmem:[%s4276_s12 + $0x28b8] sm:$0x3f] }
 0x294   : > { %14111 = vst [vmem:[#allocation1244_spill] sm:$0xff] %v8364_v40  ;;  %14112 = vst [vmem:[#allocation1245_spill] sm:$0xff] %v8367_v62  ;;  %v8373_v55 = vld [vmem:[%s4276_s12 + $0x28c0] sm:$0xff]  ;;  %v8376_v56 = vld [vmem:[%s4276_s12 + $0x28c8] sm:$0x3f] }
 0x295   : > { %14113 = vst [vmem:[#allocation1246_spill] sm:$0xff] %v8370_v37  ;;  %14114 = vst [vmem:[#allocation1247_spill] sm:$0xff] %v8373_v55  ;;  %v8379_v50 = vld [vmem:[%s4276_s12 + $0x28d0] sm:$0xff]  ;;  %v8382_v41 = vld [vmem:[%s4276_s12 + $0x28d8] sm:$0x3f] }
 0x296   : > { %14115 = vst [vmem:[#allocation1248_spill] sm:$0xff] %v8376_v56  ;;  %14116 = vst [vmem:[#allocation1249_spill] sm:$0xff] %v8379_v50  ;;  %v8385_v40 = vld [vmem:[%s4276_s12 + $0x28e0] sm:$0xff]  ;;  %v8388_v62 = vld [vmem:[%s4276_s12 + $0x28e8] sm:$0x3f] }
 0x297   : > { %14117 = vst [vmem:[#allocation1250_spill] sm:$0xff] %v8382_v41  ;;  %14118 = vst [vmem:[#allocation1251_spill] sm:$0xff] %v8385_v40  ;;  %v8391_v37 = vld [vmem:[%s4276_s12 + $0x28f0] sm:$0xff]  ;;  %v8394_v55 = vld [vmem:[%s4276_s12 + $0x28f8] sm:$0x3f] }
 0x298   : > { %14119 = vst [vmem:[#allocation1252_spill] sm:$0xff] %v8388_v62  ;;  %14120 = vst [vmem:[#allocation1253_spill] sm:$0xff] %v8391_v37  ;;  %v8397_v56 = vld [vmem:[%s4276_s12 + $0x2900] sm:$0xff]  ;;  %v8400_v50 = vld [vmem:[%s4276_s12 + $0x2908] sm:$0x3f] }
 0x299   : > { %14121 = vst [vmem:[#allocation1254_spill] sm:$0xff] %v8394_v55  ;;  %14122 = vst [vmem:[#allocation1255_spill] sm:$0xff] %v8397_v56  ;;  %v8403_v41 = vld [vmem:[%s4276_s12 + $0x2910] sm:$0xff]  ;;  %v8406_v40 = vld [vmem:[%s4276_s12 + $0x2918] sm:$0x3f] }
 0x29a   : > { %14123 = vst [vmem:[#allocation1256_spill] sm:$0xff] %v8400_v50  ;;  %14124 = vst [vmem:[#allocation1257_spill] sm:$0xff] %v8403_v41  ;;  %v8409_v62 = vld [vmem:[%s4276_s12 + $0x2920] sm:$0xff]  ;;  %v8412_v37 = vld [vmem:[%s4276_s12 + $0x2928] sm:$0x3f] }
 0x29b   : > { %14125 = vst [vmem:[#allocation1258_spill] sm:$0xff] %v8406_v40  ;;  %14126 = vst [vmem:[#allocation1259_spill] sm:$0xff] %v8409_v62  ;;  %v8415_v55 = vld [vmem:[%s4276_s12 + $0x2930] sm:$0xff]  ;;  %v8418_v56 = vld [vmem:[%s4276_s12 + $0x2938] sm:$0x3f] }
 0x29c   : > { %14127 = vst [vmem:[#allocation1260_spill] sm:$0xff] %v8412_v37  ;;  %14128 = vst [vmem:[#allocation1261_spill] sm:$0xff] %v8415_v55  ;;  %v8421_v50 = vld [vmem:[%s4276_s12 + $0x2940] sm:$0xff]  ;;  %v8424_v41 = vld [vmem:[%s4276_s12 + $0x2948] sm:$0x3f] }
 0x29d   : > { %14129 = vst [vmem:[#allocation1262_spill] sm:$0xff] %v8418_v56  ;;  %14130 = vst [vmem:[#allocation1263_spill] sm:$0xff] %v8421_v50  ;;  %v8427_v40 = vld [vmem:[%s4276_s12 + $0x2950] sm:$0xff]  ;;  %v8430_v62 = vld [vmem:[%s4276_s12 + $0x2958] sm:$0x3f] }
 0x29e   : > { %14131 = vst [vmem:[#allocation1264_spill] sm:$0xff] %v8424_v41  ;;  %14132 = vst [vmem:[#allocation1265_spill] sm:$0xff] %v8427_v40  ;;  %v8433_v49 = vld [vmem:[%s4276_s12 + $0x2960] sm:$0xff]  ;;  %v8436_v37 = vld [vmem:[%s4276_s12 + $0x2968] sm:$0x3f] }
 0x29f   : > { %14133 = vst [vmem:[#allocation1266_spill] sm:$0xff] %v8430_v62  ;;  %14134 = vst [vmem:[#allocation1267_spill] sm:$0xff] %v8433_v49  ;;  %v8439_v55 = vld [vmem:[%s4276_s12 + $0x2970] sm:$0xff]  ;;  %v8442_v56 = vld [vmem:[%s4276_s12 + $0x2978] sm:$0x3f] }
 0x2a0   : > { %14135 = vst [vmem:[#allocation1268_spill] sm:$0xff] %v8436_v37  ;;  %14136 = vst [vmem:[#allocation1269_spill] sm:$0xff] %v8439_v55  ;;  %v8445_v50 = vld [vmem:[%s4276_s12 + $0x2980] sm:$0xff]  ;;  %v8448_v41 = vld [vmem:[%s4276_s12 + $0x2988] sm:$0x3f] }
 0x2a1   : > { %14137 = vst [vmem:[#allocation1270_spill] sm:$0xff] %v8442_v56  ;;  %14138 = vst [vmem:[#allocation1271_spill] sm:$0xff] %v8445_v50  ;;  %v8451_v40 = vld [vmem:[%s4276_s12 + $0x2990] sm:$0xff]  ;;  %v8454_v62 = vld [vmem:[%s4276_s12 + $0x2998] sm:$0x3f] }
 0x2a2   : > { %14139 = vst [vmem:[#allocation1272_spill] sm:$0xff] %v8448_v41  ;;  %14140 = vst [vmem:[#allocation1273_spill] sm:$0xff] %v8451_v40  ;;  %v8457_v49 = vld [vmem:[%s4276_s12 + $0x29a0] sm:$0xff]  ;;  %v8460_v37 = vld [vmem:[%s4276_s12 + $0x29a8] sm:$0x3f] }
 0x2a3   : > { %14141 = vst [vmem:[#allocation1274_spill] sm:$0xff] %v8454_v62  ;;  %14142 = vst [vmem:[#allocation1275_spill] sm:$0xff] %v8457_v49  ;;  %v8463_v55 = vld [vmem:[%s4276_s12 + $0x29b0] sm:$0xff]  ;;  %v8466_v56 = vld [vmem:[%s4276_s12 + $0x29b8] sm:$0x3f]  ;;  %v14155_v49 = vmax.f32 %v4282_v1, 0.0 }
 0x2a4   : > { %14143 = vst [vmem:[#allocation1276_spill] sm:$0xff] %v8460_v37  ;;  %14144 = vst [vmem:[#allocation1277_spill] sm:$0xff] %v8463_v55  ;;  %v8469_v50 = vld [vmem:[%s4276_s12 + $0x29c0] sm:$0xff]  ;;  %v8472_v41 = vld [vmem:[%s4276_s12 + $0x29c8] sm:$0x3f]  ;;  %v14159_v1 = vmax.f32 %v4294_v5, 0.0 }
 0x2a5   : > { %14145 = vst [vmem:[#allocation1278_spill] sm:$0xff] %v8466_v56  ;;  %14146 = vst [vmem:[#allocation1279_spill] sm:$0xff] %v8469_v50  ;;  %v8475_v40 = vld [vmem:[%s4276_s12 + $0x5d8] sm:$0x3f]  ;;  %v8479_v62 = vld [vmem:[%s4276_s12 + $0x29d0] sm:$0xff]  ;;  %v14163_v5 = vmax.f32 %v4306_v9, 0.0 }
 0x2a6   : > { %14147 = vst [vmem:[#allocation1280_spill] sm:$0xff] %v8472_v41  ;;  %14148 = vst [vmem:[#allocation1281_spill] sm:$0xff] %v8479_v62  ;;  %v8482_v37 = vld [vmem:[%s4276_s12 + $0x29d8] sm:$0x3f]  ;;  %v8485_v55 = vld [vmem:[%s4276_s12 + $0x29e0] sm:$0xff]  ;;  %v14167_v9 = vmax.f32 %v4318_v13, 0.0 }
 0x2a7   : > { %14149 = vst [vmem:[#allocation1282_spill] sm:$0xff] %v8482_v37  ;;  %14150 = vst [vmem:[#allocation1283_spill] sm:$0xff] %v8485_v55  ;;  %v8488_v50 = vld [vmem:[%s4276_s12 + $0x5e0] sm:$0xff]  ;;  %v8492_v56 = vld [vmem:[%s4276_s12 + $0x5e8] sm:$0x3f]  ;;  %v14171_v13 = vmax.f32 %v4330_v17, 0.0 }
 0x2a8   : > { %14151 = vst [vmem:[#allocation1284_spill] sm:$0xff] %v8488_v50  ;;  %v8496_v62 = vld [vmem:[%s4276_s12 + $0x29e8] sm:$0x3f]  ;;  %v8499_v37 = vld [vmem:[%s4276_s12 + $0x29f0] sm:$0xff]  ;;  %v8502_v55 = vld [vmem:[%s4276_s12 + $0x29f8] sm:$0x3f] }
 0x2a9   : > { %14152 = vst [vmem:[#allocation1285_spill] sm:$0xff] %v8499_v37  ;;  %14153 = vst [vmem:[#allocation1286_spill] sm:$0xff] %v8502_v55  ;;  %v8505_v24 = vld [vmem:[%s4276_s12 + $0x5f0] sm:$0xff]  ;;  %v14154_v50 = vmax.f32 %v4279_v0, 0.0  ;;  %v14156_v37 = vmax.f32 %v4285_v2, 0.0  ;;  %v14157_v55 = vmax.f32 %v4288_v3, 0.0 }
 0x2aa   : > { %v1659_v41 = vmax.f32 %v8505_v24, 0.0  ;;  %2816 = vst.msk [vmem:[%s5055_s15 + $0x8] sm:$0x3f] %vm2815_vm1, %v14155_v49  ;;  %v14158_v0 = vmax.f32 %v4291_v4, 0.0  ;;  %2820 = vst.msk [vmem:[%s5055_s15 + $0x28] sm:$0x3f] %vm2815_vm1, %v14159_v1 }
 0x2ab   : > { %2814 = vst.msk [vmem:[%s5055_s15] sm:$0xff] %vm2813_vm0, %v14154_v50  ;;  %2817 = vst.msk [vmem:[%s5055_s15 + $0x10] sm:$0xff] %vm2813_vm0, %v14156_v37  ;;  %v14160_v2 = vmax.f32 %v4297_v6, 0.0  ;;  %v14161_v3 = vmax.f32 %v4300_v7, 0.0  ;;  %v14162_v4 = vmax.f32 %v4303_v8, 0.0  ;;  %v14164_v6 = vmax.f32 %v4309_v10, 0.0 }
 0x2ac   : > { %2818 = vst.msk [vmem:[%s5055_s15 + $0x18] sm:$0x3f] %vm2815_vm1, %v14157_v55  ;;  %2824 = vst.msk [vmem:[%s5055_s15 + $0x48] sm:$0x3f] %vm2815_vm1, %v14163_v5  ;;  %v14165_v7 = vmax.f32 %v4312_v11, 0.0  ;;  %v14166_v8 = vmax.f32 %v4315_v12, 0.0 }
 0x2ad   : > { %2819 = vst.msk [vmem:[%s5055_s15 + $0x20] sm:$0xff] %vm2813_vm0, %v14158_v0  ;;  %2821 = vst.msk [vmem:[%s5055_s15 + $0x30] sm:$0xff] %vm2813_vm0, %v14160_v2  ;;  %v14168_v10 = vmax.f32 %v4321_v14, 0.0  ;;  %v14169_v11 = vmax.f32 %v4324_v15, 0.0  ;;  %v14170_v12 = vmax.f32 %v4327_v16, 0.0  ;;  %v14172_v14 = vmax.f32 %v4333_v18, 0.0 }
 0x2ae   : > { %2822 = vst.msk [vmem:[%s5055_s15 + $0x38] sm:$0x3f] %vm2815_vm1, %v14161_v3  ;;  %2826 = vst.msk [vmem:[%s5055_s15 + $0x58] sm:$0x3f] %vm2815_vm1, %v14165_v7  ;;  %v14173_v15 = vmax.f32 %v4336_v19, 0.0  ;;  %v14174_v16 = vmax.f32 %v4339_v20, 0.0 }
 0x2af   : > { %2823 = vst.msk [vmem:[%s5055_s15 + $0x40] sm:$0xff] %vm2813_vm0, %v14162_v4  ;;  %2825 = vst.msk [vmem:[%s5055_s15 + $0x50] sm:$0xff] %vm2813_vm0, %v14164_v6  ;;  %v14175_v17 = vmax.f32 %v4342_v21, 0.0  ;;  %v14176_v18 = vmax.f32 %v4345_v22, 0.0  ;;  %v14177_v19 = vmax.f32 %v4351_v26, 0.0  ;;  %v14178_v20 = vmax.f32 %v4354_v27, 0.0 }
 0x2b0   : > { %2827 = vst.msk [vmem:[%s5055_s15 + $0x60] sm:$0xff] %vm2813_vm0, %v14166_v8  ;;  %2829 = vst.msk [vmem:[%s5055_s15 + $0x70] sm:$0xff] %vm2813_vm0, %v14168_v10  ;;  %v14179_v21 = vmax.f32 %v4357_v28, 0.0  ;;  %v14180_v22 = vmax.f32 %v4360_v29, 0.0  ;;  %v14181_v26 = vmax.f32 %v4367_v34, 0.0  ;;  %v14182_v27 = vmax.f32 %v4370_v35, 0.0 }
 0x2b1   : > { %2828 = vst.msk [vmem:[%s5055_s15 + $0x68] sm:$0x3f] %vm2815_vm1, %v14167_v9  ;;  %2830 = vst.msk [vmem:[%s5055_s15 + $0x78] sm:$0x3f] %vm2815_vm1, %v14169_v11  ;;  %v14183_v28 = vmax.f32 %v4373_v36, 0.0  ;;  %v14184_v37 = vld [vmem:[#allocation2_spill] sm:$0xff] }
 0x2b2   : > { %2831 = vst.msk [vmem:[%s5055_s15 + $0x80] sm:$0xff] %vm2813_vm0, %v14170_v12  ;;  %2833 = vst.msk [vmem:[%s5055_s15 + $0x90] sm:$0xff] %vm2813_vm0, %v14172_v14  ;;  %v14185_v29 = vmax.f32 %v14184_v37, 0.0  ;;  %v14186_v49 = vld [vmem:[#allocation3_spill] sm:$0xff]  ;;  %v14188_v50 = vld [vmem:[#allocation4_spill] sm:$0xff] }
 0x2b3   : > { %2832 = vst.msk [vmem:[%s5055_s15 + $0x88] sm:$0x3f] %vm2815_vm1, %v14171_v13  ;;  %2834 = vst.msk [vmem:[%s5055_s15 + $0x98] sm:$0x3f] %vm2815_vm1, %v14173_v15  ;;  %v14187_v34 = vmax.f32 %v14186_v49, 0.0  ;;  %v14189_v35 = vmax.f32 %v14188_v50, 0.0 }
 0x2b4   : > { %2835 = vst.msk [vmem:[%s5055_s15 + $0xa0] sm:$0xff] %vm2813_vm0, %v14174_v16  ;;  %2837 = vst.msk [vmem:[%s5055_s15 + $0xb0] sm:$0xff] %vm2813_vm0, %v14176_v18  ;;  %v14190_v55 = vld [vmem:[#allocation5_spill] sm:$0xff]  ;;  %v14192_v0 = vld [vmem:[#allocation6_spill] sm:$0xff] }
 0x2b5   : > { %2836 = vst.msk [vmem:[%s5055_s15 + $0xa8] sm:$0x3f] %vm2815_vm1, %v14175_v17  ;;  %2838 = vst.msk [vmem:[%s5055_s15 + $0xb8] sm:$0x3f] %vm2815_vm1, %v14177_v19  ;;  %v14191_v36 = vmax.f32 %v14190_v55, 0.0  ;;  %v14193_v1 = vmax.f32 %v14192_v0, 0.0 }
 0x2b6   : > { %2839 = vst.msk [vmem:[%s5055_s15 + $0xc0] sm:$0xff] %vm2813_vm0, %v14178_v20  ;;  %2841 = vst.msk [vmem:[%s5055_s15 + $0xd0] sm:$0xff] %vm2813_vm0, %v14180_v22  ;;  %v14194_v2 = vld [vmem:[#allocation7_spill] sm:$0xff]  ;;  %v14196_v4 = vld [vmem:[#allocation8_spill] sm:$0xff] }
 0x2b7   : > { %2840 = vst.msk [vmem:[%s5055_s15 + $0xc8] sm:$0x3f] %vm2815_vm1, %v14179_v21  ;;  %2842 = vst.msk [vmem:[%s5055_s15 + $0xd8] sm:$0x3f] %vm2815_vm1, %v14181_v26  ;;  %v14195_v3 = vmax.f32 %v14194_v2, 0.0  ;;  %v14197_v5 = vmax.f32 %v14196_v4, 0.0 }
 0x2b8   : > { %2843 = vst.msk [vmem:[%s5055_s15 + $0xe0] sm:$0xff] %vm2813_vm0, %v14182_v27  ;;  %2845 = vst.msk [vmem:[%s5055_s15 + $0xf0] sm:$0xff] %vm2813_vm0, %v14185_v29  ;;  %v14198_v6 = vld [vmem:[#allocation9_spill] sm:$0xff]  ;;  %v14200_v8 = vld [vmem:[#allocation10_spill] sm:$0xff] }
 0x2b9   : > { %2844 = vst.msk [vmem:[%s5055_s15 + $0xe8] sm:$0x3f] %vm2815_vm1, %v14183_v28  ;;  %2846 = vst.msk [vmem:[%s5055_s15 + $0xf8] sm:$0x3f] %vm2815_vm1, %v14187_v34  ;;  %v14199_v7 = vmax.f32 %v14198_v6, 0.0  ;;  %v14201_v9 = vmax.f32 %v14200_v8, 0.0 }
 0x2ba   : > { %2847 = vst.msk [vmem:[%s5055_s15 + $0x100] sm:$0xff] %vm2813_vm0, %v14189_v35  ;;  %2849 = vst.msk [vmem:[%s5055_s15 + $0x110] sm:$0xff] %vm2813_vm0, %v14193_v1  ;;  %v14202_v10 = vld [vmem:[#allocation11_spill] sm:$0xff]  ;;  %v14204_v12 = vld [vmem:[#allocation12_spill] sm:$0xff] }
 0x2bb   : > { %2848 = vst.msk [vmem:[%s5055_s15 + $0x108] sm:$0x3f] %vm2815_vm1, %v14191_v36  ;;  %2850 = vst.msk [vmem:[%s5055_s15 + $0x118] sm:$0x3f] %vm2815_vm1, %v14195_v3  ;;  %v14203_v11 = vmax.f32 %v14202_v10, 0.0  ;;  %v14205_v13 = vmax.f32 %v14204_v12, 0.0 }
 0x2bc   : > { %2851 = vst.msk [vmem:[%s5055_s15 + $0x120] sm:$0xff] %vm2813_vm0, %v14197_v5  ;;  %2853 = vst.msk [vmem:[%s5055_s15 + $0x130] sm:$0xff] %vm2813_vm0, %v14201_v9  ;;  %v14206_v14 = vld [vmem:[#allocation13_spill] sm:$0xff]  ;;  %v14208_v16 = vld [vmem:[#allocation14_spill] sm:$0xff] }
 0x2bd   : > { %2852 = vst.msk [vmem:[%s5055_s15 + $0x128] sm:$0x3f] %vm2815_vm1, %v14199_v7  ;;  %2854 = vst.msk [vmem:[%s5055_s15 + $0x138] sm:$0x3f] %vm2815_vm1, %v14203_v11  ;;  %v14207_v15 = vmax.f32 %v14206_v14, 0.0  ;;  %v14209_v17 = vmax.f32 %v14208_v16, 0.0 }
 0x2be   : > { %2855 = vst.msk [vmem:[%s5055_s15 + $0x140] sm:$0xff] %vm2813_vm0, %v14205_v13  ;;  %v14210_v18 = vld [vmem:[#allocation15_spill] sm:$0xff]  ;;  %v14212_v20 = vld [vmem:[#allocation16_spill] sm:$0xff]  ;;  %v14214_v22 = vld [vmem:[#allocation17_spill] sm:$0xff] }
 0x2bf   : > { %2856 = vst.msk [vmem:[%s5055_s15 + $0x148] sm:$0x3f] %vm2815_vm1, %v14207_v15  ;;  %v14211_v19 = vmax.f32 %v14210_v18, 0.0  ;;  %v14213_v21 = vmax.f32 %v14212_v20, 0.0  ;;  %v14215_v26 = vmax.f32 %v14214_v22, 0.0  ;;  %v14216_v27 = vld [vmem:[#allocation18_spill] sm:$0xff] }
 0x2c0   : > { %2857 = vst.msk [vmem:[%s5055_s15 + $0x150] sm:$0xff] %vm2813_vm0, %v14209_v17  ;;  %v14217_v28 = vmax.f32 %v14216_v27, 0.0  ;;  %v14218_v37 = vld [vmem:[#allocation19_spill] sm:$0xff]  ;;  %v14220_v49 = vld [vmem:[#allocation20_spill] sm:$0xff]  ;;  %v14222_v50 = vld [vmem:[#allocation21_spill] sm:$0xff] }
 0x2c1   : > { %2858 = vst.msk [vmem:[%s5055_s15 + $0x158] sm:$0x3f] %vm2815_vm1, %v14211_v19  ;;  %2860 = vst.msk [vmem:[%s5055_s15 + $0x168] sm:$0x3f] %vm2815_vm1, %v14215_v26  ;;  %v14219_v29 = vmax.f32 %v14218_v37, 0.0  ;;  %v14221_v34 = vmax.f32 %v14220_v49, 0.0 }
 0x2c2   : > { %2859 = vst.msk [vmem:[%s5055_s15 + $0x160] sm:$0xff] %vm2813_vm0, %v14213_v21  ;;  %2861 = vst.msk [vmem:[%s5055_s15 + $0x170] sm:$0xff] %vm2813_vm0, %v14217_v28  ;;  %v14223_v35 = vmax.f32 %v14222_v50, 0.0  ;;  %v14224_v55 = vld [vmem:[#allocation22_spill] sm:$0xff]  ;;  %v14226_v0 = vld [vmem:[#allocation23_spill] sm:$0xff] }
 0x2c3   : > { %2862 = vst.msk [vmem:[%s5055_s15 + $0x178] sm:$0x3f] %vm2815_vm1, %v14219_v29  ;;  %v14225_v36 = vmax.f32 %v14224_v55, 0.0  ;;  %v14227_v1 = vmax.f32 %v14226_v0, 0.0  ;;  %v14228_v2 = vld [vmem:[#allocation24_spill] sm:$0xff]  ;;  %v14230_v4 = vld [vmem:[#allocation25_spill] sm:$0xff] }
 0x2c4   : > { %2863 = vst.msk [vmem:[%s5055_s15 + $0x180] sm:$0xff] %vm2813_vm0, %v14221_v34  ;;  %v14229_v3 = vmax.f32 %v14228_v2, 0.0  ;;  %v14231_v5 = vmax.f32 %v14230_v4, 0.0  ;;  %v14232_v6 = vld [vmem:[#allocation26_spill] sm:$0xff]  ;;  %v14234_v8 = vld [vmem:[#allocation27_spill] sm:$0xff]  ;;  %v14236_v10 = vld [vmem:[#allocation28_spill] sm:$0xff] }
 0x2c5   : > { %2864 = vst.msk [vmem:[%s5055_s15 + $0x188] sm:$0x3f] %vm2815_vm1, %v14223_v35  ;;  %2866 = vst.msk [vmem:[%s5055_s15 + $0x198] sm:$0x3f] %vm2815_vm1, %v14227_v1  ;;  %v14233_v7 = vmax.f32 %v14232_v6, 0.0  ;;  %v14235_v9 = vmax.f32 %v14234_v8, 0.0 }
 0x2c6   : > { %2865 = vst.msk [vmem:[%s5055_s15 + $0x190] sm:$0xff] %vm2813_vm0, %v14225_v36  ;;  %2867 = vst.msk [vmem:[%s5055_s15 + $0x1a0] sm:$0xff] %vm2813_vm0, %v14229_v3  ;;  %v14237_v11 = vmax.f32 %v14236_v10, 0.0  ;;  %v14238_v12 = vld [vmem:[#allocation29_spill] sm:$0xff]  ;;  %v14240_v14 = vld [vmem:[#allocation30_spill] sm:$0xff] }
 0x2c7   : > { %2868 = vst.msk [vmem:[%s5055_s15 + $0x1a8] sm:$0x3f] %vm2815_vm1, %v14231_v5  ;;  %2870 = vst.msk [vmem:[%s5055_s15 + $0x1b8] sm:$0x3f] %vm2815_vm1, %v14235_v9  ;;  %v14239_v13 = vmax.f32 %v14238_v12, 0.0  ;;  %v14241_v15 = vmax.f32 %v14240_v14, 0.0 }
 0x2c8   : > { %2869 = vst.msk [vmem:[%s5055_s15 + $0x1b0] sm:$0xff] %vm2813_vm0, %v14233_v7  ;;  %2871 = vst.msk [vmem:[%s5055_s15 + $0x1c0] sm:$0xff] %vm2813_vm0, %v14237_v11  ;;  %v14242_v16 = vld [vmem:[#allocation31_spill] sm:$0xff]  ;;  %v14244_v18 = vld [vmem:[#allocation32_spill] sm:$0xff] }
 0x2c9   : > { %2872 = vst.msk [vmem:[%s5055_s15 + $0x1c8] sm:$0x3f] %vm2815_vm1, %v14239_v13  ;;  %v14243_v17 = vmax.f32 %v14242_v16, 0.0  ;;  %v14245_v19 = vmax.f32 %v14244_v18, 0.0  ;;  %v14246_v20 = vld [vmem:[#allocation33_spill] sm:$0xff]  ;;  %v14248_v22 = vld [vmem:[#allocation34_spill] sm:$0xff] }
 0x2ca   : > { %2873 = vst.msk [vmem:[%s5055_s15 + $0x1d0] sm:$0xff] %vm2813_vm0, %v14241_v15  ;;  %v14247_v21 = vmax.f32 %v14246_v20, 0.0  ;;  %v14249_v26 = vmax.f32 %v14248_v22, 0.0  ;;  %v14250_v27 = vld [vmem:[#allocation35_spill] sm:$0xff]  ;;  %v14252_v37 = vld [vmem:[#allocation36_spill] sm:$0xff]  ;;  %v14254_v49 = vld [vmem:[#allocation37_spill] sm:$0xff] }
 0x2cb   : > { %2874 = vst.msk [vmem:[%s5055_s15 + $0x1d8] sm:$0x3f] %vm2815_vm1, %v14243_v17  ;;  %v14251_v28 = vmax.f32 %v14250_v27, 0.0  ;;  %v14253_v29 = vmax.f32 %v14252_v37, 0.0  ;;  %v14255_v34 = vmax.f32 %v14254_v49, 0.0  ;;  %v14256_v50 = vld [vmem:[#allocation38_spill] sm:$0xff] }
 0x2cc   : > { %2875 = vst.msk [vmem:[%s5055_s15 + $0x1e0] sm:$0xff] %vm2813_vm0, %v14245_v19  ;;  %2877 = vst.msk [vmem:[%s5055_s15 + $0x1f0] sm:$0xff] %vm2813_vm0, %v14249_v26  ;;  %v14257_v35 = vmax.f32 %v14256_v50, 0.0  ;;  %v14258_v55 = vld [vmem:[#allocation39_spill] sm:$0xff]  ;;  %v14260_v0 = vld [vmem:[#allocation40_spill] sm:$0xff] }
 0x2cd   : > { %2876 = vst.msk [vmem:[%s5055_s15 + $0x1e8] sm:$0x3f] %vm2815_vm1, %v14247_v21  ;;  %2878 = vst.msk [vmem:[%s5055_s15 + $0x1f8] sm:$0x3f] %vm2815_vm1, %v14251_v28  ;;  %v14259_v36 = vmax.f32 %v14258_v55, 0.0  ;;  %v14261_v1 = vmax.f32 %v14260_v0, 0.0 }
 0x2ce   : > { %2879 = vst.msk [vmem:[%s5055_s15 + $0x200] sm:$0xff] %vm2813_vm0, %v14253_v29  ;;  %2881 = vst.msk [vmem:[%s5055_s15 + $0x210] sm:$0xff] %vm2813_vm0, %v14257_v35  ;;  %v14262_v2 = vld [vmem:[#allocation41_spill] sm:$0xff]  ;;  %v14264_v4 = vld [vmem:[#allocation42_spill] sm:$0xff] }
 0x2cf   : > { %2880 = vst.msk [vmem:[%s5055_s15 + $0x208] sm:$0x3f] %vm2815_vm1, %v14255_v34  ;;  %2882 = vst.msk [vmem:[%s5055_s15 + $0x218] sm:$0x3f] %vm2815_vm1, %v14259_v36  ;;  %v14263_v3 = vmax.f32 %v14262_v2, 0.0  ;;  %v14265_v5 = vmax.f32 %v14264_v4, 0.0 }
 0x2d0   : > { %2883 = vst.msk [vmem:[%s5055_s15 + $0x220] sm:$0xff] %vm2813_vm0, %v14261_v1  ;;  %v14266_v6 = vld [vmem:[#allocation43_spill] sm:$0xff]  ;;  %v14268_v8 = vld [vmem:[#allocation44_spill] sm:$0xff]  ;;  %v14270_v10 = vld [vmem:[#allocation45_spill] sm:$0xff] }
 0x2d1   : > { %2884 = vst.msk [vmem:[%s5055_s15 + $0x228] sm:$0x3f] %vm2815_vm1, %v14263_v3  ;;  %v14267_v7 = vmax.f32 %v14266_v6, 0.0  ;;  %v14269_v9 = vmax.f32 %v14268_v8, 0.0  ;;  %v14271_v11 = vmax.f32 %v14270_v10, 0.0  ;;  %v14272_v12 = vld [vmem:[#allocation46_spill] sm:$0xff] }
 0x2d2   : > { %2885 = vst.msk [vmem:[%s5055_s15 + $0x230] sm:$0xff] %vm2813_vm0, %v14265_v5  ;;  %v14273_v13 = vmax.f32 %v14272_v12, 0.0  ;;  %v14274_v14 = vld [vmem:[#allocation47_spill] sm:$0xff]  ;;  %v14276_v16 = vld [vmem:[#allocation48_spill] sm:$0xff]  ;;  %v14278_v18 = vld [vmem:[#allocation49_spill] sm:$0xff] }
 0x2d3   : > { %2886 = vst.msk [vmem:[%s5055_s15 + $0x238] sm:$0x3f] %vm2815_vm1, %v14267_v7  ;;  %2888 = vst.msk [vmem:[%s5055_s15 + $0x248] sm:$0x3f] %vm2815_vm1, %v14271_v11  ;;  %v14275_v15 = vmax.f32 %v14274_v14, 0.0  ;;  %v14277_v17 = vmax.f32 %v14276_v16, 0.0 }
 0x2d4   : > { %2887 = vst.msk [vmem:[%s5055_s15 + $0x240] sm:$0xff] %vm2813_vm0, %v14269_v9  ;;  %2889 = vst.msk [vmem:[%s5055_s15 + $0x250] sm:$0xff] %vm2813_vm0, %v14273_v13  ;;  %v14279_v19 = vmax.f32 %v14278_v18, 0.0  ;;  %v14280_v20 = vld [vmem:[#allocation50_spill] sm:$0xff]  ;;  %v14282_v22 = vld [vmem:[#allocation51_spill] sm:$0xff] }
 0x2d5   : > { %2890 = vst.msk [vmem:[%s5055_s15 + $0x258] sm:$0x3f] %vm2815_vm1, %v14275_v15  ;;  %v14281_v21 = vmax.f32 %v14280_v20, 0.0  ;;  %v14283_v26 = vmax.f32 %v14282_v22, 0.0  ;;  %v14284_v27 = vld [vmem:[#allocation52_spill] sm:$0xff]  ;;  %v14286_v37 = vld [vmem:[#allocation53_spill] sm:$0xff] }
 0x2d6   : > { %2891 = vst.msk [vmem:[%s5055_s15 + $0x260] sm:$0xff] %vm2813_vm0, %v14277_v17  ;;  %v14285_v28 = vmax.f32 %v14284_v27, 0.0  ;;  %v14287_v29 = vmax.f32 %v14286_v37, 0.0  ;;  %v14288_v49 = vld [vmem:[#allocation54_spill] sm:$0xff]  ;;  %v14290_v50 = vld [vmem:[#allocation55_spill] sm:$0xff]  ;;  %v14292_v55 = vld [vmem:[#allocation56_spill] sm:$0xff] }
 0x2d7   : > { %2892 = vst.msk [vmem:[%s5055_s15 + $0x268] sm:$0x3f] %vm2815_vm1, %v14279_v19  ;;  %2894 = vst.msk [vmem:[%s5055_s15 + $0x278] sm:$0x3f] %vm2815_vm1, %v14283_v26  ;;  %v14289_v34 = vmax.f32 %v14288_v49, 0.0  ;;  %v14291_v35 = vmax.f32 %v14290_v50, 0.0 }
 0x2d8   : > { %2893 = vst.msk [vmem:[%s5055_s15 + $0x270] sm:$0xff] %vm2813_vm0, %v14281_v21  ;;  %2895 = vst.msk [vmem:[%s5055_s15 + $0x280] sm:$0xff] %vm2813_vm0, %v14285_v28  ;;  %v14293_v36 = vmax.f32 %v14292_v55, 0.0  ;;  %v14294_v0 = vld [vmem:[#allocation57_spill] sm:$0xff]  ;;  %v14296_v2 = vld [vmem:[#allocation58_spill] sm:$0xff] }
 0x2d9   : > { %2896 = vst.msk [vmem:[%s5055_s15 + $0x288] sm:$0x3f] %vm2815_vm1, %v14287_v29  ;;  %2898 = vst.msk [vmem:[%s5055_s15 + $0x298] sm:$0x3f] %vm2815_vm1, %v14291_v35  ;;  %v14295_v1 = vmax.f32 %v14294_v0, 0.0  ;;  %v14297_v3 = vmax.f32 %v14296_v2, 0.0 }
 0x2da   : > { %2897 = vst.msk [vmem:[%s5055_s15 + $0x290] sm:$0xff] %vm2813_vm0, %v14289_v34  ;;  %2899 = vst.msk [vmem:[%s5055_s15 + $0x2a0] sm:$0xff] %vm2813_vm0, %v14293_v36  ;;  %v14298_v4 = vld [vmem:[#allocation59_spill] sm:$0xff]  ;;  %v14300_v6 = vld [vmem:[#allocation60_spill] sm:$0xff] }
 0x2db   : > { %2900 = vst.msk [vmem:[%s5055_s15 + $0x2a8] sm:$0x3f] %vm2815_vm1, %v14295_v1  ;;  %v14299_v5 = vmax.f32 %v14298_v4, 0.0  ;;  %v14301_v7 = vmax.f32 %v14300_v6, 0.0  ;;  %v14302_v8 = vld [vmem:[#allocation61_spill] sm:$0xff]  ;;  %v14304_v10 = vld [vmem:[#allocation62_spill] sm:$0xff] }
 0x2dc   : > { %2901 = vst.msk [vmem:[%s5055_s15 + $0x2b0] sm:$0xff] %vm2813_vm0, %v14297_v3  ;;  %v14303_v9 = vmax.f32 %v14302_v8, 0.0  ;;  %v14305_v11 = vmax.f32 %v14304_v10, 0.0  ;;  %v14306_v12 = vld [vmem:[#allocation63_spill] sm:$0xff]  ;;  %v14308_v14 = vld [vmem:[#allocation64_spill] sm:$0xff]  ;;  %v14310_v16 = vld [vmem:[#allocation65_spill] sm:$0xff] }
 0x2dd   : > { %2902 = vst.msk [vmem:[%s5055_s15 + $0x2b8] sm:$0x3f] %vm2815_vm1, %v14299_v5  ;;  %v14307_v13 = vmax.f32 %v14306_v12, 0.0  ;;  %v14309_v15 = vmax.f32 %v14308_v14, 0.0  ;;  %v14311_v17 = vmax.f32 %v14310_v16, 0.0  ;;  %v14312_v18 = vld [vmem:[#allocation66_spill] sm:$0xff] }
 0x2de   : > { %2903 = vst.msk [vmem:[%s5055_s15 + $0x2c0] sm:$0xff] %vm2813_vm0, %v14301_v7  ;;  %2905 = vst.msk [vmem:[%s5055_s15 + $0x2d0] sm:$0xff] %vm2813_vm0, %v14305_v11  ;;  %v14313_v19 = vmax.f32 %v14312_v18, 0.0  ;;  %v14314_v20 = vld [vmem:[#allocation67_spill] sm:$0xff]  ;;  %v14316_v22 = vld [vmem:[#allocation68_spill] sm:$0xff] }
 0x2df   : > { %2904 = vst.msk [vmem:[%s5055_s15 + $0x2c8] sm:$0x3f] %vm2815_vm1, %v14303_v9  ;;  %2906 = vst.msk [vmem:[%s5055_s15 + $0x2d8] sm:$0x3f] %vm2815_vm1, %v14307_v13  ;;  %v14315_v21 = vmax.f32 %v14314_v20, 0.0  ;;  %v14317_v26 = vmax.f32 %v14316_v22, 0.0 }
 0x2e0   : > { %2907 = vst.msk [vmem:[%s5055_s15 + $0x2e0] sm:$0xff] %vm2813_vm0, %v14309_v15  ;;  %2909 = vst.msk [vmem:[%s5055_s15 + $0x2f0] sm:$0xff] %vm2813_vm0, %v14313_v19  ;;  %v14318_v27 = vld [vmem:[#allocation69_spill] sm:$0xff]  ;;  %v14320_v37 = vld [vmem:[#allocation70_spill] sm:$0xff] }
 0x2e1   : > { %2908 = vst.msk [vmem:[%s5055_s15 + $0x2e8] sm:$0x3f] %vm2815_vm1, %v14311_v17  ;;  %2910 = vst.msk [vmem:[%s5055_s15 + $0x2f8] sm:$0x3f] %vm2815_vm1, %v14315_v21  ;;  %v14319_v28 = vmax.f32 %v14318_v27, 0.0  ;;  %v14321_v29 = vmax.f32 %v14320_v37, 0.0 }
 0x2e2   : > { %2911 = vst.msk [vmem:[%s5055_s15 + $0x300] sm:$0xff] %vm2813_vm0, %v14317_v26  ;;  %v14322_v49 = vld [vmem:[#allocation71_spill] sm:$0xff]  ;;  %v14324_v50 = vld [vmem:[#allocation72_spill] sm:$0xff]  ;;  %v14326_v55 = vld [vmem:[#allocation73_spill] sm:$0xff] }
 0x2e3   : > { %2912 = vst.msk [vmem:[%s5055_s15 + $0x308] sm:$0x3f] %vm2815_vm1, %v14319_v28  ;;  %v14323_v34 = vmax.f32 %v14322_v49, 0.0  ;;  %v14325_v35 = vmax.f32 %v14324_v50, 0.0  ;;  %v14327_v36 = vmax.f32 %v14326_v55, 0.0  ;;  %v14328_v0 = vld [vmem:[#allocation74_spill] sm:$0xff] }
 0x2e4   : > { %2913 = vst.msk [vmem:[%s5055_s15 + $0x310] sm:$0xff] %vm2813_vm0, %v14321_v29  ;;  %v14329_v1 = vmax.f32 %v14328_v0, 0.0  ;;  %v14330_v2 = vld [vmem:[#allocation75_spill] sm:$0xff]  ;;  %v14332_v4 = vld [vmem:[#allocation76_spill] sm:$0xff]  ;;  %v14334_v6 = vld [vmem:[#allocation77_spill] sm:$0xff] }
 0x2e5   : > { %2914 = vst.msk [vmem:[%s5055_s15 + $0x318] sm:$0x3f] %vm2815_vm1, %v14323_v34  ;;  %2916 = vst.msk [vmem:[%s5055_s15 + $0x328] sm:$0x3f] %vm2815_vm1, %v14327_v36  ;;  %v14331_v3 = vmax.f32 %v14330_v2, 0.0  ;;  %v14333_v5 = vmax.f32 %v14332_v4, 0.0 }
 0x2e6   : > { %2915 = vst.msk [vmem:[%s5055_s15 + $0x320] sm:$0xff] %vm2813_vm0, %v14325_v35  ;;  %2917 = vst.msk [vmem:[%s5055_s15 + $0x330] sm:$0xff] %vm2813_vm0, %v14329_v1  ;;  %v14335_v7 = vmax.f32 %v14334_v6, 0.0  ;;  %v14336_v8 = vld [vmem:[#allocation78_spill] sm:$0xff]  ;;  %v14338_v10 = vld [vmem:[#allocation79_spill] sm:$0xff] }
 0x2e7   : > { %2918 = vst.msk [vmem:[%s5055_s15 + $0x338] sm:$0x3f] %vm2815_vm1, %v14331_v3  ;;  %v14337_v9 = vmax.f32 %v14336_v8, 0.0  ;;  %v14339_v11 = vmax.f32 %v14338_v10, 0.0  ;;  %v14340_v12 = vld [vmem:[#allocation80_spill] sm:$0xff]  ;;  %v14342_v14 = vld [vmem:[#allocation81_spill] sm:$0xff] }
 0x2e8   : > { %2919 = vst.msk [vmem:[%s5055_s15 + $0x340] sm:$0xff] %vm2813_vm0, %v14333_v5  ;;  %v14341_v13 = vmax.f32 %v14340_v12, 0.0  ;;  %v14343_v15 = vmax.f32 %v14342_v14, 0.0  ;;  %v14344_v16 = vld [vmem:[#allocation82_spill] sm:$0xff]  ;;  %v14346_v18 = vld [vmem:[#allocation83_spill] sm:$0xff]  ;;  %v14348_v20 = vld [vmem:[#allocation84_spill] sm:$0xff] }
 0x2e9   : > { %2920 = vst.msk [vmem:[%s5055_s15 + $0x348] sm:$0x3f] %vm2815_vm1, %v14335_v7  ;;  %2922 = vst.msk [vmem:[%s5055_s15 + $0x358] sm:$0x3f] %vm2815_vm1, %v14339_v11  ;;  %v14345_v17 = vmax.f32 %v14344_v16, 0.0  ;;  %v14347_v19 = vmax.f32 %v14346_v18, 0.0 }
 0x2ea   : > { %2921 = vst.msk [vmem:[%s5055_s15 + $0x350] sm:$0xff] %vm2813_vm0, %v14337_v9  ;;  %2923 = vst.msk [vmem:[%s5055_s15 + $0x360] sm:$0xff] %vm2813_vm0, %v14341_v13  ;;  %v14349_v21 = vmax.f32 %v14348_v20, 0.0  ;;  %v14350_v22 = vld [vmem:[#allocation85_spill] sm:$0xff]  ;;  %v14352_v27 = vld [vmem:[#allocation86_spill] sm:$0xff] }
 0x2eb   : > { %2924 = vst.msk [vmem:[%s5055_s15 + $0x368] sm:$0x3f] %vm2815_vm1, %v14343_v15  ;;  %2926 = vst.msk [vmem:[%s5055_s15 + $0x378] sm:$0x3f] %vm2815_vm1, %v14347_v19  ;;  %v14351_v26 = vmax.f32 %v14350_v22, 0.0  ;;  %v14353_v28 = vmax.f32 %v14352_v27, 0.0 }
 0x2ec   : > { %2925 = vst.msk [vmem:[%s5055_s15 + $0x370] sm:$0xff] %vm2813_vm0, %v14345_v17  ;;  %2927 = vst.msk [vmem:[%s5055_s15 + $0x380] sm:$0xff] %vm2813_vm0, %v14349_v21  ;;  %v14354_v37 = vld [vmem:[#allocation87_spill] sm:$0xff]  ;;  %v14356_v49 = vld [vmem:[#allocation88_spill] sm:$0xff] }
 0x2ed   : > { %2928 = vst.msk [vmem:[%s5055_s15 + $0x388] sm:$0x3f] %vm2815_vm1, %v14351_v26  ;;  %v14355_v29 = vmax.f32 %v14354_v37, 0.0  ;;  %v14357_v34 = vmax.f32 %v14356_v49, 0.0  ;;  %v14358_v50 = vld [vmem:[#allocation89_spill] sm:$0xff]  ;;  %v14360_v55 = vld [vmem:[#allocation90_spill] sm:$0xff] }
 0x2ee   : > { %2929 = vst.msk [vmem:[%s5055_s15 + $0x390] sm:$0xff] %vm2813_vm0, %v14353_v28  ;;  %v14359_v35 = vmax.f32 %v14358_v50, 0.0  ;;  %v14361_v36 = vmax.f32 %v14360_v55, 0.0  ;;  %v14362_v0 = vld [vmem:[#allocation91_spill] sm:$0xff]  ;;  %v14364_v2 = vld [vmem:[#allocation92_spill] sm:$0xff]  ;;  %v14366_v4 = vld [vmem:[#allocation93_spill] sm:$0xff] }
 0x2ef   : > { %2930 = vst.msk [vmem:[%s5055_s15 + $0x398] sm:$0x3f] %vm2815_vm1, %v14355_v29  ;;  %v14363_v1 = vmax.f32 %v14362_v0, 0.0  ;;  %v14365_v3 = vmax.f32 %v14364_v2, 0.0  ;;  %v14367_v5 = vmax.f32 %v14366_v4, 0.0  ;;  %v14368_v6 = vld [vmem:[#allocation94_spill] sm:$0xff] }
 0x2f0   : > { %2931 = vst.msk [vmem:[%s5055_s15 + $0x3a0] sm:$0xff] %vm2813_vm0, %v14357_v34  ;;  %2933 = vst.msk [vmem:[%s5055_s15 + $0x3b0] sm:$0xff] %vm2813_vm0, %v14361_v36  ;;  %v14369_v7 = vmax.f32 %v14368_v6, 0.0  ;;  %v14370_v8 = vld [vmem:[#allocation95_spill] sm:$0xff]  ;;  %v14372_v10 = vld [vmem:[#allocation96_spill] sm:$0xff] }
 0x2f1   : > { %2932 = vst.msk [vmem:[%s5055_s15 + $0x3a8] sm:$0x3f] %vm2815_vm1, %v14359_v35  ;;  %2934 = vst.msk [vmem:[%s5055_s15 + $0x3b8] sm:$0x3f] %vm2815_vm1, %v14363_v1  ;;  %v14371_v9 = vmax.f32 %v14370_v8, 0.0  ;;  %v14373_v11 = vmax.f32 %v14372_v10, 0.0 }
 0x2f2   : > { %2935 = vst.msk [vmem:[%s5055_s15 + $0x3c0] sm:$0xff] %vm2813_vm0, %v14365_v3  ;;  %2937 = vst.msk [vmem:[%s5055_s15 + $0x3d0] sm:$0xff] %vm2813_vm0, %v14369_v7  ;;  %v14374_v12 = vld [vmem:[#allocation97_spill] sm:$0xff]  ;;  %v14376_v14 = vld [vmem:[#allocation98_spill] sm:$0xff] }
 0x2f3   : > { %2936 = vst.msk [vmem:[%s5055_s15 + $0x3c8] sm:$0x3f] %vm2815_vm1, %v14367_v5  ;;  %2938 = vst.msk [vmem:[%s5055_s15 + $0x3d8] sm:$0x3f] %vm2815_vm1, %v14371_v9  ;;  %v14375_v13 = vmax.f32 %v14374_v12, 0.0  ;;  %v14377_v15 = vmax.f32 %v14376_v14, 0.0 }
 0x2f4   : > { %2939 = vst.msk [vmem:[%s5055_s15 + $0x3e0] sm:$0xff] %vm2813_vm0, %v14373_v11  ;;  %v14378_v16 = vld [vmem:[#allocation99_spill] sm:$0xff]  ;;  %v14380_v18 = vld [vmem:[#allocation100_spill] sm:$0xff]  ;;  %v14382_v20 = vld [vmem:[#allocation101_spill] sm:$0xff] }
 0x2f5   : > { %2940 = vst.msk [vmem:[%s5055_s15 + $0x3e8] sm:$0x3f] %vm2815_vm1, %v14375_v13  ;;  %v14379_v17 = vmax.f32 %v14378_v16, 0.0  ;;  %v14381_v19 = vmax.f32 %v14380_v18, 0.0  ;;  %v14383_v21 = vmax.f32 %v14382_v20, 0.0  ;;  %v14384_v22 = vld [vmem:[#allocation102_spill] sm:$0xff] }
 0x2f6   : > { %2941 = vst.msk [vmem:[%s5055_s15 + $0x3f0] sm:$0xff] %vm2813_vm0, %v14377_v15  ;;  %v14385_v26 = vmax.f32 %v14384_v22, 0.0  ;;  %v14386_v27 = vld [vmem:[#allocation103_spill] sm:$0xff]  ;;  %v14388_v37 = vld [vmem:[#allocation104_spill] sm:$0xff]  ;;  %v14390_v49 = vld [vmem:[#allocation105_spill] sm:$0xff] }
 0x2f7   : > { %2942 = vst.msk [vmem:[%s5055_s15 + $0x3f8] sm:$0x3f] %vm2815_vm1, %v14379_v17  ;;  %2944 = vst.msk [vmem:[%s5055_s15 + $0x408] sm:$0x3f] %vm2815_vm1, %v14383_v21  ;;  %v14387_v28 = vmax.f32 %v14386_v27, 0.0  ;;  %v14389_v29 = vmax.f32 %v14388_v37, 0.0 }
 0x2f8   : > { %2943 = vst.msk [vmem:[%s5055_s15 + $0x400] sm:$0xff] %vm2813_vm0, %v14381_v19  ;;  %2945 = vst.msk [vmem:[%s5055_s15 + $0x410] sm:$0xff] %vm2813_vm0, %v14385_v26  ;;  %v14391_v34 = vmax.f32 %v14390_v49, 0.0  ;;  %v14392_v50 = vld [vmem:[#allocation106_spill] sm:$0xff]  ;;  %v14394_v55 = vld [vmem:[#allocation107_spill] sm:$0xff] }
 0x2f9   : > { %2946 = vst.msk [vmem:[%s5055_s15 + $0x418] sm:$0x3f] %vm2815_vm1, %v14387_v28  ;;  %v14393_v35 = vmax.f32 %v14392_v50, 0.0  ;;  %v14395_v36 = vmax.f32 %v14394_v55, 0.0  ;;  %v14396_v0 = vld [vmem:[#allocation108_spill] sm:$0xff]  ;;  %v14398_v2 = vld [vmem:[#allocation109_spill] sm:$0xff] }
 0x2fa   : > { %2947 = vst.msk [vmem:[%s5055_s15 + $0x420] sm:$0xff] %vm2813_vm0, %v14389_v29  ;;  %v14397_v1 = vmax.f32 %v14396_v0, 0.0  ;;  %v14399_v3 = vmax.f32 %v14398_v2, 0.0  ;;  %v14400_v4 = vld [vmem:[#allocation110_spill] sm:$0xff]  ;;  %v14402_v6 = vld [vmem:[#allocation111_spill] sm:$0xff]  ;;  %v14404_v8 = vld [vmem:[#allocation112_spill] sm:$0xff] }
 0x2fb   : > { %2948 = vst.msk [vmem:[%s5055_s15 + $0x428] sm:$0x3f] %vm2815_vm1, %v14391_v34  ;;  %2950 = vst.msk [vmem:[%s5055_s15 + $0x438] sm:$0x3f] %vm2815_vm1, %v14395_v36  ;;  %v14401_v5 = vmax.f32 %v14400_v4, 0.0  ;;  %v14403_v7 = vmax.f32 %v14402_v6, 0.0 }
 0x2fc   : > { %2949 = vst.msk [vmem:[%s5055_s15 + $0x430] sm:$0xff] %vm2813_vm0, %v14393_v35  ;;  %2951 = vst.msk [vmem:[%s5055_s15 + $0x440] sm:$0xff] %vm2813_vm0, %v14397_v1  ;;  %v14405_v9 = vmax.f32 %v14404_v8, 0.0  ;;  %v14406_v10 = vld [vmem:[#allocation113_spill] sm:$0xff]  ;;  %v14408_v12 = vld [vmem:[#allocation114_spill] sm:$0xff] }
 0x2fd   : > { %2952 = vst.msk [vmem:[%s5055_s15 + $0x448] sm:$0x3f] %vm2815_vm1, %v14399_v3  ;;  %2954 = vst.msk [vmem:[%s5055_s15 + $0x458] sm:$0x3f] %vm2815_vm1, %v14403_v7  ;;  %v14407_v11 = vmax.f32 %v14406_v10, 0.0  ;;  %v14409_v13 = vmax.f32 %v14408_v12, 0.0 }
 0x2fe   : > { %2953 = vst.msk [vmem:[%s5055_s15 + $0x450] sm:$0xff] %vm2813_vm0, %v14401_v5  ;;  %2955 = vst.msk [vmem:[%s5055_s15 + $0x460] sm:$0xff] %vm2813_vm0, %v14405_v9  ;;  %v14410_v14 = vld [vmem:[#allocation115_spill] sm:$0xff]  ;;  %v14412_v16 = vld [vmem:[#allocation116_spill] sm:$0xff]  ;;  %v14442_v12 = vmax.f32 %v4895_v47, 0.0  ;;  %v14448_v47 = vmax.f32 %v4911_v39, 0.0 }
 0x2ff   : > { %2956 = vst.msk [vmem:[%s5055_s15 + $0x468] sm:$0x3f] %vm2815_vm1, %v14407_v11  ;;  %v14411_v15 = vmax.f32 %v14410_v14, 0.0  ;;  %v14413_v17 = vmax.f32 %v14412_v16, 0.0  ;;  %v14414_v18 = vld [vmem:[#allocation117_spill] sm:$0xff]  ;;  %v14416_v20 = vld [vmem:[#allocation118_spill] sm:$0xff] }
 0x300   : > { %2957 = vst.msk [vmem:[%s5055_s15 + $0x470] sm:$0xff] %vm2813_vm0, %v14409_v13  ;;  %v14415_v19 = vmax.f32 %v14414_v18, 0.0  ;;  %v14417_v21 = vmax.f32 %v14416_v20, 0.0  ;;  %v14418_v22 = vld [vmem:[#allocation119_spill] sm:$0xff]  ;;  %v14420_v27 = vld [vmem:[#allocation120_spill] sm:$0xff]  ;;  %v14422_v37 = vld [vmem:[#allocation121_spill] sm:$0xff] }
 0x301   : > { %2958 = vst.msk [vmem:[%s5055_s15 + $0x478] sm:$0x3f] %vm2815_vm1, %v14411_v15  ;;  %v14419_v26 = vmax.f32 %v14418_v22, 0.0  ;;  %v14421_v28 = vmax.f32 %v14420_v27, 0.0  ;;  %v14423_v29 = vmax.f32 %v14422_v37, 0.0  ;;  %v14424_v49 = vld [vmem:[#allocation122_spill] sm:$0xff] }
 0x302   : > { %2959 = vst.msk [vmem:[%s5055_s15 + $0x480] sm:$0xff] %vm2813_vm0, %v14413_v17  ;;  %2961 = vst.msk [vmem:[%s5055_s15 + $0x490] sm:$0xff] %vm2813_vm0, %v14417_v21  ;;  %v14425_v34 = vmax.f32 %v14424_v49, 0.0  ;;  %v14426_v50 = vld [vmem:[#allocation123_spill] sm:$0xff]  ;;  %v14428_v55 = vld [vmem:[#allocation124_spill] sm:$0xff]  ;;  %v14443_v13 = vmax.f32 %v4898_v46, 0.0 }
 0x303   : > { %2960 = vst.msk [vmem:[%s5055_s15 + $0x488] sm:$0x3f] %vm2815_vm1, %v14415_v19  ;;  %2962 = vst.msk [vmem:[%s5055_s15 + $0x498] sm:$0x3f] %vm2815_vm1, %v14419_v26  ;;  %v14427_v35 = vmax.f32 %v14426_v50, 0.0  ;;  %v14429_v36 = vmax.f32 %v14428_v55, 0.0 }
 0x304   : > { %2963 = vst.msk [vmem:[%s5055_s15 + $0x4a0] sm:$0xff] %vm2813_vm0, %v14421_v28  ;;  %2965 = vst.msk [vmem:[%s5055_s15 + $0x4b0] sm:$0xff] %vm2813_vm0, %v14425_v34  ;;  %v14430_v0 = vld [vmem:[#allocation125_spill] sm:$0xff]  ;;  %v14432_v2 = vld [vmem:[#allocation126_spill] sm:$0xff]  ;;  %v14449_v46 = vmax.f32 %v4914_v38, 0.0  ;;  %v14450_v18 = vmax.f32 %v4917_v33, 0.0 }
 0x305   : > { %2964 = vst.msk [vmem:[%s5055_s15 + $0x4a8] sm:$0x3f] %vm2815_vm1, %v14423_v29  ;;  %2966 = vst.msk [vmem:[%s5055_s15 + $0x4b8] sm:$0x3f] %vm2815_vm1, %v14427_v35  ;;  %v14431_v1 = vmax.f32 %v14430_v0, 0.0  ;;  %v14433_v3 = vmax.f32 %v14432_v2, 0.0 }
 0x306   : > { %2967 = vst.msk [vmem:[%s5055_s15 + $0x4c0] sm:$0xff] %vm2813_vm0, %v14429_v36  ;;  %v14434_v4 = vld [vmem:[#allocation127_spill] sm:$0xff]  ;;  %v14436_v6 = vld [vmem:[#allocation128_spill] sm:$0xff]  ;;  %v14438_v8 = vld [vmem:[#allocation129_spill] sm:$0xff]  ;;  %v14451_v19 = vmax.f32 %v4920_v32, 0.0  ;;  %v14452_v39 = vmax.f32 %v4927_v31, 0.0 }
 0x307   : > { %2968 = vst.msk [vmem:[%s5055_s15 + $0x4c8] sm:$0x3f] %vm2815_vm1, %v14431_v1  ;;  %v14435_v5 = vmax.f32 %v14434_v4, 0.0  ;;  %v14437_v7 = vmax.f32 %v14436_v6, 0.0  ;;  %v14439_v9 = vmax.f32 %v14438_v8, 0.0  ;;  %v14440_v10 = vld [vmem:[#allocation130_spill] sm:$0xff] }
 0x308   : > { %2969 = vst.msk [vmem:[%s5055_s15 + $0x4d0] sm:$0xff] %vm2813_vm0, %v14433_v3  ;;  %v14441_v11 = vmax.f32 %v14440_v10, 0.0  ;;  %2975 = vst.msk [vmem:[%s5055_s15 + $0x500] sm:$0xff] %vm2813_vm0, %v14443_v13  ;;  %v14444_v14 = vld [vmem:[#allocation131_spill] sm:$0xff]  ;;  %v14446_v16 = vld [vmem:[#allocation132_spill] sm:$0xff]  ;;  %v14453_v38 = vmax.f32 %v4930_v30, 0.0 }
 0x309   : > { %2970 = vst.msk [vmem:[%s5055_s15 + $0x4d8] sm:$0x3f] %vm2815_vm1, %v14435_v5  ;;  %2972 = vst.msk [vmem:[%s5055_s15 + $0x4e8] sm:$0x3f] %vm2815_vm1, %v14439_v9  ;;  %v14445_v15 = vmax.f32 %v14444_v14, 0.0  ;;  %v14447_v17 = vmax.f32 %v14446_v16, 0.0 }
 0x30a   : > { %2971 = vst.msk [vmem:[%s5055_s15 + $0x4e0] sm:$0xff] %vm2813_vm0, %v14437_v7  ;;  %2973 = vst.msk [vmem:[%s5055_s15 + $0x4f0] sm:$0xff] %vm2813_vm0, %v14441_v11  ;;  %v14454_v33 = vmax.f32 %v4933_v25, 0.0  ;;  %v14455_v20 = vld [vmem:[#allocation133_spill] sm:$0xff]  ;;  %v14457_v31 = vmax.f32 %v4943_v23, 0.0  ;;  %v14458_v30 = vmax.f32 %v4946_v45, 0.0 }
 0x30b   : > { %2974 = vst.msk [vmem:[%s5055_s15 + $0x4f8] sm:$0x3f] %vm2815_vm1, %v14442_v12  ;;  %2976 = vst.msk [vmem:[%s5055_s15 + $0x508] sm:$0x3f] %vm2815_vm1, %v14445_v15  ;;  %v14456_v32 = vmax.f32 %v14455_v20, 0.0  ;;  %v14459_v25 = vmax.f32 %v4949_v44, 0.0 }
 0x30c   : > { %2977 = vst.msk [vmem:[%s5055_s15 + $0x510] sm:$0xff] %vm2813_vm0, %v14447_v17  ;;  %2979 = vst.msk [vmem:[%s5055_s15 + $0x520] sm:$0xff] %vm2813_vm0, %v14449_v46  ;;  %v14460_v21 = vmax.f32 %v4952_v43, 0.0  ;;  %v14461_v23 = vmax.f32 %v4959_v63, 0.0  ;;  %v14462_v22 = vmax.f32 %v4962_v53, 0.0  ;;  %v14463_v45 = vmax.f32 %v4965_v52, 0.0 }
 0x30d   : > { %2978 = vst.msk [vmem:[%s5055_s15 + $0x518] sm:$0x3f] %vm2815_vm1, %v14448_v47  ;;  %2980 = vst.msk [vmem:[%s5055_s15 + $0x528] sm:$0x3f] %vm2815_vm1, %v14450_v18  ;;  %v14464_v44 = vmax.f32 %v4968_v51, 0.0  ;;  %v14465_v43 = vmax.f32 %v4975_v61, 0.0 }
 0x30e   : > { %2981 = vst.msk [vmem:[%s5055_s15 + $0x530] sm:$0xff] %vm2813_vm0, %v14451_v19  ;;  %2983 = vst.msk [vmem:[%s5055_s15 + $0x540] sm:$0xff] %vm2813_vm0, %v14453_v38  ;;  %v14466_v63 = vmax.f32 %v4978_v60, 0.0  ;;  %v14467_v53 = vmax.f32 %v4981_v59, 0.0  ;;  %v14468_v52 = vmax.f32 %v4984_v58, 0.0  ;;  %v14469_v51 = vmax.f32 %v4991_v54, 0.0 }
 0x30f   : > { %2982 = vst.msk [vmem:[%s5055_s15 + $0x538] sm:$0x3f] %vm2815_vm1, %v14452_v39  ;;  %2984 = vst.msk [vmem:[%s5055_s15 + $0x548] sm:$0x3f] %vm2815_vm1, %v14454_v33  ;;  %v14470_v61 = vmax.f32 %v4994_v57, 0.0  ;;  %v14471_v60 = vmax.f32 %v4997_v42, 0.0 }
 0x310   : > { %2985 = vst.msk [vmem:[%s5055_s15 + $0x550] sm:$0xff] %vm2813_vm0, %v14456_v32  ;;  %2987 = vst.msk [vmem:[%s5055_s15 + $0x560] sm:$0xff] %vm2813_vm0, %v14458_v30  ;;  %v14472_v59 = vmax.f32 %v5000_v48, 0.0  ;;  %v14473_v58 = vmax.f32 %v8475_v40, 0.0  ;;  %v14474_v54 = vld [vmem:[#allocation1284_spill] sm:$0xff]  ;;  %v14476_v26 = vmax.f32 %v8492_v56, 0.0 }
 0x311   : > { %2986 = vst.msk [vmem:[%s5055_s15 + $0x558] sm:$0x3f] %vm2815_vm1, %v14457_v31  ;;  %2988 = vst.msk [vmem:[%s5055_s15 + $0x568] sm:$0x3f] %vm2815_vm1, %v14459_v25  ;;  %v14475_v57 = vmax.f32 %v14474_v54, 0.0  ;;  %v14477_v42 = vld [vmem:[#allocation134_spill] sm:$0xff] }
 0x312   : > { %2989 = vst.msk [vmem:[%s5055_s15 + $0x570] sm:$0xff] %vm2813_vm0, %v14460_v21  ;;  %2991 = vst.msk [vmem:[%s5055_s15 + $0x580] sm:$0xff] %vm2813_vm0, %v14462_v22  ;;  %v1660_v27 = vmax.f32 %v14477_v42, 0.0  ;;  %v14478_v28 = vld [vmem:[#allocation135_spill] sm:$0xff]  ;;  %v14479_v37 = vld [vmem:[#allocation136_spill] sm:$0xff] }
 0x313   : > { %2990 = vst.msk [vmem:[%s5055_s15 + $0x578] sm:$0x3f] %vm2815_vm1, %v14461_v23  ;;  %2992 = vst.msk [vmem:[%s5055_s15 + $0x588] sm:$0x3f] %vm2815_vm1, %v14463_v45  ;;  %v1661_v48 = vmax.f32 %v14478_v28, 0.0  ;;  %v1662_v29 = vmax.f32 %v14479_v37, 0.0 }
 0x314   : > { %2993 = vst.msk [vmem:[%s5055_s15 + $0x590] sm:$0xff] %vm2813_vm0, %v14464_v44  ;;  %2995 = vst.msk [vmem:[%s5055_s15 + $0x5a0] sm:$0xff] %vm2813_vm0, %v14466_v63  ;;  %v14480_v49 = vld [vmem:[#allocation137_spill] sm:$0xff]  ;;  %v14481_v34 = vld [vmem:[#allocation138_spill] sm:$0xff] }
 0x315   : > { %2994 = vst.msk [vmem:[%s5055_s15 + $0x598] sm:$0x3f] %vm2815_vm1, %v14465_v43  ;;  %2996 = vst.msk [vmem:[%s5055_s15 + $0x5a8] sm:$0x3f] %vm2815_vm1, %v14467_v53  ;;  %v1663_v40 = vmax.f32 %v14480_v49, 0.0  ;;  %v1664_v56 = vmax.f32 %v14481_v34, 0.0 }
 0x316   : > { %2997 = vst.msk [vmem:[%s5055_s15 + $0x5b0] sm:$0xff] %vm2813_vm0, %v14468_v52  ;;  %2999 = vst.msk [vmem:[%s5055_s15 + $0x5c0] sm:$0xff] %vm2813_vm0, %v14470_v61  ;;  %v14482_v50 = vld [vmem:[#allocation139_spill] sm:$0xff]  ;;  %v14483_v55 = vld [vmem:[#allocation140_spill] sm:$0xff] }
 0x317   : > { %2998 = vst.msk [vmem:[%s5055_s15 + $0x5b8] sm:$0x3f] %vm2815_vm1, %v14469_v51  ;;  %3000 = vst.msk [vmem:[%s5055_s15 + $0x5c8] sm:$0x3f] %vm2815_vm1, %v14471_v60  ;;  %v1665_v35 = vmax.f32 %v14482_v50, 0.0  ;;  %v1666_v36 = vmax.f32 %v14483_v55, 0.0 }
 0x318   : > { %3001 = vst.msk [vmem:[%s5055_s15 + $0x5d0] sm:$0xff] %vm2813_vm0, %v14472_v59  ;;  %3003 = vst.msk [vmem:[%s5055_s15 + $0x5e0] sm:$0xff] %vm2813_vm0, %v14475_v57  ;;  %v14484_v0 = vld [vmem:[#allocation141_spill] sm:$0xff]  ;;  %v14485_v24 = vld [vmem:[#allocation142_spill] sm:$0xff] }
 0x319   : > { %3002 = vst.msk [vmem:[%s5055_s15 + $0x5d8] sm:$0x3f] %vm2815_vm1, %v14473_v58  ;;  %3004 = vst.msk [vmem:[%s5055_s15 + $0x5e8] sm:$0x3f] %vm2815_vm1, %v14476_v26  ;;  %v1667_v1 = vmax.f32 %v14484_v0, 0.0  ;;  %v14486_v2 = vld [vmem:[#allocation143_spill] sm:$0xff] }
 0x31a   : > { %3005 = vst.msk [vmem:[%s5055_s15 + $0x5f0] sm:$0xff] %vm2813_vm0, %v1659_v41  ;;  %3007 = vst.msk [vmem:[%s5055_s15 + $0x600] sm:$0xff] %vm2813_vm0, %v1661_v48  ;;  %v1668_v41 = vmax.f32 %v14485_v24, 0.0  ;;  %v1669_v3 = vmax.f32 %v14486_v2, 0.0  ;;  %v14487_v4 = vld [vmem:[#allocation144_spill] sm:$0xff]  ;;  %v14488_v6 = vld [vmem:[#allocation145_spill] sm:$0xff] }
 0x31b   : > { %3006 = vst.msk [vmem:[%s5055_s15 + $0x5f8] sm:$0x3f] %vm2815_vm1, %v1660_v27  ;;  %3008 = vst.msk [vmem:[%s5055_s15 + $0x608] sm:$0x3f] %vm2815_vm1, %v1662_v29  ;;  %v1670_v5 = vmax.f32 %v14487_v4, 0.0  ;;  %v1671_v7 = vmax.f32 %v14488_v6, 0.0 }
 0x31c   : > { %3009 = vst.msk [vmem:[%s5055_s15 + $0x610] sm:$0xff] %vm2813_vm0, %v1663_v40  ;;  %3011 = vst.msk [vmem:[%s5055_s15 + $0x620] sm:$0xff] %vm2813_vm0, %v1665_v35  ;;  %v14489_v8 = vld [vmem:[#allocation146_spill] sm:$0xff]  ;;  %v14490_v10 = vld [vmem:[#allocation147_spill] sm:$0xff] }
 0x31d   : > { %3010 = vst.msk [vmem:[%s5055_s15 + $0x618] sm:$0x3f] %vm2815_vm1, %v1664_v56  ;;  %3012 = vst.msk [vmem:[%s5055_s15 + $0x628] sm:$0x3f] %vm2815_vm1, %v1666_v36  ;;  %v1672_v9 = vmax.f32 %v14489_v8, 0.0  ;;  %v1673_v11 = vmax.f32 %v14490_v10, 0.0 }
 0x31e   : > { %3013 = vst.msk [vmem:[%s5055_s15 + $0x630] sm:$0xff] %vm2813_vm0, %v1667_v1  ;;  %v14491_v12 = vld [vmem:[#allocation148_spill] sm:$0xff]  ;;  %v14492_v14 = vld [vmem:[#allocation149_spill] sm:$0xff]  ;;  %3015 = vst.msk [vmem:[%s5055_s15 + $0x640] sm:$0xff] %vm2813_vm0, %v1669_v3 }
 0x31f   : > { %v1674_v13 = vmax.f32 %v14491_v12, 0.0  ;;  %v1675_v15 = vmax.f32 %v14492_v14, 0.0  ;;  %3014 = vst.msk [vmem:[%s5055_s15 + $0x638] sm:$0x3f] %vm2815_vm1, %v1668_v41  ;;  %3016 = vst.msk [vmem:[%s5055_s15 + $0x648] sm:$0x3f] %vm2815_vm1, %v1670_v5 }
 0x320   : > { %3017 = vst.msk [vmem:[%s5055_s15 + $0x650] sm:$0xff] %vm2813_vm0, %v1671_v7  ;;  %v14493_v16 = vld [vmem:[#allocation150_spill] sm:$0xff]  ;;  %v14494_v47 = vld [vmem:[#allocation151_spill] sm:$0xff]  ;;  %v14495_v18 = vld [vmem:[#allocation152_spill] sm:$0xff] }
 0x321   : > { %v1676_v17 = vmax.f32 %v14493_v16, 0.0  ;;  %v1677_v46 = vmax.f32 %v14494_v47, 0.0  ;;  %v1678_v19 = vmax.f32 %v14495_v18, 0.0  ;;  %v14496_v39 = vld [vmem:[#allocation153_spill] sm:$0xff]  ;;  %3018 = vst.msk [vmem:[%s5055_s15 + $0x658] sm:$0x3f] %vm2815_vm1, %v1672_v9 }
 0x322   : > { %v1679_v38 = vmax.f32 %v14496_v39, 0.0  ;;  %3019 = vst.msk [vmem:[%s5055_s15 + $0x660] sm:$0xff] %vm2813_vm0, %v1673_v11  ;;  %3021 = vst.msk [vmem:[%s5055_s15 + $0x670] sm:$0xff] %vm2813_vm0, %v1675_v15  ;;  %v14497_v33 = vld [vmem:[#allocation154_spill] sm:$0xff]  ;;  %v14498_v32 = vld [vmem:[#allocation155_spill] sm:$0xff] }
 0x323   : > { %3020 = vst.msk [vmem:[%s5055_s15 + $0x668] sm:$0x3f] %vm2815_vm1, %v1674_v13  ;;  %v1680_v20 = vmax.f32 %v14497_v33, 0.0  ;;  %v1681_v31 = vmax.f32 %v14498_v32, 0.0  ;;  %v14499_v30 = vld [vmem:[#allocation156_spill] sm:$0xff]  ;;  %v14500_v21 = vld [vmem:[#allocation157_spill] sm:$0xff] }
 0x324   : > { %v1682_v25 = vmax.f32 %v14499_v30, 0.0  ;;  %v1683_v23 = vmax.f32 %v14500_v21, 0.0  ;;  %3022 = vst.msk [vmem:[%s5055_s15 + $0x678] sm:$0x3f] %vm2815_vm1, %v1676_v17  ;;  %3024 = vst.msk [vmem:[%s5055_s15 + $0x688] sm:$0x3f] %vm2815_vm1, %v1678_v19 }
 0x325   : > { %3023 = vst.msk [vmem:[%s5055_s15 + $0x680] sm:$0xff] %vm2813_vm0, %v1677_v46  ;;  %3025 = vst.msk [vmem:[%s5055_s15 + $0x690] sm:$0xff] %vm2813_vm0, %v1679_v38  ;;  %v14501_v22 = vld [vmem:[#allocation158_spill] sm:$0xff]  ;;  %v14502_v44 = vld [vmem:[#allocation159_spill] sm:$0xff] }
 0x326   : > { %v1684_v45 = vmax.f32 %v14501_v22, 0.0  ;;  %v1685_v43 = vmax.f32 %v14502_v44, 0.0  ;;  %v14503_v63 = vld [vmem:[#allocation160_spill] sm:$0xff]  ;;  %v14504_v52 = vld [vmem:[#allocation161_spill] sm:$0xff]  ;;  %3026 = vst.msk [vmem:[%s5055_s15 + $0x698] sm:$0x3f] %vm2815_vm1, %v1680_v20 }
 0x327   : > { %v1686_v53 = vmax.f32 %v14503_v63, 0.0  ;;  %v1687_v51 = vmax.f32 %v14504_v52, 0.0  ;;  %3027 = vst.msk [vmem:[%s5055_s15 + $0x6a0] sm:$0xff] %vm2813_vm0, %v1681_v31  ;;  %3029 = vst.msk [vmem:[%s5055_s15 + $0x6b0] sm:$0xff] %vm2813_vm0, %v1683_v23  ;;  %v14505_v61 = vld [vmem:[#allocation162_spill] sm:$0xff]  ;;  %v14506_v59 = vld [vmem:[#allocation163_spill] sm:$0xff] }
 0x328   : > { %3028 = vst.msk [vmem:[%s5055_s15 + $0x6a8] sm:$0x3f] %vm2815_vm1, %v1682_v25  ;;  %v1688_v60 = vmax.f32 %v14505_v61, 0.0  ;;  %v1689_v58 = vmax.f32 %v14506_v59, 0.0  ;;  %v14507_v54 = vld [vmem:[#allocation164_spill] sm:$0xff]  ;;  %v14508_v26 = vld [vmem:[#allocation165_spill] sm:$0xff] }
 0x329   : > { %v1690_v57 = vmax.f32 %v14507_v54, 0.0  ;;  %v1691_v42 = vmax.f32 %v14508_v26, 0.0  ;;  %3030 = vst.msk [vmem:[%s5055_s15 + $0x6b8] sm:$0x3f] %vm2815_vm1, %v1684_v45  ;;  %3032 = vst.msk [vmem:[%s5055_s15 + $0x6c8] sm:$0x3f] %vm2815_vm1, %v1686_v53 }
 0x32a   : > { %3031 = vst.msk [vmem:[%s5055_s15 + $0x6c0] sm:$0xff] %vm2813_vm0, %v1685_v43  ;;  %3033 = vst.msk [vmem:[%s5055_s15 + $0x6d0] sm:$0xff] %vm2813_vm0, %v1687_v51  ;;  %v14509_v27 = vld [vmem:[#allocation166_spill] sm:$0xff]  ;;  %v14510_v48 = vld [vmem:[#allocation167_spill] sm:$0xff] }
 0x32b   : > { %v1692_v28 = vmax.f32 %v14509_v27, 0.0  ;;  %v1693_v37 = vmax.f32 %v14510_v48, 0.0  ;;  %v14511_v29 = vld [vmem:[#allocation168_spill] sm:$0xff]  ;;  %v14512_v40 = vld [vmem:[#allocation169_spill] sm:$0xff]  ;;  %3034 = vst.msk [vmem:[%s5055_s15 + $0x6d8] sm:$0x3f] %vm2815_vm1, %v1688_v60 }
 0x32c   : > { %v1694_v49 = vmax.f32 %v14511_v29, 0.0  ;;  %v1695_v34 = vmax.f32 %v14512_v40, 0.0  ;;  %3035 = vst.msk [vmem:[%s5055_s15 + $0x6e0] sm:$0xff] %vm2813_vm0, %v1689_v58  ;;  %3037 = vst.msk [vmem:[%s5055_s15 + $0x6f0] sm:$0xff] %vm2813_vm0, %v1691_v42  ;;  %v14513_v56 = vld [vmem:[#allocation170_spill] sm:$0xff]  ;;  %v14514_v35 = vld [vmem:[#allocation171_spill] sm:$0xff] }
 0x32d   : > { %3036 = vst.msk [vmem:[%s5055_s15 + $0x6e8] sm:$0x3f] %vm2815_vm1, %v1690_v57  ;;  %v1696_v50 = vmax.f32 %v14513_v56, 0.0  ;;  %v1697_v55 = vmax.f32 %v14514_v35, 0.0  ;;  %v14515_v36 = vld [vmem:[#allocation172_spill] sm:$0xff]  ;;  %v14516_v1 = vld [vmem:[#allocation173_spill] sm:$0xff] }
 0x32e   : > { %v1698_v0 = vmax.f32 %v14515_v36, 0.0  ;;  %v1699_v24 = vmax.f32 %v14516_v1, 0.0  ;;  %3038 = vst.msk [vmem:[%s5055_s15 + $0x6f8] sm:$0x3f] %vm2815_vm1, %v1692_v28  ;;  %3040 = vst.msk [vmem:[%s5055_s15 + $0x708] sm:$0x3f] %vm2815_vm1, %v1694_v49 }
 0x32f   : > { %3039 = vst.msk [vmem:[%s5055_s15 + $0x700] sm:$0xff] %vm2813_vm0, %v1693_v37  ;;  %3041 = vst.msk [vmem:[%s5055_s15 + $0x710] sm:$0xff] %vm2813_vm0, %v1695_v34  ;;  %v14517_v41 = vld [vmem:[#allocation174_spill] sm:$0xff]  ;;  %v14518_v3 = vld [vmem:[#allocation175_spill] sm:$0xff] }
 0x330   : > { %v1700_v2 = vmax.f32 %v14517_v41, 0.0  ;;  %v1701_v4 = vmax.f32 %v14518_v3, 0.0  ;;  %v14519_v5 = vld [vmem:[#allocation176_spill] sm:$0xff]  ;;  %v14520_v7 = vld [vmem:[#allocation177_spill] sm:$0xff]  ;;  %3042 = vst.msk [vmem:[%s5055_s15 + $0x718] sm:$0x3f] %vm2815_vm1, %v1696_v50 }
 0x331   : > { %v1702_v6 = vmax.f32 %v14519_v5, 0.0  ;;  %v1703_v8 = vmax.f32 %v14520_v7, 0.0  ;;  %3043 = vst.msk [vmem:[%s5055_s15 + $0x720] sm:$0xff] %vm2813_vm0, %v1697_v55  ;;  %3045 = vst.msk [vmem:[%s5055_s15 + $0x730] sm:$0xff] %vm2813_vm0, %v1699_v24  ;;  %v14521_v9 = vld [vmem:[#allocation178_spill] sm:$0xff]  ;;  %v14522_v11 = vld [vmem:[#allocation179_spill] sm:$0xff] }
 0x332   : > { %3044 = vst.msk [vmem:[%s5055_s15 + $0x728] sm:$0x3f] %vm2815_vm1, %v1698_v0  ;;  %v1704_v10 = vmax.f32 %v14521_v9, 0.0  ;;  %v1705_v12 = vmax.f32 %v14522_v11, 0.0  ;;  %v14523_v13 = vld [vmem:[#allocation180_spill] sm:$0xff]  ;;  %v14524_v15 = vld [vmem:[#allocation181_spill] sm:$0xff] }
 0x333   : > { %v1706_v14 = vmax.f32 %v14523_v13, 0.0  ;;  %v1707_v16 = vmax.f32 %v14524_v15, 0.0  ;;  %3046 = vst.msk [vmem:[%s5055_s15 + $0x738] sm:$0x3f] %vm2815_vm1, %v1700_v2  ;;  %3048 = vst.msk [vmem:[%s5055_s15 + $0x748] sm:$0x3f] %vm2815_vm1, %v1702_v6 }
 0x334   : > { %3047 = vst.msk [vmem:[%s5055_s15 + $0x740] sm:$0xff] %vm2813_vm0, %v1701_v4  ;;  %3049 = vst.msk [vmem:[%s5055_s15 + $0x750] sm:$0xff] %vm2813_vm0, %v1703_v8  ;;  %v14525_v17 = vld [vmem:[#allocation182_spill] sm:$0xff]  ;;  %v14526_v46 = vld [vmem:[#allocation183_spill] sm:$0xff] }
 0x335   : > { %v1708_v47 = vmax.f32 %v14525_v17, 0.0  ;;  %v1709_v18 = vmax.f32 %v14526_v46, 0.0  ;;  %v14527_v19 = vld [vmem:[#allocation184_spill] sm:$0xff]  ;;  %v14528_v38 = vld [vmem:[#allocation185_spill] sm:$0xff]  ;;  %3050 = vst.msk [vmem:[%s5055_s15 + $0x758] sm:$0x3f] %vm2815_vm1, %v1704_v10 }
 0x336   : > { %v1710_v39 = vmax.f32 %v14527_v19, 0.0  ;;  %v1711_v33 = vmax.f32 %v14528_v38, 0.0  ;;  %3051 = vst.msk [vmem:[%s5055_s15 + $0x760] sm:$0xff] %vm2813_vm0, %v1705_v12  ;;  %3053 = vst.msk [vmem:[%s5055_s15 + $0x770] sm:$0xff] %vm2813_vm0, %v1707_v16  ;;  %v14529_v20 = vld [vmem:[#allocation186_spill] sm:$0xff]  ;;  %v14530_v31 = vld [vmem:[#allocation187_spill] sm:$0xff] }
 0x337   : > { %3052 = vst.msk [vmem:[%s5055_s15 + $0x768] sm:$0x3f] %vm2815_vm1, %v1706_v14  ;;  %v1712_v32 = vmax.f32 %v14529_v20, 0.0  ;;  %v1713_v30 = vmax.f32 %v14530_v31, 0.0  ;;  %v14531_v25 = vld [vmem:[#allocation188_spill] sm:$0xff]  ;;  %v14532_v23 = vld [vmem:[#allocation189_spill] sm:$0xff] }
 0x338   : > { %v1714_v21 = vmax.f32 %v14531_v25, 0.0  ;;  %v1715_v22 = vmax.f32 %v14532_v23, 0.0  ;;  %3054 = vst.msk [vmem:[%s5055_s15 + $0x778] sm:$0x3f] %vm2815_vm1, %v1708_v47  ;;  %3056 = vst.msk [vmem:[%s5055_s15 + $0x788] sm:$0x3f] %vm2815_vm1, %v1710_v39 }
 0x339   : > { %3055 = vst.msk [vmem:[%s5055_s15 + $0x780] sm:$0xff] %vm2813_vm0, %v1709_v18  ;;  %3057 = vst.msk [vmem:[%s5055_s15 + $0x790] sm:$0xff] %vm2813_vm0, %v1711_v33  ;;  %v14533_v45 = vld [vmem:[#allocation190_spill] sm:$0xff]  ;;  %v14534_v43 = vld [vmem:[#allocation191_spill] sm:$0xff] }
 0x33a   : > { %v1716_v44 = vmax.f32 %v14533_v45, 0.0  ;;  %v1717_v63 = vmax.f32 %v14534_v43, 0.0  ;;  %v14535_v53 = vld [vmem:[#allocation192_spill] sm:$0xff]  ;;  %v14536_v51 = vld [vmem:[#allocation193_spill] sm:$0xff]  ;;  %3058 = vst.msk [vmem:[%s5055_s15 + $0x798] sm:$0x3f] %vm2815_vm1, %v1712_v32 }
 0x33b   : > { %v1718_v52 = vmax.f32 %v14535_v53, 0.0  ;;  %v1719_v61 = vmax.f32 %v14536_v51, 0.0  ;;  %3059 = vst.msk [vmem:[%s5055_s15 + $0x7a0] sm:$0xff] %vm2813_vm0, %v1713_v30  ;;  %3061 = vst.msk [vmem:[%s5055_s15 + $0x7b0] sm:$0xff] %vm2813_vm0, %v1715_v22  ;;  %v14537_v60 = vld [vmem:[#allocation194_spill] sm:$0xff]  ;;  %v14538_v58 = vld [vmem:[#allocation195_spill] sm:$0xff] }
 0x33c   : > { %3060 = vst.msk [vmem:[%s5055_s15 + $0x7a8] sm:$0x3f] %vm2815_vm1, %v1714_v21  ;;  %v1720_v59 = vmax.f32 %v14537_v60, 0.0  ;;  %v1721_v54 = vmax.f32 %v14538_v58, 0.0  ;;  %v14539_v57 = vld [vmem:[#allocation196_spill] sm:$0xff]  ;;  %v14540_v42 = vld [vmem:[#allocation197_spill] sm:$0xff] }
 0x33d   : > { %v1722_v26 = vmax.f32 %v14539_v57, 0.0  ;;  %v1723_v27 = vmax.f32 %v14540_v42, 0.0  ;;  %3062 = vst.msk [vmem:[%s5055_s15 + $0x7b8] sm:$0x3f] %vm2815_vm1, %v1716_v44  ;;  %3064 = vst.msk [vmem:[%s5055_s15 + $0x7c8] sm:$0x3f] %vm2815_vm1, %v1718_v52 }
 0x33e   : > { %3063 = vst.msk [vmem:[%s5055_s15 + $0x7c0] sm:$0xff] %vm2813_vm0, %v1717_v63  ;;  %3065 = vst.msk [vmem:[%s5055_s15 + $0x7d0] sm:$0xff] %vm2813_vm0, %v1719_v61  ;;  %v14541_v28 = vld [vmem:[#allocation198_spill] sm:$0xff]  ;;  %v14542_v37 = vld [vmem:[#allocation199_spill] sm:$0xff] }
 0x33f   : > { %v1724_v48 = vmax.f32 %v14541_v28, 0.0  ;;  %v1725_v29 = vmax.f32 %v14542_v37, 0.0  ;;  %v14543_v49 = vld [vmem:[#allocation200_spill] sm:$0xff]  ;;  %v14544_v34 = vld [vmem:[#allocation201_spill] sm:$0xff]  ;;  %3066 = vst.msk [vmem:[%s5055_s15 + $0x7d8] sm:$0x3f] %vm2815_vm1, %v1720_v59 }
 0x340   : > { %v1726_v40 = vmax.f32 %v14543_v49, 0.0  ;;  %v1727_v56 = vmax.f32 %v14544_v34, 0.0  ;;  %3067 = vst.msk [vmem:[%s5055_s15 + $0x7e0] sm:$0xff] %vm2813_vm0, %v1721_v54  ;;  %3069 = vst.msk [vmem:[%s5055_s15 + $0x7f0] sm:$0xff] %vm2813_vm0, %v1723_v27  ;;  %v14545_v50 = vld [vmem:[#allocation202_spill] sm:$0xff]  ;;  %v14546_v55 = vld [vmem:[#allocation203_spill] sm:$0xff] }
 0x341   : > { %3068 = vst.msk [vmem:[%s5055_s15 + $0x7e8] sm:$0x3f] %vm2815_vm1, %v1722_v26  ;;  %v1728_v35 = vmax.f32 %v14545_v50, 0.0  ;;  %v1729_v36 = vmax.f32 %v14546_v55, 0.0  ;;  %v14547_v0 = vld [vmem:[#allocation204_spill] sm:$0xff]  ;;  %v14548_v24 = vld [vmem:[#allocation205_spill] sm:$0xff] }
 0x342   : > { %v1730_v1 = vmax.f32 %v14547_v0, 0.0  ;;  %v1731_v41 = vmax.f32 %v14548_v24, 0.0  ;;  %3070 = vst.msk [vmem:[%s5055_s15 + $0x7f8] sm:$0x3f] %vm2815_vm1, %v1724_v48  ;;  %3072 = vst.msk [vmem:[%s5055_s15 + $0x808] sm:$0x3f] %vm2815_vm1, %v1726_v40 }
 0x343   : > { %3071 = vst.msk [vmem:[%s5055_s15 + $0x800] sm:$0xff] %vm2813_vm0, %v1725_v29  ;;  %3073 = vst.msk [vmem:[%s5055_s15 + $0x810] sm:$0xff] %vm2813_vm0, %v1727_v56  ;;  %v14549_v2 = vld [vmem:[#allocation206_spill] sm:$0xff]  ;;  %v14550_v4 = vld [vmem:[#allocation207_spill] sm:$0xff] }
 0x344   : > { %v1732_v3 = vmax.f32 %v14549_v2, 0.0  ;;  %v1733_v5 = vmax.f32 %v14550_v4, 0.0  ;;  %v14551_v6 = vld [vmem:[#allocation208_spill] sm:$0xff]  ;;  %v14552_v8 = vld [vmem:[#allocation209_spill] sm:$0xff]  ;;  %3074 = vst.msk [vmem:[%s5055_s15 + $0x818] sm:$0x3f] %vm2815_vm1, %v1728_v35 }
 0x345   : > { %v1734_v7 = vmax.f32 %v14551_v6, 0.0  ;;  %v1735_v9 = vmax.f32 %v14552_v8, 0.0  ;;  %3075 = vst.msk [vmem:[%s5055_s15 + $0x820] sm:$0xff] %vm2813_vm0, %v1729_v36  ;;  %3077 = vst.msk [vmem:[%s5055_s15 + $0x830] sm:$0xff] %vm2813_vm0, %v1731_v41  ;;  %v14553_v10 = vld [vmem:[#allocation210_spill] sm:$0xff]  ;;  %v14554_v12 = vld [vmem:[#allocation211_spill] sm:$0xff] }
 0x346   : > { %3076 = vst.msk [vmem:[%s5055_s15 + $0x828] sm:$0x3f] %vm2815_vm1, %v1730_v1  ;;  %v1736_v11 = vmax.f32 %v14553_v10, 0.0  ;;  %v1737_v13 = vmax.f32 %v14554_v12, 0.0  ;;  %v14555_v14 = vld [vmem:[#allocation212_spill] sm:$0xff]  ;;  %v14556_v16 = vld [vmem:[#allocation213_spill] sm:$0xff] }
 0x347   : > { %v1738_v15 = vmax.f32 %v14555_v14, 0.0  ;;  %v1739_v17 = vmax.f32 %v14556_v16, 0.0  ;;  %3078 = vst.msk [vmem:[%s5055_s15 + $0x838] sm:$0x3f] %vm2815_vm1, %v1732_v3  ;;  %3080 = vst.msk [vmem:[%s5055_s15 + $0x848] sm:$0x3f] %vm2815_vm1, %v1734_v7 }
 0x348   : > { %3079 = vst.msk [vmem:[%s5055_s15 + $0x840] sm:$0xff] %vm2813_vm0, %v1733_v5  ;;  %3081 = vst.msk [vmem:[%s5055_s15 + $0x850] sm:$0xff] %vm2813_vm0, %v1735_v9  ;;  %v14557_v47 = vld [vmem:[#allocation214_spill] sm:$0xff]  ;;  %v14558_v18 = vld [vmem:[#allocation215_spill] sm:$0xff] }
 0x349   : > { %v1740_v46 = vmax.f32 %v14557_v47, 0.0  ;;  %v1741_v19 = vmax.f32 %v14558_v18, 0.0  ;;  %v14559_v39 = vld [vmem:[#allocation216_spill] sm:$0xff]  ;;  %v14560_v33 = vld [vmem:[#allocation217_spill] sm:$0xff]  ;;  %3082 = vst.msk [vmem:[%s5055_s15 + $0x858] sm:$0x3f] %vm2815_vm1, %v1736_v11 }
 0x34a   : > { %v1742_v38 = vmax.f32 %v14559_v39, 0.0  ;;  %v1743_v20 = vmax.f32 %v14560_v33, 0.0  ;;  %3083 = vst.msk [vmem:[%s5055_s15 + $0x860] sm:$0xff] %vm2813_vm0, %v1737_v13  ;;  %3085 = vst.msk [vmem:[%s5055_s15 + $0x870] sm:$0xff] %vm2813_vm0, %v1739_v17  ;;  %v14561_v32 = vld [vmem:[#allocation218_spill] sm:$0xff]  ;;  %v14562_v30 = vld [vmem:[#allocation219_spill] sm:$0xff] }
 0x34b   : > { %3084 = vst.msk [vmem:[%s5055_s15 + $0x868] sm:$0x3f] %vm2815_vm1, %v1738_v15  ;;  %v1744_v31 = vmax.f32 %v14561_v32, 0.0  ;;  %v1745_v25 = vmax.f32 %v14562_v30, 0.0  ;;  %v14563_v21 = vld [vmem:[#allocation220_spill] sm:$0xff]  ;;  %v14564_v22 = vld [vmem:[#allocation221_spill] sm:$0xff] }
 0x34c   : > { %v1746_v23 = vmax.f32 %v14563_v21, 0.0  ;;  %v1747_v45 = vmax.f32 %v14564_v22, 0.0  ;;  %3086 = vst.msk [vmem:[%s5055_s15 + $0x878] sm:$0x3f] %vm2815_vm1, %v1740_v46  ;;  %3088 = vst.msk [vmem:[%s5055_s15 + $0x888] sm:$0x3f] %vm2815_vm1, %v1742_v38 }
 0x34d   : > { %3087 = vst.msk [vmem:[%s5055_s15 + $0x880] sm:$0xff] %vm2813_vm0, %v1741_v19  ;;  %3089 = vst.msk [vmem:[%s5055_s15 + $0x890] sm:$0xff] %vm2813_vm0, %v1743_v20  ;;  %v14565_v44 = vld [vmem:[#allocation222_spill] sm:$0xff]  ;;  %v14566_v63 = vld [vmem:[#allocation223_spill] sm:$0xff] }
 0x34e   : > { %v1748_v43 = vmax.f32 %v14565_v44, 0.0  ;;  %v1749_v53 = vmax.f32 %v14566_v63, 0.0  ;;  %v14567_v52 = vld [vmem:[#allocation224_spill] sm:$0xff]  ;;  %v14568_v61 = vld [vmem:[#allocation225_spill] sm:$0xff]  ;;  %3090 = vst.msk [vmem:[%s5055_s15 + $0x898] sm:$0x3f] %vm2815_vm1, %v1744_v31 }
 0x34f   : > { %v1750_v51 = vmax.f32 %v14567_v52, 0.0  ;;  %v1751_v60 = vmax.f32 %v14568_v61, 0.0  ;;  %3091 = vst.msk [vmem:[%s5055_s15 + $0x8a0] sm:$0xff] %vm2813_vm0, %v1745_v25  ;;  %3093 = vst.msk [vmem:[%s5055_s15 + $0x8b0] sm:$0xff] %vm2813_vm0, %v1747_v45  ;;  %v14569_v59 = vld [vmem:[#allocation226_spill] sm:$0xff]  ;;  %v14570_v54 = vld [vmem:[#allocation227_spill] sm:$0xff] }
 0x350   : > { %3092 = vst.msk [vmem:[%s5055_s15 + $0x8a8] sm:$0x3f] %vm2815_vm1, %v1746_v23  ;;  %v1752_v58 = vmax.f32 %v14569_v59, 0.0  ;;  %v1753_v57 = vmax.f32 %v14570_v54, 0.0  ;;  %v14571_v26 = vld [vmem:[#allocation228_spill] sm:$0xff]  ;;  %v14572_v27 = vld [vmem:[#allocation229_spill] sm:$0xff] }
 0x351   : > { %v1754_v42 = vmax.f32 %v14571_v26, 0.0  ;;  %v1755_v28 = vmax.f32 %v14572_v27, 0.0  ;;  %3094 = vst.msk [vmem:[%s5055_s15 + $0x8b8] sm:$0x3f] %vm2815_vm1, %v1748_v43  ;;  %3096 = vst.msk [vmem:[%s5055_s15 + $0x8c8] sm:$0x3f] %vm2815_vm1, %v1750_v51 }
 0x352   : > { %3095 = vst.msk [vmem:[%s5055_s15 + $0x8c0] sm:$0xff] %vm2813_vm0, %v1749_v53  ;;  %3097 = vst.msk [vmem:[%s5055_s15 + $0x8d0] sm:$0xff] %vm2813_vm0, %v1751_v60  ;;  %v14573_v48 = vld [vmem:[#allocation230_spill] sm:$0xff]  ;;  %v14574_v29 = vld [vmem:[#allocation231_spill] sm:$0xff] }
 0x353   : > { %v1756_v37 = vmax.f32 %v14573_v48, 0.0  ;;  %v1757_v49 = vmax.f32 %v14574_v29, 0.0  ;;  %v14575_v40 = vld [vmem:[#allocation232_spill] sm:$0xff]  ;;  %v14576_v56 = vld [vmem:[#allocation233_spill] sm:$0xff]  ;;  %3098 = vst.msk [vmem:[%s5055_s15 + $0x8d8] sm:$0x3f] %vm2815_vm1, %v1752_v58 }
 0x354   : > { %v1758_v34 = vmax.f32 %v14575_v40, 0.0  ;;  %v1759_v50 = vmax.f32 %v14576_v56, 0.0  ;;  %3099 = vst.msk [vmem:[%s5055_s15 + $0x8e0] sm:$0xff] %vm2813_vm0, %v1753_v57  ;;  %3101 = vst.msk [vmem:[%s5055_s15 + $0x8f0] sm:$0xff] %vm2813_vm0, %v1755_v28  ;;  %v14577_v35 = vld [vmem:[#allocation234_spill] sm:$0xff]  ;;  %v14578_v36 = vld [vmem:[#allocation235_spill] sm:$0xff] }
 0x355   : > { %3100 = vst.msk [vmem:[%s5055_s15 + $0x8e8] sm:$0x3f] %vm2815_vm1, %v1754_v42  ;;  %v1760_v55 = vmax.f32 %v14577_v35, 0.0  ;;  %v1761_v0 = vmax.f32 %v14578_v36, 0.0  ;;  %v14579_v1 = vld [vmem:[#allocation236_spill] sm:$0xff]  ;;  %v14580_v41 = vld [vmem:[#allocation237_spill] sm:$0xff] }
 0x356   : > { %v1762_v24 = vmax.f32 %v14579_v1, 0.0  ;;  %v1763_v2 = vmax.f32 %v14580_v41, 0.0  ;;  %3102 = vst.msk [vmem:[%s5055_s15 + $0x8f8] sm:$0x3f] %vm2815_vm1, %v1756_v37  ;;  %3104 = vst.msk [vmem:[%s5055_s15 + $0x908] sm:$0x3f] %vm2815_vm1, %v1758_v34 }
 0x357   : > { %3103 = vst.msk [vmem:[%s5055_s15 + $0x900] sm:$0xff] %vm2813_vm0, %v1757_v49  ;;  %3105 = vst.msk [vmem:[%s5055_s15 + $0x910] sm:$0xff] %vm2813_vm0, %v1759_v50  ;;  %v14581_v3 = vld [vmem:[#allocation238_spill] sm:$0xff]  ;;  %v14582_v5 = vld [vmem:[#allocation239_spill] sm:$0xff] }
 0x358   : > { %v1764_v4 = vmax.f32 %v14581_v3, 0.0  ;;  %v1765_v6 = vmax.f32 %v14582_v5, 0.0  ;;  %v14583_v7 = vld [vmem:[#allocation240_spill] sm:$0xff]  ;;  %v14584_v9 = vld [vmem:[#allocation241_spill] sm:$0xff]  ;;  %3106 = vst.msk [vmem:[%s5055_s15 + $0x918] sm:$0x3f] %vm2815_vm1, %v1760_v55 }
 0x359   : > { %v1766_v8 = vmax.f32 %v14583_v7, 0.0  ;;  %v1767_v10 = vmax.f32 %v14584_v9, 0.0  ;;  %3107 = vst.msk [vmem:[%s5055_s15 + $0x920] sm:$0xff] %vm2813_vm0, %v1761_v0  ;;  %3109 = vst.msk [vmem:[%s5055_s15 + $0x930] sm:$0xff] %vm2813_vm0, %v1763_v2  ;;  %v14585_v11 = vld [vmem:[#allocation242_spill] sm:$0xff]  ;;  %v14586_v13 = vld [vmem:[#allocation243_spill] sm:$0xff] }
 0x35a   : > { %3108 = vst.msk [vmem:[%s5055_s15 + $0x928] sm:$0x3f] %vm2815_vm1, %v1762_v24  ;;  %v1768_v12 = vmax.f32 %v14585_v11, 0.0  ;;  %v1769_v14 = vmax.f32 %v14586_v13, 0.0  ;;  %v14587_v15 = vld [vmem:[#allocation244_spill] sm:$0xff]  ;;  %v14588_v17 = vld [vmem:[#allocation245_spill] sm:$0xff] }
 0x35b   : > { %v1770_v16 = vmax.f32 %v14587_v15, 0.0  ;;  %v1771_v47 = vmax.f32 %v14588_v17, 0.0  ;;  %3110 = vst.msk [vmem:[%s5055_s15 + $0x938] sm:$0x3f] %vm2815_vm1, %v1764_v4  ;;  %3112 = vst.msk [vmem:[%s5055_s15 + $0x948] sm:$0x3f] %vm2815_vm1, %v1766_v8 }
 0x35c   : > { %3111 = vst.msk [vmem:[%s5055_s15 + $0x940] sm:$0xff] %vm2813_vm0, %v1765_v6  ;;  %3113 = vst.msk [vmem:[%s5055_s15 + $0x950] sm:$0xff] %vm2813_vm0, %v1767_v10  ;;  %v14589_v46 = vld [vmem:[#allocation246_spill] sm:$0xff]  ;;  %v14590_v19 = vld [vmem:[#allocation247_spill] sm:$0xff] }
 0x35d   : > { %v1772_v18 = vmax.f32 %v14589_v46, 0.0  ;;  %v1773_v39 = vmax.f32 %v14590_v19, 0.0  ;;  %v14591_v38 = vld [vmem:[#allocation248_spill] sm:$0xff]  ;;  %v14592_v20 = vld [vmem:[#allocation249_spill] sm:$0xff]  ;;  %3114 = vst.msk [vmem:[%s5055_s15 + $0x958] sm:$0x3f] %vm2815_vm1, %v1768_v12 }
 0x35e   : > { %v1774_v33 = vmax.f32 %v14591_v38, 0.0  ;;  %v1775_v32 = vmax.f32 %v14592_v20, 0.0  ;;  %3115 = vst.msk [vmem:[%s5055_s15 + $0x960] sm:$0xff] %vm2813_vm0, %v1769_v14  ;;  %3117 = vst.msk [vmem:[%s5055_s15 + $0x970] sm:$0xff] %vm2813_vm0, %v1771_v47  ;;  %v14593_v31 = vld [vmem:[#allocation250_spill] sm:$0xff]  ;;  %v14594_v25 = vld [vmem:[#allocation251_spill] sm:$0xff] }
 0x35f   : > { %3116 = vst.msk [vmem:[%s5055_s15 + $0x968] sm:$0x3f] %vm2815_vm1, %v1770_v16  ;;  %v1776_v30 = vmax.f32 %v14593_v31, 0.0  ;;  %v1777_v21 = vmax.f32 %v14594_v25, 0.0  ;;  %v14595_v23 = vld [vmem:[#allocation252_spill] sm:$0xff]  ;;  %v14596_v45 = vld [vmem:[#allocation253_spill] sm:$0xff] }
 0x360   : > { %v1778_v22 = vmax.f32 %v14595_v23, 0.0  ;;  %v1779_v44 = vmax.f32 %v14596_v45, 0.0  ;;  %3118 = vst.msk [vmem:[%s5055_s15 + $0x978] sm:$0x3f] %vm2815_vm1, %v1772_v18  ;;  %3120 = vst.msk [vmem:[%s5055_s15 + $0x988] sm:$0x3f] %vm2815_vm1, %v1774_v33 }
 0x361   : > { %3119 = vst.msk [vmem:[%s5055_s15 + $0x980] sm:$0xff] %vm2813_vm0, %v1773_v39  ;;  %3121 = vst.msk [vmem:[%s5055_s15 + $0x990] sm:$0xff] %vm2813_vm0, %v1775_v32  ;;  %v14597_v43 = vld [vmem:[#allocation254_spill] sm:$0xff]  ;;  %v14598_v53 = vld [vmem:[#allocation255_spill] sm:$0xff] }
 0x362   : > { %v1780_v63 = vmax.f32 %v14597_v43, 0.0  ;;  %v1781_v52 = vmax.f32 %v14598_v53, 0.0  ;;  %v14599_v51 = vld [vmem:[#allocation256_spill] sm:$0xff]  ;;  %v14600_v60 = vld [vmem:[#allocation257_spill] sm:$0xff]  ;;  %3122 = vst.msk [vmem:[%s5055_s15 + $0x998] sm:$0x3f] %vm2815_vm1, %v1776_v30 }
 0x363   : > { %v1782_v61 = vmax.f32 %v14599_v51, 0.0  ;;  %v1783_v59 = vmax.f32 %v14600_v60, 0.0  ;;  %3123 = vst.msk [vmem:[%s5055_s15 + $0x9a0] sm:$0xff] %vm2813_vm0, %v1777_v21  ;;  %3125 = vst.msk [vmem:[%s5055_s15 + $0x9b0] sm:$0xff] %vm2813_vm0, %v1779_v44  ;;  %v14601_v58 = vld [vmem:[#allocation258_spill] sm:$0xff]  ;;  %v14602_v57 = vld [vmem:[#allocation259_spill] sm:$0xff] }
 0x364   : > { %3124 = vst.msk [vmem:[%s5055_s15 + $0x9a8] sm:$0x3f] %vm2815_vm1, %v1778_v22  ;;  %v1784_v54 = vmax.f32 %v14601_v58, 0.0  ;;  %v1785_v26 = vmax.f32 %v14602_v57, 0.0  ;;  %v14603_v42 = vld [vmem:[#allocation260_spill] sm:$0xff]  ;;  %v14604_v28 = vld [vmem:[#allocation261_spill] sm:$0xff] }
 0x365   : > { %v1786_v27 = vmax.f32 %v14603_v42, 0.0  ;;  %v1787_v48 = vmax.f32 %v14604_v28, 0.0  ;;  %3126 = vst.msk [vmem:[%s5055_s15 + $0x9b8] sm:$0x3f] %vm2815_vm1, %v1780_v63  ;;  %3128 = vst.msk [vmem:[%s5055_s15 + $0x9c8] sm:$0x3f] %vm2815_vm1, %v1782_v61 }
 0x366   : > { %3127 = vst.msk [vmem:[%s5055_s15 + $0x9c0] sm:$0xff] %vm2813_vm0, %v1781_v52  ;;  %3129 = vst.msk [vmem:[%s5055_s15 + $0x9d0] sm:$0xff] %vm2813_vm0, %v1783_v59  ;;  %v14605_v37 = vld [vmem:[#allocation262_spill] sm:$0xff]  ;;  %v14606_v49 = vld [vmem:[#allocation263_spill] sm:$0xff] }
 0x367   : > { %v1788_v29 = vmax.f32 %v14605_v37, 0.0  ;;  %v1789_v40 = vmax.f32 %v14606_v49, 0.0  ;;  %v14607_v34 = vld [vmem:[#allocation264_spill] sm:$0xff]  ;;  %v14608_v50 = vld [vmem:[#allocation265_spill] sm:$0xff]  ;;  %3130 = vst.msk [vmem:[%s5055_s15 + $0x9d8] sm:$0x3f] %vm2815_vm1, %v1784_v54 }
 0x368   : > { %v1790_v56 = vmax.f32 %v14607_v34, 0.0  ;;  %v1791_v35 = vmax.f32 %v14608_v50, 0.0  ;;  %3131 = vst.msk [vmem:[%s5055_s15 + $0x9e0] sm:$0xff] %vm2813_vm0, %v1785_v26  ;;  %3133 = vst.msk [vmem:[%s5055_s15 + $0x9f0] sm:$0xff] %vm2813_vm0, %v1787_v48  ;;  %v14609_v55 = vld [vmem:[#allocation266_spill] sm:$0xff]  ;;  %v14610_v0 = vld [vmem:[#allocation267_spill] sm:$0xff] }
 0x369   : > { %3132 = vst.msk [vmem:[%s5055_s15 + $0x9e8] sm:$0x3f] %vm2815_vm1, %v1786_v27  ;;  %v1792_v36 = vmax.f32 %v14609_v55, 0.0  ;;  %v1793_v1 = vmax.f32 %v14610_v0, 0.0  ;;  %v14611_v24 = vld [vmem:[#allocation268_spill] sm:$0xff]  ;;  %v14612_v2 = vld [vmem:[#allocation269_spill] sm:$0xff] }
 0x36a   : > { %v1794_v41 = vmax.f32 %v14611_v24, 0.0  ;;  %v1795_v3 = vmax.f32 %v14612_v2, 0.0  ;;  %3134 = vst.msk [vmem:[%s5055_s15 + $0x9f8] sm:$0x3f] %vm2815_vm1, %v1788_v29  ;;  %3136 = vst.msk [vmem:[%s5055_s15 + $0xa08] sm:$0x3f] %vm2815_vm1, %v1790_v56 }
 0x36b   : > { %3135 = vst.msk [vmem:[%s5055_s15 + $0xa00] sm:$0xff] %vm2813_vm0, %v1789_v40  ;;  %3137 = vst.msk [vmem:[%s5055_s15 + $0xa10] sm:$0xff] %vm2813_vm0, %v1791_v35  ;;  %v14613_v4 = vld [vmem:[#allocation270_spill] sm:$0xff]  ;;  %v14614_v6 = vld [vmem:[#allocation271_spill] sm:$0xff] }
 0x36c   : > { %v1796_v5 = vmax.f32 %v14613_v4, 0.0  ;;  %v1797_v7 = vmax.f32 %v14614_v6, 0.0  ;;  %v14615_v8 = vld [vmem:[#allocation272_spill] sm:$0xff]  ;;  %v14616_v10 = vld [vmem:[#allocation273_spill] sm:$0xff]  ;;  %3138 = vst.msk [vmem:[%s5055_s15 + $0xa18] sm:$0x3f] %vm2815_vm1, %v1792_v36 }
 0x36d   : > { %v1798_v9 = vmax.f32 %v14615_v8, 0.0  ;;  %v1799_v11 = vmax.f32 %v14616_v10, 0.0  ;;  %3139 = vst.msk [vmem:[%s5055_s15 + $0xa20] sm:$0xff] %vm2813_vm0, %v1793_v1  ;;  %3141 = vst.msk [vmem:[%s5055_s15 + $0xa30] sm:$0xff] %vm2813_vm0, %v1795_v3  ;;  %v14617_v12 = vld [vmem:[#allocation274_spill] sm:$0xff]  ;;  %v14618_v14 = vld [vmem:[#allocation275_spill] sm:$0xff] }
 0x36e   : > { %3140 = vst.msk [vmem:[%s5055_s15 + $0xa28] sm:$0x3f] %vm2815_vm1, %v1794_v41  ;;  %v1800_v13 = vmax.f32 %v14617_v12, 0.0  ;;  %v1801_v15 = vmax.f32 %v14618_v14, 0.0  ;;  %v14619_v16 = vld [vmem:[#allocation276_spill] sm:$0xff]  ;;  %v14620_v47 = vld [vmem:[#allocation277_spill] sm:$0xff] }
 0x36f   : > { %v1802_v17 = vmax.f32 %v14619_v16, 0.0  ;;  %v1803_v46 = vmax.f32 %v14620_v47, 0.0  ;;  %3142 = vst.msk [vmem:[%s5055_s15 + $0xa38] sm:$0x3f] %vm2815_vm1, %v1796_v5  ;;  %3144 = vst.msk [vmem:[%s5055_s15 + $0xa48] sm:$0x3f] %vm2815_vm1, %v1798_v9 }
 0x370   : > { %3143 = vst.msk [vmem:[%s5055_s15 + $0xa40] sm:$0xff] %vm2813_vm0, %v1797_v7  ;;  %3145 = vst.msk [vmem:[%s5055_s15 + $0xa50] sm:$0xff] %vm2813_vm0, %v1799_v11  ;;  %v14621_v18 = vld [vmem:[#allocation278_spill] sm:$0xff]  ;;  %v14622_v39 = vld [vmem:[#allocation279_spill] sm:$0xff] }
 0x371   : > { %v1804_v19 = vmax.f32 %v14621_v18, 0.0  ;;  %v1805_v38 = vmax.f32 %v14622_v39, 0.0  ;;  %v14623_v33 = vld [vmem:[#allocation280_spill] sm:$0xff]  ;;  %v14624_v32 = vld [vmem:[#allocation281_spill] sm:$0xff]  ;;  %3146 = vst.msk [vmem:[%s5055_s15 + $0xa58] sm:$0x3f] %vm2815_vm1, %v1800_v13 }
 0x372   : > { %v1806_v20 = vmax.f32 %v14623_v33, 0.0  ;;  %v1807_v31 = vmax.f32 %v14624_v32, 0.0  ;;  %3147 = vst.msk [vmem:[%s5055_s15 + $0xa60] sm:$0xff] %vm2813_vm0, %v1801_v15  ;;  %3149 = vst.msk [vmem:[%s5055_s15 + $0xa70] sm:$0xff] %vm2813_vm0, %v1803_v46  ;;  %v14625_v30 = vld [vmem:[#allocation282_spill] sm:$0xff]  ;;  %v14626_v21 = vld [vmem:[#allocation283_spill] sm:$0xff] }
 0x373   : > { %3148 = vst.msk [vmem:[%s5055_s15 + $0xa68] sm:$0x3f] %vm2815_vm1, %v1802_v17  ;;  %v1808_v25 = vmax.f32 %v14625_v30, 0.0  ;;  %v1809_v23 = vmax.f32 %v14626_v21, 0.0  ;;  %v14627_v22 = vld [vmem:[#allocation284_spill] sm:$0xff]  ;;  %v14628_v44 = vld [vmem:[#allocation285_spill] sm:$0xff] }
 0x374   : > { %v1810_v45 = vmax.f32 %v14627_v22, 0.0  ;;  %v1811_v43 = vmax.f32 %v14628_v44, 0.0  ;;  %3150 = vst.msk [vmem:[%s5055_s15 + $0xa78] sm:$0x3f] %vm2815_vm1, %v1804_v19  ;;  %3152 = vst.msk [vmem:[%s5055_s15 + $0xa88] sm:$0x3f] %vm2815_vm1, %v1806_v20 }
 0x375   : > { %3151 = vst.msk [vmem:[%s5055_s15 + $0xa80] sm:$0xff] %vm2813_vm0, %v1805_v38  ;;  %3153 = vst.msk [vmem:[%s5055_s15 + $0xa90] sm:$0xff] %vm2813_vm0, %v1807_v31  ;;  %v14629_v63 = vld [vmem:[#allocation286_spill] sm:$0xff]  ;;  %v14630_v52 = vld [vmem:[#allocation287_spill] sm:$0xff] }
 0x376   : > { %v1812_v53 = vmax.f32 %v14629_v63, 0.0  ;;  %v1813_v51 = vmax.f32 %v14630_v52, 0.0  ;;  %v14631_v61 = vld [vmem:[#allocation288_spill] sm:$0xff]  ;;  %v14632_v59 = vld [vmem:[#allocation289_spill] sm:$0xff]  ;;  %3154 = vst.msk [vmem:[%s5055_s15 + $0xa98] sm:$0x3f] %vm2815_vm1, %v1808_v25 }
 0x377   : > { %v1814_v60 = vmax.f32 %v14631_v61, 0.0  ;;  %v1815_v58 = vmax.f32 %v14632_v59, 0.0  ;;  %3155 = vst.msk [vmem:[%s5055_s15 + $0xaa0] sm:$0xff] %vm2813_vm0, %v1809_v23  ;;  %3157 = vst.msk [vmem:[%s5055_s15 + $0xab0] sm:$0xff] %vm2813_vm0, %v1811_v43  ;;  %v14633_v54 = vld [vmem:[#allocation290_spill] sm:$0xff]  ;;  %v14634_v26 = vld [vmem:[#allocation291_spill] sm:$0xff] }
 0x378   : > { %3156 = vst.msk [vmem:[%s5055_s15 + $0xaa8] sm:$0x3f] %vm2815_vm1, %v1810_v45  ;;  %v1816_v57 = vmax.f32 %v14633_v54, 0.0  ;;  %v1817_v42 = vmax.f32 %v14634_v26, 0.0  ;;  %v14635_v27 = vld [vmem:[#allocation292_spill] sm:$0xff]  ;;  %v14636_v48 = vld [vmem:[#allocation293_spill] sm:$0xff] }
 0x379   : > { %v1818_v28 = vmax.f32 %v14635_v27, 0.0  ;;  %v1819_v37 = vmax.f32 %v14636_v48, 0.0  ;;  %3158 = vst.msk [vmem:[%s5055_s15 + $0xab8] sm:$0x3f] %vm2815_vm1, %v1812_v53  ;;  %3160 = vst.msk [vmem:[%s5055_s15 + $0xac8] sm:$0x3f] %vm2815_vm1, %v1814_v60 }
 0x37a   : > { %3159 = vst.msk [vmem:[%s5055_s15 + $0xac0] sm:$0xff] %vm2813_vm0, %v1813_v51  ;;  %3161 = vst.msk [vmem:[%s5055_s15 + $0xad0] sm:$0xff] %vm2813_vm0, %v1815_v58  ;;  %v14637_v29 = vld [vmem:[#allocation294_spill] sm:$0xff]  ;;  %v14638_v40 = vld [vmem:[#allocation295_spill] sm:$0xff] }
 0x37b   : > { %v1820_v49 = vmax.f32 %v14637_v29, 0.0  ;;  %v1821_v34 = vmax.f32 %v14638_v40, 0.0  ;;  %v14639_v56 = vld [vmem:[#allocation296_spill] sm:$0xff]  ;;  %v14640_v35 = vld [vmem:[#allocation297_spill] sm:$0xff]  ;;  %3162 = vst.msk [vmem:[%s5055_s15 + $0xad8] sm:$0x3f] %vm2815_vm1, %v1816_v57 }
 0x37c   : > { %v1822_v50 = vmax.f32 %v14639_v56, 0.0  ;;  %v1823_v55 = vmax.f32 %v14640_v35, 0.0  ;;  %3163 = vst.msk [vmem:[%s5055_s15 + $0xae0] sm:$0xff] %vm2813_vm0, %v1817_v42  ;;  %3165 = vst.msk [vmem:[%s5055_s15 + $0xaf0] sm:$0xff] %vm2813_vm0, %v1819_v37  ;;  %v14641_v36 = vld [vmem:[#allocation298_spill] sm:$0xff]  ;;  %v14642_v1 = vld [vmem:[#allocation299_spill] sm:$0xff] }
 0x37d   : > { %3164 = vst.msk [vmem:[%s5055_s15 + $0xae8] sm:$0x3f] %vm2815_vm1, %v1818_v28  ;;  %v1824_v0 = vmax.f32 %v14641_v36, 0.0  ;;  %v1825_v24 = vmax.f32 %v14642_v1, 0.0  ;;  %v14643_v41 = vld [vmem:[#allocation300_spill] sm:$0xff]  ;;  %v14644_v3 = vld [vmem:[#allocation301_spill] sm:$0xff] }
 0x37e   : > { %v1826_v2 = vmax.f32 %v14643_v41, 0.0  ;;  %v1827_v4 = vmax.f32 %v14644_v3, 0.0  ;;  %3166 = vst.msk [vmem:[%s5055_s15 + $0xaf8] sm:$0x3f] %vm2815_vm1, %v1820_v49  ;;  %3168 = vst.msk [vmem:[%s5055_s15 + $0xb08] sm:$0x3f] %vm2815_vm1, %v1822_v50 }
 0x37f   : > { %3167 = vst.msk [vmem:[%s5055_s15 + $0xb00] sm:$0xff] %vm2813_vm0, %v1821_v34  ;;  %3169 = vst.msk [vmem:[%s5055_s15 + $0xb10] sm:$0xff] %vm2813_vm0, %v1823_v55  ;;  %v14645_v5 = vld [vmem:[#allocation302_spill] sm:$0xff]  ;;  %v14646_v7 = vld [vmem:[#allocation303_spill] sm:$0xff] }
 0x380   : > { %v1828_v6 = vmax.f32 %v14645_v5, 0.0  ;;  %v1829_v8 = vmax.f32 %v14646_v7, 0.0  ;;  %v14647_v9 = vld [vmem:[#allocation304_spill] sm:$0xff]  ;;  %v14648_v11 = vld [vmem:[#allocation305_spill] sm:$0xff]  ;;  %3170 = vst.msk [vmem:[%s5055_s15 + $0xb18] sm:$0x3f] %vm2815_vm1, %v1824_v0 }
 0x381   : > { %v1830_v10 = vmax.f32 %v14647_v9, 0.0  ;;  %v1831_v12 = vmax.f32 %v14648_v11, 0.0  ;;  %3171 = vst.msk [vmem:[%s5055_s15 + $0xb20] sm:$0xff] %vm2813_vm0, %v1825_v24  ;;  %3173 = vst.msk [vmem:[%s5055_s15 + $0xb30] sm:$0xff] %vm2813_vm0, %v1827_v4  ;;  %v14649_v13 = vld [vmem:[#allocation306_spill] sm:$0xff]  ;;  %v14650_v15 = vld [vmem:[#allocation307_spill] sm:$0xff] }
 0x382   : > { %3172 = vst.msk [vmem:[%s5055_s15 + $0xb28] sm:$0x3f] %vm2815_vm1, %v1826_v2  ;;  %v1832_v14 = vmax.f32 %v14649_v13, 0.0  ;;  %v1833_v16 = vmax.f32 %v14650_v15, 0.0  ;;  %v14651_v17 = vld [vmem:[#allocation308_spill] sm:$0xff]  ;;  %v14652_v46 = vld [vmem:[#allocation309_spill] sm:$0xff] }
 0x383   : > { %v1834_v47 = vmax.f32 %v14651_v17, 0.0  ;;  %v1835_v18 = vmax.f32 %v14652_v46, 0.0  ;;  %3174 = vst.msk [vmem:[%s5055_s15 + $0xb38] sm:$0x3f] %vm2815_vm1, %v1828_v6  ;;  %3176 = vst.msk [vmem:[%s5055_s15 + $0xb48] sm:$0x3f] %vm2815_vm1, %v1830_v10 }
 0x384   : > { %3175 = vst.msk [vmem:[%s5055_s15 + $0xb40] sm:$0xff] %vm2813_vm0, %v1829_v8  ;;  %3177 = vst.msk [vmem:[%s5055_s15 + $0xb50] sm:$0xff] %vm2813_vm0, %v1831_v12  ;;  %v14653_v19 = vld [vmem:[#allocation310_spill] sm:$0xff]  ;;  %v14654_v38 = vld [vmem:[#allocation311_spill] sm:$0xff] }
 0x385   : > { %v1836_v39 = vmax.f32 %v14653_v19, 0.0  ;;  %v1837_v33 = vmax.f32 %v14654_v38, 0.0  ;;  %v14655_v20 = vld [vmem:[#allocation312_spill] sm:$0xff]  ;;  %v14656_v31 = vld [vmem:[#allocation313_spill] sm:$0xff]  ;;  %3178 = vst.msk [vmem:[%s5055_s15 + $0xb58] sm:$0x3f] %vm2815_vm1, %v1832_v14 }
 0x386   : > { %v1838_v32 = vmax.f32 %v14655_v20, 0.0  ;;  %v1839_v30 = vmax.f32 %v14656_v31, 0.0  ;;  %3179 = vst.msk [vmem:[%s5055_s15 + $0xb60] sm:$0xff] %vm2813_vm0, %v1833_v16  ;;  %3181 = vst.msk [vmem:[%s5055_s15 + $0xb70] sm:$0xff] %vm2813_vm0, %v1835_v18  ;;  %v14657_v25 = vld [vmem:[#allocation314_spill] sm:$0xff]  ;;  %v14658_v23 = vld [vmem:[#allocation315_spill] sm:$0xff] }
 0x387   : > { %3180 = vst.msk [vmem:[%s5055_s15 + $0xb68] sm:$0x3f] %vm2815_vm1, %v1834_v47  ;;  %v1840_v21 = vmax.f32 %v14657_v25, 0.0  ;;  %v1841_v22 = vmax.f32 %v14658_v23, 0.0  ;;  %v14659_v45 = vld [vmem:[#allocation316_spill] sm:$0xff]  ;;  %v14660_v43 = vld [vmem:[#allocation317_spill] sm:$0xff] }
 0x388   : > { %v1842_v44 = vmax.f32 %v14659_v45, 0.0  ;;  %v1843_v63 = vmax.f32 %v14660_v43, 0.0  ;;  %3182 = vst.msk [vmem:[%s5055_s15 + $0xb78] sm:$0x3f] %vm2815_vm1, %v1836_v39  ;;  %3184 = vst.msk [vmem:[%s5055_s15 + $0xb88] sm:$0x3f] %vm2815_vm1, %v1838_v32 }
 0x389   : > { %3183 = vst.msk [vmem:[%s5055_s15 + $0xb80] sm:$0xff] %vm2813_vm0, %v1837_v33  ;;  %3185 = vst.msk [vmem:[%s5055_s15 + $0xb90] sm:$0xff] %vm2813_vm0, %v1839_v30  ;;  %v14661_v53 = vld [vmem:[#allocation318_spill] sm:$0xff]  ;;  %v14662_v51 = vld [vmem:[#allocation319_spill] sm:$0xff] }
 0x38a   : > { %v1844_v52 = vmax.f32 %v14661_v53, 0.0  ;;  %v1845_v61 = vmax.f32 %v14662_v51, 0.0  ;;  %v14663_v60 = vld [vmem:[#allocation320_spill] sm:$0xff]  ;;  %v14664_v58 = vld [vmem:[#allocation321_spill] sm:$0xff]  ;;  %3186 = vst.msk [vmem:[%s5055_s15 + $0xb98] sm:$0x3f] %vm2815_vm1, %v1840_v21 }
 0x38b   : > { %v1846_v59 = vmax.f32 %v14663_v60, 0.0  ;;  %v1847_v54 = vmax.f32 %v14664_v58, 0.0  ;;  %3187 = vst.msk [vmem:[%s5055_s15 + $0xba0] sm:$0xff] %vm2813_vm0, %v1841_v22  ;;  %3189 = vst.msk [vmem:[%s5055_s15 + $0xbb0] sm:$0xff] %vm2813_vm0, %v1843_v63  ;;  %v14665_v57 = vld [vmem:[#allocation322_spill] sm:$0xff]  ;;  %v14666_v42 = vld [vmem:[#allocation323_spill] sm:$0xff] }
 0x38c   : > { %3188 = vst.msk [vmem:[%s5055_s15 + $0xba8] sm:$0x3f] %vm2815_vm1, %v1842_v44  ;;  %v1848_v26 = vmax.f32 %v14665_v57, 0.0  ;;  %v1849_v27 = vmax.f32 %v14666_v42, 0.0  ;;  %v14667_v28 = vld [vmem:[#allocation324_spill] sm:$0xff]  ;;  %v14668_v37 = vld [vmem:[#allocation325_spill] sm:$0xff] }
 0x38d   : > { %v1850_v48 = vmax.f32 %v14667_v28, 0.0  ;;  %v1851_v29 = vmax.f32 %v14668_v37, 0.0  ;;  %3190 = vst.msk [vmem:[%s5055_s15 + $0xbb8] sm:$0x3f] %vm2815_vm1, %v1844_v52  ;;  %3192 = vst.msk [vmem:[%s5055_s15 + $0xbc8] sm:$0x3f] %vm2815_vm1, %v1846_v59 }
 0x38e   : > { %3191 = vst.msk [vmem:[%s5055_s15 + $0xbc0] sm:$0xff] %vm2813_vm0, %v1845_v61  ;;  %3193 = vst.msk [vmem:[%s5055_s15 + $0xbd0] sm:$0xff] %vm2813_vm0, %v1847_v54  ;;  %v14669_v49 = vld [vmem:[#allocation326_spill] sm:$0xff]  ;;  %v14670_v34 = vld [vmem:[#allocation327_spill] sm:$0xff] }
 0x38f   : > { %v1852_v40 = vmax.f32 %v14669_v49, 0.0  ;;  %v1853_v56 = vmax.f32 %v14670_v34, 0.0  ;;  %v14671_v50 = vld [vmem:[#allocation328_spill] sm:$0xff]  ;;  %v14672_v55 = vld [vmem:[#allocation329_spill] sm:$0xff]  ;;  %3194 = vst.msk [vmem:[%s5055_s15 + $0xbd8] sm:$0x3f] %vm2815_vm1, %v1848_v26 }
 0x390   : > { %v1854_v35 = vmax.f32 %v14671_v50, 0.0  ;;  %v1855_v36 = vmax.f32 %v14672_v55, 0.0  ;;  %3195 = vst.msk [vmem:[%s5055_s15 + $0xbe0] sm:$0xff] %vm2813_vm0, %v1849_v27  ;;  %3197 = vst.msk [vmem:[%s5055_s15 + $0xbf0] sm:$0xff] %vm2813_vm0, %v1851_v29  ;;  %v14673_v0 = vld [vmem:[#allocation330_spill] sm:$0xff]  ;;  %v14674_v24 = vld [vmem:[#allocation331_spill] sm:$0xff] }
 0x391   : > { %3196 = vst.msk [vmem:[%s5055_s15 + $0xbe8] sm:$0x3f] %vm2815_vm1, %v1850_v48  ;;  %v1856_v1 = vmax.f32 %v14673_v0, 0.0  ;;  %v1857_v41 = vmax.f32 %v14674_v24, 0.0  ;;  %v14675_v2 = vld [vmem:[#allocation332_spill] sm:$0xff]  ;;  %v14676_v4 = vld [vmem:[#allocation333_spill] sm:$0xff] }
 0x392   : > { %v1858_v3 = vmax.f32 %v14675_v2, 0.0  ;;  %v1859_v5 = vmax.f32 %v14676_v4, 0.0  ;;  %3198 = vst.msk [vmem:[%s5055_s15 + $0xbf8] sm:$0x3f] %vm2815_vm1, %v1852_v40  ;;  %3200 = vst.msk [vmem:[%s5055_s15 + $0xc08] sm:$0x3f] %vm2815_vm1, %v1854_v35 }
 0x393   : > { %3199 = vst.msk [vmem:[%s5055_s15 + $0xc00] sm:$0xff] %vm2813_vm0, %v1853_v56  ;;  %3201 = vst.msk [vmem:[%s5055_s15 + $0xc10] sm:$0xff] %vm2813_vm0, %v1855_v36  ;;  %v14677_v6 = vld [vmem:[#allocation334_spill] sm:$0xff]  ;;  %v14678_v8 = vld [vmem:[#allocation335_spill] sm:$0xff] }
 0x394   : > { %v1860_v7 = vmax.f32 %v14677_v6, 0.0  ;;  %v1861_v9 = vmax.f32 %v14678_v8, 0.0  ;;  %v14679_v10 = vld [vmem:[#allocation336_spill] sm:$0xff]  ;;  %v14680_v12 = vld [vmem:[#allocation337_spill] sm:$0xff]  ;;  %3202 = vst.msk [vmem:[%s5055_s15 + $0xc18] sm:$0x3f] %vm2815_vm1, %v1856_v1 }
 0x395   : > { %v1862_v11 = vmax.f32 %v14679_v10, 0.0  ;;  %v1863_v13 = vmax.f32 %v14680_v12, 0.0  ;;  %3203 = vst.msk [vmem:[%s5055_s15 + $0xc20] sm:$0xff] %vm2813_vm0, %v1857_v41  ;;  %3205 = vst.msk [vmem:[%s5055_s15 + $0xc30] sm:$0xff] %vm2813_vm0, %v1859_v5  ;;  %v14681_v14 = vld [vmem:[#allocation338_spill] sm:$0xff]  ;;  %v14682_v16 = vld [vmem:[#allocation339_spill] sm:$0xff] }
 0x396   : > { %3204 = vst.msk [vmem:[%s5055_s15 + $0xc28] sm:$0x3f] %vm2815_vm1, %v1858_v3  ;;  %v1864_v15 = vmax.f32 %v14681_v14, 0.0  ;;  %v1865_v17 = vmax.f32 %v14682_v16, 0.0  ;;  %v14683_v47 = vld [vmem:[#allocation340_spill] sm:$0xff]  ;;  %v14684_v18 = vld [vmem:[#allocation341_spill] sm:$0xff] }
 0x397   : > { %v1866_v46 = vmax.f32 %v14683_v47, 0.0  ;;  %v1867_v19 = vmax.f32 %v14684_v18, 0.0  ;;  %3206 = vst.msk [vmem:[%s5055_s15 + $0xc38] sm:$0x3f] %vm2815_vm1, %v1860_v7  ;;  %3208 = vst.msk [vmem:[%s5055_s15 + $0xc48] sm:$0x3f] %vm2815_vm1, %v1862_v11 }
 0x398   : > { %3207 = vst.msk [vmem:[%s5055_s15 + $0xc40] sm:$0xff] %vm2813_vm0, %v1861_v9  ;;  %3209 = vst.msk [vmem:[%s5055_s15 + $0xc50] sm:$0xff] %vm2813_vm0, %v1863_v13  ;;  %v14685_v39 = vld [vmem:[#allocation342_spill] sm:$0xff]  ;;  %v14686_v33 = vld [vmem:[#allocation343_spill] sm:$0xff] }
 0x399   : > { %v1868_v38 = vmax.f32 %v14685_v39, 0.0  ;;  %v1869_v20 = vmax.f32 %v14686_v33, 0.0  ;;  %v14687_v32 = vld [vmem:[#allocation344_spill] sm:$0xff]  ;;  %v14688_v30 = vld [vmem:[#allocation345_spill] sm:$0xff]  ;;  %3210 = vst.msk [vmem:[%s5055_s15 + $0xc58] sm:$0x3f] %vm2815_vm1, %v1864_v15 }
 0x39a   : > { %v1870_v31 = vmax.f32 %v14687_v32, 0.0  ;;  %v1871_v25 = vmax.f32 %v14688_v30, 0.0  ;;  %3211 = vst.msk [vmem:[%s5055_s15 + $0xc60] sm:$0xff] %vm2813_vm0, %v1865_v17  ;;  %3213 = vst.msk [vmem:[%s5055_s15 + $0xc70] sm:$0xff] %vm2813_vm0, %v1867_v19  ;;  %v14689_v21 = vld [vmem:[#allocation346_spill] sm:$0xff]  ;;  %v14690_v22 = vld [vmem:[#allocation347_spill] sm:$0xff] }
 0x39b   : > { %3212 = vst.msk [vmem:[%s5055_s15 + $0xc68] sm:$0x3f] %vm2815_vm1, %v1866_v46  ;;  %v1872_v23 = vmax.f32 %v14689_v21, 0.0  ;;  %v1873_v45 = vmax.f32 %v14690_v22, 0.0  ;;  %v14691_v44 = vld [vmem:[#allocation348_spill] sm:$0xff]  ;;  %v14692_v63 = vld [vmem:[#allocation349_spill] sm:$0xff] }
 0x39c   : > { %v1874_v43 = vmax.f32 %v14691_v44, 0.0  ;;  %v1875_v53 = vmax.f32 %v14692_v63, 0.0  ;;  %3214 = vst.msk [vmem:[%s5055_s15 + $0xc78] sm:$0x3f] %vm2815_vm1, %v1868_v38  ;;  %3216 = vst.msk [vmem:[%s5055_s15 + $0xc88] sm:$0x3f] %vm2815_vm1, %v1870_v31 }
 0x39d   : > { %3215 = vst.msk [vmem:[%s5055_s15 + $0xc80] sm:$0xff] %vm2813_vm0, %v1869_v20  ;;  %3217 = vst.msk [vmem:[%s5055_s15 + $0xc90] sm:$0xff] %vm2813_vm0, %v1871_v25  ;;  %v14693_v52 = vld [vmem:[#allocation350_spill] sm:$0xff]  ;;  %v14694_v61 = vld [vmem:[#allocation351_spill] sm:$0xff] }
 0x39e   : > { %v1876_v51 = vmax.f32 %v14693_v52, 0.0  ;;  %v1877_v60 = vmax.f32 %v14694_v61, 0.0  ;;  %v14695_v59 = vld [vmem:[#allocation352_spill] sm:$0xff]  ;;  %v14696_v54 = vld [vmem:[#allocation353_spill] sm:$0xff]  ;;  %3218 = vst.msk [vmem:[%s5055_s15 + $0xc98] sm:$0x3f] %vm2815_vm1, %v1872_v23 }
 0x39f   : > { %v1878_v58 = vmax.f32 %v14695_v59, 0.0  ;;  %v1879_v57 = vmax.f32 %v14696_v54, 0.0  ;;  %3219 = vst.msk [vmem:[%s5055_s15 + $0xca0] sm:$0xff] %vm2813_vm0, %v1873_v45  ;;  %3221 = vst.msk [vmem:[%s5055_s15 + $0xcb0] sm:$0xff] %vm2813_vm0, %v1875_v53  ;;  %v14697_v26 = vld [vmem:[#allocation354_spill] sm:$0xff]  ;;  %v14698_v27 = vld [vmem:[#allocation355_spill] sm:$0xff] }
 0x3a0   : > { %3220 = vst.msk [vmem:[%s5055_s15 + $0xca8] sm:$0x3f] %vm2815_vm1, %v1874_v43  ;;  %v1880_v42 = vmax.f32 %v14697_v26, 0.0  ;;  %v1881_v28 = vmax.f32 %v14698_v27, 0.0  ;;  %v14699_v48 = vld [vmem:[#allocation356_spill] sm:$0xff]  ;;  %v14700_v29 = vld [vmem:[#allocation357_spill] sm:$0xff] }
 0x3a1   : > { %v1882_v37 = vmax.f32 %v14699_v48, 0.0  ;;  %v1883_v49 = vmax.f32 %v14700_v29, 0.0  ;;  %3222 = vst.msk [vmem:[%s5055_s15 + $0xcb8] sm:$0x3f] %vm2815_vm1, %v1876_v51  ;;  %3224 = vst.msk [vmem:[%s5055_s15 + $0xcc8] sm:$0x3f] %vm2815_vm1, %v1878_v58 }
 0x3a2   : > { %3223 = vst.msk [vmem:[%s5055_s15 + $0xcc0] sm:$0xff] %vm2813_vm0, %v1877_v60  ;;  %3225 = vst.msk [vmem:[%s5055_s15 + $0xcd0] sm:$0xff] %vm2813_vm0, %v1879_v57  ;;  %v14701_v40 = vld [vmem:[#allocation358_spill] sm:$0xff]  ;;  %v14702_v56 = vld [vmem:[#allocation359_spill] sm:$0xff] }
 0x3a3   : > { %v1884_v34 = vmax.f32 %v14701_v40, 0.0  ;;  %v1885_v50 = vmax.f32 %v14702_v56, 0.0  ;;  %v14703_v35 = vld [vmem:[#allocation360_spill] sm:$0xff]  ;;  %v14704_v36 = vld [vmem:[#allocation361_spill] sm:$0xff]  ;;  %3226 = vst.msk [vmem:[%s5055_s15 + $0xcd8] sm:$0x3f] %vm2815_vm1, %v1880_v42 }
 0x3a4   : > { %v1886_v55 = vmax.f32 %v14703_v35, 0.0  ;;  %v1887_v0 = vmax.f32 %v14704_v36, 0.0  ;;  %3227 = vst.msk [vmem:[%s5055_s15 + $0xce0] sm:$0xff] %vm2813_vm0, %v1881_v28  ;;  %3229 = vst.msk [vmem:[%s5055_s15 + $0xcf0] sm:$0xff] %vm2813_vm0, %v1883_v49  ;;  %v14705_v1 = vld [vmem:[#allocation362_spill] sm:$0xff]  ;;  %v14706_v41 = vld [vmem:[#allocation363_spill] sm:$0xff] }
 0x3a5   : > { %3228 = vst.msk [vmem:[%s5055_s15 + $0xce8] sm:$0x3f] %vm2815_vm1, %v1882_v37  ;;  %v1888_v24 = vmax.f32 %v14705_v1, 0.0  ;;  %v1889_v2 = vmax.f32 %v14706_v41, 0.0  ;;  %v14707_v3 = vld [vmem:[#allocation364_spill] sm:$0xff]  ;;  %v14708_v5 = vld [vmem:[#allocation365_spill] sm:$0xff] }
 0x3a6   : > { %v1890_v4 = vmax.f32 %v14707_v3, 0.0  ;;  %v1891_v6 = vmax.f32 %v14708_v5, 0.0  ;;  %3230 = vst.msk [vmem:[%s5055_s15 + $0xcf8] sm:$0x3f] %vm2815_vm1, %v1884_v34  ;;  %3232 = vst.msk [vmem:[%s5055_s15 + $0xd08] sm:$0x3f] %vm2815_vm1, %v1886_v55 }
 0x3a7   : > { %3231 = vst.msk [vmem:[%s5055_s15 + $0xd00] sm:$0xff] %vm2813_vm0, %v1885_v50  ;;  %3233 = vst.msk [vmem:[%s5055_s15 + $0xd10] sm:$0xff] %vm2813_vm0, %v1887_v0  ;;  %v14709_v7 = vld [vmem:[#allocation366_spill] sm:$0xff]  ;;  %v14710_v9 = vld [vmem:[#allocation367_spill] sm:$0xff] }
 0x3a8   : > { %v1892_v8 = vmax.f32 %v14709_v7, 0.0  ;;  %v1893_v10 = vmax.f32 %v14710_v9, 0.0  ;;  %v14711_v11 = vld [vmem:[#allocation368_spill] sm:$0xff]  ;;  %v14712_v13 = vld [vmem:[#allocation369_spill] sm:$0xff]  ;;  %3234 = vst.msk [vmem:[%s5055_s15 + $0xd18] sm:$0x3f] %vm2815_vm1, %v1888_v24 }
 0x3a9   : > { %v1894_v12 = vmax.f32 %v14711_v11, 0.0  ;;  %v1895_v14 = vmax.f32 %v14712_v13, 0.0  ;;  %3235 = vst.msk [vmem:[%s5055_s15 + $0xd20] sm:$0xff] %vm2813_vm0, %v1889_v2  ;;  %3237 = vst.msk [vmem:[%s5055_s15 + $0xd30] sm:$0xff] %vm2813_vm0, %v1891_v6  ;;  %v14713_v15 = vld [vmem:[#allocation370_spill] sm:$0xff]  ;;  %v14714_v17 = vld [vmem:[#allocation371_spill] sm:$0xff] }
 0x3aa   : > { %3236 = vst.msk [vmem:[%s5055_s15 + $0xd28] sm:$0x3f] %vm2815_vm1, %v1890_v4  ;;  %v1896_v16 = vmax.f32 %v14713_v15, 0.0  ;;  %v1897_v47 = vmax.f32 %v14714_v17, 0.0  ;;  %v14715_v46 = vld [vmem:[#allocation372_spill] sm:$0xff]  ;;  %v14716_v19 = vld [vmem:[#allocation373_spill] sm:$0xff] }
 0x3ab   : > { %v1898_v18 = vmax.f32 %v14715_v46, 0.0  ;;  %v1899_v39 = vmax.f32 %v14716_v19, 0.0  ;;  %3238 = vst.msk [vmem:[%s5055_s15 + $0xd38] sm:$0x3f] %vm2815_vm1, %v1892_v8  ;;  %3240 = vst.msk [vmem:[%s5055_s15 + $0xd48] sm:$0x3f] %vm2815_vm1, %v1894_v12 }
 0x3ac   : > { %3239 = vst.msk [vmem:[%s5055_s15 + $0xd40] sm:$0xff] %vm2813_vm0, %v1893_v10  ;;  %3241 = vst.msk [vmem:[%s5055_s15 + $0xd50] sm:$0xff] %vm2813_vm0, %v1895_v14  ;;  %v14717_v38 = vld [vmem:[#allocation374_spill] sm:$0xff]  ;;  %v14718_v20 = vld [vmem:[#allocation375_spill] sm:$0xff] }
 0x3ad   : > { %v1900_v33 = vmax.f32 %v14717_v38, 0.0  ;;  %v1901_v32 = vmax.f32 %v14718_v20, 0.0  ;;  %v14719_v31 = vld [vmem:[#allocation376_spill] sm:$0xff]  ;;  %v14720_v25 = vld [vmem:[#allocation377_spill] sm:$0xff]  ;;  %3242 = vst.msk [vmem:[%s5055_s15 + $0xd58] sm:$0x3f] %vm2815_vm1, %v1896_v16 }
 0x3ae   : > { %v1902_v30 = vmax.f32 %v14719_v31, 0.0  ;;  %v1903_v21 = vmax.f32 %v14720_v25, 0.0  ;;  %3243 = vst.msk [vmem:[%s5055_s15 + $0xd60] sm:$0xff] %vm2813_vm0, %v1897_v47  ;;  %3245 = vst.msk [vmem:[%s5055_s15 + $0xd70] sm:$0xff] %vm2813_vm0, %v1899_v39  ;;  %v14721_v23 = vld [vmem:[#allocation378_spill] sm:$0xff]  ;;  %v14722_v45 = vld [vmem:[#allocation379_spill] sm:$0xff] }
 0x3af   : > { %3244 = vst.msk [vmem:[%s5055_s15 + $0xd68] sm:$0x3f] %vm2815_vm1, %v1898_v18  ;;  %v1904_v22 = vmax.f32 %v14721_v23, 0.0  ;;  %v1905_v44 = vmax.f32 %v14722_v45, 0.0  ;;  %v14723_v43 = vld [vmem:[#allocation380_spill] sm:$0xff]  ;;  %v14724_v53 = vld [vmem:[#allocation381_spill] sm:$0xff] }
 0x3b0   : > { %v1906_v63 = vmax.f32 %v14723_v43, 0.0  ;;  %v1907_v52 = vmax.f32 %v14724_v53, 0.0  ;;  %3246 = vst.msk [vmem:[%s5055_s15 + $0xd78] sm:$0x3f] %vm2815_vm1, %v1900_v33  ;;  %3248 = vst.msk [vmem:[%s5055_s15 + $0xd88] sm:$0x3f] %vm2815_vm1, %v1902_v30 }
 0x3b1   : > { %3247 = vst.msk [vmem:[%s5055_s15 + $0xd80] sm:$0xff] %vm2813_vm0, %v1901_v32  ;;  %3249 = vst.msk [vmem:[%s5055_s15 + $0xd90] sm:$0xff] %vm2813_vm0, %v1903_v21  ;;  %v14725_v51 = vld [vmem:[#allocation382_spill] sm:$0xff]  ;;  %v14726_v60 = vld [vmem:[#allocation383_spill] sm:$0xff] }
 0x3b2   : > { %v1908_v61 = vmax.f32 %v14725_v51, 0.0  ;;  %v1909_v59 = vmax.f32 %v14726_v60, 0.0  ;;  %v14727_v58 = vld [vmem:[#allocation384_spill] sm:$0xff]  ;;  %v14728_v57 = vld [vmem:[#allocation385_spill] sm:$0xff]  ;;  %3250 = vst.msk [vmem:[%s5055_s15 + $0xd98] sm:$0x3f] %vm2815_vm1, %v1904_v22 }
 0x3b3   : > { %v1910_v54 = vmax.f32 %v14727_v58, 0.0  ;;  %v1911_v26 = vmax.f32 %v14728_v57, 0.0  ;;  %3251 = vst.msk [vmem:[%s5055_s15 + $0xda0] sm:$0xff] %vm2813_vm0, %v1905_v44  ;;  %3253 = vst.msk [vmem:[%s5055_s15 + $0xdb0] sm:$0xff] %vm2813_vm0, %v1907_v52  ;;  %v14729_v42 = vld [vmem:[#allocation386_spill] sm:$0xff]  ;;  %v14730_v28 = vld [vmem:[#allocation387_spill] sm:$0xff] }
 0x3b4   : > { %3252 = vst.msk [vmem:[%s5055_s15 + $0xda8] sm:$0x3f] %vm2815_vm1, %v1906_v63  ;;  %v1912_v27 = vmax.f32 %v14729_v42, 0.0  ;;  %v1913_v48 = vmax.f32 %v14730_v28, 0.0  ;;  %v14731_v37 = vld [vmem:[#allocation388_spill] sm:$0xff]  ;;  %v14732_v49 = vld [vmem:[#allocation389_spill] sm:$0xff] }
 0x3b5   : > { %v1914_v29 = vmax.f32 %v14731_v37, 0.0  ;;  %v1915_v40 = vmax.f32 %v14732_v49, 0.0  ;;  %3254 = vst.msk [vmem:[%s5055_s15 + $0xdb8] sm:$0x3f] %vm2815_vm1, %v1908_v61  ;;  %3256 = vst.msk [vmem:[%s5055_s15 + $0xdc8] sm:$0x3f] %vm2815_vm1, %v1910_v54 }
 0x3b6   : > { %3255 = vst.msk [vmem:[%s5055_s15 + $0xdc0] sm:$0xff] %vm2813_vm0, %v1909_v59  ;;  %3257 = vst.msk [vmem:[%s5055_s15 + $0xdd0] sm:$0xff] %vm2813_vm0, %v1911_v26  ;;  %v14733_v34 = vld [vmem:[#allocation390_spill] sm:$0xff]  ;;  %v14734_v50 = vld [vmem:[#allocation391_spill] sm:$0xff] }
 0x3b7   : > { %v1916_v56 = vmax.f32 %v14733_v34, 0.0  ;;  %v1917_v35 = vmax.f32 %v14734_v50, 0.0  ;;  %v14735_v55 = vld [vmem:[#allocation392_spill] sm:$0xff]  ;;  %v14736_v0 = vld [vmem:[#allocation393_spill] sm:$0xff]  ;;  %3258 = vst.msk [vmem:[%s5055_s15 + $0xdd8] sm:$0x3f] %vm2815_vm1, %v1912_v27 }
 0x3b8   : > { %v1918_v36 = vmax.f32 %v14735_v55, 0.0  ;;  %v1919_v1 = vmax.f32 %v14736_v0, 0.0  ;;  %3259 = vst.msk [vmem:[%s5055_s15 + $0xde0] sm:$0xff] %vm2813_vm0, %v1913_v48  ;;  %3261 = vst.msk [vmem:[%s5055_s15 + $0xdf0] sm:$0xff] %vm2813_vm0, %v1915_v40  ;;  %v14737_v24 = vld [vmem:[#allocation394_spill] sm:$0xff]  ;;  %v14738_v2 = vld [vmem:[#allocation395_spill] sm:$0xff] }
 0x3b9   : > { %3260 = vst.msk [vmem:[%s5055_s15 + $0xde8] sm:$0x3f] %vm2815_vm1, %v1914_v29  ;;  %v1920_v41 = vmax.f32 %v14737_v24, 0.0  ;;  %v1921_v3 = vmax.f32 %v14738_v2, 0.0  ;;  %v14739_v4 = vld [vmem:[#allocation396_spill] sm:$0xff]  ;;  %v14740_v6 = vld [vmem:[#allocation397_spill] sm:$0xff] }
 0x3ba   : > { %v1922_v5 = vmax.f32 %v14739_v4, 0.0  ;;  %v1923_v7 = vmax.f32 %v14740_v6, 0.0  ;;  %3262 = vst.msk [vmem:[%s5055_s15 + $0xdf8] sm:$0x3f] %vm2815_vm1, %v1916_v56  ;;  %3264 = vst.msk [vmem:[%s5055_s15 + $0xe08] sm:$0x3f] %vm2815_vm1, %v1918_v36 }
 0x3bb   : > { %3263 = vst.msk [vmem:[%s5055_s15 + $0xe00] sm:$0xff] %vm2813_vm0, %v1917_v35  ;;  %3265 = vst.msk [vmem:[%s5055_s15 + $0xe10] sm:$0xff] %vm2813_vm0, %v1919_v1  ;;  %v14741_v8 = vld [vmem:[#allocation398_spill] sm:$0xff]  ;;  %v14742_v10 = vld [vmem:[#allocation399_spill] sm:$0xff] }
 0x3bc   : > { %v1924_v9 = vmax.f32 %v14741_v8, 0.0  ;;  %v1925_v11 = vmax.f32 %v14742_v10, 0.0  ;;  %v14743_v12 = vld [vmem:[#allocation400_spill] sm:$0xff]  ;;  %v14744_v14 = vld [vmem:[#allocation401_spill] sm:$0xff]  ;;  %3266 = vst.msk [vmem:[%s5055_s15 + $0xe18] sm:$0x3f] %vm2815_vm1, %v1920_v41 }
 0x3bd   : > { %v1926_v13 = vmax.f32 %v14743_v12, 0.0  ;;  %v1927_v15 = vmax.f32 %v14744_v14, 0.0  ;;  %3267 = vst.msk [vmem:[%s5055_s15 + $0xe20] sm:$0xff] %vm2813_vm0, %v1921_v3  ;;  %3269 = vst.msk [vmem:[%s5055_s15 + $0xe30] sm:$0xff] %vm2813_vm0, %v1923_v7  ;;  %v14745_v16 = vld [vmem:[#allocation402_spill] sm:$0xff]  ;;  %v14746_v47 = vld [vmem:[#allocation403_spill] sm:$0xff] }
 0x3be   : > { %3268 = vst.msk [vmem:[%s5055_s15 + $0xe28] sm:$0x3f] %vm2815_vm1, %v1922_v5  ;;  %v1928_v17 = vmax.f32 %v14745_v16, 0.0  ;;  %v1929_v46 = vmax.f32 %v14746_v47, 0.0  ;;  %v14747_v18 = vld [vmem:[#allocation404_spill] sm:$0xff]  ;;  %v14748_v39 = vld [vmem:[#allocation405_spill] sm:$0xff] }
 0x3bf   : > { %v1930_v19 = vmax.f32 %v14747_v18, 0.0  ;;  %v1931_v38 = vmax.f32 %v14748_v39, 0.0  ;;  %3270 = vst.msk [vmem:[%s5055_s15 + $0xe38] sm:$0x3f] %vm2815_vm1, %v1924_v9  ;;  %3272 = vst.msk [vmem:[%s5055_s15 + $0xe48] sm:$0x3f] %vm2815_vm1, %v1926_v13 }
 0x3c0   : > { %3271 = vst.msk [vmem:[%s5055_s15 + $0xe40] sm:$0xff] %vm2813_vm0, %v1925_v11  ;;  %3273 = vst.msk [vmem:[%s5055_s15 + $0xe50] sm:$0xff] %vm2813_vm0, %v1927_v15  ;;  %v14749_v33 = vld [vmem:[#allocation406_spill] sm:$0xff]  ;;  %v14750_v32 = vld [vmem:[#allocation407_spill] sm:$0xff] }
 0x3c1   : > { %v1932_v20 = vmax.f32 %v14749_v33, 0.0  ;;  %v1933_v31 = vmax.f32 %v14750_v32, 0.0  ;;  %v14751_v30 = vld [vmem:[#allocation408_spill] sm:$0xff]  ;;  %v14752_v21 = vld [vmem:[#allocation409_spill] sm:$0xff]  ;;  %3274 = vst.msk [vmem:[%s5055_s15 + $0xe58] sm:$0x3f] %vm2815_vm1, %v1928_v17 }
 0x3c2   : > { %v1934_v25 = vmax.f32 %v14751_v30, 0.0  ;;  %v1935_v23 = vmax.f32 %v14752_v21, 0.0  ;;  %3275 = vst.msk [vmem:[%s5055_s15 + $0xe60] sm:$0xff] %vm2813_vm0, %v1929_v46  ;;  %3277 = vst.msk [vmem:[%s5055_s15 + $0xe70] sm:$0xff] %vm2813_vm0, %v1931_v38  ;;  %v14753_v22 = vld [vmem:[#allocation410_spill] sm:$0xff]  ;;  %v14754_v44 = vld [vmem:[#allocation411_spill] sm:$0xff] }
 0x3c3   : > { %3276 = vst.msk [vmem:[%s5055_s15 + $0xe68] sm:$0x3f] %vm2815_vm1, %v1930_v19  ;;  %v1936_v45 = vmax.f32 %v14753_v22, 0.0  ;;  %v1937_v43 = vmax.f32 %v14754_v44, 0.0  ;;  %v14755_v63 = vld [vmem:[#allocation412_spill] sm:$0xff]  ;;  %v14756_v52 = vld [vmem:[#allocation413_spill] sm:$0xff] }
 0x3c4   : > { %v1938_v53 = vmax.f32 %v14755_v63, 0.0  ;;  %v1939_v51 = vmax.f32 %v14756_v52, 0.0  ;;  %3278 = vst.msk [vmem:[%s5055_s15 + $0xe78] sm:$0x3f] %vm2815_vm1, %v1932_v20  ;;  %3280 = vst.msk [vmem:[%s5055_s15 + $0xe88] sm:$0x3f] %vm2815_vm1, %v1934_v25 }
 0x3c5   : > { %3279 = vst.msk [vmem:[%s5055_s15 + $0xe80] sm:$0xff] %vm2813_vm0, %v1933_v31  ;;  %3281 = vst.msk [vmem:[%s5055_s15 + $0xe90] sm:$0xff] %vm2813_vm0, %v1935_v23  ;;  %v14757_v61 = vld [vmem:[#allocation414_spill] sm:$0xff]  ;;  %v14758_v59 = vld [vmem:[#allocation415_spill] sm:$0xff] }
 0x3c6   : > { %v1940_v60 = vmax.f32 %v14757_v61, 0.0  ;;  %v1941_v58 = vmax.f32 %v14758_v59, 0.0  ;;  %v14759_v54 = vld [vmem:[#allocation416_spill] sm:$0xff]  ;;  %v14760_v26 = vld [vmem:[#allocation417_spill] sm:$0xff]  ;;  %3282 = vst.msk [vmem:[%s5055_s15 + $0xe98] sm:$0x3f] %vm2815_vm1, %v1936_v45 }
 0x3c7   : > { %v1942_v57 = vmax.f32 %v14759_v54, 0.0  ;;  %v1943_v42 = vmax.f32 %v14760_v26, 0.0  ;;  %3283 = vst.msk [vmem:[%s5055_s15 + $0xea0] sm:$0xff] %vm2813_vm0, %v1937_v43  ;;  %3285 = vst.msk [vmem:[%s5055_s15 + $0xeb0] sm:$0xff] %vm2813_vm0, %v1939_v51  ;;  %v14761_v27 = vld [vmem:[#allocation418_spill] sm:$0xff]  ;;  %v14762_v48 = vld [vmem:[#allocation419_spill] sm:$0xff] }
 0x3c8   : > { %3284 = vst.msk [vmem:[%s5055_s15 + $0xea8] sm:$0x3f] %vm2815_vm1, %v1938_v53  ;;  %v1944_v28 = vmax.f32 %v14761_v27, 0.0  ;;  %v1945_v37 = vmax.f32 %v14762_v48, 0.0  ;;  %v14763_v29 = vld [vmem:[#allocation420_spill] sm:$0xff]  ;;  %v14764_v40 = vld [vmem:[#allocation421_spill] sm:$0xff] }
 0x3c9   : > { %v1946_v49 = vmax.f32 %v14763_v29, 0.0  ;;  %v1947_v34 = vmax.f32 %v14764_v40, 0.0  ;;  %3286 = vst.msk [vmem:[%s5055_s15 + $0xeb8] sm:$0x3f] %vm2815_vm1, %v1940_v60  ;;  %3288 = vst.msk [vmem:[%s5055_s15 + $0xec8] sm:$0x3f] %vm2815_vm1, %v1942_v57 }
 0x3ca   : > { %3287 = vst.msk [vmem:[%s5055_s15 + $0xec0] sm:$0xff] %vm2813_vm0, %v1941_v58  ;;  %3289 = vst.msk [vmem:[%s5055_s15 + $0xed0] sm:$0xff] %vm2813_vm0, %v1943_v42  ;;  %v14765_v56 = vld [vmem:[#allocation422_spill] sm:$0xff]  ;;  %v14766_v35 = vld [vmem:[#allocation423_spill] sm:$0xff] }
 0x3cb   : > { %v1948_v50 = vmax.f32 %v14765_v56, 0.0  ;;  %v1949_v55 = vmax.f32 %v14766_v35, 0.0  ;;  %v14767_v36 = vld [vmem:[#allocation424_spill] sm:$0xff]  ;;  %v14768_v1 = vld [vmem:[#allocation425_spill] sm:$0xff]  ;;  %3290 = vst.msk [vmem:[%s5055_s15 + $0xed8] sm:$0x3f] %vm2815_vm1, %v1944_v28 }
 0x3cc   : > { %v1950_v0 = vmax.f32 %v14767_v36, 0.0  ;;  %v1951_v24 = vmax.f32 %v14768_v1, 0.0  ;;  %3291 = vst.msk [vmem:[%s5055_s15 + $0xee0] sm:$0xff] %vm2813_vm0, %v1945_v37  ;;  %3293 = vst.msk [vmem:[%s5055_s15 + $0xef0] sm:$0xff] %vm2813_vm0, %v1947_v34  ;;  %v14769_v41 = vld [vmem:[#allocation426_spill] sm:$0xff]  ;;  %v14770_v3 = vld [vmem:[#allocation427_spill] sm:$0xff] }
 0x3cd   : > { %3292 = vst.msk [vmem:[%s5055_s15 + $0xee8] sm:$0x3f] %vm2815_vm1, %v1946_v49  ;;  %v1952_v2 = vmax.f32 %v14769_v41, 0.0  ;;  %v1953_v4 = vmax.f32 %v14770_v3, 0.0  ;;  %v14771_v5 = vld [vmem:[#allocation428_spill] sm:$0xff]  ;;  %v14772_v7 = vld [vmem:[#allocation429_spill] sm:$0xff] }
 0x3ce   : > { %v1954_v6 = vmax.f32 %v14771_v5, 0.0  ;;  %v1955_v8 = vmax.f32 %v14772_v7, 0.0  ;;  %3294 = vst.msk [vmem:[%s5055_s15 + $0xef8] sm:$0x3f] %vm2815_vm1, %v1948_v50  ;;  %3296 = vst.msk [vmem:[%s5055_s15 + $0xf08] sm:$0x3f] %vm2815_vm1, %v1950_v0 }
 0x3cf   : > { %3295 = vst.msk [vmem:[%s5055_s15 + $0xf00] sm:$0xff] %vm2813_vm0, %v1949_v55  ;;  %3297 = vst.msk [vmem:[%s5055_s15 + $0xf10] sm:$0xff] %vm2813_vm0, %v1951_v24  ;;  %v14773_v9 = vld [vmem:[#allocation430_spill] sm:$0xff]  ;;  %v14774_v11 = vld [vmem:[#allocation431_spill] sm:$0xff] }
 0x3d0   : > { %v1956_v10 = vmax.f32 %v14773_v9, 0.0  ;;  %v1957_v12 = vmax.f32 %v14774_v11, 0.0  ;;  %v14775_v13 = vld [vmem:[#allocation432_spill] sm:$0xff]  ;;  %v14776_v15 = vld [vmem:[#allocation433_spill] sm:$0xff]  ;;  %3298 = vst.msk [vmem:[%s5055_s15 + $0xf18] sm:$0x3f] %vm2815_vm1, %v1952_v2 }
 0x3d1   : > { %v1958_v14 = vmax.f32 %v14775_v13, 0.0  ;;  %v1959_v16 = vmax.f32 %v14776_v15, 0.0  ;;  %3299 = vst.msk [vmem:[%s5055_s15 + $0xf20] sm:$0xff] %vm2813_vm0, %v1953_v4  ;;  %3301 = vst.msk [vmem:[%s5055_s15 + $0xf30] sm:$0xff] %vm2813_vm0, %v1955_v8  ;;  %v14777_v17 = vld [vmem:[#allocation434_spill] sm:$0xff]  ;;  %v14778_v46 = vld [vmem:[#allocation435_spill] sm:$0xff] }
 0x3d2   : > { %3300 = vst.msk [vmem:[%s5055_s15 + $0xf28] sm:$0x3f] %vm2815_vm1, %v1954_v6  ;;  %v1960_v47 = vmax.f32 %v14777_v17, 0.0  ;;  %v1961_v18 = vmax.f32 %v14778_v46, 0.0  ;;  %v14779_v19 = vld [vmem:[#allocation436_spill] sm:$0xff]  ;;  %v14780_v38 = vld [vmem:[#allocation437_spill] sm:$0xff] }
 0x3d3   : > { %v1962_v39 = vmax.f32 %v14779_v19, 0.0  ;;  %v1963_v33 = vmax.f32 %v14780_v38, 0.0  ;;  %3302 = vst.msk [vmem:[%s5055_s15 + $0xf38] sm:$0x3f] %vm2815_vm1, %v1956_v10  ;;  %3304 = vst.msk [vmem:[%s5055_s15 + $0xf48] sm:$0x3f] %vm2815_vm1, %v1958_v14 }
 0x3d4   : > { %3303 = vst.msk [vmem:[%s5055_s15 + $0xf40] sm:$0xff] %vm2813_vm0, %v1957_v12  ;;  %3305 = vst.msk [vmem:[%s5055_s15 + $0xf50] sm:$0xff] %vm2813_vm0, %v1959_v16  ;;  %v14781_v20 = vld [vmem:[#allocation438_spill] sm:$0xff]  ;;  %v14782_v31 = vld [vmem:[#allocation439_spill] sm:$0xff] }
 0x3d5   : > { %v1964_v32 = vmax.f32 %v14781_v20, 0.0  ;;  %v1965_v30 = vmax.f32 %v14782_v31, 0.0  ;;  %v14783_v25 = vld [vmem:[#allocation440_spill] sm:$0xff]  ;;  %v14784_v23 = vld [vmem:[#allocation441_spill] sm:$0xff]  ;;  %3306 = vst.msk [vmem:[%s5055_s15 + $0xf58] sm:$0x3f] %vm2815_vm1, %v1960_v47 }
 0x3d6   : > { %v1966_v21 = vmax.f32 %v14783_v25, 0.0  ;;  %v1967_v22 = vmax.f32 %v14784_v23, 0.0  ;;  %3307 = vst.msk [vmem:[%s5055_s15 + $0xf60] sm:$0xff] %vm2813_vm0, %v1961_v18  ;;  %3309 = vst.msk [vmem:[%s5055_s15 + $0xf70] sm:$0xff] %vm2813_vm0, %v1963_v33  ;;  %v14785_v45 = vld [vmem:[#allocation442_spill] sm:$0xff]  ;;  %v14786_v43 = vld [vmem:[#allocation443_spill] sm:$0xff] }
 0x3d7   : > { %3308 = vst.msk [vmem:[%s5055_s15 + $0xf68] sm:$0x3f] %vm2815_vm1, %v1962_v39  ;;  %v1968_v44 = vmax.f32 %v14785_v45, 0.0  ;;  %v1969_v63 = vmax.f32 %v14786_v43, 0.0  ;;  %v14787_v53 = vld [vmem:[#allocation444_spill] sm:$0xff]  ;;  %v14788_v51 = vld [vmem:[#allocation445_spill] sm:$0xff] }
 0x3d8   : > { %v1970_v52 = vmax.f32 %v14787_v53, 0.0  ;;  %v1971_v61 = vmax.f32 %v14788_v51, 0.0  ;;  %3310 = vst.msk [vmem:[%s5055_s15 + $0xf78] sm:$0x3f] %vm2815_vm1, %v1964_v32  ;;  %3312 = vst.msk [vmem:[%s5055_s15 + $0xf88] sm:$0x3f] %vm2815_vm1, %v1966_v21 }
 0x3d9   : > { %3311 = vst.msk [vmem:[%s5055_s15 + $0xf80] sm:$0xff] %vm2813_vm0, %v1965_v30  ;;  %3313 = vst.msk [vmem:[%s5055_s15 + $0xf90] sm:$0xff] %vm2813_vm0, %v1967_v22  ;;  %v14789_v60 = vld [vmem:[#allocation446_spill] sm:$0xff]  ;;  %v14790_v58 = vld [vmem:[#allocation447_spill] sm:$0xff] }
 0x3da   : > { %v1972_v59 = vmax.f32 %v14789_v60, 0.0  ;;  %v1973_v54 = vmax.f32 %v14790_v58, 0.0  ;;  %v14791_v57 = vld [vmem:[#allocation448_spill] sm:$0xff]  ;;  %v14792_v42 = vld [vmem:[#allocation449_spill] sm:$0xff]  ;;  %3314 = vst.msk [vmem:[%s5055_s15 + $0xf98] sm:$0x3f] %vm2815_vm1, %v1968_v44 }
 0x3db   : > { %v1974_v26 = vmax.f32 %v14791_v57, 0.0  ;;  %v1975_v27 = vmax.f32 %v14792_v42, 0.0  ;;  %3315 = vst.msk [vmem:[%s5055_s15 + $0xfa0] sm:$0xff] %vm2813_vm0, %v1969_v63  ;;  %3317 = vst.msk [vmem:[%s5055_s15 + $0xfb0] sm:$0xff] %vm2813_vm0, %v1971_v61  ;;  %v14793_v28 = vld [vmem:[#allocation450_spill] sm:$0xff]  ;;  %v14794_v37 = vld [vmem:[#allocation451_spill] sm:$0xff] }
 0x3dc   : > { %3316 = vst.msk [vmem:[%s5055_s15 + $0xfa8] sm:$0x3f] %vm2815_vm1, %v1970_v52  ;;  %v1976_v48 = vmax.f32 %v14793_v28, 0.0  ;;  %v1977_v29 = vmax.f32 %v14794_v37, 0.0  ;;  %v14795_v49 = vld [vmem:[#allocation452_spill] sm:$0xff]  ;;  %v14796_v34 = vld [vmem:[#allocation453_spill] sm:$0xff] }
 0x3dd   : > { %v1978_v40 = vmax.f32 %v14795_v49, 0.0  ;;  %v1979_v56 = vmax.f32 %v14796_v34, 0.0  ;;  %3318 = vst.msk [vmem:[%s5055_s15 + $0xfb8] sm:$0x3f] %vm2815_vm1, %v1972_v59  ;;  %3320 = vst.msk [vmem:[%s5055_s15 + $0xfc8] sm:$0x3f] %vm2815_vm1, %v1974_v26 }
 0x3de   : > { %3319 = vst.msk [vmem:[%s5055_s15 + $0xfc0] sm:$0xff] %vm2813_vm0, %v1973_v54  ;;  %3321 = vst.msk [vmem:[%s5055_s15 + $0xfd0] sm:$0xff] %vm2813_vm0, %v1975_v27  ;;  %v14797_v50 = vld [vmem:[#allocation454_spill] sm:$0xff]  ;;  %v14798_v55 = vld [vmem:[#allocation455_spill] sm:$0xff] }
 0x3df   : > { %v1980_v35 = vmax.f32 %v14797_v50, 0.0  ;;  %v1981_v36 = vmax.f32 %v14798_v55, 0.0  ;;  %v14799_v0 = vld [vmem:[#allocation456_spill] sm:$0xff]  ;;  %v14800_v24 = vld [vmem:[#allocation457_spill] sm:$0xff]  ;;  %3322 = vst.msk [vmem:[%s5055_s15 + $0xfd8] sm:$0x3f] %vm2815_vm1, %v1976_v48 }
 0x3e0   : > { %v1982_v1 = vmax.f32 %v14799_v0, 0.0  ;;  %v1983_v41 = vmax.f32 %v14800_v24, 0.0  ;;  %3323 = vst.msk [vmem:[%s5055_s15 + $0xfe0] sm:$0xff] %vm2813_vm0, %v1977_v29  ;;  %3325 = vst.msk [vmem:[%s5055_s15 + $0xff0] sm:$0xff] %vm2813_vm0, %v1979_v56  ;;  %v14801_v2 = vld [vmem:[#allocation458_spill] sm:$0xff]  ;;  %v14802_v4 = vld [vmem:[#allocation459_spill] sm:$0xff] }
 0x3e1   : > { %3324 = vst.msk [vmem:[%s5055_s15 + $0xfe8] sm:$0x3f] %vm2815_vm1, %v1978_v40  ;;  %v1984_v3 = vmax.f32 %v14801_v2, 0.0  ;;  %v1985_v5 = vmax.f32 %v14802_v4, 0.0  ;;  %v14803_v6 = vld [vmem:[#allocation460_spill] sm:$0xff]  ;;  %v14804_v8 = vld [vmem:[#allocation461_spill] sm:$0xff] }
 0x3e2   : > { %v1986_v7 = vmax.f32 %v14803_v6, 0.0  ;;  %v1987_v9 = vmax.f32 %v14804_v8, 0.0  ;;  %3326 = vst.msk [vmem:[%s5055_s15 + $0xff8] sm:$0x3f] %vm2815_vm1, %v1980_v35  ;;  %3328 = vst.msk [vmem:[%s5055_s15 + $0x1008] sm:$0x3f] %vm2815_vm1, %v1982_v1 }
 0x3e3   : > { %3327 = vst.msk [vmem:[%s5055_s15 + $0x1000] sm:$0xff] %vm2813_vm0, %v1981_v36  ;;  %3329 = vst.msk [vmem:[%s5055_s15 + $0x1010] sm:$0xff] %vm2813_vm0, %v1983_v41  ;;  %v14805_v10 = vld [vmem:[#allocation462_spill] sm:$0xff]  ;;  %v14806_v12 = vld [vmem:[#allocation463_spill] sm:$0xff] }
 0x3e4   : > { %v1988_v11 = vmax.f32 %v14805_v10, 0.0  ;;  %v1989_v13 = vmax.f32 %v14806_v12, 0.0  ;;  %v14807_v14 = vld [vmem:[#allocation464_spill] sm:$0xff]  ;;  %v14808_v16 = vld [vmem:[#allocation465_spill] sm:$0xff]  ;;  %3330 = vst.msk [vmem:[%s5055_s15 + $0x1018] sm:$0x3f] %vm2815_vm1, %v1984_v3 }
 0x3e5   : > { %v1990_v15 = vmax.f32 %v14807_v14, 0.0  ;;  %v1991_v17 = vmax.f32 %v14808_v16, 0.0  ;;  %3331 = vst.msk [vmem:[%s5055_s15 + $0x1020] sm:$0xff] %vm2813_vm0, %v1985_v5  ;;  %3333 = vst.msk [vmem:[%s5055_s15 + $0x1030] sm:$0xff] %vm2813_vm0, %v1987_v9  ;;  %v14809_v47 = vld [vmem:[#allocation466_spill] sm:$0xff]  ;;  %v14810_v18 = vld [vmem:[#allocation467_spill] sm:$0xff] }
 0x3e6   : > { %3332 = vst.msk [vmem:[%s5055_s15 + $0x1028] sm:$0x3f] %vm2815_vm1, %v1986_v7  ;;  %v1992_v46 = vmax.f32 %v14809_v47, 0.0  ;;  %v1993_v19 = vmax.f32 %v14810_v18, 0.0  ;;  %v14811_v39 = vld [vmem:[#allocation468_spill] sm:$0xff]  ;;  %v14812_v33 = vld [vmem:[#allocation469_spill] sm:$0xff] }
 0x3e7   : > { %v1994_v38 = vmax.f32 %v14811_v39, 0.0  ;;  %v1995_v20 = vmax.f32 %v14812_v33, 0.0  ;;  %3334 = vst.msk [vmem:[%s5055_s15 + $0x1038] sm:$0x3f] %vm2815_vm1, %v1988_v11  ;;  %3336 = vst.msk [vmem:[%s5055_s15 + $0x1048] sm:$0x3f] %vm2815_vm1, %v1990_v15 }
 0x3e8   : > { %3335 = vst.msk [vmem:[%s5055_s15 + $0x1040] sm:$0xff] %vm2813_vm0, %v1989_v13  ;;  %3337 = vst.msk [vmem:[%s5055_s15 + $0x1050] sm:$0xff] %vm2813_vm0, %v1991_v17  ;;  %v14813_v32 = vld [vmem:[#allocation470_spill] sm:$0xff]  ;;  %v14814_v30 = vld [vmem:[#allocation471_spill] sm:$0xff] }
 0x3e9   : > { %v1996_v31 = vmax.f32 %v14813_v32, 0.0  ;;  %v1997_v25 = vmax.f32 %v14814_v30, 0.0  ;;  %v14815_v21 = vld [vmem:[#allocation472_spill] sm:$0xff]  ;;  %v14816_v22 = vld [vmem:[#allocation473_spill] sm:$0xff]  ;;  %3338 = vst.msk [vmem:[%s5055_s15 + $0x1058] sm:$0x3f] %vm2815_vm1, %v1992_v46 }
 0x3ea   : > { %v1998_v23 = vmax.f32 %v14815_v21, 0.0  ;;  %v1999_v45 = vmax.f32 %v14816_v22, 0.0  ;;  %3339 = vst.msk [vmem:[%s5055_s15 + $0x1060] sm:$0xff] %vm2813_vm0, %v1993_v19  ;;  %3341 = vst.msk [vmem:[%s5055_s15 + $0x1070] sm:$0xff] %vm2813_vm0, %v1995_v20  ;;  %v14817_v44 = vld [vmem:[#allocation474_spill] sm:$0xff]  ;;  %v14818_v63 = vld [vmem:[#allocation475_spill] sm:$0xff] }
 0x3eb   : > { %3340 = vst.msk [vmem:[%s5055_s15 + $0x1068] sm:$0x3f] %vm2815_vm1, %v1994_v38  ;;  %v2000_v43 = vmax.f32 %v14817_v44, 0.0  ;;  %v2001_v53 = vmax.f32 %v14818_v63, 0.0  ;;  %v14819_v52 = vld [vmem:[#allocation476_spill] sm:$0xff]  ;;  %v14820_v61 = vld [vmem:[#allocation477_spill] sm:$0xff] }
 0x3ec   : > { %v2002_v51 = vmax.f32 %v14819_v52, 0.0  ;;  %v2003_v60 = vmax.f32 %v14820_v61, 0.0  ;;  %3342 = vst.msk [vmem:[%s5055_s15 + $0x1078] sm:$0x3f] %vm2815_vm1, %v1996_v31  ;;  %3344 = vst.msk [vmem:[%s5055_s15 + $0x1088] sm:$0x3f] %vm2815_vm1, %v1998_v23 }
 0x3ed   : > { %3343 = vst.msk [vmem:[%s5055_s15 + $0x1080] sm:$0xff] %vm2813_vm0, %v1997_v25  ;;  %3345 = vst.msk [vmem:[%s5055_s15 + $0x1090] sm:$0xff] %vm2813_vm0, %v1999_v45  ;;  %v14821_v59 = vld [vmem:[#allocation478_spill] sm:$0xff]  ;;  %v14822_v54 = vld [vmem:[#allocation479_spill] sm:$0xff] }
 0x3ee   : > { %v2004_v58 = vmax.f32 %v14821_v59, 0.0  ;;  %v2005_v57 = vmax.f32 %v14822_v54, 0.0  ;;  %v14823_v26 = vld [vmem:[#allocation480_spill] sm:$0xff]  ;;  %v14824_v27 = vld [vmem:[#allocation481_spill] sm:$0xff]  ;;  %3346 = vst.msk [vmem:[%s5055_s15 + $0x1098] sm:$0x3f] %vm2815_vm1, %v2000_v43 }
 0x3ef   : > { %v2006_v42 = vmax.f32 %v14823_v26, 0.0  ;;  %v2007_v28 = vmax.f32 %v14824_v27, 0.0  ;;  %3347 = vst.msk [vmem:[%s5055_s15 + $0x10a0] sm:$0xff] %vm2813_vm0, %v2001_v53  ;;  %3349 = vst.msk [vmem:[%s5055_s15 + $0x10b0] sm:$0xff] %vm2813_vm0, %v2003_v60  ;;  %v14825_v48 = vld [vmem:[#allocation482_spill] sm:$0xff]  ;;  %v14826_v29 = vld [vmem:[#allocation483_spill] sm:$0xff] }
 0x3f0   : > { %3348 = vst.msk [vmem:[%s5055_s15 + $0x10a8] sm:$0x3f] %vm2815_vm1, %v2002_v51  ;;  %v2008_v37 = vmax.f32 %v14825_v48, 0.0  ;;  %v2009_v49 = vmax.f32 %v14826_v29, 0.0  ;;  %v14827_v40 = vld [vmem:[#allocation484_spill] sm:$0xff]  ;;  %v14828_v56 = vld [vmem:[#allocation485_spill] sm:$0xff] }
 0x3f1   : > { %v2010_v34 = vmax.f32 %v14827_v40, 0.0  ;;  %v2011_v50 = vmax.f32 %v14828_v56, 0.0  ;;  %3350 = vst.msk [vmem:[%s5055_s15 + $0x10b8] sm:$0x3f] %vm2815_vm1, %v2004_v58  ;;  %3352 = vst.msk [vmem:[%s5055_s15 + $0x10c8] sm:$0x3f] %vm2815_vm1, %v2006_v42 }
 0x3f2   : > { %3351 = vst.msk [vmem:[%s5055_s15 + $0x10c0] sm:$0xff] %vm2813_vm0, %v2005_v57  ;;  %3353 = vst.msk [vmem:[%s5055_s15 + $0x10d0] sm:$0xff] %vm2813_vm0, %v2007_v28  ;;  %v14829_v35 = vld [vmem:[#allocation486_spill] sm:$0xff]  ;;  %v14830_v36 = vld [vmem:[#allocation487_spill] sm:$0xff] }
 0x3f3   : > { %v2012_v55 = vmax.f32 %v14829_v35, 0.0  ;;  %v2013_v0 = vmax.f32 %v14830_v36, 0.0  ;;  %v14831_v1 = vld [vmem:[#allocation488_spill] sm:$0xff]  ;;  %v14832_v41 = vld [vmem:[#allocation489_spill] sm:$0xff]  ;;  %3354 = vst.msk [vmem:[%s5055_s15 + $0x10d8] sm:$0x3f] %vm2815_vm1, %v2008_v37 }
 0x3f4   : > { %v2014_v24 = vmax.f32 %v14831_v1, 0.0  ;;  %v2015_v2 = vmax.f32 %v14832_v41, 0.0  ;;  %3355 = vst.msk [vmem:[%s5055_s15 + $0x10e0] sm:$0xff] %vm2813_vm0, %v2009_v49  ;;  %3357 = vst.msk [vmem:[%s5055_s15 + $0x10f0] sm:$0xff] %vm2813_vm0, %v2011_v50  ;;  %v14833_v3 = vld [vmem:[#allocation490_spill] sm:$0xff]  ;;  %v14834_v5 = vld [vmem:[#allocation491_spill] sm:$0xff] }
 0x3f5   : > { %3356 = vst.msk [vmem:[%s5055_s15 + $0x10e8] sm:$0x3f] %vm2815_vm1, %v2010_v34  ;;  %v2016_v4 = vmax.f32 %v14833_v3, 0.0  ;;  %v2017_v6 = vmax.f32 %v14834_v5, 0.0  ;;  %v14835_v7 = vld [vmem:[#allocation492_spill] sm:$0xff]  ;;  %v14836_v9 = vld [vmem:[#allocation493_spill] sm:$0xff] }
 0x3f6   : > { %v2018_v8 = vmax.f32 %v14835_v7, 0.0  ;;  %v2019_v10 = vmax.f32 %v14836_v9, 0.0  ;;  %3358 = vst.msk [vmem:[%s5055_s15 + $0x10f8] sm:$0x3f] %vm2815_vm1, %v2012_v55  ;;  %3360 = vst.msk [vmem:[%s5055_s15 + $0x1108] sm:$0x3f] %vm2815_vm1, %v2014_v24 }
 0x3f7   : > { %3359 = vst.msk [vmem:[%s5055_s15 + $0x1100] sm:$0xff] %vm2813_vm0, %v2013_v0  ;;  %3361 = vst.msk [vmem:[%s5055_s15 + $0x1110] sm:$0xff] %vm2813_vm0, %v2015_v2  ;;  %v14837_v11 = vld [vmem:[#allocation494_spill] sm:$0xff]  ;;  %v14838_v13 = vld [vmem:[#allocation495_spill] sm:$0xff] }
 0x3f8   : > { %v2020_v12 = vmax.f32 %v14837_v11, 0.0  ;;  %v2021_v14 = vmax.f32 %v14838_v13, 0.0  ;;  %v14839_v15 = vld [vmem:[#allocation496_spill] sm:$0xff]  ;;  %v14840_v17 = vld [vmem:[#allocation497_spill] sm:$0xff]  ;;  %3362 = vst.msk [vmem:[%s5055_s15 + $0x1118] sm:$0x3f] %vm2815_vm1, %v2016_v4 }
 0x3f9   : > { %v2022_v16 = vmax.f32 %v14839_v15, 0.0  ;;  %v2023_v47 = vmax.f32 %v14840_v17, 0.0  ;;  %3363 = vst.msk [vmem:[%s5055_s15 + $0x1120] sm:$0xff] %vm2813_vm0, %v2017_v6  ;;  %3365 = vst.msk [vmem:[%s5055_s15 + $0x1130] sm:$0xff] %vm2813_vm0, %v2019_v10  ;;  %v14841_v46 = vld [vmem:[#allocation498_spill] sm:$0xff]  ;;  %v14842_v19 = vld [vmem:[#allocation499_spill] sm:$0xff] }
 0x3fa   : > { %3364 = vst.msk [vmem:[%s5055_s15 + $0x1128] sm:$0x3f] %vm2815_vm1, %v2018_v8  ;;  %v2024_v18 = vmax.f32 %v14841_v46, 0.0  ;;  %v2025_v39 = vmax.f32 %v14842_v19, 0.0  ;;  %v14843_v38 = vld [vmem:[#allocation500_spill] sm:$0xff]  ;;  %v14844_v20 = vld [vmem:[#allocation501_spill] sm:$0xff] }
 0x3fb   : > { %v2026_v33 = vmax.f32 %v14843_v38, 0.0  ;;  %v2027_v32 = vmax.f32 %v14844_v20, 0.0  ;;  %3366 = vst.msk [vmem:[%s5055_s15 + $0x1138] sm:$0x3f] %vm2815_vm1, %v2020_v12  ;;  %3368 = vst.msk [vmem:[%s5055_s15 + $0x1148] sm:$0x3f] %vm2815_vm1, %v2022_v16 }
 0x3fc   : > { %3367 = vst.msk [vmem:[%s5055_s15 + $0x1140] sm:$0xff] %vm2813_vm0, %v2021_v14  ;;  %3369 = vst.msk [vmem:[%s5055_s15 + $0x1150] sm:$0xff] %vm2813_vm0, %v2023_v47  ;;  %v14845_v31 = vld [vmem:[#allocation502_spill] sm:$0xff]  ;;  %v14846_v25 = vld [vmem:[#allocation503_spill] sm:$0xff] }
 0x3fd   : > { %v2028_v30 = vmax.f32 %v14845_v31, 0.0  ;;  %v2029_v21 = vmax.f32 %v14846_v25, 0.0  ;;  %v14847_v23 = vld [vmem:[#allocation504_spill] sm:$0xff]  ;;  %v14848_v45 = vld [vmem:[#allocation505_spill] sm:$0xff]  ;;  %3370 = vst.msk [vmem:[%s5055_s15 + $0x1158] sm:$0x3f] %vm2815_vm1, %v2024_v18 }
 0x3fe   : > { %v2030_v22 = vmax.f32 %v14847_v23, 0.0  ;;  %v2031_v44 = vmax.f32 %v14848_v45, 0.0  ;;  %3371 = vst.msk [vmem:[%s5055_s15 + $0x1160] sm:$0xff] %vm2813_vm0, %v2025_v39  ;;  %3373 = vst.msk [vmem:[%s5055_s15 + $0x1170] sm:$0xff] %vm2813_vm0, %v2027_v32  ;;  %v14849_v43 = vld [vmem:[#allocation506_spill] sm:$0xff]  ;;  %v14850_v53 = vld [vmem:[#allocation507_spill] sm:$0xff] }
 0x3ff   : > { %3372 = vst.msk [vmem:[%s5055_s15 + $0x1168] sm:$0x3f] %vm2815_vm1, %v2026_v33  ;;  %v2032_v63 = vmax.f32 %v14849_v43, 0.0  ;;  %v2033_v52 = vmax.f32 %v14850_v53, 0.0  ;;  %v14851_v51 = vld [vmem:[#allocation508_spill] sm:$0xff]  ;;  %v14852_v60 = vld [vmem:[#allocation509_spill] sm:$0xff] }
 0x400   : > { %v2034_v61 = vmax.f32 %v14851_v51, 0.0  ;;  %v2035_v59 = vmax.f32 %v14852_v60, 0.0  ;;  %3374 = vst.msk [vmem:[%s5055_s15 + $0x1178] sm:$0x3f] %vm2815_vm1, %v2028_v30  ;;  %3376 = vst.msk [vmem:[%s5055_s15 + $0x1188] sm:$0x3f] %vm2815_vm1, %v2030_v22 }
 0x401   : > { %3375 = vst.msk [vmem:[%s5055_s15 + $0x1180] sm:$0xff] %vm2813_vm0, %v2029_v21  ;;  %3377 = vst.msk [vmem:[%s5055_s15 + $0x1190] sm:$0xff] %vm2813_vm0, %v2031_v44  ;;  %v14853_v58 = vld [vmem:[#allocation510_spill] sm:$0xff]  ;;  %v14854_v57 = vld [vmem:[#allocation511_spill] sm:$0xff] }
 0x402   : > { %v2036_v54 = vmax.f32 %v14853_v58, 0.0  ;;  %v2037_v26 = vmax.f32 %v14854_v57, 0.0  ;;  %v14855_v42 = vld [vmem:[#allocation512_spill] sm:$0xff]  ;;  %v14856_v28 = vld [vmem:[#allocation513_spill] sm:$0xff]  ;;  %3378 = vst.msk [vmem:[%s5055_s15 + $0x1198] sm:$0x3f] %vm2815_vm1, %v2032_v63 }
 0x403   : > { %v2038_v27 = vmax.f32 %v14855_v42, 0.0  ;;  %v2039_v48 = vmax.f32 %v14856_v28, 0.0  ;;  %3379 = vst.msk [vmem:[%s5055_s15 + $0x11a0] sm:$0xff] %vm2813_vm0, %v2033_v52  ;;  %3381 = vst.msk [vmem:[%s5055_s15 + $0x11b0] sm:$0xff] %vm2813_vm0, %v2035_v59  ;;  %v14857_v37 = vld [vmem:[#allocation514_spill] sm:$0xff]  ;;  %v14858_v49 = vld [vmem:[#allocation515_spill] sm:$0xff] }
 0x404   : > { %3380 = vst.msk [vmem:[%s5055_s15 + $0x11a8] sm:$0x3f] %vm2815_vm1, %v2034_v61  ;;  %v2040_v29 = vmax.f32 %v14857_v37, 0.0  ;;  %v2041_v40 = vmax.f32 %v14858_v49, 0.0  ;;  %v14859_v34 = vld [vmem:[#allocation516_spill] sm:$0xff]  ;;  %v14860_v50 = vld [vmem:[#allocation517_spill] sm:$0xff] }
 0x405   : > { %v2042_v56 = vmax.f32 %v14859_v34, 0.0  ;;  %v2043_v35 = vmax.f32 %v14860_v50, 0.0  ;;  %3382 = vst.msk [vmem:[%s5055_s15 + $0x11b8] sm:$0x3f] %vm2815_vm1, %v2036_v54  ;;  %3384 = vst.msk [vmem:[%s5055_s15 + $0x11c8] sm:$0x3f] %vm2815_vm1, %v2038_v27 }
 0x406   : > { %3383 = vst.msk [vmem:[%s5055_s15 + $0x11c0] sm:$0xff] %vm2813_vm0, %v2037_v26  ;;  %3385 = vst.msk [vmem:[%s5055_s15 + $0x11d0] sm:$0xff] %vm2813_vm0, %v2039_v48  ;;  %v14861_v55 = vld [vmem:[#allocation518_spill] sm:$0xff]  ;;  %v14862_v0 = vld [vmem:[#allocation519_spill] sm:$0xff] }
 0x407   : > { %v2044_v36 = vmax.f32 %v14861_v55, 0.0  ;;  %v2045_v1 = vmax.f32 %v14862_v0, 0.0  ;;  %v14863_v24 = vld [vmem:[#allocation520_spill] sm:$0xff]  ;;  %v14864_v2 = vld [vmem:[#allocation521_spill] sm:$0xff]  ;;  %3386 = vst.msk [vmem:[%s5055_s15 + $0x11d8] sm:$0x3f] %vm2815_vm1, %v2040_v29 }
 0x408   : > { %v2046_v41 = vmax.f32 %v14863_v24, 0.0  ;;  %v2047_v3 = vmax.f32 %v14864_v2, 0.0  ;;  %3387 = vst.msk [vmem:[%s5055_s15 + $0x11e0] sm:$0xff] %vm2813_vm0, %v2041_v40  ;;  %3389 = vst.msk [vmem:[%s5055_s15 + $0x11f0] sm:$0xff] %vm2813_vm0, %v2043_v35  ;;  %v14865_v4 = vld [vmem:[#allocation522_spill] sm:$0xff]  ;;  %v14866_v6 = vld [vmem:[#allocation523_spill] sm:$0xff] }
 0x409   : > { %3388 = vst.msk [vmem:[%s5055_s15 + $0x11e8] sm:$0x3f] %vm2815_vm1, %v2042_v56  ;;  %v2048_v5 = vmax.f32 %v14865_v4, 0.0  ;;  %v2049_v7 = vmax.f32 %v14866_v6, 0.0  ;;  %v14867_v8 = vld [vmem:[#allocation524_spill] sm:$0xff]  ;;  %v14868_v10 = vld [vmem:[#allocation525_spill] sm:$0xff] }
 0x40a   : > { %v2050_v9 = vmax.f32 %v14867_v8, 0.0  ;;  %v2051_v11 = vmax.f32 %v14868_v10, 0.0  ;;  %3390 = vst.msk [vmem:[%s5055_s15 + $0x11f8] sm:$0x3f] %vm2815_vm1, %v2044_v36  ;;  %3392 = vst.msk [vmem:[%s5055_s15 + $0x1208] sm:$0x3f] %vm2815_vm1, %v2046_v41 }
 0x40b   : > { %3391 = vst.msk [vmem:[%s5055_s15 + $0x1200] sm:$0xff] %vm2813_vm0, %v2045_v1  ;;  %3393 = vst.msk [vmem:[%s5055_s15 + $0x1210] sm:$0xff] %vm2813_vm0, %v2047_v3  ;;  %v14869_v12 = vld [vmem:[#allocation526_spill] sm:$0xff]  ;;  %v14870_v14 = vld [vmem:[#allocation527_spill] sm:$0xff] }
 0x40c   : > { %v2052_v13 = vmax.f32 %v14869_v12, 0.0  ;;  %v2053_v15 = vmax.f32 %v14870_v14, 0.0  ;;  %v14871_v16 = vld [vmem:[#allocation528_spill] sm:$0xff]  ;;  %v14872_v47 = vld [vmem:[#allocation529_spill] sm:$0xff]  ;;  %3394 = vst.msk [vmem:[%s5055_s15 + $0x1218] sm:$0x3f] %vm2815_vm1, %v2048_v5 }
 0x40d   : > { %v2054_v17 = vmax.f32 %v14871_v16, 0.0  ;;  %v2055_v46 = vmax.f32 %v14872_v47, 0.0  ;;  %3395 = vst.msk [vmem:[%s5055_s15 + $0x1220] sm:$0xff] %vm2813_vm0, %v2049_v7  ;;  %3397 = vst.msk [vmem:[%s5055_s15 + $0x1230] sm:$0xff] %vm2813_vm0, %v2051_v11  ;;  %v14873_v18 = vld [vmem:[#allocation530_spill] sm:$0xff]  ;;  %v14874_v39 = vld [vmem:[#allocation531_spill] sm:$0xff] }
 0x40e   : > { %3396 = vst.msk [vmem:[%s5055_s15 + $0x1228] sm:$0x3f] %vm2815_vm1, %v2050_v9  ;;  %v2056_v19 = vmax.f32 %v14873_v18, 0.0  ;;  %v2057_v38 = vmax.f32 %v14874_v39, 0.0  ;;  %v14875_v33 = vld [vmem:[#allocation532_spill] sm:$0xff]  ;;  %v14876_v32 = vld [vmem:[#allocation533_spill] sm:$0xff] }
 0x40f   : > { %v2058_v20 = vmax.f32 %v14875_v33, 0.0  ;;  %v2059_v31 = vmax.f32 %v14876_v32, 0.0  ;;  %3398 = vst.msk [vmem:[%s5055_s15 + $0x1238] sm:$0x3f] %vm2815_vm1, %v2052_v13  ;;  %3400 = vst.msk [vmem:[%s5055_s15 + $0x1248] sm:$0x3f] %vm2815_vm1, %v2054_v17 }
 0x410   : > { %3399 = vst.msk [vmem:[%s5055_s15 + $0x1240] sm:$0xff] %vm2813_vm0, %v2053_v15  ;;  %3401 = vst.msk [vmem:[%s5055_s15 + $0x1250] sm:$0xff] %vm2813_vm0, %v2055_v46  ;;  %v14877_v30 = vld [vmem:[#allocation534_spill] sm:$0xff]  ;;  %v14878_v21 = vld [vmem:[#allocation535_spill] sm:$0xff] }
 0x411   : > { %v2060_v25 = vmax.f32 %v14877_v30, 0.0  ;;  %v2061_v23 = vmax.f32 %v14878_v21, 0.0  ;;  %v14879_v22 = vld [vmem:[#allocation536_spill] sm:$0xff]  ;;  %v14880_v44 = vld [vmem:[#allocation537_spill] sm:$0xff]  ;;  %3402 = vst.msk [vmem:[%s5055_s15 + $0x1258] sm:$0x3f] %vm2815_vm1, %v2056_v19 }
 0x412   : > { %v2062_v45 = vmax.f32 %v14879_v22, 0.0  ;;  %v2063_v43 = vmax.f32 %v14880_v44, 0.0  ;;  %3403 = vst.msk [vmem:[%s5055_s15 + $0x1260] sm:$0xff] %vm2813_vm0, %v2057_v38  ;;  %3405 = vst.msk [vmem:[%s5055_s15 + $0x1270] sm:$0xff] %vm2813_vm0, %v2059_v31  ;;  %v14881_v63 = vld [vmem:[#allocation538_spill] sm:$0xff]  ;;  %v14882_v52 = vld [vmem:[#allocation539_spill] sm:$0xff] }
 0x413   : > { %3404 = vst.msk [vmem:[%s5055_s15 + $0x1268] sm:$0x3f] %vm2815_vm1, %v2058_v20  ;;  %v2064_v53 = vmax.f32 %v14881_v63, 0.0  ;;  %v2065_v51 = vmax.f32 %v14882_v52, 0.0  ;;  %v14883_v61 = vld [vmem:[#allocation540_spill] sm:$0xff]  ;;  %v14884_v59 = vld [vmem:[#allocation541_spill] sm:$0xff] }
 0x414   : > { %v2066_v60 = vmax.f32 %v14883_v61, 0.0  ;;  %v2067_v58 = vmax.f32 %v14884_v59, 0.0  ;;  %3406 = vst.msk [vmem:[%s5055_s15 + $0x1278] sm:$0x3f] %vm2815_vm1, %v2060_v25  ;;  %3408 = vst.msk [vmem:[%s5055_s15 + $0x1288] sm:$0x3f] %vm2815_vm1, %v2062_v45 }
 0x415   : > { %3407 = vst.msk [vmem:[%s5055_s15 + $0x1280] sm:$0xff] %vm2813_vm0, %v2061_v23  ;;  %3409 = vst.msk [vmem:[%s5055_s15 + $0x1290] sm:$0xff] %vm2813_vm0, %v2063_v43  ;;  %v14885_v54 = vld [vmem:[#allocation542_spill] sm:$0xff]  ;;  %v14886_v26 = vld [vmem:[#allocation543_spill] sm:$0xff] }
 0x416   : > { %v2068_v57 = vmax.f32 %v14885_v54, 0.0  ;;  %v2069_v42 = vmax.f32 %v14886_v26, 0.0  ;;  %v14887_v27 = vld [vmem:[#allocation544_spill] sm:$0xff]  ;;  %v14888_v48 = vld [vmem:[#allocation545_spill] sm:$0xff]  ;;  %3410 = vst.msk [vmem:[%s5055_s15 + $0x1298] sm:$0x3f] %vm2815_vm1, %v2064_v53 }
 0x417   : > { %v2070_v28 = vmax.f32 %v14887_v27, 0.0  ;;  %v2071_v37 = vmax.f32 %v14888_v48, 0.0  ;;  %3411 = vst.msk [vmem:[%s5055_s15 + $0x12a0] sm:$0xff] %vm2813_vm0, %v2065_v51  ;;  %3413 = vst.msk [vmem:[%s5055_s15 + $0x12b0] sm:$0xff] %vm2813_vm0, %v2067_v58  ;;  %v14889_v29 = vld [vmem:[#allocation546_spill] sm:$0xff]  ;;  %v14890_v40 = vld [vmem:[#allocation547_spill] sm:$0xff] }
 0x418   : > { %3412 = vst.msk [vmem:[%s5055_s15 + $0x12a8] sm:$0x3f] %vm2815_vm1, %v2066_v60  ;;  %v2072_v49 = vmax.f32 %v14889_v29, 0.0  ;;  %v2073_v34 = vmax.f32 %v14890_v40, 0.0  ;;  %v14891_v56 = vld [vmem:[#allocation548_spill] sm:$0xff]  ;;  %v14892_v35 = vld [vmem:[#allocation549_spill] sm:$0xff] }
 0x419   : > { %v2074_v50 = vmax.f32 %v14891_v56, 0.0  ;;  %v2075_v55 = vmax.f32 %v14892_v35, 0.0  ;;  %3414 = vst.msk [vmem:[%s5055_s15 + $0x12b8] sm:$0x3f] %vm2815_vm1, %v2068_v57  ;;  %3416 = vst.msk [vmem:[%s5055_s15 + $0x12c8] sm:$0x3f] %vm2815_vm1, %v2070_v28 }
 0x41a   : > { %3415 = vst.msk [vmem:[%s5055_s15 + $0x12c0] sm:$0xff] %vm2813_vm0, %v2069_v42  ;;  %3417 = vst.msk [vmem:[%s5055_s15 + $0x12d0] sm:$0xff] %vm2813_vm0, %v2071_v37  ;;  %v14893_v36 = vld [vmem:[#allocation550_spill] sm:$0xff]  ;;  %v14894_v1 = vld [vmem:[#allocation551_spill] sm:$0xff] }
 0x41b   : > { %v2076_v0 = vmax.f32 %v14893_v36, 0.0  ;;  %v2077_v24 = vmax.f32 %v14894_v1, 0.0  ;;  %v14895_v41 = vld [vmem:[#allocation552_spill] sm:$0xff]  ;;  %v14896_v3 = vld [vmem:[#allocation553_spill] sm:$0xff]  ;;  %3418 = vst.msk [vmem:[%s5055_s15 + $0x12d8] sm:$0x3f] %vm2815_vm1, %v2072_v49 }
 0x41c   : > { %v2078_v2 = vmax.f32 %v14895_v41, 0.0  ;;  %v2079_v4 = vmax.f32 %v14896_v3, 0.0  ;;  %3419 = vst.msk [vmem:[%s5055_s15 + $0x12e0] sm:$0xff] %vm2813_vm0, %v2073_v34  ;;  %3421 = vst.msk [vmem:[%s5055_s15 + $0x12f0] sm:$0xff] %vm2813_vm0, %v2075_v55  ;;  %v14897_v5 = vld [vmem:[#allocation554_spill] sm:$0xff]  ;;  %v14898_v7 = vld [vmem:[#allocation555_spill] sm:$0xff] }
 0x41d   : > { %3420 = vst.msk [vmem:[%s5055_s15 + $0x12e8] sm:$0x3f] %vm2815_vm1, %v2074_v50  ;;  %v2080_v6 = vmax.f32 %v14897_v5, 0.0  ;;  %v2081_v8 = vmax.f32 %v14898_v7, 0.0  ;;  %v14899_v9 = vld [vmem:[#allocation556_spill] sm:$0xff]  ;;  %v14900_v11 = vld [vmem:[#allocation557_spill] sm:$0xff] }
 0x41e   : > { %v2082_v10 = vmax.f32 %v14899_v9, 0.0  ;;  %v2083_v12 = vmax.f32 %v14900_v11, 0.0  ;;  %3422 = vst.msk [vmem:[%s5055_s15 + $0x12f8] sm:$0x3f] %vm2815_vm1, %v2076_v0  ;;  %3424 = vst.msk [vmem:[%s5055_s15 + $0x1308] sm:$0x3f] %vm2815_vm1, %v2078_v2 }
 0x41f   : > { %3423 = vst.msk [vmem:[%s5055_s15 + $0x1300] sm:$0xff] %vm2813_vm0, %v2077_v24  ;;  %3425 = vst.msk [vmem:[%s5055_s15 + $0x1310] sm:$0xff] %vm2813_vm0, %v2079_v4  ;;  %v14901_v13 = vld [vmem:[#allocation558_spill] sm:$0xff]  ;;  %v14902_v15 = vld [vmem:[#allocation559_spill] sm:$0xff] }
 0x420   : > { %v2084_v14 = vmax.f32 %v14901_v13, 0.0  ;;  %v2085_v16 = vmax.f32 %v14902_v15, 0.0  ;;  %v14903_v17 = vld [vmem:[#allocation560_spill] sm:$0xff]  ;;  %v14904_v46 = vld [vmem:[#allocation561_spill] sm:$0xff]  ;;  %3426 = vst.msk [vmem:[%s5055_s15 + $0x1318] sm:$0x3f] %vm2815_vm1, %v2080_v6 }
 0x421   : > { %v2086_v47 = vmax.f32 %v14903_v17, 0.0  ;;  %v2087_v18 = vmax.f32 %v14904_v46, 0.0  ;;  %3427 = vst.msk [vmem:[%s5055_s15 + $0x1320] sm:$0xff] %vm2813_vm0, %v2081_v8  ;;  %3429 = vst.msk [vmem:[%s5055_s15 + $0x1330] sm:$0xff] %vm2813_vm0, %v2083_v12  ;;  %v14905_v19 = vld [vmem:[#allocation562_spill] sm:$0xff]  ;;  %v14906_v38 = vld [vmem:[#allocation563_spill] sm:$0xff] }
 0x422   : > { %3428 = vst.msk [vmem:[%s5055_s15 + $0x1328] sm:$0x3f] %vm2815_vm1, %v2082_v10  ;;  %v2088_v39 = vmax.f32 %v14905_v19, 0.0  ;;  %v2089_v33 = vmax.f32 %v14906_v38, 0.0  ;;  %v14907_v20 = vld [vmem:[#allocation564_spill] sm:$0xff]  ;;  %v14908_v31 = vld [vmem:[#allocation565_spill] sm:$0xff] }
 0x423   : > { %v2090_v32 = vmax.f32 %v14907_v20, 0.0  ;;  %v2091_v30 = vmax.f32 %v14908_v31, 0.0  ;;  %3430 = vst.msk [vmem:[%s5055_s15 + $0x1338] sm:$0x3f] %vm2815_vm1, %v2084_v14  ;;  %3432 = vst.msk [vmem:[%s5055_s15 + $0x1348] sm:$0x3f] %vm2815_vm1, %v2086_v47 }
 0x424   : > { %3431 = vst.msk [vmem:[%s5055_s15 + $0x1340] sm:$0xff] %vm2813_vm0, %v2085_v16  ;;  %3433 = vst.msk [vmem:[%s5055_s15 + $0x1350] sm:$0xff] %vm2813_vm0, %v2087_v18  ;;  %v14909_v25 = vld [vmem:[#allocation566_spill] sm:$0xff]  ;;  %v14910_v23 = vld [vmem:[#allocation567_spill] sm:$0xff] }
 0x425   : > { %v2092_v21 = vmax.f32 %v14909_v25, 0.0  ;;  %v2093_v22 = vmax.f32 %v14910_v23, 0.0  ;;  %v14911_v45 = vld [vmem:[#allocation568_spill] sm:$0xff]  ;;  %v14912_v43 = vld [vmem:[#allocation569_spill] sm:$0xff]  ;;  %3434 = vst.msk [vmem:[%s5055_s15 + $0x1358] sm:$0x3f] %vm2815_vm1, %v2088_v39 }
 0x426   : > { %v2094_v44 = vmax.f32 %v14911_v45, 0.0  ;;  %v2095_v63 = vmax.f32 %v14912_v43, 0.0  ;;  %3435 = vst.msk [vmem:[%s5055_s15 + $0x1360] sm:$0xff] %vm2813_vm0, %v2089_v33  ;;  %3437 = vst.msk [vmem:[%s5055_s15 + $0x1370] sm:$0xff] %vm2813_vm0, %v2091_v30  ;;  %v14913_v53 = vld [vmem:[#allocation570_spill] sm:$0xff]  ;;  %v14914_v51 = vld [vmem:[#allocation571_spill] sm:$0xff] }
 0x427   : > { %3436 = vst.msk [vmem:[%s5055_s15 + $0x1368] sm:$0x3f] %vm2815_vm1, %v2090_v32  ;;  %v2096_v52 = vmax.f32 %v14913_v53, 0.0  ;;  %v2097_v61 = vmax.f32 %v14914_v51, 0.0  ;;  %v14915_v60 = vld [vmem:[#allocation572_spill] sm:$0xff]  ;;  %v14916_v58 = vld [vmem:[#allocation573_spill] sm:$0xff] }
 0x428   : > { %v2098_v59 = vmax.f32 %v14915_v60, 0.0  ;;  %v2099_v54 = vmax.f32 %v14916_v58, 0.0  ;;  %3438 = vst.msk [vmem:[%s5055_s15 + $0x1378] sm:$0x3f] %vm2815_vm1, %v2092_v21  ;;  %3440 = vst.msk [vmem:[%s5055_s15 + $0x1388] sm:$0x3f] %vm2815_vm1, %v2094_v44 }
 0x429   : > { %3439 = vst.msk [vmem:[%s5055_s15 + $0x1380] sm:$0xff] %vm2813_vm0, %v2093_v22  ;;  %3441 = vst.msk [vmem:[%s5055_s15 + $0x1390] sm:$0xff] %vm2813_vm0, %v2095_v63  ;;  %v14917_v57 = vld [vmem:[#allocation574_spill] sm:$0xff]  ;;  %v14918_v42 = vld [vmem:[#allocation575_spill] sm:$0xff] }
 0x42a   : > { %v2100_v26 = vmax.f32 %v14917_v57, 0.0  ;;  %v2101_v27 = vmax.f32 %v14918_v42, 0.0  ;;  %v14919_v28 = vld [vmem:[#allocation576_spill] sm:$0xff]  ;;  %v14920_v37 = vld [vmem:[#allocation577_spill] sm:$0xff]  ;;  %3442 = vst.msk [vmem:[%s5055_s15 + $0x1398] sm:$0x3f] %vm2815_vm1, %v2096_v52 }
 0x42b   : > { %v2102_v48 = vmax.f32 %v14919_v28, 0.0  ;;  %v2103_v29 = vmax.f32 %v14920_v37, 0.0  ;;  %3443 = vst.msk [vmem:[%s5055_s15 + $0x13a0] sm:$0xff] %vm2813_vm0, %v2097_v61  ;;  %3445 = vst.msk [vmem:[%s5055_s15 + $0x13b0] sm:$0xff] %vm2813_vm0, %v2099_v54  ;;  %v14921_v49 = vld [vmem:[#allocation578_spill] sm:$0xff]  ;;  %v14922_v34 = vld [vmem:[#allocation579_spill] sm:$0xff] }
 0x42c   : > { %3444 = vst.msk [vmem:[%s5055_s15 + $0x13a8] sm:$0x3f] %vm2815_vm1, %v2098_v59  ;;  %v2104_v40 = vmax.f32 %v14921_v49, 0.0  ;;  %v2105_v56 = vmax.f32 %v14922_v34, 0.0  ;;  %v14923_v50 = vld [vmem:[#allocation580_spill] sm:$0xff]  ;;  %v14924_v55 = vld [vmem:[#allocation581_spill] sm:$0xff] }
 0x42d   : > { %v2106_v35 = vmax.f32 %v14923_v50, 0.0  ;;  %v2107_v36 = vmax.f32 %v14924_v55, 0.0  ;;  %3446 = vst.msk [vmem:[%s5055_s15 + $0x13b8] sm:$0x3f] %vm2815_vm1, %v2100_v26  ;;  %3448 = vst.msk [vmem:[%s5055_s15 + $0x13c8] sm:$0x3f] %vm2815_vm1, %v2102_v48 }
 0x42e   : > { %3447 = vst.msk [vmem:[%s5055_s15 + $0x13c0] sm:$0xff] %vm2813_vm0, %v2101_v27  ;;  %3449 = vst.msk [vmem:[%s5055_s15 + $0x13d0] sm:$0xff] %vm2813_vm0, %v2103_v29  ;;  %v14925_v0 = vld [vmem:[#allocation582_spill] sm:$0xff]  ;;  %v14926_v24 = vld [vmem:[#allocation583_spill] sm:$0xff] }
 0x42f   : > { %v2108_v1 = vmax.f32 %v14925_v0, 0.0  ;;  %v2109_v41 = vmax.f32 %v14926_v24, 0.0  ;;  %v14927_v2 = vld [vmem:[#allocation584_spill] sm:$0xff]  ;;  %v14928_v4 = vld [vmem:[#allocation585_spill] sm:$0xff]  ;;  %3450 = vst.msk [vmem:[%s5055_s15 + $0x13d8] sm:$0x3f] %vm2815_vm1, %v2104_v40 }
 0x430   : > { %v2110_v3 = vmax.f32 %v14927_v2, 0.0  ;;  %v2111_v5 = vmax.f32 %v14928_v4, 0.0  ;;  %3451 = vst.msk [vmem:[%s5055_s15 + $0x13e0] sm:$0xff] %vm2813_vm0, %v2105_v56  ;;  %3453 = vst.msk [vmem:[%s5055_s15 + $0x13f0] sm:$0xff] %vm2813_vm0, %v2107_v36  ;;  %v14929_v6 = vld [vmem:[#allocation586_spill] sm:$0xff]  ;;  %v14930_v8 = vld [vmem:[#allocation587_spill] sm:$0xff] }
 0x431   : > { %3452 = vst.msk [vmem:[%s5055_s15 + $0x13e8] sm:$0x3f] %vm2815_vm1, %v2106_v35  ;;  %v2112_v7 = vmax.f32 %v14929_v6, 0.0  ;;  %v2113_v9 = vmax.f32 %v14930_v8, 0.0  ;;  %v14931_v10 = vld [vmem:[#allocation588_spill] sm:$0xff]  ;;  %v14932_v12 = vld [vmem:[#allocation589_spill] sm:$0xff] }
 0x432   : > { %v2114_v11 = vmax.f32 %v14931_v10, 0.0  ;;  %v2115_v13 = vmax.f32 %v14932_v12, 0.0  ;;  %3454 = vst.msk [vmem:[%s5055_s15 + $0x13f8] sm:$0x3f] %vm2815_vm1, %v2108_v1  ;;  %3456 = vst.msk [vmem:[%s5055_s15 + $0x1408] sm:$0x3f] %vm2815_vm1, %v2110_v3 }
 0x433   : > { %3455 = vst.msk [vmem:[%s5055_s15 + $0x1400] sm:$0xff] %vm2813_vm0, %v2109_v41  ;;  %3457 = vst.msk [vmem:[%s5055_s15 + $0x1410] sm:$0xff] %vm2813_vm0, %v2111_v5  ;;  %v14933_v14 = vld [vmem:[#allocation590_spill] sm:$0xff]  ;;  %v14934_v16 = vld [vmem:[#allocation591_spill] sm:$0xff] }
 0x434   : > { %v2116_v15 = vmax.f32 %v14933_v14, 0.0  ;;  %v2117_v17 = vmax.f32 %v14934_v16, 0.0  ;;  %v14935_v47 = vld [vmem:[#allocation592_spill] sm:$0xff]  ;;  %v14936_v18 = vld [vmem:[#allocation593_spill] sm:$0xff]  ;;  %3458 = vst.msk [vmem:[%s5055_s15 + $0x1418] sm:$0x3f] %vm2815_vm1, %v2112_v7 }
 0x435   : > { %v2118_v46 = vmax.f32 %v14935_v47, 0.0  ;;  %v2119_v19 = vmax.f32 %v14936_v18, 0.0  ;;  %3459 = vst.msk [vmem:[%s5055_s15 + $0x1420] sm:$0xff] %vm2813_vm0, %v2113_v9  ;;  %3461 = vst.msk [vmem:[%s5055_s15 + $0x1430] sm:$0xff] %vm2813_vm0, %v2115_v13  ;;  %v14937_v39 = vld [vmem:[#allocation594_spill] sm:$0xff]  ;;  %v14938_v33 = vld [vmem:[#allocation595_spill] sm:$0xff] }
 0x436   : > { %3460 = vst.msk [vmem:[%s5055_s15 + $0x1428] sm:$0x3f] %vm2815_vm1, %v2114_v11  ;;  %v2120_v38 = vmax.f32 %v14937_v39, 0.0  ;;  %v2121_v20 = vmax.f32 %v14938_v33, 0.0  ;;  %v14939_v32 = vld [vmem:[#allocation596_spill] sm:$0xff]  ;;  %v14940_v30 = vld [vmem:[#allocation597_spill] sm:$0xff] }
 0x437   : > { %v2122_v31 = vmax.f32 %v14939_v32, 0.0  ;;  %v2123_v25 = vmax.f32 %v14940_v30, 0.0  ;;  %3462 = vst.msk [vmem:[%s5055_s15 + $0x1438] sm:$0x3f] %vm2815_vm1, %v2116_v15  ;;  %3464 = vst.msk [vmem:[%s5055_s15 + $0x1448] sm:$0x3f] %vm2815_vm1, %v2118_v46 }
 0x438   : > { %3463 = vst.msk [vmem:[%s5055_s15 + $0x1440] sm:$0xff] %vm2813_vm0, %v2117_v17  ;;  %3465 = vst.msk [vmem:[%s5055_s15 + $0x1450] sm:$0xff] %vm2813_vm0, %v2119_v19  ;;  %v14941_v21 = vld [vmem:[#allocation598_spill] sm:$0xff]  ;;  %v14942_v22 = vld [vmem:[#allocation599_spill] sm:$0xff] }
 0x439   : > { %v2124_v23 = vmax.f32 %v14941_v21, 0.0  ;;  %v2125_v45 = vmax.f32 %v14942_v22, 0.0  ;;  %v14943_v44 = vld [vmem:[#allocation600_spill] sm:$0xff]  ;;  %v14944_v63 = vld [vmem:[#allocation601_spill] sm:$0xff]  ;;  %3466 = vst.msk [vmem:[%s5055_s15 + $0x1458] sm:$0x3f] %vm2815_vm1, %v2120_v38 }
 0x43a   : > { %v2126_v43 = vmax.f32 %v14943_v44, 0.0  ;;  %v2127_v53 = vmax.f32 %v14944_v63, 0.0  ;;  %3467 = vst.msk [vmem:[%s5055_s15 + $0x1460] sm:$0xff] %vm2813_vm0, %v2121_v20  ;;  %3469 = vst.msk [vmem:[%s5055_s15 + $0x1470] sm:$0xff] %vm2813_vm0, %v2123_v25  ;;  %v14945_v52 = vld [vmem:[#allocation602_spill] sm:$0xff]  ;;  %v14946_v61 = vld [vmem:[#allocation603_spill] sm:$0xff] }
 0x43b   : > { %3468 = vst.msk [vmem:[%s5055_s15 + $0x1468] sm:$0x3f] %vm2815_vm1, %v2122_v31  ;;  %v2128_v51 = vmax.f32 %v14945_v52, 0.0  ;;  %v2129_v60 = vmax.f32 %v14946_v61, 0.0  ;;  %v14947_v59 = vld [vmem:[#allocation604_spill] sm:$0xff]  ;;  %v14948_v54 = vld [vmem:[#allocation605_spill] sm:$0xff] }
 0x43c   : > { %v2130_v58 = vmax.f32 %v14947_v59, 0.0  ;;  %v2131_v57 = vmax.f32 %v14948_v54, 0.0  ;;  %3470 = vst.msk [vmem:[%s5055_s15 + $0x1478] sm:$0x3f] %vm2815_vm1, %v2124_v23  ;;  %3472 = vst.msk [vmem:[%s5055_s15 + $0x1488] sm:$0x3f] %vm2815_vm1, %v2126_v43 }
 0x43d   : > { %3471 = vst.msk [vmem:[%s5055_s15 + $0x1480] sm:$0xff] %vm2813_vm0, %v2125_v45  ;;  %3473 = vst.msk [vmem:[%s5055_s15 + $0x1490] sm:$0xff] %vm2813_vm0, %v2127_v53  ;;  %v14949_v26 = vld [vmem:[#allocation606_spill] sm:$0xff]  ;;  %v14950_v27 = vld [vmem:[#allocation607_spill] sm:$0xff] }
 0x43e   : > { %v2132_v42 = vmax.f32 %v14949_v26, 0.0  ;;  %v2133_v28 = vmax.f32 %v14950_v27, 0.0  ;;  %v14951_v48 = vld [vmem:[#allocation608_spill] sm:$0xff]  ;;  %v14952_v29 = vld [vmem:[#allocation609_spill] sm:$0xff]  ;;  %3474 = vst.msk [vmem:[%s5055_s15 + $0x1498] sm:$0x3f] %vm2815_vm1, %v2128_v51 }
 0x43f   : > { %v2134_v37 = vmax.f32 %v14951_v48, 0.0  ;;  %v2135_v49 = vmax.f32 %v14952_v29, 0.0  ;;  %3475 = vst.msk [vmem:[%s5055_s15 + $0x14a0] sm:$0xff] %vm2813_vm0, %v2129_v60  ;;  %3477 = vst.msk [vmem:[%s5055_s15 + $0x14b0] sm:$0xff] %vm2813_vm0, %v2131_v57  ;;  %v14953_v40 = vld [vmem:[#allocation610_spill] sm:$0xff]  ;;  %v14954_v56 = vld [vmem:[#allocation611_spill] sm:$0xff] }
 0x440   : > { %3476 = vst.msk [vmem:[%s5055_s15 + $0x14a8] sm:$0x3f] %vm2815_vm1, %v2130_v58  ;;  %v2136_v34 = vmax.f32 %v14953_v40, 0.0  ;;  %v2137_v50 = vmax.f32 %v14954_v56, 0.0  ;;  %v14955_v35 = vld [vmem:[#allocation612_spill] sm:$0xff]  ;;  %v14956_v36 = vld [vmem:[#allocation613_spill] sm:$0xff] }
 0x441   : > { %v2138_v55 = vmax.f32 %v14955_v35, 0.0  ;;  %v2139_v0 = vmax.f32 %v14956_v36, 0.0  ;;  %3478 = vst.msk [vmem:[%s5055_s15 + $0x14b8] sm:$0x3f] %vm2815_vm1, %v2132_v42  ;;  %3480 = vst.msk [vmem:[%s5055_s15 + $0x14c8] sm:$0x3f] %vm2815_vm1, %v2134_v37 }
 0x442   : > { %3479 = vst.msk [vmem:[%s5055_s15 + $0x14c0] sm:$0xff] %vm2813_vm0, %v2133_v28  ;;  %3481 = vst.msk [vmem:[%s5055_s15 + $0x14d0] sm:$0xff] %vm2813_vm0, %v2135_v49  ;;  %v14957_v1 = vld [vmem:[#allocation614_spill] sm:$0xff]  ;;  %v14958_v41 = vld [vmem:[#allocation615_spill] sm:$0xff] }
 0x443   : > { %v2140_v24 = vmax.f32 %v14957_v1, 0.0  ;;  %v2141_v2 = vmax.f32 %v14958_v41, 0.0  ;;  %v14959_v3 = vld [vmem:[#allocation616_spill] sm:$0xff]  ;;  %v14960_v5 = vld [vmem:[#allocation617_spill] sm:$0xff]  ;;  %3482 = vst.msk [vmem:[%s5055_s15 + $0x14d8] sm:$0x3f] %vm2815_vm1, %v2136_v34 }
 0x444   : > { %v2142_v4 = vmax.f32 %v14959_v3, 0.0  ;;  %v2143_v6 = vmax.f32 %v14960_v5, 0.0  ;;  %3483 = vst.msk [vmem:[%s5055_s15 + $0x14e0] sm:$0xff] %vm2813_vm0, %v2137_v50  ;;  %3485 = vst.msk [vmem:[%s5055_s15 + $0x14f0] sm:$0xff] %vm2813_vm0, %v2139_v0  ;;  %v14961_v7 = vld [vmem:[#allocation618_spill] sm:$0xff]  ;;  %v14962_v9 = vld [vmem:[#allocation619_spill] sm:$0xff] }
 0x445   : > { %3484 = vst.msk [vmem:[%s5055_s15 + $0x14e8] sm:$0x3f] %vm2815_vm1, %v2138_v55  ;;  %v2144_v8 = vmax.f32 %v14961_v7, 0.0  ;;  %v2145_v10 = vmax.f32 %v14962_v9, 0.0  ;;  %v14963_v11 = vld [vmem:[#allocation620_spill] sm:$0xff]  ;;  %v14964_v13 = vld [vmem:[#allocation621_spill] sm:$0xff] }
 0x446   : > { %v2146_v12 = vmax.f32 %v14963_v11, 0.0  ;;  %v2147_v14 = vmax.f32 %v14964_v13, 0.0  ;;  %3486 = vst.msk [vmem:[%s5055_s15 + $0x14f8] sm:$0x3f] %vm2815_vm1, %v2140_v24  ;;  %3488 = vst.msk [vmem:[%s5055_s15 + $0x1508] sm:$0x3f] %vm2815_vm1, %v2142_v4 }
 0x447   : > { %3487 = vst.msk [vmem:[%s5055_s15 + $0x1500] sm:$0xff] %vm2813_vm0, %v2141_v2  ;;  %3489 = vst.msk [vmem:[%s5055_s15 + $0x1510] sm:$0xff] %vm2813_vm0, %v2143_v6  ;;  %v14965_v15 = vld [vmem:[#allocation622_spill] sm:$0xff]  ;;  %v14966_v17 = vld [vmem:[#allocation623_spill] sm:$0xff] }
 0x448   : > { %v2148_v16 = vmax.f32 %v14965_v15, 0.0  ;;  %v2149_v47 = vmax.f32 %v14966_v17, 0.0  ;;  %v14967_v46 = vld [vmem:[#allocation624_spill] sm:$0xff]  ;;  %v14968_v19 = vld [vmem:[#allocation625_spill] sm:$0xff]  ;;  %3490 = vst.msk [vmem:[%s5055_s15 + $0x1518] sm:$0x3f] %vm2815_vm1, %v2144_v8 }
 0x449   : > { %v2150_v18 = vmax.f32 %v14967_v46, 0.0  ;;  %v2151_v39 = vmax.f32 %v14968_v19, 0.0  ;;  %3491 = vst.msk [vmem:[%s5055_s15 + $0x1520] sm:$0xff] %vm2813_vm0, %v2145_v10  ;;  %3493 = vst.msk [vmem:[%s5055_s15 + $0x1530] sm:$0xff] %vm2813_vm0, %v2147_v14  ;;  %v14969_v38 = vld [vmem:[#allocation626_spill] sm:$0xff]  ;;  %v14970_v20 = vld [vmem:[#allocation627_spill] sm:$0xff] }
 0x44a   : > { %3492 = vst.msk [vmem:[%s5055_s15 + $0x1528] sm:$0x3f] %vm2815_vm1, %v2146_v12  ;;  %v2152_v33 = vmax.f32 %v14969_v38, 0.0  ;;  %v2153_v32 = vmax.f32 %v14970_v20, 0.0  ;;  %v14971_v31 = vld [vmem:[#allocation628_spill] sm:$0xff]  ;;  %v14972_v25 = vld [vmem:[#allocation629_spill] sm:$0xff] }
 0x44b   : > { %v2154_v30 = vmax.f32 %v14971_v31, 0.0  ;;  %v2155_v21 = vmax.f32 %v14972_v25, 0.0  ;;  %3494 = vst.msk [vmem:[%s5055_s15 + $0x1538] sm:$0x3f] %vm2815_vm1, %v2148_v16  ;;  %3496 = vst.msk [vmem:[%s5055_s15 + $0x1548] sm:$0x3f] %vm2815_vm1, %v2150_v18 }
 0x44c   : > { %3495 = vst.msk [vmem:[%s5055_s15 + $0x1540] sm:$0xff] %vm2813_vm0, %v2149_v47  ;;  %3497 = vst.msk [vmem:[%s5055_s15 + $0x1550] sm:$0xff] %vm2813_vm0, %v2151_v39  ;;  %v14973_v23 = vld [vmem:[#allocation630_spill] sm:$0xff]  ;;  %v14974_v45 = vld [vmem:[#allocation631_spill] sm:$0xff] }
 0x44d   : > { %v2156_v22 = vmax.f32 %v14973_v23, 0.0  ;;  %v2157_v44 = vmax.f32 %v14974_v45, 0.0  ;;  %v14975_v43 = vld [vmem:[#allocation632_spill] sm:$0xff]  ;;  %v14976_v53 = vld [vmem:[#allocation633_spill] sm:$0xff]  ;;  %3498 = vst.msk [vmem:[%s5055_s15 + $0x1558] sm:$0x3f] %vm2815_vm1, %v2152_v33 }
 0x44e   : > { %v2158_v63 = vmax.f32 %v14975_v43, 0.0  ;;  %v2159_v52 = vmax.f32 %v14976_v53, 0.0  ;;  %3499 = vst.msk [vmem:[%s5055_s15 + $0x1560] sm:$0xff] %vm2813_vm0, %v2153_v32  ;;  %3501 = vst.msk [vmem:[%s5055_s15 + $0x1570] sm:$0xff] %vm2813_vm0, %v2155_v21  ;;  %v14977_v51 = vld [vmem:[#allocation634_spill] sm:$0xff]  ;;  %v14978_v60 = vld [vmem:[#allocation635_spill] sm:$0xff] }
 0x44f   : > { %3500 = vst.msk [vmem:[%s5055_s15 + $0x1568] sm:$0x3f] %vm2815_vm1, %v2154_v30  ;;  %v2160_v61 = vmax.f32 %v14977_v51, 0.0  ;;  %v2161_v59 = vmax.f32 %v14978_v60, 0.0  ;;  %v14979_v58 = vld [vmem:[#allocation636_spill] sm:$0xff]  ;;  %v14980_v57 = vld [vmem:[#allocation637_spill] sm:$0xff] }
 0x450   : > { %v2162_v54 = vmax.f32 %v14979_v58, 0.0  ;;  %v2163_v26 = vmax.f32 %v14980_v57, 0.0  ;;  %3502 = vst.msk [vmem:[%s5055_s15 + $0x1578] sm:$0x3f] %vm2815_vm1, %v2156_v22  ;;  %3504 = vst.msk [vmem:[%s5055_s15 + $0x1588] sm:$0x3f] %vm2815_vm1, %v2158_v63 }
 0x451   : > { %3503 = vst.msk [vmem:[%s5055_s15 + $0x1580] sm:$0xff] %vm2813_vm0, %v2157_v44  ;;  %3505 = vst.msk [vmem:[%s5055_s15 + $0x1590] sm:$0xff] %vm2813_vm0, %v2159_v52  ;;  %v14981_v42 = vld [vmem:[#allocation638_spill] sm:$0xff]  ;;  %v14982_v28 = vld [vmem:[#allocation639_spill] sm:$0xff] }
 0x452   : > { %v2164_v27 = vmax.f32 %v14981_v42, 0.0  ;;  %v2165_v48 = vmax.f32 %v14982_v28, 0.0  ;;  %v14983_v37 = vld [vmem:[#allocation640_spill] sm:$0xff]  ;;  %v14984_v49 = vld [vmem:[#allocation641_spill] sm:$0xff]  ;;  %3506 = vst.msk [vmem:[%s5055_s15 + $0x1598] sm:$0x3f] %vm2815_vm1, %v2160_v61 }
 0x453   : > { %v2166_v29 = vmax.f32 %v14983_v37, 0.0  ;;  %v2167_v40 = vmax.f32 %v14984_v49, 0.0  ;;  %3507 = vst.msk [vmem:[%s5055_s15 + $0x15a0] sm:$0xff] %vm2813_vm0, %v2161_v59  ;;  %3509 = vst.msk [vmem:[%s5055_s15 + $0x15b0] sm:$0xff] %vm2813_vm0, %v2163_v26  ;;  %v14985_v34 = vld [vmem:[#allocation642_spill] sm:$0xff]  ;;  %v14986_v50 = vld [vmem:[#allocation643_spill] sm:$0xff] }
 0x454   : > { %3508 = vst.msk [vmem:[%s5055_s15 + $0x15a8] sm:$0x3f] %vm2815_vm1, %v2162_v54  ;;  %v2168_v56 = vmax.f32 %v14985_v34, 0.0  ;;  %v2169_v35 = vmax.f32 %v14986_v50, 0.0  ;;  %v14987_v55 = vld [vmem:[#allocation644_spill] sm:$0xff]  ;;  %v14988_v0 = vld [vmem:[#allocation645_spill] sm:$0xff] }
 0x455   : > { %v2170_v36 = vmax.f32 %v14987_v55, 0.0  ;;  %v2171_v1 = vmax.f32 %v14988_v0, 0.0  ;;  %3510 = vst.msk [vmem:[%s5055_s15 + $0x15b8] sm:$0x3f] %vm2815_vm1, %v2164_v27  ;;  %3512 = vst.msk [vmem:[%s5055_s15 + $0x15c8] sm:$0x3f] %vm2815_vm1, %v2166_v29 }
 0x456   : > { %3511 = vst.msk [vmem:[%s5055_s15 + $0x15c0] sm:$0xff] %vm2813_vm0, %v2165_v48  ;;  %3513 = vst.msk [vmem:[%s5055_s15 + $0x15d0] sm:$0xff] %vm2813_vm0, %v2167_v40  ;;  %v14989_v24 = vld [vmem:[#allocation646_spill] sm:$0xff]  ;;  %v14990_v2 = vld [vmem:[#allocation647_spill] sm:$0xff] }
 0x457   : > { %v2172_v41 = vmax.f32 %v14989_v24, 0.0  ;;  %v2173_v3 = vmax.f32 %v14990_v2, 0.0  ;;  %v14991_v4 = vld [vmem:[#allocation648_spill] sm:$0xff]  ;;  %v14992_v6 = vld [vmem:[#allocation649_spill] sm:$0xff]  ;;  %3514 = vst.msk [vmem:[%s5055_s15 + $0x15d8] sm:$0x3f] %vm2815_vm1, %v2168_v56 }
 0x458   : > { %v2174_v5 = vmax.f32 %v14991_v4, 0.0  ;;  %v2175_v7 = vmax.f32 %v14992_v6, 0.0  ;;  %3515 = vst.msk [vmem:[%s5055_s15 + $0x15e0] sm:$0xff] %vm2813_vm0, %v2169_v35  ;;  %3517 = vst.msk [vmem:[%s5055_s15 + $0x15f0] sm:$0xff] %vm2813_vm0, %v2171_v1  ;;  %v14993_v8 = vld [vmem:[#allocation650_spill] sm:$0xff]  ;;  %v14994_v10 = vld [vmem:[#allocation651_spill] sm:$0xff] }
 0x459   : > { %3516 = vst.msk [vmem:[%s5055_s15 + $0x15e8] sm:$0x3f] %vm2815_vm1, %v2170_v36  ;;  %v2176_v9 = vmax.f32 %v14993_v8, 0.0  ;;  %v2177_v11 = vmax.f32 %v14994_v10, 0.0  ;;  %v14995_v12 = vld [vmem:[#allocation652_spill] sm:$0xff]  ;;  %v14996_v14 = vld [vmem:[#allocation653_spill] sm:$0xff] }
 0x45a   : > { %v2178_v13 = vmax.f32 %v14995_v12, 0.0  ;;  %v2179_v15 = vmax.f32 %v14996_v14, 0.0  ;;  %3518 = vst.msk [vmem:[%s5055_s15 + $0x15f8] sm:$0x3f] %vm2815_vm1, %v2172_v41  ;;  %3520 = vst.msk [vmem:[%s5055_s15 + $0x1608] sm:$0x3f] %vm2815_vm1, %v2174_v5 }
 0x45b   : > { %3519 = vst.msk [vmem:[%s5055_s15 + $0x1600] sm:$0xff] %vm2813_vm0, %v2173_v3  ;;  %3521 = vst.msk [vmem:[%s5055_s15 + $0x1610] sm:$0xff] %vm2813_vm0, %v2175_v7  ;;  %v14997_v16 = vld [vmem:[#allocation654_spill] sm:$0xff]  ;;  %v14998_v47 = vld [vmem:[#allocation655_spill] sm:$0xff] }
 0x45c   : > { %v2180_v17 = vmax.f32 %v14997_v16, 0.0  ;;  %v2181_v46 = vmax.f32 %v14998_v47, 0.0  ;;  %v14999_v18 = vld [vmem:[#allocation656_spill] sm:$0xff]  ;;  %v15000_v39 = vld [vmem:[#allocation657_spill] sm:$0xff]  ;;  %3522 = vst.msk [vmem:[%s5055_s15 + $0x1618] sm:$0x3f] %vm2815_vm1, %v2176_v9 }
 0x45d   : > { %v2182_v19 = vmax.f32 %v14999_v18, 0.0  ;;  %v2183_v38 = vmax.f32 %v15000_v39, 0.0  ;;  %3523 = vst.msk [vmem:[%s5055_s15 + $0x1620] sm:$0xff] %vm2813_vm0, %v2177_v11  ;;  %3525 = vst.msk [vmem:[%s5055_s15 + $0x1630] sm:$0xff] %vm2813_vm0, %v2179_v15  ;;  %v15001_v33 = vld [vmem:[#allocation658_spill] sm:$0xff]  ;;  %v15002_v32 = vld [vmem:[#allocation659_spill] sm:$0xff] }
 0x45e   : > { %3524 = vst.msk [vmem:[%s5055_s15 + $0x1628] sm:$0x3f] %vm2815_vm1, %v2178_v13  ;;  %v2184_v20 = vmax.f32 %v15001_v33, 0.0  ;;  %v2185_v31 = vmax.f32 %v15002_v32, 0.0  ;;  %v15003_v30 = vld [vmem:[#allocation660_spill] sm:$0xff]  ;;  %v15004_v21 = vld [vmem:[#allocation661_spill] sm:$0xff] }
 0x45f   : > { %v2186_v25 = vmax.f32 %v15003_v30, 0.0  ;;  %v2187_v23 = vmax.f32 %v15004_v21, 0.0  ;;  %3526 = vst.msk [vmem:[%s5055_s15 + $0x1638] sm:$0x3f] %vm2815_vm1, %v2180_v17  ;;  %3528 = vst.msk [vmem:[%s5055_s15 + $0x1648] sm:$0x3f] %vm2815_vm1, %v2182_v19 }
 0x460   : > { %3527 = vst.msk [vmem:[%s5055_s15 + $0x1640] sm:$0xff] %vm2813_vm0, %v2181_v46  ;;  %3529 = vst.msk [vmem:[%s5055_s15 + $0x1650] sm:$0xff] %vm2813_vm0, %v2183_v38  ;;  %v15005_v22 = vld [vmem:[#allocation662_spill] sm:$0xff]  ;;  %v15006_v44 = vld [vmem:[#allocation663_spill] sm:$0xff] }
 0x461   : > { %v2188_v45 = vmax.f32 %v15005_v22, 0.0  ;;  %v2189_v43 = vmax.f32 %v15006_v44, 0.0  ;;  %v15007_v63 = vld [vmem:[#allocation664_spill] sm:$0xff]  ;;  %v15008_v52 = vld [vmem:[#allocation665_spill] sm:$0xff]  ;;  %3530 = vst.msk [vmem:[%s5055_s15 + $0x1658] sm:$0x3f] %vm2815_vm1, %v2184_v20 }
 0x462   : > { %v2190_v53 = vmax.f32 %v15007_v63, 0.0  ;;  %v2191_v51 = vmax.f32 %v15008_v52, 0.0  ;;  %3531 = vst.msk [vmem:[%s5055_s15 + $0x1660] sm:$0xff] %vm2813_vm0, %v2185_v31  ;;  %3533 = vst.msk [vmem:[%s5055_s15 + $0x1670] sm:$0xff] %vm2813_vm0, %v2187_v23  ;;  %v15009_v61 = vld [vmem:[#allocation666_spill] sm:$0xff]  ;;  %v15010_v59 = vld [vmem:[#allocation667_spill] sm:$0xff] }
 0x463   : > { %3532 = vst.msk [vmem:[%s5055_s15 + $0x1668] sm:$0x3f] %vm2815_vm1, %v2186_v25  ;;  %v2192_v60 = vmax.f32 %v15009_v61, 0.0  ;;  %v2193_v58 = vmax.f32 %v15010_v59, 0.0  ;;  %v15011_v54 = vld [vmem:[#allocation668_spill] sm:$0xff]  ;;  %v15012_v26 = vld [vmem:[#allocation669_spill] sm:$0xff] }
 0x464   : > { %v2194_v57 = vmax.f32 %v15011_v54, 0.0  ;;  %v2195_v42 = vmax.f32 %v15012_v26, 0.0  ;;  %3534 = vst.msk [vmem:[%s5055_s15 + $0x1678] sm:$0x3f] %vm2815_vm1, %v2188_v45  ;;  %3536 = vst.msk [vmem:[%s5055_s15 + $0x1688] sm:$0x3f] %vm2815_vm1, %v2190_v53 }
 0x465   : > { %3535 = vst.msk [vmem:[%s5055_s15 + $0x1680] sm:$0xff] %vm2813_vm0, %v2189_v43  ;;  %3537 = vst.msk [vmem:[%s5055_s15 + $0x1690] sm:$0xff] %vm2813_vm0, %v2191_v51  ;;  %v15013_v27 = vld [vmem:[#allocation670_spill] sm:$0xff]  ;;  %v15014_v48 = vld [vmem:[#allocation671_spill] sm:$0xff] }
 0x466   : > { %v2196_v28 = vmax.f32 %v15013_v27, 0.0  ;;  %v2197_v37 = vmax.f32 %v15014_v48, 0.0  ;;  %v15015_v29 = vld [vmem:[#allocation672_spill] sm:$0xff]  ;;  %v15016_v40 = vld [vmem:[#allocation673_spill] sm:$0xff]  ;;  %3538 = vst.msk [vmem:[%s5055_s15 + $0x1698] sm:$0x3f] %vm2815_vm1, %v2192_v60 }
 0x467   : > { %v2198_v49 = vmax.f32 %v15015_v29, 0.0  ;;  %v2199_v34 = vmax.f32 %v15016_v40, 0.0  ;;  %3539 = vst.msk [vmem:[%s5055_s15 + $0x16a0] sm:$0xff] %vm2813_vm0, %v2193_v58  ;;  %3541 = vst.msk [vmem:[%s5055_s15 + $0x16b0] sm:$0xff] %vm2813_vm0, %v2195_v42  ;;  %v15017_v56 = vld [vmem:[#allocation674_spill] sm:$0xff]  ;;  %v15018_v35 = vld [vmem:[#allocation675_spill] sm:$0xff] }
 0x468   : > { %3540 = vst.msk [vmem:[%s5055_s15 + $0x16a8] sm:$0x3f] %vm2815_vm1, %v2194_v57  ;;  %v2200_v50 = vmax.f32 %v15017_v56, 0.0  ;;  %v2201_v55 = vmax.f32 %v15018_v35, 0.0  ;;  %v15019_v36 = vld [vmem:[#allocation676_spill] sm:$0xff]  ;;  %v15020_v1 = vld [vmem:[#allocation677_spill] sm:$0xff] }
 0x469   : > { %v2202_v0 = vmax.f32 %v15019_v36, 0.0  ;;  %v2203_v24 = vmax.f32 %v15020_v1, 0.0  ;;  %3542 = vst.msk [vmem:[%s5055_s15 + $0x16b8] sm:$0x3f] %vm2815_vm1, %v2196_v28  ;;  %3544 = vst.msk [vmem:[%s5055_s15 + $0x16c8] sm:$0x3f] %vm2815_vm1, %v2198_v49 }
 0x46a   : > { %3543 = vst.msk [vmem:[%s5055_s15 + $0x16c0] sm:$0xff] %vm2813_vm0, %v2197_v37  ;;  %3545 = vst.msk [vmem:[%s5055_s15 + $0x16d0] sm:$0xff] %vm2813_vm0, %v2199_v34  ;;  %v15021_v41 = vld [vmem:[#allocation678_spill] sm:$0xff]  ;;  %v15022_v3 = vld [vmem:[#allocation679_spill] sm:$0xff] }
 0x46b   : > { %v2204_v2 = vmax.f32 %v15021_v41, 0.0  ;;  %v2205_v4 = vmax.f32 %v15022_v3, 0.0  ;;  %v15023_v5 = vld [vmem:[#allocation680_spill] sm:$0xff]  ;;  %v15024_v7 = vld [vmem:[#allocation681_spill] sm:$0xff]  ;;  %3546 = vst.msk [vmem:[%s5055_s15 + $0x16d8] sm:$0x3f] %vm2815_vm1, %v2200_v50 }
 0x46c   : > { %v2206_v6 = vmax.f32 %v15023_v5, 0.0  ;;  %v2207_v8 = vmax.f32 %v15024_v7, 0.0  ;;  %3547 = vst.msk [vmem:[%s5055_s15 + $0x16e0] sm:$0xff] %vm2813_vm0, %v2201_v55  ;;  %3549 = vst.msk [vmem:[%s5055_s15 + $0x16f0] sm:$0xff] %vm2813_vm0, %v2203_v24  ;;  %v15025_v9 = vld [vmem:[#allocation682_spill] sm:$0xff]  ;;  %v15026_v11 = vld [vmem:[#allocation683_spill] sm:$0xff] }
 0x46d   : > { %3548 = vst.msk [vmem:[%s5055_s15 + $0x16e8] sm:$0x3f] %vm2815_vm1, %v2202_v0  ;;  %v2208_v10 = vmax.f32 %v15025_v9, 0.0  ;;  %v2209_v12 = vmax.f32 %v15026_v11, 0.0  ;;  %v15027_v13 = vld [vmem:[#allocation684_spill] sm:$0xff]  ;;  %v15028_v15 = vld [vmem:[#allocation685_spill] sm:$0xff] }
 0x46e   : > { %v2210_v14 = vmax.f32 %v15027_v13, 0.0  ;;  %v2211_v16 = vmax.f32 %v15028_v15, 0.0  ;;  %3550 = vst.msk [vmem:[%s5055_s15 + $0x16f8] sm:$0x3f] %vm2815_vm1, %v2204_v2  ;;  %3552 = vst.msk [vmem:[%s5055_s15 + $0x1708] sm:$0x3f] %vm2815_vm1, %v2206_v6 }
 0x46f   : > { %3551 = vst.msk [vmem:[%s5055_s15 + $0x1700] sm:$0xff] %vm2813_vm0, %v2205_v4  ;;  %3553 = vst.msk [vmem:[%s5055_s15 + $0x1710] sm:$0xff] %vm2813_vm0, %v2207_v8  ;;  %v15029_v17 = vld [vmem:[#allocation686_spill] sm:$0xff]  ;;  %v15030_v46 = vld [vmem:[#allocation687_spill] sm:$0xff] }
 0x470   : > { %v2212_v47 = vmax.f32 %v15029_v17, 0.0  ;;  %v2213_v18 = vmax.f32 %v15030_v46, 0.0  ;;  %v15031_v19 = vld [vmem:[#allocation688_spill] sm:$0xff]  ;;  %v15032_v38 = vld [vmem:[#allocation689_spill] sm:$0xff]  ;;  %3554 = vst.msk [vmem:[%s5055_s15 + $0x1718] sm:$0x3f] %vm2815_vm1, %v2208_v10 }
 0x471   : > { %v2214_v39 = vmax.f32 %v15031_v19, 0.0  ;;  %v2215_v33 = vmax.f32 %v15032_v38, 0.0  ;;  %3555 = vst.msk [vmem:[%s5055_s15 + $0x1720] sm:$0xff] %vm2813_vm0, %v2209_v12  ;;  %3557 = vst.msk [vmem:[%s5055_s15 + $0x1730] sm:$0xff] %vm2813_vm0, %v2211_v16  ;;  %v15033_v20 = vld [vmem:[#allocation690_spill] sm:$0xff]  ;;  %v15034_v31 = vld [vmem:[#allocation691_spill] sm:$0xff] }
 0x472   : > { %3556 = vst.msk [vmem:[%s5055_s15 + $0x1728] sm:$0x3f] %vm2815_vm1, %v2210_v14  ;;  %v2216_v32 = vmax.f32 %v15033_v20, 0.0  ;;  %v2217_v30 = vmax.f32 %v15034_v31, 0.0  ;;  %v15035_v25 = vld [vmem:[#allocation692_spill] sm:$0xff]  ;;  %v15036_v23 = vld [vmem:[#allocation693_spill] sm:$0xff] }
 0x473   : > { %v2218_v21 = vmax.f32 %v15035_v25, 0.0  ;;  %v2219_v22 = vmax.f32 %v15036_v23, 0.0  ;;  %3558 = vst.msk [vmem:[%s5055_s15 + $0x1738] sm:$0x3f] %vm2815_vm1, %v2212_v47  ;;  %3560 = vst.msk [vmem:[%s5055_s15 + $0x1748] sm:$0x3f] %vm2815_vm1, %v2214_v39 }
 0x474   : > { %3559 = vst.msk [vmem:[%s5055_s15 + $0x1740] sm:$0xff] %vm2813_vm0, %v2213_v18  ;;  %3561 = vst.msk [vmem:[%s5055_s15 + $0x1750] sm:$0xff] %vm2813_vm0, %v2215_v33  ;;  %v15037_v45 = vld [vmem:[#allocation694_spill] sm:$0xff]  ;;  %v15038_v43 = vld [vmem:[#allocation695_spill] sm:$0xff] }
 0x475   : > { %v2220_v44 = vmax.f32 %v15037_v45, 0.0  ;;  %v2221_v63 = vmax.f32 %v15038_v43, 0.0  ;;  %v15039_v53 = vld [vmem:[#allocation696_spill] sm:$0xff]  ;;  %v15040_v51 = vld [vmem:[#allocation697_spill] sm:$0xff]  ;;  %3562 = vst.msk [vmem:[%s5055_s15 + $0x1758] sm:$0x3f] %vm2815_vm1, %v2216_v32 }
 0x476   : > { %v2222_v52 = vmax.f32 %v15039_v53, 0.0  ;;  %v2223_v61 = vmax.f32 %v15040_v51, 0.0  ;;  %3563 = vst.msk [vmem:[%s5055_s15 + $0x1760] sm:$0xff] %vm2813_vm0, %v2217_v30  ;;  %3565 = vst.msk [vmem:[%s5055_s15 + $0x1770] sm:$0xff] %vm2813_vm0, %v2219_v22  ;;  %v15041_v60 = vld [vmem:[#allocation698_spill] sm:$0xff]  ;;  %v15042_v58 = vld [vmem:[#allocation699_spill] sm:$0xff] }
 0x477   : > { %3564 = vst.msk [vmem:[%s5055_s15 + $0x1768] sm:$0x3f] %vm2815_vm1, %v2218_v21  ;;  %v2224_v59 = vmax.f32 %v15041_v60, 0.0  ;;  %v2225_v54 = vmax.f32 %v15042_v58, 0.0  ;;  %v15043_v57 = vld [vmem:[#allocation700_spill] sm:$0xff]  ;;  %v15044_v42 = vld [vmem:[#allocation701_spill] sm:$0xff] }
 0x478   : > { %v2226_v26 = vmax.f32 %v15043_v57, 0.0  ;;  %v2227_v27 = vmax.f32 %v15044_v42, 0.0  ;;  %3566 = vst.msk [vmem:[%s5055_s15 + $0x1778] sm:$0x3f] %vm2815_vm1, %v2220_v44  ;;  %3568 = vst.msk [vmem:[%s5055_s15 + $0x1788] sm:$0x3f] %vm2815_vm1, %v2222_v52 }
 0x479   : > { %3567 = vst.msk [vmem:[%s5055_s15 + $0x1780] sm:$0xff] %vm2813_vm0, %v2221_v63  ;;  %3569 = vst.msk [vmem:[%s5055_s15 + $0x1790] sm:$0xff] %vm2813_vm0, %v2223_v61  ;;  %v15045_v28 = vld [vmem:[#allocation702_spill] sm:$0xff]  ;;  %v15046_v37 = vld [vmem:[#allocation703_spill] sm:$0xff] }
 0x47a   : > { %v2228_v48 = vmax.f32 %v15045_v28, 0.0  ;;  %v2229_v29 = vmax.f32 %v15046_v37, 0.0  ;;  %v15047_v49 = vld [vmem:[#allocation704_spill] sm:$0xff]  ;;  %v15048_v34 = vld [vmem:[#allocation705_spill] sm:$0xff]  ;;  %3570 = vst.msk [vmem:[%s5055_s15 + $0x1798] sm:$0x3f] %vm2815_vm1, %v2224_v59 }
 0x47b   : > { %v2230_v40 = vmax.f32 %v15047_v49, 0.0  ;;  %v2231_v56 = vmax.f32 %v15048_v34, 0.0  ;;  %3571 = vst.msk [vmem:[%s5055_s15 + $0x17a0] sm:$0xff] %vm2813_vm0, %v2225_v54  ;;  %3573 = vst.msk [vmem:[%s5055_s15 + $0x17b0] sm:$0xff] %vm2813_vm0, %v2227_v27  ;;  %v15049_v50 = vld [vmem:[#allocation706_spill] sm:$0xff]  ;;  %v15050_v55 = vld [vmem:[#allocation707_spill] sm:$0xff] }
 0x47c   : > { %3572 = vst.msk [vmem:[%s5055_s15 + $0x17a8] sm:$0x3f] %vm2815_vm1, %v2226_v26  ;;  %v2232_v35 = vmax.f32 %v15049_v50, 0.0  ;;  %v2233_v36 = vmax.f32 %v15050_v55, 0.0  ;;  %v15051_v0 = vld [vmem:[#allocation708_spill] sm:$0xff]  ;;  %v15052_v24 = vld [vmem:[#allocation709_spill] sm:$0xff] }
 0x47d   : > { %v2234_v1 = vmax.f32 %v15051_v0, 0.0  ;;  %v2235_v41 = vmax.f32 %v15052_v24, 0.0  ;;  %3574 = vst.msk [vmem:[%s5055_s15 + $0x17b8] sm:$0x3f] %vm2815_vm1, %v2228_v48  ;;  %3576 = vst.msk [vmem:[%s5055_s15 + $0x17c8] sm:$0x3f] %vm2815_vm1, %v2230_v40 }
 0x47e   : > { %3575 = vst.msk [vmem:[%s5055_s15 + $0x17c0] sm:$0xff] %vm2813_vm0, %v2229_v29  ;;  %3577 = vst.msk [vmem:[%s5055_s15 + $0x17d0] sm:$0xff] %vm2813_vm0, %v2231_v56  ;;  %v15053_v2 = vld [vmem:[#allocation710_spill] sm:$0xff]  ;;  %v15054_v4 = vld [vmem:[#allocation711_spill] sm:$0xff] }
 0x47f   : > { %v2236_v3 = vmax.f32 %v15053_v2, 0.0  ;;  %v2237_v5 = vmax.f32 %v15054_v4, 0.0  ;;  %v15055_v6 = vld [vmem:[#allocation712_spill] sm:$0xff]  ;;  %v15056_v8 = vld [vmem:[#allocation713_spill] sm:$0xff]  ;;  %3578 = vst.msk [vmem:[%s5055_s15 + $0x17d8] sm:$0x3f] %vm2815_vm1, %v2232_v35 }
 0x480   : > { %v2238_v7 = vmax.f32 %v15055_v6, 0.0  ;;  %v2239_v9 = vmax.f32 %v15056_v8, 0.0  ;;  %3579 = vst.msk [vmem:[%s5055_s15 + $0x17e0] sm:$0xff] %vm2813_vm0, %v2233_v36  ;;  %3581 = vst.msk [vmem:[%s5055_s15 + $0x17f0] sm:$0xff] %vm2813_vm0, %v2235_v41  ;;  %v15057_v10 = vld [vmem:[#allocation714_spill] sm:$0xff]  ;;  %v15058_v12 = vld [vmem:[#allocation715_spill] sm:$0xff] }
 0x481   : > { %3580 = vst.msk [vmem:[%s5055_s15 + $0x17e8] sm:$0x3f] %vm2815_vm1, %v2234_v1  ;;  %v2240_v11 = vmax.f32 %v15057_v10, 0.0  ;;  %v2241_v13 = vmax.f32 %v15058_v12, 0.0  ;;  %v15059_v14 = vld [vmem:[#allocation716_spill] sm:$0xff]  ;;  %v15060_v16 = vld [vmem:[#allocation717_spill] sm:$0xff] }
 0x482   : > { %v2242_v15 = vmax.f32 %v15059_v14, 0.0  ;;  %v2243_v17 = vmax.f32 %v15060_v16, 0.0  ;;  %3582 = vst.msk [vmem:[%s5055_s15 + $0x17f8] sm:$0x3f] %vm2815_vm1, %v2236_v3  ;;  %3584 = vst.msk [vmem:[%s5055_s15 + $0x1808] sm:$0x3f] %vm2815_vm1, %v2238_v7 }
 0x483   : > { %3583 = vst.msk [vmem:[%s5055_s15 + $0x1800] sm:$0xff] %vm2813_vm0, %v2237_v5  ;;  %3585 = vst.msk [vmem:[%s5055_s15 + $0x1810] sm:$0xff] %vm2813_vm0, %v2239_v9  ;;  %v15061_v47 = vld [vmem:[#allocation718_spill] sm:$0xff]  ;;  %v15062_v18 = vld [vmem:[#allocation719_spill] sm:$0xff] }
 0x484   : > { %v2244_v46 = vmax.f32 %v15061_v47, 0.0  ;;  %v2245_v19 = vmax.f32 %v15062_v18, 0.0  ;;  %v15063_v39 = vld [vmem:[#allocation720_spill] sm:$0xff]  ;;  %v15064_v33 = vld [vmem:[#allocation721_spill] sm:$0xff]  ;;  %3586 = vst.msk [vmem:[%s5055_s15 + $0x1818] sm:$0x3f] %vm2815_vm1, %v2240_v11 }
 0x485   : > { %v2246_v38 = vmax.f32 %v15063_v39, 0.0  ;;  %v2247_v20 = vmax.f32 %v15064_v33, 0.0  ;;  %3587 = vst.msk [vmem:[%s5055_s15 + $0x1820] sm:$0xff] %vm2813_vm0, %v2241_v13  ;;  %3589 = vst.msk [vmem:[%s5055_s15 + $0x1830] sm:$0xff] %vm2813_vm0, %v2243_v17  ;;  %v15065_v32 = vld [vmem:[#allocation722_spill] sm:$0xff]  ;;  %v15066_v30 = vld [vmem:[#allocation723_spill] sm:$0xff] }
 0x486   : > { %3588 = vst.msk [vmem:[%s5055_s15 + $0x1828] sm:$0x3f] %vm2815_vm1, %v2242_v15  ;;  %v2248_v31 = vmax.f32 %v15065_v32, 0.0  ;;  %v2249_v25 = vmax.f32 %v15066_v30, 0.0  ;;  %v15067_v21 = vld [vmem:[#allocation724_spill] sm:$0xff]  ;;  %v15068_v22 = vld [vmem:[#allocation725_spill] sm:$0xff] }
 0x487   : > { %v2250_v23 = vmax.f32 %v15067_v21, 0.0  ;;  %v2251_v45 = vmax.f32 %v15068_v22, 0.0  ;;  %3590 = vst.msk [vmem:[%s5055_s15 + $0x1838] sm:$0x3f] %vm2815_vm1, %v2244_v46  ;;  %3592 = vst.msk [vmem:[%s5055_s15 + $0x1848] sm:$0x3f] %vm2815_vm1, %v2246_v38 }
 0x488   : > { %3591 = vst.msk [vmem:[%s5055_s15 + $0x1840] sm:$0xff] %vm2813_vm0, %v2245_v19  ;;  %3593 = vst.msk [vmem:[%s5055_s15 + $0x1850] sm:$0xff] %vm2813_vm0, %v2247_v20  ;;  %v15069_v44 = vld [vmem:[#allocation726_spill] sm:$0xff]  ;;  %v15070_v63 = vld [vmem:[#allocation727_spill] sm:$0xff] }
 0x489   : > { %v2252_v43 = vmax.f32 %v15069_v44, 0.0  ;;  %v2253_v53 = vmax.f32 %v15070_v63, 0.0  ;;  %v15071_v52 = vld [vmem:[#allocation728_spill] sm:$0xff]  ;;  %v15072_v61 = vld [vmem:[#allocation729_spill] sm:$0xff]  ;;  %3594 = vst.msk [vmem:[%s5055_s15 + $0x1858] sm:$0x3f] %vm2815_vm1, %v2248_v31 }
 0x48a   : > { %v2254_v51 = vmax.f32 %v15071_v52, 0.0  ;;  %v2255_v60 = vmax.f32 %v15072_v61, 0.0  ;;  %3595 = vst.msk [vmem:[%s5055_s15 + $0x1860] sm:$0xff] %vm2813_vm0, %v2249_v25  ;;  %3597 = vst.msk [vmem:[%s5055_s15 + $0x1870] sm:$0xff] %vm2813_vm0, %v2251_v45  ;;  %v15073_v59 = vld [vmem:[#allocation730_spill] sm:$0xff]  ;;  %v15074_v54 = vld [vmem:[#allocation731_spill] sm:$0xff] }
 0x48b   : > { %3596 = vst.msk [vmem:[%s5055_s15 + $0x1868] sm:$0x3f] %vm2815_vm1, %v2250_v23  ;;  %v2256_v58 = vmax.f32 %v15073_v59, 0.0  ;;  %v2257_v57 = vmax.f32 %v15074_v54, 0.0  ;;  %v15075_v26 = vld [vmem:[#allocation732_spill] sm:$0xff]  ;;  %v15076_v27 = vld [vmem:[#allocation733_spill] sm:$0xff] }
 0x48c   : > { %v2258_v42 = vmax.f32 %v15075_v26, 0.0  ;;  %v2259_v28 = vmax.f32 %v15076_v27, 0.0  ;;  %3598 = vst.msk [vmem:[%s5055_s15 + $0x1878] sm:$0x3f] %vm2815_vm1, %v2252_v43  ;;  %3600 = vst.msk [vmem:[%s5055_s15 + $0x1888] sm:$0x3f] %vm2815_vm1, %v2254_v51 }
 0x48d   : > { %3599 = vst.msk [vmem:[%s5055_s15 + $0x1880] sm:$0xff] %vm2813_vm0, %v2253_v53  ;;  %3601 = vst.msk [vmem:[%s5055_s15 + $0x1890] sm:$0xff] %vm2813_vm0, %v2255_v60  ;;  %v15077_v48 = vld [vmem:[#allocation734_spill] sm:$0xff]  ;;  %v15078_v29 = vld [vmem:[#allocation735_spill] sm:$0xff] }
 0x48e   : > { %v2260_v37 = vmax.f32 %v15077_v48, 0.0  ;;  %v2261_v49 = vmax.f32 %v15078_v29, 0.0  ;;  %v15079_v40 = vld [vmem:[#allocation736_spill] sm:$0xff]  ;;  %v15080_v56 = vld [vmem:[#allocation737_spill] sm:$0xff]  ;;  %3602 = vst.msk [vmem:[%s5055_s15 + $0x1898] sm:$0x3f] %vm2815_vm1, %v2256_v58 }
 0x48f   : > { %v2262_v34 = vmax.f32 %v15079_v40, 0.0  ;;  %v2263_v50 = vmax.f32 %v15080_v56, 0.0  ;;  %3603 = vst.msk [vmem:[%s5055_s15 + $0x18a0] sm:$0xff] %vm2813_vm0, %v2257_v57  ;;  %3605 = vst.msk [vmem:[%s5055_s15 + $0x18b0] sm:$0xff] %vm2813_vm0, %v2259_v28  ;;  %v15081_v35 = vld [vmem:[#allocation738_spill] sm:$0xff]  ;;  %v15082_v36 = vld [vmem:[#allocation739_spill] sm:$0xff] }
 0x490   : > { %3604 = vst.msk [vmem:[%s5055_s15 + $0x18a8] sm:$0x3f] %vm2815_vm1, %v2258_v42  ;;  %v2264_v55 = vmax.f32 %v15081_v35, 0.0  ;;  %v2265_v0 = vmax.f32 %v15082_v36, 0.0  ;;  %v15083_v1 = vld [vmem:[#allocation740_spill] sm:$0xff]  ;;  %v15084_v41 = vld [vmem:[#allocation741_spill] sm:$0xff] }
 0x491   : > { %v2266_v24 = vmax.f32 %v15083_v1, 0.0  ;;  %v2267_v2 = vmax.f32 %v15084_v41, 0.0  ;;  %3606 = vst.msk [vmem:[%s5055_s15 + $0x18b8] sm:$0x3f] %vm2815_vm1, %v2260_v37  ;;  %3608 = vst.msk [vmem:[%s5055_s15 + $0x18c8] sm:$0x3f] %vm2815_vm1, %v2262_v34 }
 0x492   : > { %3607 = vst.msk [vmem:[%s5055_s15 + $0x18c0] sm:$0xff] %vm2813_vm0, %v2261_v49  ;;  %3609 = vst.msk [vmem:[%s5055_s15 + $0x18d0] sm:$0xff] %vm2813_vm0, %v2263_v50  ;;  %v15085_v3 = vld [vmem:[#allocation742_spill] sm:$0xff]  ;;  %v15086_v5 = vld [vmem:[#allocation743_spill] sm:$0xff] }
 0x493   : > { %v2268_v4 = vmax.f32 %v15085_v3, 0.0  ;;  %v2269_v6 = vmax.f32 %v15086_v5, 0.0  ;;  %v15087_v7 = vld [vmem:[#allocation744_spill] sm:$0xff]  ;;  %v15088_v9 = vld [vmem:[#allocation745_spill] sm:$0xff]  ;;  %3610 = vst.msk [vmem:[%s5055_s15 + $0x18d8] sm:$0x3f] %vm2815_vm1, %v2264_v55 }
 0x494   : > { %v2270_v8 = vmax.f32 %v15087_v7, 0.0  ;;  %v2271_v10 = vmax.f32 %v15088_v9, 0.0  ;;  %3611 = vst.msk [vmem:[%s5055_s15 + $0x18e0] sm:$0xff] %vm2813_vm0, %v2265_v0  ;;  %3613 = vst.msk [vmem:[%s5055_s15 + $0x18f0] sm:$0xff] %vm2813_vm0, %v2267_v2  ;;  %v15089_v11 = vld [vmem:[#allocation746_spill] sm:$0xff]  ;;  %v15090_v13 = vld [vmem:[#allocation747_spill] sm:$0xff] }
 0x495   : > { %3612 = vst.msk [vmem:[%s5055_s15 + $0x18e8] sm:$0x3f] %vm2815_vm1, %v2266_v24  ;;  %v2272_v12 = vmax.f32 %v15089_v11, 0.0  ;;  %v2273_v14 = vmax.f32 %v15090_v13, 0.0  ;;  %v15091_v15 = vld [vmem:[#allocation748_spill] sm:$0xff]  ;;  %v15092_v17 = vld [vmem:[#allocation749_spill] sm:$0xff] }
 0x496   : > { %v2274_v16 = vmax.f32 %v15091_v15, 0.0  ;;  %v2275_v47 = vmax.f32 %v15092_v17, 0.0  ;;  %3614 = vst.msk [vmem:[%s5055_s15 + $0x18f8] sm:$0x3f] %vm2815_vm1, %v2268_v4  ;;  %3616 = vst.msk [vmem:[%s5055_s15 + $0x1908] sm:$0x3f] %vm2815_vm1, %v2270_v8 }
 0x497   : > { %3615 = vst.msk [vmem:[%s5055_s15 + $0x1900] sm:$0xff] %vm2813_vm0, %v2269_v6  ;;  %3617 = vst.msk [vmem:[%s5055_s15 + $0x1910] sm:$0xff] %vm2813_vm0, %v2271_v10  ;;  %v15093_v46 = vld [vmem:[#allocation750_spill] sm:$0xff]  ;;  %v15094_v19 = vld [vmem:[#allocation751_spill] sm:$0xff] }
 0x498   : > { %v2276_v18 = vmax.f32 %v15093_v46, 0.0  ;;  %v2277_v39 = vmax.f32 %v15094_v19, 0.0  ;;  %v15095_v38 = vld [vmem:[#allocation752_spill] sm:$0xff]  ;;  %v15096_v20 = vld [vmem:[#allocation753_spill] sm:$0xff]  ;;  %3618 = vst.msk [vmem:[%s5055_s15 + $0x1918] sm:$0x3f] %vm2815_vm1, %v2272_v12 }
 0x499   : > { %v2278_v33 = vmax.f32 %v15095_v38, 0.0  ;;  %v2279_v32 = vmax.f32 %v15096_v20, 0.0  ;;  %3619 = vst.msk [vmem:[%s5055_s15 + $0x1920] sm:$0xff] %vm2813_vm0, %v2273_v14  ;;  %3621 = vst.msk [vmem:[%s5055_s15 + $0x1930] sm:$0xff] %vm2813_vm0, %v2275_v47  ;;  %v15097_v31 = vld [vmem:[#allocation754_spill] sm:$0xff]  ;;  %v15098_v25 = vld [vmem:[#allocation755_spill] sm:$0xff] }
 0x49a   : > { %3620 = vst.msk [vmem:[%s5055_s15 + $0x1928] sm:$0x3f] %vm2815_vm1, %v2274_v16  ;;  %v2280_v30 = vmax.f32 %v15097_v31, 0.0  ;;  %v2281_v21 = vmax.f32 %v15098_v25, 0.0  ;;  %v15099_v23 = vld [vmem:[#allocation756_spill] sm:$0xff]  ;;  %v15100_v45 = vld [vmem:[#allocation757_spill] sm:$0xff] }
 0x49b   : > { %v2282_v22 = vmax.f32 %v15099_v23, 0.0  ;;  %v2283_v44 = vmax.f32 %v15100_v45, 0.0  ;;  %3622 = vst.msk [vmem:[%s5055_s15 + $0x1938] sm:$0x3f] %vm2815_vm1, %v2276_v18  ;;  %3624 = vst.msk [vmem:[%s5055_s15 + $0x1948] sm:$0x3f] %vm2815_vm1, %v2278_v33 }
 0x49c   : > { %3623 = vst.msk [vmem:[%s5055_s15 + $0x1940] sm:$0xff] %vm2813_vm0, %v2277_v39  ;;  %3625 = vst.msk [vmem:[%s5055_s15 + $0x1950] sm:$0xff] %vm2813_vm0, %v2279_v32  ;;  %v15101_v43 = vld [vmem:[#allocation758_spill] sm:$0xff]  ;;  %v15102_v53 = vld [vmem:[#allocation759_spill] sm:$0xff] }
 0x49d   : > { %v2284_v63 = vmax.f32 %v15101_v43, 0.0  ;;  %v2285_v52 = vmax.f32 %v15102_v53, 0.0  ;;  %v15103_v51 = vld [vmem:[#allocation760_spill] sm:$0xff]  ;;  %v15104_v60 = vld [vmem:[#allocation761_spill] sm:$0xff]  ;;  %3626 = vst.msk [vmem:[%s5055_s15 + $0x1958] sm:$0x3f] %vm2815_vm1, %v2280_v30 }
 0x49e   : > { %v2286_v61 = vmax.f32 %v15103_v51, 0.0  ;;  %v2287_v59 = vmax.f32 %v15104_v60, 0.0  ;;  %3627 = vst.msk [vmem:[%s5055_s15 + $0x1960] sm:$0xff] %vm2813_vm0, %v2281_v21  ;;  %3629 = vst.msk [vmem:[%s5055_s15 + $0x1970] sm:$0xff] %vm2813_vm0, %v2283_v44  ;;  %v15105_v58 = vld [vmem:[#allocation762_spill] sm:$0xff]  ;;  %v15106_v57 = vld [vmem:[#allocation763_spill] sm:$0xff] }
 0x49f   : > { %3628 = vst.msk [vmem:[%s5055_s15 + $0x1968] sm:$0x3f] %vm2815_vm1, %v2282_v22  ;;  %v2288_v54 = vmax.f32 %v15105_v58, 0.0  ;;  %v2289_v26 = vmax.f32 %v15106_v57, 0.0  ;;  %v15107_v42 = vld [vmem:[#allocation764_spill] sm:$0xff]  ;;  %v15108_v28 = vld [vmem:[#allocation765_spill] sm:$0xff] }
 0x4a0   : > { %v2290_v27 = vmax.f32 %v15107_v42, 0.0  ;;  %v2291_v48 = vmax.f32 %v15108_v28, 0.0  ;;  %3630 = vst.msk [vmem:[%s5055_s15 + $0x1978] sm:$0x3f] %vm2815_vm1, %v2284_v63  ;;  %3632 = vst.msk [vmem:[%s5055_s15 + $0x1988] sm:$0x3f] %vm2815_vm1, %v2286_v61 }
 0x4a1   : > { %3631 = vst.msk [vmem:[%s5055_s15 + $0x1980] sm:$0xff] %vm2813_vm0, %v2285_v52  ;;  %3633 = vst.msk [vmem:[%s5055_s15 + $0x1990] sm:$0xff] %vm2813_vm0, %v2287_v59  ;;  %v15109_v37 = vld [vmem:[#allocation766_spill] sm:$0xff]  ;;  %v15110_v49 = vld [vmem:[#allocation767_spill] sm:$0xff] }
 0x4a2   : > { %v2292_v29 = vmax.f32 %v15109_v37, 0.0  ;;  %v2293_v40 = vmax.f32 %v15110_v49, 0.0  ;;  %v15111_v34 = vld [vmem:[#allocation768_spill] sm:$0xff]  ;;  %v15112_v50 = vld [vmem:[#allocation769_spill] sm:$0xff]  ;;  %3634 = vst.msk [vmem:[%s5055_s15 + $0x1998] sm:$0x3f] %vm2815_vm1, %v2288_v54 }
 0x4a3   : > { %v2294_v56 = vmax.f32 %v15111_v34, 0.0  ;;  %v2295_v35 = vmax.f32 %v15112_v50, 0.0  ;;  %3635 = vst.msk [vmem:[%s5055_s15 + $0x19a0] sm:$0xff] %vm2813_vm0, %v2289_v26  ;;  %3637 = vst.msk [vmem:[%s5055_s15 + $0x19b0] sm:$0xff] %vm2813_vm0, %v2291_v48  ;;  %v15113_v55 = vld [vmem:[#allocation770_spill] sm:$0xff]  ;;  %v15114_v0 = vld [vmem:[#allocation771_spill] sm:$0xff] }
 0x4a4   : > { %3636 = vst.msk [vmem:[%s5055_s15 + $0x19a8] sm:$0x3f] %vm2815_vm1, %v2290_v27  ;;  %v2296_v36 = vmax.f32 %v15113_v55, 0.0  ;;  %v2297_v1 = vmax.f32 %v15114_v0, 0.0  ;;  %v15115_v24 = vld [vmem:[#allocation772_spill] sm:$0xff]  ;;  %v15116_v2 = vld [vmem:[#allocation773_spill] sm:$0xff] }
 0x4a5   : > { %v2298_v41 = vmax.f32 %v15115_v24, 0.0  ;;  %v2299_v3 = vmax.f32 %v15116_v2, 0.0  ;;  %3638 = vst.msk [vmem:[%s5055_s15 + $0x19b8] sm:$0x3f] %vm2815_vm1, %v2292_v29  ;;  %3640 = vst.msk [vmem:[%s5055_s15 + $0x19c8] sm:$0x3f] %vm2815_vm1, %v2294_v56 }
 0x4a6   : > { %3639 = vst.msk [vmem:[%s5055_s15 + $0x19c0] sm:$0xff] %vm2813_vm0, %v2293_v40  ;;  %3641 = vst.msk [vmem:[%s5055_s15 + $0x19d0] sm:$0xff] %vm2813_vm0, %v2295_v35  ;;  %v15117_v4 = vld [vmem:[#allocation774_spill] sm:$0xff]  ;;  %v15118_v6 = vld [vmem:[#allocation775_spill] sm:$0xff] }
 0x4a7   : > { %v2300_v5 = vmax.f32 %v15117_v4, 0.0  ;;  %v2301_v7 = vmax.f32 %v15118_v6, 0.0  ;;  %v15119_v8 = vld [vmem:[#allocation776_spill] sm:$0xff]  ;;  %v15120_v10 = vld [vmem:[#allocation777_spill] sm:$0xff]  ;;  %3642 = vst.msk [vmem:[%s5055_s15 + $0x19d8] sm:$0x3f] %vm2815_vm1, %v2296_v36 }
 0x4a8   : > { %v2302_v9 = vmax.f32 %v15119_v8, 0.0  ;;  %v2303_v11 = vmax.f32 %v15120_v10, 0.0  ;;  %3643 = vst.msk [vmem:[%s5055_s15 + $0x19e0] sm:$0xff] %vm2813_vm0, %v2297_v1  ;;  %3645 = vst.msk [vmem:[%s5055_s15 + $0x19f0] sm:$0xff] %vm2813_vm0, %v2299_v3  ;;  %v15121_v12 = vld [vmem:[#allocation778_spill] sm:$0xff]  ;;  %v15122_v14 = vld [vmem:[#allocation779_spill] sm:$0xff] }
 0x4a9   : > { %3644 = vst.msk [vmem:[%s5055_s15 + $0x19e8] sm:$0x3f] %vm2815_vm1, %v2298_v41  ;;  %v2304_v13 = vmax.f32 %v15121_v12, 0.0  ;;  %v2305_v15 = vmax.f32 %v15122_v14, 0.0  ;;  %v15123_v16 = vld [vmem:[#allocation780_spill] sm:$0xff]  ;;  %v15124_v47 = vld [vmem:[#allocation781_spill] sm:$0xff] }
 0x4aa   : > { %v2306_v17 = vmax.f32 %v15123_v16, 0.0  ;;  %v2307_v46 = vmax.f32 %v15124_v47, 0.0  ;;  %3646 = vst.msk [vmem:[%s5055_s15 + $0x19f8] sm:$0x3f] %vm2815_vm1, %v2300_v5  ;;  %3648 = vst.msk [vmem:[%s5055_s15 + $0x1a08] sm:$0x3f] %vm2815_vm1, %v2302_v9 }
 0x4ab   : > { %3647 = vst.msk [vmem:[%s5055_s15 + $0x1a00] sm:$0xff] %vm2813_vm0, %v2301_v7  ;;  %3649 = vst.msk [vmem:[%s5055_s15 + $0x1a10] sm:$0xff] %vm2813_vm0, %v2303_v11  ;;  %v15125_v18 = vld [vmem:[#allocation782_spill] sm:$0xff]  ;;  %v15126_v39 = vld [vmem:[#allocation783_spill] sm:$0xff] }
 0x4ac   : > { %v2308_v19 = vmax.f32 %v15125_v18, 0.0  ;;  %v2309_v38 = vmax.f32 %v15126_v39, 0.0  ;;  %v15127_v33 = vld [vmem:[#allocation784_spill] sm:$0xff]  ;;  %v15128_v32 = vld [vmem:[#allocation785_spill] sm:$0xff]  ;;  %3650 = vst.msk [vmem:[%s5055_s15 + $0x1a18] sm:$0x3f] %vm2815_vm1, %v2304_v13 }
 0x4ad   : > { %v2310_v20 = vmax.f32 %v15127_v33, 0.0  ;;  %v2311_v31 = vmax.f32 %v15128_v32, 0.0  ;;  %3651 = vst.msk [vmem:[%s5055_s15 + $0x1a20] sm:$0xff] %vm2813_vm0, %v2305_v15  ;;  %3653 = vst.msk [vmem:[%s5055_s15 + $0x1a30] sm:$0xff] %vm2813_vm0, %v2307_v46  ;;  %v15129_v30 = vld [vmem:[#allocation786_spill] sm:$0xff]  ;;  %v15130_v21 = vld [vmem:[#allocation787_spill] sm:$0xff] }
 0x4ae   : > { %3652 = vst.msk [vmem:[%s5055_s15 + $0x1a28] sm:$0x3f] %vm2815_vm1, %v2306_v17  ;;  %v2312_v25 = vmax.f32 %v15129_v30, 0.0  ;;  %v2313_v23 = vmax.f32 %v15130_v21, 0.0  ;;  %v15131_v22 = vld [vmem:[#allocation788_spill] sm:$0xff]  ;;  %v15132_v44 = vld [vmem:[#allocation789_spill] sm:$0xff] }
 0x4af   : > { %v2314_v45 = vmax.f32 %v15131_v22, 0.0  ;;  %v2315_v43 = vmax.f32 %v15132_v44, 0.0  ;;  %3654 = vst.msk [vmem:[%s5055_s15 + $0x1a38] sm:$0x3f] %vm2815_vm1, %v2308_v19  ;;  %3656 = vst.msk [vmem:[%s5055_s15 + $0x1a48] sm:$0x3f] %vm2815_vm1, %v2310_v20 }
 0x4b0   : > { %3655 = vst.msk [vmem:[%s5055_s15 + $0x1a40] sm:$0xff] %vm2813_vm0, %v2309_v38  ;;  %3657 = vst.msk [vmem:[%s5055_s15 + $0x1a50] sm:$0xff] %vm2813_vm0, %v2311_v31  ;;  %v15133_v63 = vld [vmem:[#allocation790_spill] sm:$0xff]  ;;  %v15134_v52 = vld [vmem:[#allocation791_spill] sm:$0xff] }
 0x4b1   : > { %v2316_v53 = vmax.f32 %v15133_v63, 0.0  ;;  %v2317_v51 = vmax.f32 %v15134_v52, 0.0  ;;  %v15135_v61 = vld [vmem:[#allocation792_spill] sm:$0xff]  ;;  %v15136_v59 = vld [vmem:[#allocation793_spill] sm:$0xff]  ;;  %3658 = vst.msk [vmem:[%s5055_s15 + $0x1a58] sm:$0x3f] %vm2815_vm1, %v2312_v25 }
 0x4b2   : > { %v2318_v60 = vmax.f32 %v15135_v61, 0.0  ;;  %v2319_v58 = vmax.f32 %v15136_v59, 0.0  ;;  %3659 = vst.msk [vmem:[%s5055_s15 + $0x1a60] sm:$0xff] %vm2813_vm0, %v2313_v23  ;;  %3661 = vst.msk [vmem:[%s5055_s15 + $0x1a70] sm:$0xff] %vm2813_vm0, %v2315_v43  ;;  %v15137_v54 = vld [vmem:[#allocation794_spill] sm:$0xff]  ;;  %v15138_v26 = vld [vmem:[#allocation795_spill] sm:$0xff] }
 0x4b3   : > { %3660 = vst.msk [vmem:[%s5055_s15 + $0x1a68] sm:$0x3f] %vm2815_vm1, %v2314_v45  ;;  %v2320_v57 = vmax.f32 %v15137_v54, 0.0  ;;  %v2321_v42 = vmax.f32 %v15138_v26, 0.0  ;;  %v15139_v27 = vld [vmem:[#allocation796_spill] sm:$0xff]  ;;  %v15140_v48 = vld [vmem:[#allocation797_spill] sm:$0xff] }
 0x4b4   : > { %v2322_v28 = vmax.f32 %v15139_v27, 0.0  ;;  %v2323_v37 = vmax.f32 %v15140_v48, 0.0  ;;  %3662 = vst.msk [vmem:[%s5055_s15 + $0x1a78] sm:$0x3f] %vm2815_vm1, %v2316_v53  ;;  %3664 = vst.msk [vmem:[%s5055_s15 + $0x1a88] sm:$0x3f] %vm2815_vm1, %v2318_v60 }
 0x4b5   : > { %3663 = vst.msk [vmem:[%s5055_s15 + $0x1a80] sm:$0xff] %vm2813_vm0, %v2317_v51  ;;  %3665 = vst.msk [vmem:[%s5055_s15 + $0x1a90] sm:$0xff] %vm2813_vm0, %v2319_v58  ;;  %v15141_v29 = vld [vmem:[#allocation798_spill] sm:$0xff]  ;;  %v15142_v40 = vld [vmem:[#allocation799_spill] sm:$0xff] }
 0x4b6   : > { %v2324_v49 = vmax.f32 %v15141_v29, 0.0  ;;  %v2325_v34 = vmax.f32 %v15142_v40, 0.0  ;;  %v15143_v56 = vld [vmem:[#allocation800_spill] sm:$0xff]  ;;  %v15144_v35 = vld [vmem:[#allocation801_spill] sm:$0xff]  ;;  %3666 = vst.msk [vmem:[%s5055_s15 + $0x1a98] sm:$0x3f] %vm2815_vm1, %v2320_v57 }
 0x4b7   : > { %v2326_v50 = vmax.f32 %v15143_v56, 0.0  ;;  %v2327_v55 = vmax.f32 %v15144_v35, 0.0  ;;  %3667 = vst.msk [vmem:[%s5055_s15 + $0x1aa0] sm:$0xff] %vm2813_vm0, %v2321_v42  ;;  %3669 = vst.msk [vmem:[%s5055_s15 + $0x1ab0] sm:$0xff] %vm2813_vm0, %v2323_v37  ;;  %v15145_v36 = vld [vmem:[#allocation802_spill] sm:$0xff]  ;;  %v15146_v1 = vld [vmem:[#allocation803_spill] sm:$0xff] }
 0x4b8   : > { %3668 = vst.msk [vmem:[%s5055_s15 + $0x1aa8] sm:$0x3f] %vm2815_vm1, %v2322_v28  ;;  %v2328_v0 = vmax.f32 %v15145_v36, 0.0  ;;  %v2329_v24 = vmax.f32 %v15146_v1, 0.0  ;;  %v15147_v41 = vld [vmem:[#allocation804_spill] sm:$0xff]  ;;  %v15148_v3 = vld [vmem:[#allocation805_spill] sm:$0xff] }
 0x4b9   : > { %v2330_v2 = vmax.f32 %v15147_v41, 0.0  ;;  %v2331_v4 = vmax.f32 %v15148_v3, 0.0  ;;  %3670 = vst.msk [vmem:[%s5055_s15 + $0x1ab8] sm:$0x3f] %vm2815_vm1, %v2324_v49  ;;  %3672 = vst.msk [vmem:[%s5055_s15 + $0x1ac8] sm:$0x3f] %vm2815_vm1, %v2326_v50 }
 0x4ba   : > { %3671 = vst.msk [vmem:[%s5055_s15 + $0x1ac0] sm:$0xff] %vm2813_vm0, %v2325_v34  ;;  %3673 = vst.msk [vmem:[%s5055_s15 + $0x1ad0] sm:$0xff] %vm2813_vm0, %v2327_v55  ;;  %v15149_v5 = vld [vmem:[#allocation806_spill] sm:$0xff]  ;;  %v15150_v7 = vld [vmem:[#allocation807_spill] sm:$0xff] }
 0x4bb   : > { %v2332_v6 = vmax.f32 %v15149_v5, 0.0  ;;  %v2333_v8 = vmax.f32 %v15150_v7, 0.0  ;;  %v15151_v9 = vld [vmem:[#allocation808_spill] sm:$0xff]  ;;  %v15152_v11 = vld [vmem:[#allocation809_spill] sm:$0xff]  ;;  %3674 = vst.msk [vmem:[%s5055_s15 + $0x1ad8] sm:$0x3f] %vm2815_vm1, %v2328_v0 }
 0x4bc   : > { %v2334_v10 = vmax.f32 %v15151_v9, 0.0  ;;  %v2335_v12 = vmax.f32 %v15152_v11, 0.0  ;;  %3675 = vst.msk [vmem:[%s5055_s15 + $0x1ae0] sm:$0xff] %vm2813_vm0, %v2329_v24  ;;  %3677 = vst.msk [vmem:[%s5055_s15 + $0x1af0] sm:$0xff] %vm2813_vm0, %v2331_v4  ;;  %v15153_v13 = vld [vmem:[#allocation810_spill] sm:$0xff]  ;;  %v15154_v15 = vld [vmem:[#allocation811_spill] sm:$0xff] }
 0x4bd   : > { %3676 = vst.msk [vmem:[%s5055_s15 + $0x1ae8] sm:$0x3f] %vm2815_vm1, %v2330_v2  ;;  %v2336_v14 = vmax.f32 %v15153_v13, 0.0  ;;  %v2337_v16 = vmax.f32 %v15154_v15, 0.0  ;;  %v15155_v17 = vld [vmem:[#allocation812_spill] sm:$0xff]  ;;  %v15156_v46 = vld [vmem:[#allocation813_spill] sm:$0xff] }
 0x4be   : > { %v2338_v47 = vmax.f32 %v15155_v17, 0.0  ;;  %v2339_v18 = vmax.f32 %v15156_v46, 0.0  ;;  %3678 = vst.msk [vmem:[%s5055_s15 + $0x1af8] sm:$0x3f] %vm2815_vm1, %v2332_v6  ;;  %3680 = vst.msk [vmem:[%s5055_s15 + $0x1b08] sm:$0x3f] %vm2815_vm1, %v2334_v10 }
 0x4bf   : > { %3679 = vst.msk [vmem:[%s5055_s15 + $0x1b00] sm:$0xff] %vm2813_vm0, %v2333_v8  ;;  %3681 = vst.msk [vmem:[%s5055_s15 + $0x1b10] sm:$0xff] %vm2813_vm0, %v2335_v12  ;;  %v15157_v19 = vld [vmem:[#allocation814_spill] sm:$0xff]  ;;  %v15158_v38 = vld [vmem:[#allocation815_spill] sm:$0xff] }
 0x4c0   : > { %v2340_v39 = vmax.f32 %v15157_v19, 0.0  ;;  %v2341_v33 = vmax.f32 %v15158_v38, 0.0  ;;  %v15159_v20 = vld [vmem:[#allocation816_spill] sm:$0xff]  ;;  %v15160_v31 = vld [vmem:[#allocation817_spill] sm:$0xff]  ;;  %3682 = vst.msk [vmem:[%s5055_s15 + $0x1b18] sm:$0x3f] %vm2815_vm1, %v2336_v14 }
 0x4c1   : > { %v2342_v32 = vmax.f32 %v15159_v20, 0.0  ;;  %v2343_v30 = vmax.f32 %v15160_v31, 0.0  ;;  %3683 = vst.msk [vmem:[%s5055_s15 + $0x1b20] sm:$0xff] %vm2813_vm0, %v2337_v16  ;;  %3685 = vst.msk [vmem:[%s5055_s15 + $0x1b30] sm:$0xff] %vm2813_vm0, %v2339_v18  ;;  %v15161_v25 = vld [vmem:[#allocation818_spill] sm:$0xff]  ;;  %v15162_v23 = vld [vmem:[#allocation819_spill] sm:$0xff] }
 0x4c2   : > { %3684 = vst.msk [vmem:[%s5055_s15 + $0x1b28] sm:$0x3f] %vm2815_vm1, %v2338_v47  ;;  %v2344_v21 = vmax.f32 %v15161_v25, 0.0  ;;  %v2345_v22 = vmax.f32 %v15162_v23, 0.0  ;;  %v15163_v45 = vld [vmem:[#allocation820_spill] sm:$0xff]  ;;  %v15164_v43 = vld [vmem:[#allocation821_spill] sm:$0xff] }
 0x4c3   : > { %v2346_v44 = vmax.f32 %v15163_v45, 0.0  ;;  %v2347_v63 = vmax.f32 %v15164_v43, 0.0  ;;  %3686 = vst.msk [vmem:[%s5055_s15 + $0x1b38] sm:$0x3f] %vm2815_vm1, %v2340_v39  ;;  %3688 = vst.msk [vmem:[%s5055_s15 + $0x1b48] sm:$0x3f] %vm2815_vm1, %v2342_v32 }
 0x4c4   : > { %3687 = vst.msk [vmem:[%s5055_s15 + $0x1b40] sm:$0xff] %vm2813_vm0, %v2341_v33  ;;  %3689 = vst.msk [vmem:[%s5055_s15 + $0x1b50] sm:$0xff] %vm2813_vm0, %v2343_v30  ;;  %v15165_v53 = vld [vmem:[#allocation822_spill] sm:$0xff]  ;;  %v15166_v51 = vld [vmem:[#allocation823_spill] sm:$0xff] }
 0x4c5   : > { %v2348_v52 = vmax.f32 %v15165_v53, 0.0  ;;  %v2349_v61 = vmax.f32 %v15166_v51, 0.0  ;;  %v15167_v60 = vld [vmem:[#allocation824_spill] sm:$0xff]  ;;  %v15168_v58 = vld [vmem:[#allocation825_spill] sm:$0xff]  ;;  %3690 = vst.msk [vmem:[%s5055_s15 + $0x1b58] sm:$0x3f] %vm2815_vm1, %v2344_v21 }
 0x4c6   : > { %v2350_v59 = vmax.f32 %v15167_v60, 0.0  ;;  %v2351_v54 = vmax.f32 %v15168_v58, 0.0  ;;  %3691 = vst.msk [vmem:[%s5055_s15 + $0x1b60] sm:$0xff] %vm2813_vm0, %v2345_v22  ;;  %3693 = vst.msk [vmem:[%s5055_s15 + $0x1b70] sm:$0xff] %vm2813_vm0, %v2347_v63  ;;  %v15169_v57 = vld [vmem:[#allocation826_spill] sm:$0xff]  ;;  %v15170_v42 = vld [vmem:[#allocation827_spill] sm:$0xff] }
 0x4c7   : > { %3692 = vst.msk [vmem:[%s5055_s15 + $0x1b68] sm:$0x3f] %vm2815_vm1, %v2346_v44  ;;  %v2352_v26 = vmax.f32 %v15169_v57, 0.0  ;;  %v2353_v27 = vmax.f32 %v15170_v42, 0.0  ;;  %v15171_v28 = vld [vmem:[#allocation828_spill] sm:$0xff]  ;;  %v15172_v37 = vld [vmem:[#allocation829_spill] sm:$0xff] }
 0x4c8   : > { %v2354_v48 = vmax.f32 %v15171_v28, 0.0  ;;  %v2355_v29 = vmax.f32 %v15172_v37, 0.0  ;;  %3694 = vst.msk [vmem:[%s5055_s15 + $0x1b78] sm:$0x3f] %vm2815_vm1, %v2348_v52  ;;  %3696 = vst.msk [vmem:[%s5055_s15 + $0x1b88] sm:$0x3f] %vm2815_vm1, %v2350_v59 }
 0x4c9   : > { %3695 = vst.msk [vmem:[%s5055_s15 + $0x1b80] sm:$0xff] %vm2813_vm0, %v2349_v61  ;;  %3697 = vst.msk [vmem:[%s5055_s15 + $0x1b90] sm:$0xff] %vm2813_vm0, %v2351_v54  ;;  %v15173_v49 = vld [vmem:[#allocation830_spill] sm:$0xff]  ;;  %v15174_v34 = vld [vmem:[#allocation831_spill] sm:$0xff] }
 0x4ca   : > { %v2356_v40 = vmax.f32 %v15173_v49, 0.0  ;;  %v2357_v56 = vmax.f32 %v15174_v34, 0.0  ;;  %v15175_v50 = vld [vmem:[#allocation832_spill] sm:$0xff]  ;;  %v15176_v55 = vld [vmem:[#allocation833_spill] sm:$0xff]  ;;  %3698 = vst.msk [vmem:[%s5055_s15 + $0x1b98] sm:$0x3f] %vm2815_vm1, %v2352_v26 }
 0x4cb   : > { %v2358_v35 = vmax.f32 %v15175_v50, 0.0  ;;  %v2359_v36 = vmax.f32 %v15176_v55, 0.0  ;;  %3699 = vst.msk [vmem:[%s5055_s15 + $0x1ba0] sm:$0xff] %vm2813_vm0, %v2353_v27  ;;  %3701 = vst.msk [vmem:[%s5055_s15 + $0x1bb0] sm:$0xff] %vm2813_vm0, %v2355_v29  ;;  %v15177_v0 = vld [vmem:[#allocation834_spill] sm:$0xff]  ;;  %v15178_v24 = vld [vmem:[#allocation835_spill] sm:$0xff] }
 0x4cc   : > { %3700 = vst.msk [vmem:[%s5055_s15 + $0x1ba8] sm:$0x3f] %vm2815_vm1, %v2354_v48  ;;  %v2360_v1 = vmax.f32 %v15177_v0, 0.0  ;;  %v2361_v41 = vmax.f32 %v15178_v24, 0.0  ;;  %v15179_v2 = vld [vmem:[#allocation836_spill] sm:$0xff]  ;;  %v15180_v4 = vld [vmem:[#allocation837_spill] sm:$0xff] }
 0x4cd   : > { %v2362_v3 = vmax.f32 %v15179_v2, 0.0  ;;  %v2363_v5 = vmax.f32 %v15180_v4, 0.0  ;;  %3702 = vst.msk [vmem:[%s5055_s15 + $0x1bb8] sm:$0x3f] %vm2815_vm1, %v2356_v40  ;;  %3704 = vst.msk [vmem:[%s5055_s15 + $0x1bc8] sm:$0x3f] %vm2815_vm1, %v2358_v35 }
 0x4ce   : > { %3703 = vst.msk [vmem:[%s5055_s15 + $0x1bc0] sm:$0xff] %vm2813_vm0, %v2357_v56  ;;  %3705 = vst.msk [vmem:[%s5055_s15 + $0x1bd0] sm:$0xff] %vm2813_vm0, %v2359_v36  ;;  %v15181_v6 = vld [vmem:[#allocation838_spill] sm:$0xff]  ;;  %v15182_v8 = vld [vmem:[#allocation839_spill] sm:$0xff] }
 0x4cf   : > { %v2364_v7 = vmax.f32 %v15181_v6, 0.0  ;;  %v2365_v9 = vmax.f32 %v15182_v8, 0.0  ;;  %v15183_v10 = vld [vmem:[#allocation840_spill] sm:$0xff]  ;;  %v15184_v12 = vld [vmem:[#allocation841_spill] sm:$0xff]  ;;  %3706 = vst.msk [vmem:[%s5055_s15 + $0x1bd8] sm:$0x3f] %vm2815_vm1, %v2360_v1 }
 0x4d0   : > { %v2366_v11 = vmax.f32 %v15183_v10, 0.0  ;;  %v2367_v13 = vmax.f32 %v15184_v12, 0.0  ;;  %3707 = vst.msk [vmem:[%s5055_s15 + $0x1be0] sm:$0xff] %vm2813_vm0, %v2361_v41  ;;  %3709 = vst.msk [vmem:[%s5055_s15 + $0x1bf0] sm:$0xff] %vm2813_vm0, %v2363_v5  ;;  %v15185_v14 = vld [vmem:[#allocation842_spill] sm:$0xff]  ;;  %v15186_v16 = vld [vmem:[#allocation843_spill] sm:$0xff] }
 0x4d1   : > { %3708 = vst.msk [vmem:[%s5055_s15 + $0x1be8] sm:$0x3f] %vm2815_vm1, %v2362_v3  ;;  %v2368_v15 = vmax.f32 %v15185_v14, 0.0  ;;  %v2369_v17 = vmax.f32 %v15186_v16, 0.0  ;;  %v15187_v47 = vld [vmem:[#allocation844_spill] sm:$0xff]  ;;  %v15188_v18 = vld [vmem:[#allocation845_spill] sm:$0xff] }
 0x4d2   : > { %v2370_v46 = vmax.f32 %v15187_v47, 0.0  ;;  %v2371_v19 = vmax.f32 %v15188_v18, 0.0  ;;  %3710 = vst.msk [vmem:[%s5055_s15 + $0x1bf8] sm:$0x3f] %vm2815_vm1, %v2364_v7  ;;  %3712 = vst.msk [vmem:[%s5055_s15 + $0x1c08] sm:$0x3f] %vm2815_vm1, %v2366_v11 }
 0x4d3   : > { %3711 = vst.msk [vmem:[%s5055_s15 + $0x1c00] sm:$0xff] %vm2813_vm0, %v2365_v9  ;;  %3713 = vst.msk [vmem:[%s5055_s15 + $0x1c10] sm:$0xff] %vm2813_vm0, %v2367_v13  ;;  %v15189_v39 = vld [vmem:[#allocation846_spill] sm:$0xff]  ;;  %v15190_v33 = vld [vmem:[#allocation847_spill] sm:$0xff] }
 0x4d4   : > { %v2372_v38 = vmax.f32 %v15189_v39, 0.0  ;;  %v2373_v20 = vmax.f32 %v15190_v33, 0.0  ;;  %v15191_v32 = vld [vmem:[#allocation848_spill] sm:$0xff]  ;;  %v15192_v30 = vld [vmem:[#allocation849_spill] sm:$0xff]  ;;  %3714 = vst.msk [vmem:[%s5055_s15 + $0x1c18] sm:$0x3f] %vm2815_vm1, %v2368_v15 }
 0x4d5   : > { %v2374_v31 = vmax.f32 %v15191_v32, 0.0  ;;  %v2375_v25 = vmax.f32 %v15192_v30, 0.0  ;;  %3715 = vst.msk [vmem:[%s5055_s15 + $0x1c20] sm:$0xff] %vm2813_vm0, %v2369_v17  ;;  %3717 = vst.msk [vmem:[%s5055_s15 + $0x1c30] sm:$0xff] %vm2813_vm0, %v2371_v19  ;;  %v15193_v21 = vld [vmem:[#allocation850_spill] sm:$0xff]  ;;  %v15194_v22 = vld [vmem:[#allocation851_spill] sm:$0xff] }
 0x4d6   : > { %3716 = vst.msk [vmem:[%s5055_s15 + $0x1c28] sm:$0x3f] %vm2815_vm1, %v2370_v46  ;;  %v2376_v23 = vmax.f32 %v15193_v21, 0.0  ;;  %v2377_v45 = vmax.f32 %v15194_v22, 0.0  ;;  %v15195_v44 = vld [vmem:[#allocation852_spill] sm:$0xff]  ;;  %v15196_v63 = vld [vmem:[#allocation853_spill] sm:$0xff] }
 0x4d7   : > { %v2378_v43 = vmax.f32 %v15195_v44, 0.0  ;;  %v2379_v53 = vmax.f32 %v15196_v63, 0.0  ;;  %3718 = vst.msk [vmem:[%s5055_s15 + $0x1c38] sm:$0x3f] %vm2815_vm1, %v2372_v38  ;;  %3720 = vst.msk [vmem:[%s5055_s15 + $0x1c48] sm:$0x3f] %vm2815_vm1, %v2374_v31 }
 0x4d8   : > { %3719 = vst.msk [vmem:[%s5055_s15 + $0x1c40] sm:$0xff] %vm2813_vm0, %v2373_v20  ;;  %3721 = vst.msk [vmem:[%s5055_s15 + $0x1c50] sm:$0xff] %vm2813_vm0, %v2375_v25  ;;  %v15197_v52 = vld [vmem:[#allocation854_spill] sm:$0xff]  ;;  %v15198_v61 = vld [vmem:[#allocation855_spill] sm:$0xff] }
 0x4d9   : > { %v2380_v51 = vmax.f32 %v15197_v52, 0.0  ;;  %v2381_v60 = vmax.f32 %v15198_v61, 0.0  ;;  %v15199_v59 = vld [vmem:[#allocation856_spill] sm:$0xff]  ;;  %v15200_v54 = vld [vmem:[#allocation857_spill] sm:$0xff]  ;;  %3722 = vst.msk [vmem:[%s5055_s15 + $0x1c58] sm:$0x3f] %vm2815_vm1, %v2376_v23 }
 0x4da   : > { %v2382_v58 = vmax.f32 %v15199_v59, 0.0  ;;  %v2383_v57 = vmax.f32 %v15200_v54, 0.0  ;;  %3723 = vst.msk [vmem:[%s5055_s15 + $0x1c60] sm:$0xff] %vm2813_vm0, %v2377_v45  ;;  %3725 = vst.msk [vmem:[%s5055_s15 + $0x1c70] sm:$0xff] %vm2813_vm0, %v2379_v53  ;;  %v15201_v26 = vld [vmem:[#allocation858_spill] sm:$0xff]  ;;  %v15202_v27 = vld [vmem:[#allocation859_spill] sm:$0xff] }
 0x4db   : > { %3724 = vst.msk [vmem:[%s5055_s15 + $0x1c68] sm:$0x3f] %vm2815_vm1, %v2378_v43  ;;  %v2384_v42 = vmax.f32 %v15201_v26, 0.0  ;;  %v2385_v28 = vmax.f32 %v15202_v27, 0.0  ;;  %v15203_v48 = vld [vmem:[#allocation860_spill] sm:$0xff]  ;;  %v15204_v29 = vld [vmem:[#allocation861_spill] sm:$0xff] }
 0x4dc   : > { %v2386_v37 = vmax.f32 %v15203_v48, 0.0  ;;  %v2387_v49 = vmax.f32 %v15204_v29, 0.0  ;;  %3726 = vst.msk [vmem:[%s5055_s15 + $0x1c78] sm:$0x3f] %vm2815_vm1, %v2380_v51  ;;  %3728 = vst.msk [vmem:[%s5055_s15 + $0x1c88] sm:$0x3f] %vm2815_vm1, %v2382_v58 }
 0x4dd   : > { %3727 = vst.msk [vmem:[%s5055_s15 + $0x1c80] sm:$0xff] %vm2813_vm0, %v2381_v60  ;;  %3729 = vst.msk [vmem:[%s5055_s15 + $0x1c90] sm:$0xff] %vm2813_vm0, %v2383_v57  ;;  %v15205_v40 = vld [vmem:[#allocation862_spill] sm:$0xff]  ;;  %v15206_v56 = vld [vmem:[#allocation863_spill] sm:$0xff] }
 0x4de   : > { %v2388_v34 = vmax.f32 %v15205_v40, 0.0  ;;  %v2389_v50 = vmax.f32 %v15206_v56, 0.0  ;;  %v15207_v35 = vld [vmem:[#allocation864_spill] sm:$0xff]  ;;  %v15208_v36 = vld [vmem:[#allocation865_spill] sm:$0xff]  ;;  %3730 = vst.msk [vmem:[%s5055_s15 + $0x1c98] sm:$0x3f] %vm2815_vm1, %v2384_v42 }
 0x4df   : > { %v2390_v55 = vmax.f32 %v15207_v35, 0.0  ;;  %v2391_v0 = vmax.f32 %v15208_v36, 0.0  ;;  %3731 = vst.msk [vmem:[%s5055_s15 + $0x1ca0] sm:$0xff] %vm2813_vm0, %v2385_v28  ;;  %3733 = vst.msk [vmem:[%s5055_s15 + $0x1cb0] sm:$0xff] %vm2813_vm0, %v2387_v49  ;;  %v15209_v1 = vld [vmem:[#allocation866_spill] sm:$0xff]  ;;  %v15210_v41 = vld [vmem:[#allocation867_spill] sm:$0xff] }
 0x4e0   : > { %3732 = vst.msk [vmem:[%s5055_s15 + $0x1ca8] sm:$0x3f] %vm2815_vm1, %v2386_v37  ;;  %v2392_v24 = vmax.f32 %v15209_v1, 0.0  ;;  %v2393_v2 = vmax.f32 %v15210_v41, 0.0  ;;  %v15211_v3 = vld [vmem:[#allocation868_spill] sm:$0xff]  ;;  %v15212_v5 = vld [vmem:[#allocation869_spill] sm:$0xff] }
 0x4e1   : > { %v2394_v4 = vmax.f32 %v15211_v3, 0.0  ;;  %v2395_v6 = vmax.f32 %v15212_v5, 0.0  ;;  %3734 = vst.msk [vmem:[%s5055_s15 + $0x1cb8] sm:$0x3f] %vm2815_vm1, %v2388_v34  ;;  %3736 = vst.msk [vmem:[%s5055_s15 + $0x1cc8] sm:$0x3f] %vm2815_vm1, %v2390_v55 }
 0x4e2   : > { %3735 = vst.msk [vmem:[%s5055_s15 + $0x1cc0] sm:$0xff] %vm2813_vm0, %v2389_v50  ;;  %3737 = vst.msk [vmem:[%s5055_s15 + $0x1cd0] sm:$0xff] %vm2813_vm0, %v2391_v0  ;;  %v15213_v7 = vld [vmem:[#allocation870_spill] sm:$0xff]  ;;  %v15214_v9 = vld [vmem:[#allocation871_spill] sm:$0xff] }
 0x4e3   : > { %v2396_v8 = vmax.f32 %v15213_v7, 0.0  ;;  %v2397_v10 = vmax.f32 %v15214_v9, 0.0  ;;  %v15215_v11 = vld [vmem:[#allocation872_spill] sm:$0xff]  ;;  %v15216_v13 = vld [vmem:[#allocation873_spill] sm:$0xff]  ;;  %3738 = vst.msk [vmem:[%s5055_s15 + $0x1cd8] sm:$0x3f] %vm2815_vm1, %v2392_v24 }
 0x4e4   : > { %v2398_v12 = vmax.f32 %v15215_v11, 0.0  ;;  %v2399_v14 = vmax.f32 %v15216_v13, 0.0  ;;  %3739 = vst.msk [vmem:[%s5055_s15 + $0x1ce0] sm:$0xff] %vm2813_vm0, %v2393_v2  ;;  %3741 = vst.msk [vmem:[%s5055_s15 + $0x1cf0] sm:$0xff] %vm2813_vm0, %v2395_v6  ;;  %v15217_v15 = vld [vmem:[#allocation874_spill] sm:$0xff]  ;;  %v15218_v17 = vld [vmem:[#allocation875_spill] sm:$0xff] }
 0x4e5   : > { %3740 = vst.msk [vmem:[%s5055_s15 + $0x1ce8] sm:$0x3f] %vm2815_vm1, %v2394_v4  ;;  %v2400_v16 = vmax.f32 %v15217_v15, 0.0  ;;  %v2401_v47 = vmax.f32 %v15218_v17, 0.0  ;;  %v15219_v46 = vld [vmem:[#allocation876_spill] sm:$0xff]  ;;  %v15220_v19 = vld [vmem:[#allocation877_spill] sm:$0xff] }
 0x4e6   : > { %v2402_v18 = vmax.f32 %v15219_v46, 0.0  ;;  %v2403_v39 = vmax.f32 %v15220_v19, 0.0  ;;  %3742 = vst.msk [vmem:[%s5055_s15 + $0x1cf8] sm:$0x3f] %vm2815_vm1, %v2396_v8  ;;  %3744 = vst.msk [vmem:[%s5055_s15 + $0x1d08] sm:$0x3f] %vm2815_vm1, %v2398_v12 }
 0x4e7   : > { %3743 = vst.msk [vmem:[%s5055_s15 + $0x1d00] sm:$0xff] %vm2813_vm0, %v2397_v10  ;;  %3745 = vst.msk [vmem:[%s5055_s15 + $0x1d10] sm:$0xff] %vm2813_vm0, %v2399_v14  ;;  %v15221_v38 = vld [vmem:[#allocation878_spill] sm:$0xff]  ;;  %v15222_v20 = vld [vmem:[#allocation879_spill] sm:$0xff] }
 0x4e8   : > { %v2404_v33 = vmax.f32 %v15221_v38, 0.0  ;;  %v2405_v32 = vmax.f32 %v15222_v20, 0.0  ;;  %v15223_v31 = vld [vmem:[#allocation880_spill] sm:$0xff]  ;;  %v15224_v25 = vld [vmem:[#allocation881_spill] sm:$0xff]  ;;  %3746 = vst.msk [vmem:[%s5055_s15 + $0x1d18] sm:$0x3f] %vm2815_vm1, %v2400_v16 }
 0x4e9   : > { %v2406_v30 = vmax.f32 %v15223_v31, 0.0  ;;  %v2407_v21 = vmax.f32 %v15224_v25, 0.0  ;;  %3747 = vst.msk [vmem:[%s5055_s15 + $0x1d20] sm:$0xff] %vm2813_vm0, %v2401_v47  ;;  %3749 = vst.msk [vmem:[%s5055_s15 + $0x1d30] sm:$0xff] %vm2813_vm0, %v2403_v39  ;;  %v15225_v23 = vld [vmem:[#allocation882_spill] sm:$0xff]  ;;  %v15226_v45 = vld [vmem:[#allocation883_spill] sm:$0xff] }
 0x4ea   : > { %3748 = vst.msk [vmem:[%s5055_s15 + $0x1d28] sm:$0x3f] %vm2815_vm1, %v2402_v18  ;;  %v2408_v22 = vmax.f32 %v15225_v23, 0.0  ;;  %v2409_v44 = vmax.f32 %v15226_v45, 0.0  ;;  %v15227_v43 = vld [vmem:[#allocation884_spill] sm:$0xff]  ;;  %v15228_v53 = vld [vmem:[#allocation885_spill] sm:$0xff] }
 0x4eb   : > { %v2410_v63 = vmax.f32 %v15227_v43, 0.0  ;;  %v2411_v52 = vmax.f32 %v15228_v53, 0.0  ;;  %3750 = vst.msk [vmem:[%s5055_s15 + $0x1d38] sm:$0x3f] %vm2815_vm1, %v2404_v33  ;;  %3752 = vst.msk [vmem:[%s5055_s15 + $0x1d48] sm:$0x3f] %vm2815_vm1, %v2406_v30 }
 0x4ec   : > { %3751 = vst.msk [vmem:[%s5055_s15 + $0x1d40] sm:$0xff] %vm2813_vm0, %v2405_v32  ;;  %3753 = vst.msk [vmem:[%s5055_s15 + $0x1d50] sm:$0xff] %vm2813_vm0, %v2407_v21  ;;  %v15229_v51 = vld [vmem:[#allocation886_spill] sm:$0xff]  ;;  %v15230_v60 = vld [vmem:[#allocation887_spill] sm:$0xff] }
 0x4ed   : > { %v2412_v61 = vmax.f32 %v15229_v51, 0.0  ;;  %v2413_v59 = vmax.f32 %v15230_v60, 0.0  ;;  %v15231_v58 = vld [vmem:[#allocation888_spill] sm:$0xff]  ;;  %v15232_v57 = vld [vmem:[#allocation889_spill] sm:$0xff]  ;;  %3754 = vst.msk [vmem:[%s5055_s15 + $0x1d58] sm:$0x3f] %vm2815_vm1, %v2408_v22 }
 0x4ee   : > { %v2414_v54 = vmax.f32 %v15231_v58, 0.0  ;;  %v2415_v26 = vmax.f32 %v15232_v57, 0.0  ;;  %3755 = vst.msk [vmem:[%s5055_s15 + $0x1d60] sm:$0xff] %vm2813_vm0, %v2409_v44  ;;  %3757 = vst.msk [vmem:[%s5055_s15 + $0x1d70] sm:$0xff] %vm2813_vm0, %v2411_v52  ;;  %v15233_v42 = vld [vmem:[#allocation890_spill] sm:$0xff]  ;;  %v15234_v28 = vld [vmem:[#allocation891_spill] sm:$0xff] }
 0x4ef   : > { %3756 = vst.msk [vmem:[%s5055_s15 + $0x1d68] sm:$0x3f] %vm2815_vm1, %v2410_v63  ;;  %v2416_v27 = vmax.f32 %v15233_v42, 0.0  ;;  %v2417_v48 = vmax.f32 %v15234_v28, 0.0  ;;  %v15235_v37 = vld [vmem:[#allocation892_spill] sm:$0xff]  ;;  %v15236_v49 = vld [vmem:[#allocation893_spill] sm:$0xff] }
 0x4f0   : > { %v2418_v29 = vmax.f32 %v15235_v37, 0.0  ;;  %v2419_v40 = vmax.f32 %v15236_v49, 0.0  ;;  %3758 = vst.msk [vmem:[%s5055_s15 + $0x1d78] sm:$0x3f] %vm2815_vm1, %v2412_v61  ;;  %3760 = vst.msk [vmem:[%s5055_s15 + $0x1d88] sm:$0x3f] %vm2815_vm1, %v2414_v54 }
 0x4f1   : > { %3759 = vst.msk [vmem:[%s5055_s15 + $0x1d80] sm:$0xff] %vm2813_vm0, %v2413_v59  ;;  %3761 = vst.msk [vmem:[%s5055_s15 + $0x1d90] sm:$0xff] %vm2813_vm0, %v2415_v26  ;;  %v15237_v34 = vld [vmem:[#allocation894_spill] sm:$0xff]  ;;  %v15238_v50 = vld [vmem:[#allocation895_spill] sm:$0xff] }
 0x4f2   : > { %v2420_v56 = vmax.f32 %v15237_v34, 0.0  ;;  %v2421_v35 = vmax.f32 %v15238_v50, 0.0  ;;  %v15239_v55 = vld [vmem:[#allocation896_spill] sm:$0xff]  ;;  %v15240_v0 = vld [vmem:[#allocation897_spill] sm:$0xff]  ;;  %3762 = vst.msk [vmem:[%s5055_s15 + $0x1d98] sm:$0x3f] %vm2815_vm1, %v2416_v27 }
 0x4f3   : > { %v2422_v36 = vmax.f32 %v15239_v55, 0.0  ;;  %v2423_v1 = vmax.f32 %v15240_v0, 0.0  ;;  %3763 = vst.msk [vmem:[%s5055_s15 + $0x1da0] sm:$0xff] %vm2813_vm0, %v2417_v48  ;;  %3765 = vst.msk [vmem:[%s5055_s15 + $0x1db0] sm:$0xff] %vm2813_vm0, %v2419_v40  ;;  %v15241_v24 = vld [vmem:[#allocation898_spill] sm:$0xff]  ;;  %v15242_v2 = vld [vmem:[#allocation899_spill] sm:$0xff] }
 0x4f4   : > { %3764 = vst.msk [vmem:[%s5055_s15 + $0x1da8] sm:$0x3f] %vm2815_vm1, %v2418_v29  ;;  %v2424_v41 = vmax.f32 %v15241_v24, 0.0  ;;  %v2425_v3 = vmax.f32 %v15242_v2, 0.0  ;;  %v15243_v4 = vld [vmem:[#allocation900_spill] sm:$0xff]  ;;  %v15244_v6 = vld [vmem:[#allocation901_spill] sm:$0xff] }
 0x4f5   : > { %v2426_v5 = vmax.f32 %v15243_v4, 0.0  ;;  %v2427_v7 = vmax.f32 %v15244_v6, 0.0  ;;  %3766 = vst.msk [vmem:[%s5055_s15 + $0x1db8] sm:$0x3f] %vm2815_vm1, %v2420_v56  ;;  %3768 = vst.msk [vmem:[%s5055_s15 + $0x1dc8] sm:$0x3f] %vm2815_vm1, %v2422_v36 }
 0x4f6   : > { %3767 = vst.msk [vmem:[%s5055_s15 + $0x1dc0] sm:$0xff] %vm2813_vm0, %v2421_v35  ;;  %3769 = vst.msk [vmem:[%s5055_s15 + $0x1dd0] sm:$0xff] %vm2813_vm0, %v2423_v1  ;;  %v15245_v8 = vld [vmem:[#allocation902_spill] sm:$0xff]  ;;  %v15246_v10 = vld [vmem:[#allocation903_spill] sm:$0xff] }
 0x4f7   : > { %v2428_v9 = vmax.f32 %v15245_v8, 0.0  ;;  %v2429_v11 = vmax.f32 %v15246_v10, 0.0  ;;  %v15247_v12 = vld [vmem:[#allocation904_spill] sm:$0xff]  ;;  %v15248_v14 = vld [vmem:[#allocation905_spill] sm:$0xff]  ;;  %3770 = vst.msk [vmem:[%s5055_s15 + $0x1dd8] sm:$0x3f] %vm2815_vm1, %v2424_v41 }
 0x4f8   : > { %v2430_v13 = vmax.f32 %v15247_v12, 0.0  ;;  %v2431_v15 = vmax.f32 %v15248_v14, 0.0  ;;  %3771 = vst.msk [vmem:[%s5055_s15 + $0x1de0] sm:$0xff] %vm2813_vm0, %v2425_v3  ;;  %3773 = vst.msk [vmem:[%s5055_s15 + $0x1df0] sm:$0xff] %vm2813_vm0, %v2427_v7  ;;  %v15249_v16 = vld [vmem:[#allocation906_spill] sm:$0xff]  ;;  %v15250_v47 = vld [vmem:[#allocation907_spill] sm:$0xff] }
 0x4f9   : > { %3772 = vst.msk [vmem:[%s5055_s15 + $0x1de8] sm:$0x3f] %vm2815_vm1, %v2426_v5  ;;  %v2432_v17 = vmax.f32 %v15249_v16, 0.0  ;;  %v2433_v46 = vmax.f32 %v15250_v47, 0.0  ;;  %v15251_v18 = vld [vmem:[#allocation908_spill] sm:$0xff]  ;;  %v15252_v39 = vld [vmem:[#allocation909_spill] sm:$0xff] }
 0x4fa   : > { %v2434_v19 = vmax.f32 %v15251_v18, 0.0  ;;  %v2435_v38 = vmax.f32 %v15252_v39, 0.0  ;;  %3774 = vst.msk [vmem:[%s5055_s15 + $0x1df8] sm:$0x3f] %vm2815_vm1, %v2428_v9  ;;  %3776 = vst.msk [vmem:[%s5055_s15 + $0x1e08] sm:$0x3f] %vm2815_vm1, %v2430_v13 }
 0x4fb   : > { %3775 = vst.msk [vmem:[%s5055_s15 + $0x1e00] sm:$0xff] %vm2813_vm0, %v2429_v11  ;;  %3777 = vst.msk [vmem:[%s5055_s15 + $0x1e10] sm:$0xff] %vm2813_vm0, %v2431_v15  ;;  %v15253_v33 = vld [vmem:[#allocation910_spill] sm:$0xff]  ;;  %v15254_v32 = vld [vmem:[#allocation911_spill] sm:$0xff] }
 0x4fc   : > { %v2436_v20 = vmax.f32 %v15253_v33, 0.0  ;;  %v2437_v31 = vmax.f32 %v15254_v32, 0.0  ;;  %v15255_v30 = vld [vmem:[#allocation912_spill] sm:$0xff]  ;;  %v15256_v21 = vld [vmem:[#allocation913_spill] sm:$0xff]  ;;  %3778 = vst.msk [vmem:[%s5055_s15 + $0x1e18] sm:$0x3f] %vm2815_vm1, %v2432_v17 }
 0x4fd   : > { %v2438_v25 = vmax.f32 %v15255_v30, 0.0  ;;  %v2439_v23 = vmax.f32 %v15256_v21, 0.0  ;;  %3779 = vst.msk [vmem:[%s5055_s15 + $0x1e20] sm:$0xff] %vm2813_vm0, %v2433_v46  ;;  %3781 = vst.msk [vmem:[%s5055_s15 + $0x1e30] sm:$0xff] %vm2813_vm0, %v2435_v38  ;;  %v15257_v22 = vld [vmem:[#allocation914_spill] sm:$0xff]  ;;  %v15258_v44 = vld [vmem:[#allocation915_spill] sm:$0xff] }
 0x4fe   : > { %3780 = vst.msk [vmem:[%s5055_s15 + $0x1e28] sm:$0x3f] %vm2815_vm1, %v2434_v19  ;;  %v2440_v45 = vmax.f32 %v15257_v22, 0.0  ;;  %v2441_v43 = vmax.f32 %v15258_v44, 0.0  ;;  %v15259_v63 = vld [vmem:[#allocation916_spill] sm:$0xff]  ;;  %v15260_v52 = vld [vmem:[#allocation917_spill] sm:$0xff] }
 0x4ff   : > { %v2442_v53 = vmax.f32 %v15259_v63, 0.0  ;;  %v2443_v51 = vmax.f32 %v15260_v52, 0.0  ;;  %3782 = vst.msk [vmem:[%s5055_s15 + $0x1e38] sm:$0x3f] %vm2815_vm1, %v2436_v20  ;;  %3784 = vst.msk [vmem:[%s5055_s15 + $0x1e48] sm:$0x3f] %vm2815_vm1, %v2438_v25 }
 0x500   : > { %3783 = vst.msk [vmem:[%s5055_s15 + $0x1e40] sm:$0xff] %vm2813_vm0, %v2437_v31  ;;  %3785 = vst.msk [vmem:[%s5055_s15 + $0x1e50] sm:$0xff] %vm2813_vm0, %v2439_v23  ;;  %v15261_v61 = vld [vmem:[#allocation918_spill] sm:$0xff]  ;;  %v15262_v59 = vld [vmem:[#allocation919_spill] sm:$0xff] }
 0x501   : > { %v2444_v60 = vmax.f32 %v15261_v61, 0.0  ;;  %v2445_v58 = vmax.f32 %v15262_v59, 0.0  ;;  %v15263_v54 = vld [vmem:[#allocation920_spill] sm:$0xff]  ;;  %v15264_v26 = vld [vmem:[#allocation921_spill] sm:$0xff]  ;;  %3786 = vst.msk [vmem:[%s5055_s15 + $0x1e58] sm:$0x3f] %vm2815_vm1, %v2440_v45 }
 0x502   : > { %v2446_v57 = vmax.f32 %v15263_v54, 0.0  ;;  %v2447_v42 = vmax.f32 %v15264_v26, 0.0  ;;  %3787 = vst.msk [vmem:[%s5055_s15 + $0x1e60] sm:$0xff] %vm2813_vm0, %v2441_v43  ;;  %3789 = vst.msk [vmem:[%s5055_s15 + $0x1e70] sm:$0xff] %vm2813_vm0, %v2443_v51  ;;  %v15265_v27 = vld [vmem:[#allocation922_spill] sm:$0xff]  ;;  %v15266_v48 = vld [vmem:[#allocation923_spill] sm:$0xff] }
 0x503   : > { %3788 = vst.msk [vmem:[%s5055_s15 + $0x1e68] sm:$0x3f] %vm2815_vm1, %v2442_v53  ;;  %v2448_v28 = vmax.f32 %v15265_v27, 0.0  ;;  %v2449_v37 = vmax.f32 %v15266_v48, 0.0  ;;  %v15267_v29 = vld [vmem:[#allocation924_spill] sm:$0xff]  ;;  %v15268_v40 = vld [vmem:[#allocation925_spill] sm:$0xff] }
 0x504   : > { %v2450_v49 = vmax.f32 %v15267_v29, 0.0  ;;  %v2451_v34 = vmax.f32 %v15268_v40, 0.0  ;;  %3790 = vst.msk [vmem:[%s5055_s15 + $0x1e78] sm:$0x3f] %vm2815_vm1, %v2444_v60  ;;  %3792 = vst.msk [vmem:[%s5055_s15 + $0x1e88] sm:$0x3f] %vm2815_vm1, %v2446_v57 }
 0x505   : > { %3791 = vst.msk [vmem:[%s5055_s15 + $0x1e80] sm:$0xff] %vm2813_vm0, %v2445_v58  ;;  %3793 = vst.msk [vmem:[%s5055_s15 + $0x1e90] sm:$0xff] %vm2813_vm0, %v2447_v42  ;;  %v15269_v56 = vld [vmem:[#allocation926_spill] sm:$0xff]  ;;  %v15270_v35 = vld [vmem:[#allocation927_spill] sm:$0xff] }
 0x506   : > { %v2452_v50 = vmax.f32 %v15269_v56, 0.0  ;;  %v2453_v55 = vmax.f32 %v15270_v35, 0.0  ;;  %v15271_v36 = vld [vmem:[#allocation928_spill] sm:$0xff]  ;;  %v15272_v1 = vld [vmem:[#allocation929_spill] sm:$0xff]  ;;  %3794 = vst.msk [vmem:[%s5055_s15 + $0x1e98] sm:$0x3f] %vm2815_vm1, %v2448_v28 }
 0x507   : > { %v2454_v0 = vmax.f32 %v15271_v36, 0.0  ;;  %v2455_v24 = vmax.f32 %v15272_v1, 0.0  ;;  %3795 = vst.msk [vmem:[%s5055_s15 + $0x1ea0] sm:$0xff] %vm2813_vm0, %v2449_v37  ;;  %3797 = vst.msk [vmem:[%s5055_s15 + $0x1eb0] sm:$0xff] %vm2813_vm0, %v2451_v34  ;;  %v15273_v41 = vld [vmem:[#allocation930_spill] sm:$0xff]  ;;  %v15274_v3 = vld [vmem:[#allocation931_spill] sm:$0xff] }
 0x508   : > { %3796 = vst.msk [vmem:[%s5055_s15 + $0x1ea8] sm:$0x3f] %vm2815_vm1, %v2450_v49  ;;  %v2456_v2 = vmax.f32 %v15273_v41, 0.0  ;;  %v2457_v4 = vmax.f32 %v15274_v3, 0.0  ;;  %v15275_v5 = vld [vmem:[#allocation932_spill] sm:$0xff]  ;;  %v15276_v7 = vld [vmem:[#allocation933_spill] sm:$0xff] }
 0x509   : > { %v2458_v6 = vmax.f32 %v15275_v5, 0.0  ;;  %v2459_v8 = vmax.f32 %v15276_v7, 0.0  ;;  %3798 = vst.msk [vmem:[%s5055_s15 + $0x1eb8] sm:$0x3f] %vm2815_vm1, %v2452_v50  ;;  %3800 = vst.msk [vmem:[%s5055_s15 + $0x1ec8] sm:$0x3f] %vm2815_vm1, %v2454_v0 }
 0x50a   : > { %3799 = vst.msk [vmem:[%s5055_s15 + $0x1ec0] sm:$0xff] %vm2813_vm0, %v2453_v55  ;;  %3801 = vst.msk [vmem:[%s5055_s15 + $0x1ed0] sm:$0xff] %vm2813_vm0, %v2455_v24  ;;  %v15277_v9 = vld [vmem:[#allocation934_spill] sm:$0xff]  ;;  %v15278_v11 = vld [vmem:[#allocation935_spill] sm:$0xff] }
 0x50b   : > { %v2460_v10 = vmax.f32 %v15277_v9, 0.0  ;;  %v2461_v12 = vmax.f32 %v15278_v11, 0.0  ;;  %v15279_v13 = vld [vmem:[#allocation936_spill] sm:$0xff]  ;;  %v15280_v15 = vld [vmem:[#allocation937_spill] sm:$0xff]  ;;  %3802 = vst.msk [vmem:[%s5055_s15 + $0x1ed8] sm:$0x3f] %vm2815_vm1, %v2456_v2 }
 0x50c   : > { %v2462_v14 = vmax.f32 %v15279_v13, 0.0  ;;  %v2463_v16 = vmax.f32 %v15280_v15, 0.0  ;;  %3803 = vst.msk [vmem:[%s5055_s15 + $0x1ee0] sm:$0xff] %vm2813_vm0, %v2457_v4  ;;  %3805 = vst.msk [vmem:[%s5055_s15 + $0x1ef0] sm:$0xff] %vm2813_vm0, %v2459_v8  ;;  %v15281_v17 = vld [vmem:[#allocation938_spill] sm:$0xff]  ;;  %v15282_v46 = vld [vmem:[#allocation939_spill] sm:$0xff] }
 0x50d   : > { %3804 = vst.msk [vmem:[%s5055_s15 + $0x1ee8] sm:$0x3f] %vm2815_vm1, %v2458_v6  ;;  %v2464_v47 = vmax.f32 %v15281_v17, 0.0  ;;  %v2465_v18 = vmax.f32 %v15282_v46, 0.0  ;;  %v15283_v19 = vld [vmem:[#allocation940_spill] sm:$0xff]  ;;  %v15284_v38 = vld [vmem:[#allocation941_spill] sm:$0xff] }
 0x50e   : > { %v2466_v39 = vmax.f32 %v15283_v19, 0.0  ;;  %v2467_v33 = vmax.f32 %v15284_v38, 0.0  ;;  %3806 = vst.msk [vmem:[%s5055_s15 + $0x1ef8] sm:$0x3f] %vm2815_vm1, %v2460_v10  ;;  %3808 = vst.msk [vmem:[%s5055_s15 + $0x1f08] sm:$0x3f] %vm2815_vm1, %v2462_v14 }
 0x50f   : > { %3807 = vst.msk [vmem:[%s5055_s15 + $0x1f00] sm:$0xff] %vm2813_vm0, %v2461_v12  ;;  %3809 = vst.msk [vmem:[%s5055_s15 + $0x1f10] sm:$0xff] %vm2813_vm0, %v2463_v16  ;;  %v15285_v20 = vld [vmem:[#allocation942_spill] sm:$0xff]  ;;  %v15286_v31 = vld [vmem:[#allocation943_spill] sm:$0xff] }
 0x510   : > { %v2468_v32 = vmax.f32 %v15285_v20, 0.0  ;;  %v2469_v30 = vmax.f32 %v15286_v31, 0.0  ;;  %v15287_v25 = vld [vmem:[#allocation944_spill] sm:$0xff]  ;;  %v15288_v23 = vld [vmem:[#allocation945_spill] sm:$0xff]  ;;  %3810 = vst.msk [vmem:[%s5055_s15 + $0x1f18] sm:$0x3f] %vm2815_vm1, %v2464_v47 }
 0x511   : > { %v2470_v21 = vmax.f32 %v15287_v25, 0.0  ;;  %v2471_v22 = vmax.f32 %v15288_v23, 0.0  ;;  %3811 = vst.msk [vmem:[%s5055_s15 + $0x1f20] sm:$0xff] %vm2813_vm0, %v2465_v18  ;;  %3813 = vst.msk [vmem:[%s5055_s15 + $0x1f30] sm:$0xff] %vm2813_vm0, %v2467_v33  ;;  %v15289_v45 = vld [vmem:[#allocation946_spill] sm:$0xff]  ;;  %v15290_v43 = vld [vmem:[#allocation947_spill] sm:$0xff] }
 0x512   : > { %3812 = vst.msk [vmem:[%s5055_s15 + $0x1f28] sm:$0x3f] %vm2815_vm1, %v2466_v39  ;;  %v2472_v44 = vmax.f32 %v15289_v45, 0.0  ;;  %v2473_v63 = vmax.f32 %v15290_v43, 0.0  ;;  %v15291_v53 = vld [vmem:[#allocation948_spill] sm:$0xff]  ;;  %v15292_v51 = vld [vmem:[#allocation949_spill] sm:$0xff] }
 0x513   : > { %v2474_v52 = vmax.f32 %v15291_v53, 0.0  ;;  %v2475_v61 = vmax.f32 %v15292_v51, 0.0  ;;  %3814 = vst.msk [vmem:[%s5055_s15 + $0x1f38] sm:$0x3f] %vm2815_vm1, %v2468_v32  ;;  %3816 = vst.msk [vmem:[%s5055_s15 + $0x1f48] sm:$0x3f] %vm2815_vm1, %v2470_v21 }
 0x514   : > { %3815 = vst.msk [vmem:[%s5055_s15 + $0x1f40] sm:$0xff] %vm2813_vm0, %v2469_v30  ;;  %3817 = vst.msk [vmem:[%s5055_s15 + $0x1f50] sm:$0xff] %vm2813_vm0, %v2471_v22  ;;  %v15293_v60 = vld [vmem:[#allocation950_spill] sm:$0xff]  ;;  %v15294_v58 = vld [vmem:[#allocation951_spill] sm:$0xff] }
 0x515   : > { %v2476_v59 = vmax.f32 %v15293_v60, 0.0  ;;  %v2477_v54 = vmax.f32 %v15294_v58, 0.0  ;;  %v15295_v57 = vld [vmem:[#allocation952_spill] sm:$0xff]  ;;  %v15296_v42 = vld [vmem:[#allocation953_spill] sm:$0xff]  ;;  %3818 = vst.msk [vmem:[%s5055_s15 + $0x1f58] sm:$0x3f] %vm2815_vm1, %v2472_v44 }
 0x516   : > { %v2478_v26 = vmax.f32 %v15295_v57, 0.0  ;;  %v2479_v27 = vmax.f32 %v15296_v42, 0.0  ;;  %3819 = vst.msk [vmem:[%s5055_s15 + $0x1f60] sm:$0xff] %vm2813_vm0, %v2473_v63  ;;  %3821 = vst.msk [vmem:[%s5055_s15 + $0x1f70] sm:$0xff] %vm2813_vm0, %v2475_v61  ;;  %v15297_v28 = vld [vmem:[#allocation954_spill] sm:$0xff]  ;;  %v15298_v37 = vld [vmem:[#allocation955_spill] sm:$0xff] }
 0x517   : > { %3820 = vst.msk [vmem:[%s5055_s15 + $0x1f68] sm:$0x3f] %vm2815_vm1, %v2474_v52  ;;  %v2480_v48 = vmax.f32 %v15297_v28, 0.0  ;;  %v2481_v29 = vmax.f32 %v15298_v37, 0.0  ;;  %v15299_v49 = vld [vmem:[#allocation956_spill] sm:$0xff]  ;;  %v15300_v34 = vld [vmem:[#allocation957_spill] sm:$0xff] }
 0x518   : > { %v2482_v40 = vmax.f32 %v15299_v49, 0.0  ;;  %v2483_v56 = vmax.f32 %v15300_v34, 0.0  ;;  %3822 = vst.msk [vmem:[%s5055_s15 + $0x1f78] sm:$0x3f] %vm2815_vm1, %v2476_v59  ;;  %3824 = vst.msk [vmem:[%s5055_s15 + $0x1f88] sm:$0x3f] %vm2815_vm1, %v2478_v26 }
 0x519   : > { %3823 = vst.msk [vmem:[%s5055_s15 + $0x1f80] sm:$0xff] %vm2813_vm0, %v2477_v54  ;;  %3825 = vst.msk [vmem:[%s5055_s15 + $0x1f90] sm:$0xff] %vm2813_vm0, %v2479_v27  ;;  %v15301_v50 = vld [vmem:[#allocation958_spill] sm:$0xff]  ;;  %v15302_v55 = vld [vmem:[#allocation959_spill] sm:$0xff] }
 0x51a   : > { %v2484_v35 = vmax.f32 %v15301_v50, 0.0  ;;  %v2485_v36 = vmax.f32 %v15302_v55, 0.0  ;;  %v15303_v0 = vld [vmem:[#allocation960_spill] sm:$0xff]  ;;  %v15304_v24 = vld [vmem:[#allocation961_spill] sm:$0xff]  ;;  %3826 = vst.msk [vmem:[%s5055_s15 + $0x1f98] sm:$0x3f] %vm2815_vm1, %v2480_v48 }
 0x51b   : > { %v2486_v1 = vmax.f32 %v15303_v0, 0.0  ;;  %v2487_v41 = vmax.f32 %v15304_v24, 0.0  ;;  %3827 = vst.msk [vmem:[%s5055_s15 + $0x1fa0] sm:$0xff] %vm2813_vm0, %v2481_v29  ;;  %3829 = vst.msk [vmem:[%s5055_s15 + $0x1fb0] sm:$0xff] %vm2813_vm0, %v2483_v56  ;;  %v15305_v2 = vld [vmem:[#allocation962_spill] sm:$0xff]  ;;  %v15306_v4 = vld [vmem:[#allocation963_spill] sm:$0xff] }
 0x51c   : > { %3828 = vst.msk [vmem:[%s5055_s15 + $0x1fa8] sm:$0x3f] %vm2815_vm1, %v2482_v40  ;;  %v2488_v3 = vmax.f32 %v15305_v2, 0.0  ;;  %v2489_v5 = vmax.f32 %v15306_v4, 0.0  ;;  %v15307_v6 = vld [vmem:[#allocation964_spill] sm:$0xff]  ;;  %v15308_v8 = vld [vmem:[#allocation965_spill] sm:$0xff] }
 0x51d   : > { %v2490_v7 = vmax.f32 %v15307_v6, 0.0  ;;  %v2491_v9 = vmax.f32 %v15308_v8, 0.0  ;;  %3830 = vst.msk [vmem:[%s5055_s15 + $0x1fb8] sm:$0x3f] %vm2815_vm1, %v2484_v35  ;;  %3832 = vst.msk [vmem:[%s5055_s15 + $0x1fc8] sm:$0x3f] %vm2815_vm1, %v2486_v1 }
 0x51e   : > { %3831 = vst.msk [vmem:[%s5055_s15 + $0x1fc0] sm:$0xff] %vm2813_vm0, %v2485_v36  ;;  %3833 = vst.msk [vmem:[%s5055_s15 + $0x1fd0] sm:$0xff] %vm2813_vm0, %v2487_v41  ;;  %v15309_v10 = vld [vmem:[#allocation966_spill] sm:$0xff]  ;;  %v15310_v12 = vld [vmem:[#allocation967_spill] sm:$0xff] }
 0x51f   : > { %v2492_v11 = vmax.f32 %v15309_v10, 0.0  ;;  %v2493_v13 = vmax.f32 %v15310_v12, 0.0  ;;  %v15311_v14 = vld [vmem:[#allocation968_spill] sm:$0xff]  ;;  %v15312_v16 = vld [vmem:[#allocation969_spill] sm:$0xff]  ;;  %3834 = vst.msk [vmem:[%s5055_s15 + $0x1fd8] sm:$0x3f] %vm2815_vm1, %v2488_v3 }
 0x520   : > { %v2494_v15 = vmax.f32 %v15311_v14, 0.0  ;;  %v2495_v17 = vmax.f32 %v15312_v16, 0.0  ;;  %3835 = vst.msk [vmem:[%s5055_s15 + $0x1fe0] sm:$0xff] %vm2813_vm0, %v2489_v5  ;;  %3837 = vst.msk [vmem:[%s5055_s15 + $0x1ff0] sm:$0xff] %vm2813_vm0, %v2491_v9  ;;  %v15313_v47 = vld [vmem:[#allocation970_spill] sm:$0xff]  ;;  %v15314_v18 = vld [vmem:[#allocation971_spill] sm:$0xff] }
 0x521   : > { %3836 = vst.msk [vmem:[%s5055_s15 + $0x1fe8] sm:$0x3f] %vm2815_vm1, %v2490_v7  ;;  %v2496_v46 = vmax.f32 %v15313_v47, 0.0  ;;  %v2497_v19 = vmax.f32 %v15314_v18, 0.0  ;;  %v15315_v39 = vld [vmem:[#allocation972_spill] sm:$0xff]  ;;  %v15316_v33 = vld [vmem:[#allocation973_spill] sm:$0xff] }
 0x522   : > { %v2498_v38 = vmax.f32 %v15315_v39, 0.0  ;;  %v2499_v20 = vmax.f32 %v15316_v33, 0.0  ;;  %3838 = vst.msk [vmem:[%s5055_s15 + $0x1ff8] sm:$0x3f] %vm2815_vm1, %v2492_v11  ;;  %3840 = vst.msk [vmem:[%s5055_s15 + $0x2008] sm:$0x3f] %vm2815_vm1, %v2494_v15 }
 0x523   : > { %3839 = vst.msk [vmem:[%s5055_s15 + $0x2000] sm:$0xff] %vm2813_vm0, %v2493_v13  ;;  %3841 = vst.msk [vmem:[%s5055_s15 + $0x2010] sm:$0xff] %vm2813_vm0, %v2495_v17  ;;  %v15317_v32 = vld [vmem:[#allocation974_spill] sm:$0xff]  ;;  %v15318_v30 = vld [vmem:[#allocation975_spill] sm:$0xff] }
 0x524   : > { %v2500_v31 = vmax.f32 %v15317_v32, 0.0  ;;  %v2501_v25 = vmax.f32 %v15318_v30, 0.0  ;;  %v15319_v21 = vld [vmem:[#allocation976_spill] sm:$0xff]  ;;  %v15320_v22 = vld [vmem:[#allocation977_spill] sm:$0xff]  ;;  %3842 = vst.msk [vmem:[%s5055_s15 + $0x2018] sm:$0x3f] %vm2815_vm1, %v2496_v46 }
 0x525   : > { %v2502_v23 = vmax.f32 %v15319_v21, 0.0  ;;  %v2503_v45 = vmax.f32 %v15320_v22, 0.0  ;;  %3843 = vst.msk [vmem:[%s5055_s15 + $0x2020] sm:$0xff] %vm2813_vm0, %v2497_v19  ;;  %3845 = vst.msk [vmem:[%s5055_s15 + $0x2030] sm:$0xff] %vm2813_vm0, %v2499_v20  ;;  %v15321_v44 = vld [vmem:[#allocation978_spill] sm:$0xff]  ;;  %v15322_v63 = vld [vmem:[#allocation979_spill] sm:$0xff] }
 0x526   : > { %3844 = vst.msk [vmem:[%s5055_s15 + $0x2028] sm:$0x3f] %vm2815_vm1, %v2498_v38  ;;  %v2504_v43 = vmax.f32 %v15321_v44, 0.0  ;;  %v2505_v53 = vmax.f32 %v15322_v63, 0.0  ;;  %v15323_v52 = vld [vmem:[#allocation980_spill] sm:$0xff]  ;;  %v15324_v61 = vld [vmem:[#allocation981_spill] sm:$0xff] }
 0x527   : > { %v2506_v51 = vmax.f32 %v15323_v52, 0.0  ;;  %v2507_v60 = vmax.f32 %v15324_v61, 0.0  ;;  %3846 = vst.msk [vmem:[%s5055_s15 + $0x2038] sm:$0x3f] %vm2815_vm1, %v2500_v31  ;;  %3848 = vst.msk [vmem:[%s5055_s15 + $0x2048] sm:$0x3f] %vm2815_vm1, %v2502_v23 }
 0x528   : > { %3847 = vst.msk [vmem:[%s5055_s15 + $0x2040] sm:$0xff] %vm2813_vm0, %v2501_v25  ;;  %3849 = vst.msk [vmem:[%s5055_s15 + $0x2050] sm:$0xff] %vm2813_vm0, %v2503_v45  ;;  %v15325_v59 = vld [vmem:[#allocation982_spill] sm:$0xff]  ;;  %v15326_v54 = vld [vmem:[#allocation983_spill] sm:$0xff] }
 0x529   : > { %v2508_v58 = vmax.f32 %v15325_v59, 0.0  ;;  %v2509_v57 = vmax.f32 %v15326_v54, 0.0  ;;  %v15327_v26 = vld [vmem:[#allocation984_spill] sm:$0xff]  ;;  %v15328_v27 = vld [vmem:[#allocation985_spill] sm:$0xff]  ;;  %3850 = vst.msk [vmem:[%s5055_s15 + $0x2058] sm:$0x3f] %vm2815_vm1, %v2504_v43 }
 0x52a   : > { %v2510_v42 = vmax.f32 %v15327_v26, 0.0  ;;  %v2511_v28 = vmax.f32 %v15328_v27, 0.0  ;;  %3851 = vst.msk [vmem:[%s5055_s15 + $0x2060] sm:$0xff] %vm2813_vm0, %v2505_v53  ;;  %3853 = vst.msk [vmem:[%s5055_s15 + $0x2070] sm:$0xff] %vm2813_vm0, %v2507_v60  ;;  %v15329_v48 = vld [vmem:[#allocation986_spill] sm:$0xff]  ;;  %v15330_v29 = vld [vmem:[#allocation987_spill] sm:$0xff] }
 0x52b   : > { %3852 = vst.msk [vmem:[%s5055_s15 + $0x2068] sm:$0x3f] %vm2815_vm1, %v2506_v51  ;;  %v2512_v37 = vmax.f32 %v15329_v48, 0.0  ;;  %v2513_v49 = vmax.f32 %v15330_v29, 0.0  ;;  %v15331_v40 = vld [vmem:[#allocation988_spill] sm:$0xff]  ;;  %v15332_v56 = vld [vmem:[#allocation989_spill] sm:$0xff] }
 0x52c   : > { %v2514_v34 = vmax.f32 %v15331_v40, 0.0  ;;  %v2515_v50 = vmax.f32 %v15332_v56, 0.0  ;;  %3854 = vst.msk [vmem:[%s5055_s15 + $0x2078] sm:$0x3f] %vm2815_vm1, %v2508_v58  ;;  %3856 = vst.msk [vmem:[%s5055_s15 + $0x2088] sm:$0x3f] %vm2815_vm1, %v2510_v42 }
 0x52d   : > { %3855 = vst.msk [vmem:[%s5055_s15 + $0x2080] sm:$0xff] %vm2813_vm0, %v2509_v57  ;;  %3857 = vst.msk [vmem:[%s5055_s15 + $0x2090] sm:$0xff] %vm2813_vm0, %v2511_v28  ;;  %v15333_v35 = vld [vmem:[#allocation990_spill] sm:$0xff]  ;;  %v15334_v36 = vld [vmem:[#allocation991_spill] sm:$0xff] }
 0x52e   : > { %v2516_v55 = vmax.f32 %v15333_v35, 0.0  ;;  %v2517_v0 = vmax.f32 %v15334_v36, 0.0  ;;  %v15335_v1 = vld [vmem:[#allocation992_spill] sm:$0xff]  ;;  %v15336_v41 = vld [vmem:[#allocation993_spill] sm:$0xff]  ;;  %3858 = vst.msk [vmem:[%s5055_s15 + $0x2098] sm:$0x3f] %vm2815_vm1, %v2512_v37 }
 0x52f   : > { %v2518_v24 = vmax.f32 %v15335_v1, 0.0  ;;  %v2519_v2 = vmax.f32 %v15336_v41, 0.0  ;;  %3859 = vst.msk [vmem:[%s5055_s15 + $0x20a0] sm:$0xff] %vm2813_vm0, %v2513_v49  ;;  %3861 = vst.msk [vmem:[%s5055_s15 + $0x20b0] sm:$0xff] %vm2813_vm0, %v2515_v50  ;;  %v15337_v3 = vld [vmem:[#allocation994_spill] sm:$0xff]  ;;  %v15338_v5 = vld [vmem:[#allocation995_spill] sm:$0xff] }
 0x530   : > { %3860 = vst.msk [vmem:[%s5055_s15 + $0x20a8] sm:$0x3f] %vm2815_vm1, %v2514_v34  ;;  %v2520_v4 = vmax.f32 %v15337_v3, 0.0  ;;  %v2521_v6 = vmax.f32 %v15338_v5, 0.0  ;;  %v15339_v7 = vld [vmem:[#allocation996_spill] sm:$0xff]  ;;  %v15340_v9 = vld [vmem:[#allocation997_spill] sm:$0xff] }
 0x531   : > { %v2522_v8 = vmax.f32 %v15339_v7, 0.0  ;;  %v2523_v10 = vmax.f32 %v15340_v9, 0.0  ;;  %3862 = vst.msk [vmem:[%s5055_s15 + $0x20b8] sm:$0x3f] %vm2815_vm1, %v2516_v55  ;;  %3864 = vst.msk [vmem:[%s5055_s15 + $0x20c8] sm:$0x3f] %vm2815_vm1, %v2518_v24 }
 0x532   : > { %3863 = vst.msk [vmem:[%s5055_s15 + $0x20c0] sm:$0xff] %vm2813_vm0, %v2517_v0  ;;  %3865 = vst.msk [vmem:[%s5055_s15 + $0x20d0] sm:$0xff] %vm2813_vm0, %v2519_v2  ;;  %v15341_v11 = vld [vmem:[#allocation998_spill] sm:$0xff]  ;;  %v15342_v13 = vld [vmem:[#allocation999_spill] sm:$0xff] }
 0x533   : > { %v2524_v12 = vmax.f32 %v15341_v11, 0.0  ;;  %v2525_v14 = vmax.f32 %v15342_v13, 0.0  ;;  %v15343_v15 = vld [vmem:[#allocation1000_spill] sm:$0xff]  ;;  %v15344_v17 = vld [vmem:[#allocation1001_spill] sm:$0xff]  ;;  %3866 = vst.msk [vmem:[%s5055_s15 + $0x20d8] sm:$0x3f] %vm2815_vm1, %v2520_v4 }
 0x534   : > { %v2526_v16 = vmax.f32 %v15343_v15, 0.0  ;;  %v2527_v47 = vmax.f32 %v15344_v17, 0.0  ;;  %3867 = vst.msk [vmem:[%s5055_s15 + $0x20e0] sm:$0xff] %vm2813_vm0, %v2521_v6  ;;  %3869 = vst.msk [vmem:[%s5055_s15 + $0x20f0] sm:$0xff] %vm2813_vm0, %v2523_v10  ;;  %v15345_v46 = vld [vmem:[#allocation1002_spill] sm:$0xff]  ;;  %v15346_v19 = vld [vmem:[#allocation1003_spill] sm:$0xff] }
 0x535   : > { %3868 = vst.msk [vmem:[%s5055_s15 + $0x20e8] sm:$0x3f] %vm2815_vm1, %v2522_v8  ;;  %v2528_v18 = vmax.f32 %v15345_v46, 0.0  ;;  %v2529_v39 = vmax.f32 %v15346_v19, 0.0  ;;  %v15347_v38 = vld [vmem:[#allocation1004_spill] sm:$0xff]  ;;  %v15348_v20 = vld [vmem:[#allocation1005_spill] sm:$0xff] }
 0x536   : > { %v2530_v33 = vmax.f32 %v15347_v38, 0.0  ;;  %v2531_v32 = vmax.f32 %v15348_v20, 0.0  ;;  %3870 = vst.msk [vmem:[%s5055_s15 + $0x20f8] sm:$0x3f] %vm2815_vm1, %v2524_v12  ;;  %3872 = vst.msk [vmem:[%s5055_s15 + $0x2108] sm:$0x3f] %vm2815_vm1, %v2526_v16 }
 0x537   : > { %3871 = vst.msk [vmem:[%s5055_s15 + $0x2100] sm:$0xff] %vm2813_vm0, %v2525_v14  ;;  %3873 = vst.msk [vmem:[%s5055_s15 + $0x2110] sm:$0xff] %vm2813_vm0, %v2527_v47  ;;  %v15349_v31 = vld [vmem:[#allocation1006_spill] sm:$0xff]  ;;  %v15350_v25 = vld [vmem:[#allocation1007_spill] sm:$0xff] }
 0x538   : > { %v2532_v30 = vmax.f32 %v15349_v31, 0.0  ;;  %v2533_v21 = vmax.f32 %v15350_v25, 0.0  ;;  %v15351_v23 = vld [vmem:[#allocation1008_spill] sm:$0xff]  ;;  %v15352_v45 = vld [vmem:[#allocation1009_spill] sm:$0xff]  ;;  %3874 = vst.msk [vmem:[%s5055_s15 + $0x2118] sm:$0x3f] %vm2815_vm1, %v2528_v18 }
 0x539   : > { %v2534_v22 = vmax.f32 %v15351_v23, 0.0  ;;  %v2535_v44 = vmax.f32 %v15352_v45, 0.0  ;;  %3875 = vst.msk [vmem:[%s5055_s15 + $0x2120] sm:$0xff] %vm2813_vm0, %v2529_v39  ;;  %3877 = vst.msk [vmem:[%s5055_s15 + $0x2130] sm:$0xff] %vm2813_vm0, %v2531_v32  ;;  %v15353_v43 = vld [vmem:[#allocation1010_spill] sm:$0xff]  ;;  %v15354_v53 = vld [vmem:[#allocation1011_spill] sm:$0xff] }
 0x53a   : > { %3876 = vst.msk [vmem:[%s5055_s15 + $0x2128] sm:$0x3f] %vm2815_vm1, %v2530_v33  ;;  %v2536_v63 = vmax.f32 %v15353_v43, 0.0  ;;  %v2537_v52 = vmax.f32 %v15354_v53, 0.0  ;;  %v15355_v51 = vld [vmem:[#allocation1012_spill] sm:$0xff]  ;;  %v15356_v60 = vld [vmem:[#allocation1013_spill] sm:$0xff] }
 0x53b   : > { %v2538_v61 = vmax.f32 %v15355_v51, 0.0  ;;  %v2539_v59 = vmax.f32 %v15356_v60, 0.0  ;;  %3878 = vst.msk [vmem:[%s5055_s15 + $0x2138] sm:$0x3f] %vm2815_vm1, %v2532_v30  ;;  %3880 = vst.msk [vmem:[%s5055_s15 + $0x2148] sm:$0x3f] %vm2815_vm1, %v2534_v22 }
 0x53c   : > { %3879 = vst.msk [vmem:[%s5055_s15 + $0x2140] sm:$0xff] %vm2813_vm0, %v2533_v21  ;;  %3881 = vst.msk [vmem:[%s5055_s15 + $0x2150] sm:$0xff] %vm2813_vm0, %v2535_v44  ;;  %v15357_v58 = vld [vmem:[#allocation1014_spill] sm:$0xff]  ;;  %v15358_v57 = vld [vmem:[#allocation1015_spill] sm:$0xff] }
 0x53d   : > { %v2540_v54 = vmax.f32 %v15357_v58, 0.0  ;;  %v2541_v26 = vmax.f32 %v15358_v57, 0.0  ;;  %v15359_v42 = vld [vmem:[#allocation1016_spill] sm:$0xff]  ;;  %v15360_v28 = vld [vmem:[#allocation1017_spill] sm:$0xff]  ;;  %3882 = vst.msk [vmem:[%s5055_s15 + $0x2158] sm:$0x3f] %vm2815_vm1, %v2536_v63 }
 0x53e   : > { %v2542_v27 = vmax.f32 %v15359_v42, 0.0  ;;  %v2543_v48 = vmax.f32 %v15360_v28, 0.0  ;;  %3883 = vst.msk [vmem:[%s5055_s15 + $0x2160] sm:$0xff] %vm2813_vm0, %v2537_v52  ;;  %3885 = vst.msk [vmem:[%s5055_s15 + $0x2170] sm:$0xff] %vm2813_vm0, %v2539_v59  ;;  %v15361_v37 = vld [vmem:[#allocation1018_spill] sm:$0xff]  ;;  %v15362_v49 = vld [vmem:[#allocation1019_spill] sm:$0xff] }
 0x53f   : > { %3884 = vst.msk [vmem:[%s5055_s15 + $0x2168] sm:$0x3f] %vm2815_vm1, %v2538_v61  ;;  %v2544_v29 = vmax.f32 %v15361_v37, 0.0  ;;  %v2545_v40 = vmax.f32 %v15362_v49, 0.0  ;;  %v15363_v34 = vld [vmem:[#allocation1020_spill] sm:$0xff]  ;;  %v15364_v50 = vld [vmem:[#allocation1021_spill] sm:$0xff] }
 0x540   : > { %v2546_v56 = vmax.f32 %v15363_v34, 0.0  ;;  %v2547_v35 = vmax.f32 %v15364_v50, 0.0  ;;  %3886 = vst.msk [vmem:[%s5055_s15 + $0x2178] sm:$0x3f] %vm2815_vm1, %v2540_v54  ;;  %3888 = vst.msk [vmem:[%s5055_s15 + $0x2188] sm:$0x3f] %vm2815_vm1, %v2542_v27 }
 0x541   : > { %3887 = vst.msk [vmem:[%s5055_s15 + $0x2180] sm:$0xff] %vm2813_vm0, %v2541_v26  ;;  %3889 = vst.msk [vmem:[%s5055_s15 + $0x2190] sm:$0xff] %vm2813_vm0, %v2543_v48  ;;  %v15365_v55 = vld [vmem:[#allocation1022_spill] sm:$0xff]  ;;  %v15366_v0 = vld [vmem:[#allocation1023_spill] sm:$0xff] }
 0x542   : > { %v2548_v36 = vmax.f32 %v15365_v55, 0.0  ;;  %v2549_v1 = vmax.f32 %v15366_v0, 0.0  ;;  %v15367_v24 = vld [vmem:[#allocation1024_spill] sm:$0xff]  ;;  %v15368_v2 = vld [vmem:[#allocation1025_spill] sm:$0xff]  ;;  %3890 = vst.msk [vmem:[%s5055_s15 + $0x2198] sm:$0x3f] %vm2815_vm1, %v2544_v29 }
 0x543   : > { %v2550_v41 = vmax.f32 %v15367_v24, 0.0  ;;  %v2551_v3 = vmax.f32 %v15368_v2, 0.0  ;;  %3891 = vst.msk [vmem:[%s5055_s15 + $0x21a0] sm:$0xff] %vm2813_vm0, %v2545_v40  ;;  %3893 = vst.msk [vmem:[%s5055_s15 + $0x21b0] sm:$0xff] %vm2813_vm0, %v2547_v35  ;;  %v15369_v4 = vld [vmem:[#allocation1026_spill] sm:$0xff]  ;;  %v15370_v6 = vld [vmem:[#allocation1027_spill] sm:$0xff] }
 0x544   : > { %3892 = vst.msk [vmem:[%s5055_s15 + $0x21a8] sm:$0x3f] %vm2815_vm1, %v2546_v56  ;;  %v2552_v5 = vmax.f32 %v15369_v4, 0.0  ;;  %v2553_v7 = vmax.f32 %v15370_v6, 0.0  ;;  %v15371_v8 = vld [vmem:[#allocation1028_spill] sm:$0xff]  ;;  %v15372_v10 = vld [vmem:[#allocation1029_spill] sm:$0xff] }
 0x545   : > { %v2554_v9 = vmax.f32 %v15371_v8, 0.0  ;;  %v2555_v11 = vmax.f32 %v15372_v10, 0.0  ;;  %3894 = vst.msk [vmem:[%s5055_s15 + $0x21b8] sm:$0x3f] %vm2815_vm1, %v2548_v36  ;;  %3896 = vst.msk [vmem:[%s5055_s15 + $0x21c8] sm:$0x3f] %vm2815_vm1, %v2550_v41 }
 0x546   : > { %3895 = vst.msk [vmem:[%s5055_s15 + $0x21c0] sm:$0xff] %vm2813_vm0, %v2549_v1  ;;  %3897 = vst.msk [vmem:[%s5055_s15 + $0x21d0] sm:$0xff] %vm2813_vm0, %v2551_v3  ;;  %v15373_v12 = vld [vmem:[#allocation1030_spill] sm:$0xff]  ;;  %v15374_v14 = vld [vmem:[#allocation1031_spill] sm:$0xff] }
 0x547   : > { %v2556_v13 = vmax.f32 %v15373_v12, 0.0  ;;  %v2557_v15 = vmax.f32 %v15374_v14, 0.0  ;;  %v15375_v16 = vld [vmem:[#allocation1032_spill] sm:$0xff]  ;;  %v15376_v47 = vld [vmem:[#allocation1033_spill] sm:$0xff]  ;;  %3898 = vst.msk [vmem:[%s5055_s15 + $0x21d8] sm:$0x3f] %vm2815_vm1, %v2552_v5 }
 0x548   : > { %v2558_v17 = vmax.f32 %v15375_v16, 0.0  ;;  %v2559_v46 = vmax.f32 %v15376_v47, 0.0  ;;  %3899 = vst.msk [vmem:[%s5055_s15 + $0x21e0] sm:$0xff] %vm2813_vm0, %v2553_v7  ;;  %3901 = vst.msk [vmem:[%s5055_s15 + $0x21f0] sm:$0xff] %vm2813_vm0, %v2555_v11  ;;  %v15377_v18 = vld [vmem:[#allocation1034_spill] sm:$0xff]  ;;  %v15378_v39 = vld [vmem:[#allocation1035_spill] sm:$0xff] }
 0x549   : > { %3900 = vst.msk [vmem:[%s5055_s15 + $0x21e8] sm:$0x3f] %vm2815_vm1, %v2554_v9  ;;  %v2560_v19 = vmax.f32 %v15377_v18, 0.0  ;;  %v2561_v38 = vmax.f32 %v15378_v39, 0.0  ;;  %v15379_v33 = vld [vmem:[#allocation1036_spill] sm:$0xff]  ;;  %v15380_v32 = vld [vmem:[#allocation1037_spill] sm:$0xff] }
 0x54a   : > { %v2562_v20 = vmax.f32 %v15379_v33, 0.0  ;;  %v2563_v31 = vmax.f32 %v15380_v32, 0.0  ;;  %3902 = vst.msk [vmem:[%s5055_s15 + $0x21f8] sm:$0x3f] %vm2815_vm1, %v2556_v13  ;;  %3904 = vst.msk [vmem:[%s5055_s15 + $0x2208] sm:$0x3f] %vm2815_vm1, %v2558_v17 }
 0x54b   : > { %3903 = vst.msk [vmem:[%s5055_s15 + $0x2200] sm:$0xff] %vm2813_vm0, %v2557_v15  ;;  %3905 = vst.msk [vmem:[%s5055_s15 + $0x2210] sm:$0xff] %vm2813_vm0, %v2559_v46  ;;  %v15381_v30 = vld [vmem:[#allocation1038_spill] sm:$0xff]  ;;  %v15382_v21 = vld [vmem:[#allocation1039_spill] sm:$0xff] }
 0x54c   : > { %v2564_v25 = vmax.f32 %v15381_v30, 0.0  ;;  %v2565_v23 = vmax.f32 %v15382_v21, 0.0  ;;  %v15383_v22 = vld [vmem:[#allocation1040_spill] sm:$0xff]  ;;  %v15384_v44 = vld [vmem:[#allocation1041_spill] sm:$0xff]  ;;  %3906 = vst.msk [vmem:[%s5055_s15 + $0x2218] sm:$0x3f] %vm2815_vm1, %v2560_v19 }
 0x54d   : > { %v2566_v45 = vmax.f32 %v15383_v22, 0.0  ;;  %v2567_v43 = vmax.f32 %v15384_v44, 0.0  ;;  %3907 = vst.msk [vmem:[%s5055_s15 + $0x2220] sm:$0xff] %vm2813_vm0, %v2561_v38  ;;  %3909 = vst.msk [vmem:[%s5055_s15 + $0x2230] sm:$0xff] %vm2813_vm0, %v2563_v31  ;;  %v15385_v63 = vld [vmem:[#allocation1042_spill] sm:$0xff]  ;;  %v15386_v52 = vld [vmem:[#allocation1043_spill] sm:$0xff] }
 0x54e   : > { %3908 = vst.msk [vmem:[%s5055_s15 + $0x2228] sm:$0x3f] %vm2815_vm1, %v2562_v20  ;;  %v2568_v53 = vmax.f32 %v15385_v63, 0.0  ;;  %v2569_v51 = vmax.f32 %v15386_v52, 0.0  ;;  %v15387_v61 = vld [vmem:[#allocation1044_spill] sm:$0xff]  ;;  %v15388_v59 = vld [vmem:[#allocation1045_spill] sm:$0xff] }
 0x54f   : > { %v2570_v60 = vmax.f32 %v15387_v61, 0.0  ;;  %v2571_v58 = vmax.f32 %v15388_v59, 0.0  ;;  %3910 = vst.msk [vmem:[%s5055_s15 + $0x2238] sm:$0x3f] %vm2815_vm1, %v2564_v25  ;;  %3912 = vst.msk [vmem:[%s5055_s15 + $0x2248] sm:$0x3f] %vm2815_vm1, %v2566_v45 }
 0x550   : > { %3911 = vst.msk [vmem:[%s5055_s15 + $0x2240] sm:$0xff] %vm2813_vm0, %v2565_v23  ;;  %3913 = vst.msk [vmem:[%s5055_s15 + $0x2250] sm:$0xff] %vm2813_vm0, %v2567_v43  ;;  %v15389_v54 = vld [vmem:[#allocation1046_spill] sm:$0xff]  ;;  %v15390_v26 = vld [vmem:[#allocation1047_spill] sm:$0xff] }
 0x551   : > { %v2572_v57 = vmax.f32 %v15389_v54, 0.0  ;;  %v2573_v42 = vmax.f32 %v15390_v26, 0.0  ;;  %v15391_v27 = vld [vmem:[#allocation1048_spill] sm:$0xff]  ;;  %v15392_v48 = vld [vmem:[#allocation1049_spill] sm:$0xff]  ;;  %3914 = vst.msk [vmem:[%s5055_s15 + $0x2258] sm:$0x3f] %vm2815_vm1, %v2568_v53 }
 0x552   : > { %v2574_v28 = vmax.f32 %v15391_v27, 0.0  ;;  %v2575_v37 = vmax.f32 %v15392_v48, 0.0  ;;  %3915 = vst.msk [vmem:[%s5055_s15 + $0x2260] sm:$0xff] %vm2813_vm0, %v2569_v51  ;;  %3917 = vst.msk [vmem:[%s5055_s15 + $0x2270] sm:$0xff] %vm2813_vm0, %v2571_v58  ;;  %v15393_v29 = vld [vmem:[#allocation1050_spill] sm:$0xff]  ;;  %v15394_v40 = vld [vmem:[#allocation1051_spill] sm:$0xff] }
 0x553   : > { %3916 = vst.msk [vmem:[%s5055_s15 + $0x2268] sm:$0x3f] %vm2815_vm1, %v2570_v60  ;;  %v2576_v49 = vmax.f32 %v15393_v29, 0.0  ;;  %v2577_v34 = vmax.f32 %v15394_v40, 0.0  ;;  %v15395_v56 = vld [vmem:[#allocation1052_spill] sm:$0xff]  ;;  %v15396_v35 = vld [vmem:[#allocation1053_spill] sm:$0xff] }
 0x554   : > { %v2578_v50 = vmax.f32 %v15395_v56, 0.0  ;;  %v2579_v55 = vmax.f32 %v15396_v35, 0.0  ;;  %3918 = vst.msk [vmem:[%s5055_s15 + $0x2278] sm:$0x3f] %vm2815_vm1, %v2572_v57  ;;  %3920 = vst.msk [vmem:[%s5055_s15 + $0x2288] sm:$0x3f] %vm2815_vm1, %v2574_v28 }
 0x555   : > { %3919 = vst.msk [vmem:[%s5055_s15 + $0x2280] sm:$0xff] %vm2813_vm0, %v2573_v42  ;;  %3921 = vst.msk [vmem:[%s5055_s15 + $0x2290] sm:$0xff] %vm2813_vm0, %v2575_v37  ;;  %v15397_v36 = vld [vmem:[#allocation1054_spill] sm:$0xff]  ;;  %v15398_v1 = vld [vmem:[#allocation1055_spill] sm:$0xff] }
 0x556   : > { %v2580_v0 = vmax.f32 %v15397_v36, 0.0  ;;  %v2581_v24 = vmax.f32 %v15398_v1, 0.0  ;;  %v15399_v41 = vld [vmem:[#allocation1056_spill] sm:$0xff]  ;;  %v15400_v3 = vld [vmem:[#allocation1057_spill] sm:$0xff]  ;;  %3922 = vst.msk [vmem:[%s5055_s15 + $0x2298] sm:$0x3f] %vm2815_vm1, %v2576_v49 }
 0x557   : > { %v2582_v2 = vmax.f32 %v15399_v41, 0.0  ;;  %v2583_v4 = vmax.f32 %v15400_v3, 0.0  ;;  %3923 = vst.msk [vmem:[%s5055_s15 + $0x22a0] sm:$0xff] %vm2813_vm0, %v2577_v34  ;;  %3925 = vst.msk [vmem:[%s5055_s15 + $0x22b0] sm:$0xff] %vm2813_vm0, %v2579_v55  ;;  %v15401_v5 = vld [vmem:[#allocation1058_spill] sm:$0xff]  ;;  %v15402_v7 = vld [vmem:[#allocation1059_spill] sm:$0xff] }
 0x558   : > { %3924 = vst.msk [vmem:[%s5055_s15 + $0x22a8] sm:$0x3f] %vm2815_vm1, %v2578_v50  ;;  %v2584_v6 = vmax.f32 %v15401_v5, 0.0  ;;  %v2585_v8 = vmax.f32 %v15402_v7, 0.0  ;;  %v15403_v9 = vld [vmem:[#allocation1060_spill] sm:$0xff]  ;;  %v15404_v11 = vld [vmem:[#allocation1061_spill] sm:$0xff] }
 0x559   : > { %v2586_v10 = vmax.f32 %v15403_v9, 0.0  ;;  %v2587_v12 = vmax.f32 %v15404_v11, 0.0  ;;  %3926 = vst.msk [vmem:[%s5055_s15 + $0x22b8] sm:$0x3f] %vm2815_vm1, %v2580_v0  ;;  %3928 = vst.msk [vmem:[%s5055_s15 + $0x22c8] sm:$0x3f] %vm2815_vm1, %v2582_v2 }
 0x55a   : > { %3927 = vst.msk [vmem:[%s5055_s15 + $0x22c0] sm:$0xff] %vm2813_vm0, %v2581_v24  ;;  %3929 = vst.msk [vmem:[%s5055_s15 + $0x22d0] sm:$0xff] %vm2813_vm0, %v2583_v4  ;;  %v15405_v13 = vld [vmem:[#allocation1062_spill] sm:$0xff]  ;;  %v15406_v15 = vld [vmem:[#allocation1063_spill] sm:$0xff] }
 0x55b   : > { %v2588_v14 = vmax.f32 %v15405_v13, 0.0  ;;  %v2589_v16 = vmax.f32 %v15406_v15, 0.0  ;;  %v15407_v17 = vld [vmem:[#allocation1064_spill] sm:$0xff]  ;;  %v15408_v46 = vld [vmem:[#allocation1065_spill] sm:$0xff]  ;;  %3930 = vst.msk [vmem:[%s5055_s15 + $0x22d8] sm:$0x3f] %vm2815_vm1, %v2584_v6 }
 0x55c   : > { %v2590_v47 = vmax.f32 %v15407_v17, 0.0  ;;  %v2591_v18 = vmax.f32 %v15408_v46, 0.0  ;;  %3931 = vst.msk [vmem:[%s5055_s15 + $0x22e0] sm:$0xff] %vm2813_vm0, %v2585_v8  ;;  %3933 = vst.msk [vmem:[%s5055_s15 + $0x22f0] sm:$0xff] %vm2813_vm0, %v2587_v12  ;;  %v15409_v19 = vld [vmem:[#allocation1066_spill] sm:$0xff]  ;;  %v15410_v38 = vld [vmem:[#allocation1067_spill] sm:$0xff] }
 0x55d   : > { %3932 = vst.msk [vmem:[%s5055_s15 + $0x22e8] sm:$0x3f] %vm2815_vm1, %v2586_v10  ;;  %v2592_v39 = vmax.f32 %v15409_v19, 0.0  ;;  %v2593_v33 = vmax.f32 %v15410_v38, 0.0  ;;  %v15411_v20 = vld [vmem:[#allocation1068_spill] sm:$0xff]  ;;  %v15412_v31 = vld [vmem:[#allocation1069_spill] sm:$0xff] }
 0x55e   : > { %v2594_v32 = vmax.f32 %v15411_v20, 0.0  ;;  %v2595_v30 = vmax.f32 %v15412_v31, 0.0  ;;  %3934 = vst.msk [vmem:[%s5055_s15 + $0x22f8] sm:$0x3f] %vm2815_vm1, %v2588_v14  ;;  %3936 = vst.msk [vmem:[%s5055_s15 + $0x2308] sm:$0x3f] %vm2815_vm1, %v2590_v47 }
 0x55f   : > { %3935 = vst.msk [vmem:[%s5055_s15 + $0x2300] sm:$0xff] %vm2813_vm0, %v2589_v16  ;;  %3937 = vst.msk [vmem:[%s5055_s15 + $0x2310] sm:$0xff] %vm2813_vm0, %v2591_v18  ;;  %v15413_v25 = vld [vmem:[#allocation1070_spill] sm:$0xff]  ;;  %v15414_v23 = vld [vmem:[#allocation1071_spill] sm:$0xff] }
 0x560   : > { %v2596_v21 = vmax.f32 %v15413_v25, 0.0  ;;  %v2597_v22 = vmax.f32 %v15414_v23, 0.0  ;;  %v15415_v45 = vld [vmem:[#allocation1072_spill] sm:$0xff]  ;;  %v15416_v43 = vld [vmem:[#allocation1073_spill] sm:$0xff]  ;;  %3938 = vst.msk [vmem:[%s5055_s15 + $0x2318] sm:$0x3f] %vm2815_vm1, %v2592_v39 }
 0x561   : > { %v2598_v44 = vmax.f32 %v15415_v45, 0.0  ;;  %v2599_v63 = vmax.f32 %v15416_v43, 0.0  ;;  %3939 = vst.msk [vmem:[%s5055_s15 + $0x2320] sm:$0xff] %vm2813_vm0, %v2593_v33  ;;  %3941 = vst.msk [vmem:[%s5055_s15 + $0x2330] sm:$0xff] %vm2813_vm0, %v2595_v30  ;;  %v15417_v53 = vld [vmem:[#allocation1074_spill] sm:$0xff]  ;;  %v15418_v51 = vld [vmem:[#allocation1075_spill] sm:$0xff] }
 0x562   : > { %3940 = vst.msk [vmem:[%s5055_s15 + $0x2328] sm:$0x3f] %vm2815_vm1, %v2594_v32  ;;  %v2600_v52 = vmax.f32 %v15417_v53, 0.0  ;;  %v2601_v61 = vmax.f32 %v15418_v51, 0.0  ;;  %v15419_v60 = vld [vmem:[#allocation1076_spill] sm:$0xff]  ;;  %v15420_v58 = vld [vmem:[#allocation1077_spill] sm:$0xff] }
 0x563   : > { %v2602_v59 = vmax.f32 %v15419_v60, 0.0  ;;  %v2603_v54 = vmax.f32 %v15420_v58, 0.0  ;;  %3942 = vst.msk [vmem:[%s5055_s15 + $0x2338] sm:$0x3f] %vm2815_vm1, %v2596_v21  ;;  %3944 = vst.msk [vmem:[%s5055_s15 + $0x2348] sm:$0x3f] %vm2815_vm1, %v2598_v44 }
 0x564   : > { %3943 = vst.msk [vmem:[%s5055_s15 + $0x2340] sm:$0xff] %vm2813_vm0, %v2597_v22  ;;  %3945 = vst.msk [vmem:[%s5055_s15 + $0x2350] sm:$0xff] %vm2813_vm0, %v2599_v63  ;;  %v15421_v57 = vld [vmem:[#allocation1078_spill] sm:$0xff]  ;;  %v15422_v42 = vld [vmem:[#allocation1079_spill] sm:$0xff] }
 0x565   : > { %v2604_v26 = vmax.f32 %v15421_v57, 0.0  ;;  %v2605_v27 = vmax.f32 %v15422_v42, 0.0  ;;  %v15423_v28 = vld [vmem:[#allocation1080_spill] sm:$0xff]  ;;  %v15424_v37 = vld [vmem:[#allocation1081_spill] sm:$0xff]  ;;  %3946 = vst.msk [vmem:[%s5055_s15 + $0x2358] sm:$0x3f] %vm2815_vm1, %v2600_v52 }
 0x566   : > { %v2606_v48 = vmax.f32 %v15423_v28, 0.0  ;;  %v2607_v29 = vmax.f32 %v15424_v37, 0.0  ;;  %3947 = vst.msk [vmem:[%s5055_s15 + $0x2360] sm:$0xff] %vm2813_vm0, %v2601_v61  ;;  %3949 = vst.msk [vmem:[%s5055_s15 + $0x2370] sm:$0xff] %vm2813_vm0, %v2603_v54  ;;  %v15425_v49 = vld [vmem:[#allocation1082_spill] sm:$0xff]  ;;  %v15426_v34 = vld [vmem:[#allocation1083_spill] sm:$0xff] }
 0x567   : > { %3948 = vst.msk [vmem:[%s5055_s15 + $0x2368] sm:$0x3f] %vm2815_vm1, %v2602_v59  ;;  %v2608_v40 = vmax.f32 %v15425_v49, 0.0  ;;  %v2609_v56 = vmax.f32 %v15426_v34, 0.0  ;;  %v15427_v50 = vld [vmem:[#allocation1084_spill] sm:$0xff]  ;;  %v15428_v55 = vld [vmem:[#allocation1085_spill] sm:$0xff] }
 0x568   : > { %v2610_v35 = vmax.f32 %v15427_v50, 0.0  ;;  %v2611_v36 = vmax.f32 %v15428_v55, 0.0  ;;  %3950 = vst.msk [vmem:[%s5055_s15 + $0x2378] sm:$0x3f] %vm2815_vm1, %v2604_v26  ;;  %3952 = vst.msk [vmem:[%s5055_s15 + $0x2388] sm:$0x3f] %vm2815_vm1, %v2606_v48 }
 0x569   : > { %3951 = vst.msk [vmem:[%s5055_s15 + $0x2380] sm:$0xff] %vm2813_vm0, %v2605_v27  ;;  %3953 = vst.msk [vmem:[%s5055_s15 + $0x2390] sm:$0xff] %vm2813_vm0, %v2607_v29  ;;  %v15429_v0 = vld [vmem:[#allocation1086_spill] sm:$0xff]  ;;  %v15430_v24 = vld [vmem:[#allocation1087_spill] sm:$0xff] }
 0x56a   : > { %v2612_v1 = vmax.f32 %v15429_v0, 0.0  ;;  %v2613_v41 = vmax.f32 %v15430_v24, 0.0  ;;  %v15431_v2 = vld [vmem:[#allocation1088_spill] sm:$0xff]  ;;  %v15432_v4 = vld [vmem:[#allocation1089_spill] sm:$0xff]  ;;  %3954 = vst.msk [vmem:[%s5055_s15 + $0x2398] sm:$0x3f] %vm2815_vm1, %v2608_v40 }
 0x56b   : > { %v2614_v3 = vmax.f32 %v15431_v2, 0.0  ;;  %v2615_v5 = vmax.f32 %v15432_v4, 0.0  ;;  %3955 = vst.msk [vmem:[%s5055_s15 + $0x23a0] sm:$0xff] %vm2813_vm0, %v2609_v56  ;;  %3957 = vst.msk [vmem:[%s5055_s15 + $0x23b0] sm:$0xff] %vm2813_vm0, %v2611_v36  ;;  %v15433_v6 = vld [vmem:[#allocation1090_spill] sm:$0xff]  ;;  %v15434_v8 = vld [vmem:[#allocation1091_spill] sm:$0xff] }
 0x56c   : > { %3956 = vst.msk [vmem:[%s5055_s15 + $0x23a8] sm:$0x3f] %vm2815_vm1, %v2610_v35  ;;  %v2616_v7 = vmax.f32 %v15433_v6, 0.0  ;;  %v2617_v9 = vmax.f32 %v15434_v8, 0.0  ;;  %v15435_v10 = vld [vmem:[#allocation1092_spill] sm:$0xff]  ;;  %v15436_v12 = vld [vmem:[#allocation1093_spill] sm:$0xff] }
 0x56d   : > { %v2618_v11 = vmax.f32 %v15435_v10, 0.0  ;;  %v2619_v13 = vmax.f32 %v15436_v12, 0.0  ;;  %3958 = vst.msk [vmem:[%s5055_s15 + $0x23b8] sm:$0x3f] %vm2815_vm1, %v2612_v1  ;;  %3960 = vst.msk [vmem:[%s5055_s15 + $0x23c8] sm:$0x3f] %vm2815_vm1, %v2614_v3 }
 0x56e   : > { %3959 = vst.msk [vmem:[%s5055_s15 + $0x23c0] sm:$0xff] %vm2813_vm0, %v2613_v41  ;;  %3961 = vst.msk [vmem:[%s5055_s15 + $0x23d0] sm:$0xff] %vm2813_vm0, %v2615_v5  ;;  %v15437_v14 = vld [vmem:[#allocation1094_spill] sm:$0xff]  ;;  %v15438_v16 = vld [vmem:[#allocation1095_spill] sm:$0xff] }
 0x56f   : > { %v2620_v15 = vmax.f32 %v15437_v14, 0.0  ;;  %v2621_v17 = vmax.f32 %v15438_v16, 0.0  ;;  %v15439_v47 = vld [vmem:[#allocation1096_spill] sm:$0xff]  ;;  %v15440_v18 = vld [vmem:[#allocation1097_spill] sm:$0xff]  ;;  %3962 = vst.msk [vmem:[%s5055_s15 + $0x23d8] sm:$0x3f] %vm2815_vm1, %v2616_v7 }
 0x570   : > { %v2622_v46 = vmax.f32 %v15439_v47, 0.0  ;;  %v2623_v19 = vmax.f32 %v15440_v18, 0.0  ;;  %3963 = vst.msk [vmem:[%s5055_s15 + $0x23e0] sm:$0xff] %vm2813_vm0, %v2617_v9  ;;  %3965 = vst.msk [vmem:[%s5055_s15 + $0x23f0] sm:$0xff] %vm2813_vm0, %v2619_v13  ;;  %v15441_v39 = vld [vmem:[#allocation1098_spill] sm:$0xff]  ;;  %v15442_v33 = vld [vmem:[#allocation1099_spill] sm:$0xff] }
 0x571   : > { %3964 = vst.msk [vmem:[%s5055_s15 + $0x23e8] sm:$0x3f] %vm2815_vm1, %v2618_v11  ;;  %v2624_v38 = vmax.f32 %v15441_v39, 0.0  ;;  %v2625_v20 = vmax.f32 %v15442_v33, 0.0  ;;  %v15443_v32 = vld [vmem:[#allocation1100_spill] sm:$0xff]  ;;  %v15444_v30 = vld [vmem:[#allocation1101_spill] sm:$0xff] }
 0x572   : > { %v2626_v31 = vmax.f32 %v15443_v32, 0.0  ;;  %v2627_v25 = vmax.f32 %v15444_v30, 0.0  ;;  %3966 = vst.msk [vmem:[%s5055_s15 + $0x23f8] sm:$0x3f] %vm2815_vm1, %v2620_v15  ;;  %3968 = vst.msk [vmem:[%s5055_s15 + $0x2408] sm:$0x3f] %vm2815_vm1, %v2622_v46 }
 0x573   : > { %3967 = vst.msk [vmem:[%s5055_s15 + $0x2400] sm:$0xff] %vm2813_vm0, %v2621_v17  ;;  %3969 = vst.msk [vmem:[%s5055_s15 + $0x2410] sm:$0xff] %vm2813_vm0, %v2623_v19  ;;  %v15445_v21 = vld [vmem:[#allocation1102_spill] sm:$0xff]  ;;  %v15446_v22 = vld [vmem:[#allocation1103_spill] sm:$0xff] }
 0x574   : > { %v2628_v23 = vmax.f32 %v15445_v21, 0.0  ;;  %v2629_v45 = vmax.f32 %v15446_v22, 0.0  ;;  %v15447_v44 = vld [vmem:[#allocation1104_spill] sm:$0xff]  ;;  %v15448_v63 = vld [vmem:[#allocation1105_spill] sm:$0xff]  ;;  %3970 = vst.msk [vmem:[%s5055_s15 + $0x2418] sm:$0x3f] %vm2815_vm1, %v2624_v38 }
 0x575   : > { %v2630_v43 = vmax.f32 %v15447_v44, 0.0  ;;  %v2631_v53 = vmax.f32 %v15448_v63, 0.0  ;;  %3971 = vst.msk [vmem:[%s5055_s15 + $0x2420] sm:$0xff] %vm2813_vm0, %v2625_v20  ;;  %3973 = vst.msk [vmem:[%s5055_s15 + $0x2430] sm:$0xff] %vm2813_vm0, %v2627_v25  ;;  %v15449_v52 = vld [vmem:[#allocation1106_spill] sm:$0xff]  ;;  %v15450_v61 = vld [vmem:[#allocation1107_spill] sm:$0xff] }
 0x576   : > { %3972 = vst.msk [vmem:[%s5055_s15 + $0x2428] sm:$0x3f] %vm2815_vm1, %v2626_v31  ;;  %v2632_v51 = vmax.f32 %v15449_v52, 0.0  ;;  %v2633_v60 = vmax.f32 %v15450_v61, 0.0  ;;  %v15451_v59 = vld [vmem:[#allocation1108_spill] sm:$0xff]  ;;  %v15452_v54 = vld [vmem:[#allocation1109_spill] sm:$0xff] }
 0x577   : > { %v2634_v58 = vmax.f32 %v15451_v59, 0.0  ;;  %v2635_v57 = vmax.f32 %v15452_v54, 0.0  ;;  %3974 = vst.msk [vmem:[%s5055_s15 + $0x2438] sm:$0x3f] %vm2815_vm1, %v2628_v23  ;;  %3976 = vst.msk [vmem:[%s5055_s15 + $0x2448] sm:$0x3f] %vm2815_vm1, %v2630_v43 }
 0x578   : > { %3975 = vst.msk [vmem:[%s5055_s15 + $0x2440] sm:$0xff] %vm2813_vm0, %v2629_v45  ;;  %3977 = vst.msk [vmem:[%s5055_s15 + $0x2450] sm:$0xff] %vm2813_vm0, %v2631_v53  ;;  %v15453_v26 = vld [vmem:[#allocation1110_spill] sm:$0xff]  ;;  %v15454_v27 = vld [vmem:[#allocation1111_spill] sm:$0xff] }
 0x579   : > { %v2636_v42 = vmax.f32 %v15453_v26, 0.0  ;;  %v2637_v28 = vmax.f32 %v15454_v27, 0.0  ;;  %v15455_v48 = vld [vmem:[#allocation1112_spill] sm:$0xff]  ;;  %v15456_v29 = vld [vmem:[#allocation1113_spill] sm:$0xff]  ;;  %3978 = vst.msk [vmem:[%s5055_s15 + $0x2458] sm:$0x3f] %vm2815_vm1, %v2632_v51 }
 0x57a   : > { %v2638_v37 = vmax.f32 %v15455_v48, 0.0  ;;  %v2639_v49 = vmax.f32 %v15456_v29, 0.0  ;;  %3979 = vst.msk [vmem:[%s5055_s15 + $0x2460] sm:$0xff] %vm2813_vm0, %v2633_v60  ;;  %3981 = vst.msk [vmem:[%s5055_s15 + $0x2470] sm:$0xff] %vm2813_vm0, %v2635_v57  ;;  %v15457_v40 = vld [vmem:[#allocation1114_spill] sm:$0xff]  ;;  %v15458_v56 = vld [vmem:[#allocation1115_spill] sm:$0xff] }
 0x57b   : > { %3980 = vst.msk [vmem:[%s5055_s15 + $0x2468] sm:$0x3f] %vm2815_vm1, %v2634_v58  ;;  %v2640_v34 = vmax.f32 %v15457_v40, 0.0  ;;  %v2641_v50 = vmax.f32 %v15458_v56, 0.0  ;;  %v15459_v35 = vld [vmem:[#allocation1116_spill] sm:$0xff]  ;;  %v15460_v36 = vld [vmem:[#allocation1117_spill] sm:$0xff] }
 0x57c   : > { %v2642_v55 = vmax.f32 %v15459_v35, 0.0  ;;  %v2643_v0 = vmax.f32 %v15460_v36, 0.0  ;;  %3982 = vst.msk [vmem:[%s5055_s15 + $0x2478] sm:$0x3f] %vm2815_vm1, %v2636_v42  ;;  %3984 = vst.msk [vmem:[%s5055_s15 + $0x2488] sm:$0x3f] %vm2815_vm1, %v2638_v37 }
 0x57d   : > { %3983 = vst.msk [vmem:[%s5055_s15 + $0x2480] sm:$0xff] %vm2813_vm0, %v2637_v28  ;;  %3985 = vst.msk [vmem:[%s5055_s15 + $0x2490] sm:$0xff] %vm2813_vm0, %v2639_v49  ;;  %v15461_v1 = vld [vmem:[#allocation1118_spill] sm:$0xff]  ;;  %v15462_v41 = vld [vmem:[#allocation1119_spill] sm:$0xff] }
 0x57e   : > { %v2644_v24 = vmax.f32 %v15461_v1, 0.0  ;;  %v2645_v2 = vmax.f32 %v15462_v41, 0.0  ;;  %v15463_v3 = vld [vmem:[#allocation1120_spill] sm:$0xff]  ;;  %v15464_v5 = vld [vmem:[#allocation1121_spill] sm:$0xff]  ;;  %3986 = vst.msk [vmem:[%s5055_s15 + $0x2498] sm:$0x3f] %vm2815_vm1, %v2640_v34 }
 0x57f   : > { %v2646_v4 = vmax.f32 %v15463_v3, 0.0  ;;  %v2647_v6 = vmax.f32 %v15464_v5, 0.0  ;;  %3987 = vst.msk [vmem:[%s5055_s15 + $0x24a0] sm:$0xff] %vm2813_vm0, %v2641_v50  ;;  %3989 = vst.msk [vmem:[%s5055_s15 + $0x24b0] sm:$0xff] %vm2813_vm0, %v2643_v0  ;;  %v15465_v7 = vld [vmem:[#allocation1122_spill] sm:$0xff]  ;;  %v15466_v9 = vld [vmem:[#allocation1123_spill] sm:$0xff] }
 0x580   : > { %3988 = vst.msk [vmem:[%s5055_s15 + $0x24a8] sm:$0x3f] %vm2815_vm1, %v2642_v55  ;;  %v2648_v8 = vmax.f32 %v15465_v7, 0.0  ;;  %v2649_v10 = vmax.f32 %v15466_v9, 0.0  ;;  %v15467_v11 = vld [vmem:[#allocation1124_spill] sm:$0xff]  ;;  %v15468_v13 = vld [vmem:[#allocation1125_spill] sm:$0xff] }
 0x581   : > { %v2650_v12 = vmax.f32 %v15467_v11, 0.0  ;;  %v2651_v14 = vmax.f32 %v15468_v13, 0.0  ;;  %3990 = vst.msk [vmem:[%s5055_s15 + $0x24b8] sm:$0x3f] %vm2815_vm1, %v2644_v24  ;;  %3992 = vst.msk [vmem:[%s5055_s15 + $0x24c8] sm:$0x3f] %vm2815_vm1, %v2646_v4 }
 0x582   : > { %3991 = vst.msk [vmem:[%s5055_s15 + $0x24c0] sm:$0xff] %vm2813_vm0, %v2645_v2  ;;  %3993 = vst.msk [vmem:[%s5055_s15 + $0x24d0] sm:$0xff] %vm2813_vm0, %v2647_v6  ;;  %v15469_v15 = vld [vmem:[#allocation1126_spill] sm:$0xff]  ;;  %v15470_v17 = vld [vmem:[#allocation1127_spill] sm:$0xff] }
 0x583   : > { %v2652_v16 = vmax.f32 %v15469_v15, 0.0  ;;  %v2653_v47 = vmax.f32 %v15470_v17, 0.0  ;;  %v15471_v46 = vld [vmem:[#allocation1128_spill] sm:$0xff]  ;;  %v15472_v19 = vld [vmem:[#allocation1129_spill] sm:$0xff]  ;;  %3994 = vst.msk [vmem:[%s5055_s15 + $0x24d8] sm:$0x3f] %vm2815_vm1, %v2648_v8 }
 0x584   : > { %v2654_v18 = vmax.f32 %v15471_v46, 0.0  ;;  %v2655_v39 = vmax.f32 %v15472_v19, 0.0  ;;  %3995 = vst.msk [vmem:[%s5055_s15 + $0x24e0] sm:$0xff] %vm2813_vm0, %v2649_v10  ;;  %3997 = vst.msk [vmem:[%s5055_s15 + $0x24f0] sm:$0xff] %vm2813_vm0, %v2651_v14  ;;  %v15473_v38 = vld [vmem:[#allocation1130_spill] sm:$0xff]  ;;  %v15474_v20 = vld [vmem:[#allocation1131_spill] sm:$0xff] }
 0x585   : > { %3996 = vst.msk [vmem:[%s5055_s15 + $0x24e8] sm:$0x3f] %vm2815_vm1, %v2650_v12  ;;  %v2656_v33 = vmax.f32 %v15473_v38, 0.0  ;;  %v2657_v32 = vmax.f32 %v15474_v20, 0.0  ;;  %v15475_v31 = vld [vmem:[#allocation1132_spill] sm:$0xff]  ;;  %v15476_v25 = vld [vmem:[#allocation1133_spill] sm:$0xff] }
 0x586   : > { %v2658_v30 = vmax.f32 %v15475_v31, 0.0  ;;  %v2659_v21 = vmax.f32 %v15476_v25, 0.0  ;;  %3998 = vst.msk [vmem:[%s5055_s15 + $0x24f8] sm:$0x3f] %vm2815_vm1, %v2652_v16  ;;  %4000 = vst.msk [vmem:[%s5055_s15 + $0x2508] sm:$0x3f] %vm2815_vm1, %v2654_v18 }
 0x587   : > { %3999 = vst.msk [vmem:[%s5055_s15 + $0x2500] sm:$0xff] %vm2813_vm0, %v2653_v47  ;;  %4001 = vst.msk [vmem:[%s5055_s15 + $0x2510] sm:$0xff] %vm2813_vm0, %v2655_v39  ;;  %v15477_v23 = vld [vmem:[#allocation1134_spill] sm:$0xff]  ;;  %v15478_v45 = vld [vmem:[#allocation1135_spill] sm:$0xff] }
 0x588   : > { %v2660_v22 = vmax.f32 %v15477_v23, 0.0  ;;  %v2661_v44 = vmax.f32 %v15478_v45, 0.0  ;;  %v15479_v43 = vld [vmem:[#allocation1136_spill] sm:$0xff]  ;;  %v15480_v53 = vld [vmem:[#allocation1137_spill] sm:$0xff]  ;;  %4002 = vst.msk [vmem:[%s5055_s15 + $0x2518] sm:$0x3f] %vm2815_vm1, %v2656_v33 }
 0x589   : > { %v2662_v63 = vmax.f32 %v15479_v43, 0.0  ;;  %v2663_v52 = vmax.f32 %v15480_v53, 0.0  ;;  %4003 = vst.msk [vmem:[%s5055_s15 + $0x2520] sm:$0xff] %vm2813_vm0, %v2657_v32  ;;  %4005 = vst.msk [vmem:[%s5055_s15 + $0x2530] sm:$0xff] %vm2813_vm0, %v2659_v21  ;;  %v15481_v51 = vld [vmem:[#allocation1138_spill] sm:$0xff]  ;;  %v15482_v60 = vld [vmem:[#allocation1139_spill] sm:$0xff] }
 0x58a   : > { %4004 = vst.msk [vmem:[%s5055_s15 + $0x2528] sm:$0x3f] %vm2815_vm1, %v2658_v30  ;;  %v2664_v61 = vmax.f32 %v15481_v51, 0.0  ;;  %v2665_v59 = vmax.f32 %v15482_v60, 0.0  ;;  %v15483_v58 = vld [vmem:[#allocation1140_spill] sm:$0xff]  ;;  %v15484_v57 = vld [vmem:[#allocation1141_spill] sm:$0xff] }
 0x58b   : > { %v2666_v54 = vmax.f32 %v15483_v58, 0.0  ;;  %v2667_v26 = vmax.f32 %v15484_v57, 0.0  ;;  %4006 = vst.msk [vmem:[%s5055_s15 + $0x2538] sm:$0x3f] %vm2815_vm1, %v2660_v22  ;;  %4008 = vst.msk [vmem:[%s5055_s15 + $0x2548] sm:$0x3f] %vm2815_vm1, %v2662_v63 }
 0x58c   : > { %4007 = vst.msk [vmem:[%s5055_s15 + $0x2540] sm:$0xff] %vm2813_vm0, %v2661_v44  ;;  %4009 = vst.msk [vmem:[%s5055_s15 + $0x2550] sm:$0xff] %vm2813_vm0, %v2663_v52  ;;  %v15485_v42 = vld [vmem:[#allocation1142_spill] sm:$0xff]  ;;  %v15486_v28 = vld [vmem:[#allocation1143_spill] sm:$0xff] }
 0x58d   : > { %v2668_v27 = vmax.f32 %v15485_v42, 0.0  ;;  %v2669_v48 = vmax.f32 %v15486_v28, 0.0  ;;  %v15487_v37 = vld [vmem:[#allocation1144_spill] sm:$0xff]  ;;  %v15488_v49 = vld [vmem:[#allocation1145_spill] sm:$0xff]  ;;  %4010 = vst.msk [vmem:[%s5055_s15 + $0x2558] sm:$0x3f] %vm2815_vm1, %v2664_v61 }
 0x58e   : > { %v2670_v29 = vmax.f32 %v15487_v37, 0.0  ;;  %v2671_v40 = vmax.f32 %v15488_v49, 0.0  ;;  %4011 = vst.msk [vmem:[%s5055_s15 + $0x2560] sm:$0xff] %vm2813_vm0, %v2665_v59  ;;  %4013 = vst.msk [vmem:[%s5055_s15 + $0x2570] sm:$0xff] %vm2813_vm0, %v2667_v26  ;;  %v15489_v34 = vld [vmem:[#allocation1146_spill] sm:$0xff]  ;;  %v15490_v50 = vld [vmem:[#allocation1147_spill] sm:$0xff] }
 0x58f   : > { %4012 = vst.msk [vmem:[%s5055_s15 + $0x2568] sm:$0x3f] %vm2815_vm1, %v2666_v54  ;;  %v2672_v56 = vmax.f32 %v15489_v34, 0.0  ;;  %v2673_v35 = vmax.f32 %v15490_v50, 0.0  ;;  %v15491_v55 = vld [vmem:[#allocation1148_spill] sm:$0xff]  ;;  %v15492_v0 = vld [vmem:[#allocation1149_spill] sm:$0xff] }
 0x590   : > { %v2674_v36 = vmax.f32 %v15491_v55, 0.0  ;;  %v2675_v1 = vmax.f32 %v15492_v0, 0.0  ;;  %4014 = vst.msk [vmem:[%s5055_s15 + $0x2578] sm:$0x3f] %vm2815_vm1, %v2668_v27  ;;  %4016 = vst.msk [vmem:[%s5055_s15 + $0x2588] sm:$0x3f] %vm2815_vm1, %v2670_v29 }
 0x591   : > { %4015 = vst.msk [vmem:[%s5055_s15 + $0x2580] sm:$0xff] %vm2813_vm0, %v2669_v48  ;;  %4017 = vst.msk [vmem:[%s5055_s15 + $0x2590] sm:$0xff] %vm2813_vm0, %v2671_v40  ;;  %v15493_v24 = vld [vmem:[#allocation1150_spill] sm:$0xff]  ;;  %v15494_v2 = vld [vmem:[#allocation1151_spill] sm:$0xff] }
 0x592   : > { %v2676_v41 = vmax.f32 %v15493_v24, 0.0  ;;  %v2677_v3 = vmax.f32 %v15494_v2, 0.0  ;;  %v15495_v4 = vld [vmem:[#allocation1152_spill] sm:$0xff]  ;;  %v15496_v6 = vld [vmem:[#allocation1153_spill] sm:$0xff]  ;;  %4018 = vst.msk [vmem:[%s5055_s15 + $0x2598] sm:$0x3f] %vm2815_vm1, %v2672_v56 }
 0x593   : > { %v2678_v5 = vmax.f32 %v15495_v4, 0.0  ;;  %v2679_v7 = vmax.f32 %v15496_v6, 0.0  ;;  %4019 = vst.msk [vmem:[%s5055_s15 + $0x25a0] sm:$0xff] %vm2813_vm0, %v2673_v35  ;;  %4021 = vst.msk [vmem:[%s5055_s15 + $0x25b0] sm:$0xff] %vm2813_vm0, %v2675_v1  ;;  %v15497_v8 = vld [vmem:[#allocation1154_spill] sm:$0xff]  ;;  %v15498_v10 = vld [vmem:[#allocation1155_spill] sm:$0xff] }
 0x594   : > { %4020 = vst.msk [vmem:[%s5055_s15 + $0x25a8] sm:$0x3f] %vm2815_vm1, %v2674_v36  ;;  %v2680_v9 = vmax.f32 %v15497_v8, 0.0  ;;  %v2681_v11 = vmax.f32 %v15498_v10, 0.0  ;;  %v15499_v12 = vld [vmem:[#allocation1156_spill] sm:$0xff]  ;;  %v15500_v14 = vld [vmem:[#allocation1157_spill] sm:$0xff] }
 0x595   : > { %v2682_v13 = vmax.f32 %v15499_v12, 0.0  ;;  %v2683_v15 = vmax.f32 %v15500_v14, 0.0  ;;  %4022 = vst.msk [vmem:[%s5055_s15 + $0x25b8] sm:$0x3f] %vm2815_vm1, %v2676_v41  ;;  %4024 = vst.msk [vmem:[%s5055_s15 + $0x25c8] sm:$0x3f] %vm2815_vm1, %v2678_v5 }
 0x596   : > { %4023 = vst.msk [vmem:[%s5055_s15 + $0x25c0] sm:$0xff] %vm2813_vm0, %v2677_v3  ;;  %4025 = vst.msk [vmem:[%s5055_s15 + $0x25d0] sm:$0xff] %vm2813_vm0, %v2679_v7  ;;  %v15501_v16 = vld [vmem:[#allocation1158_spill] sm:$0xff]  ;;  %v15502_v47 = vld [vmem:[#allocation1159_spill] sm:$0xff] }
 0x597   : > { %v2684_v17 = vmax.f32 %v15501_v16, 0.0  ;;  %v2685_v46 = vmax.f32 %v15502_v47, 0.0  ;;  %v15503_v18 = vld [vmem:[#allocation1160_spill] sm:$0xff]  ;;  %v15504_v39 = vld [vmem:[#allocation1161_spill] sm:$0xff]  ;;  %4026 = vst.msk [vmem:[%s5055_s15 + $0x25d8] sm:$0x3f] %vm2815_vm1, %v2680_v9 }
 0x598   : > { %v2686_v19 = vmax.f32 %v15503_v18, 0.0  ;;  %v2687_v38 = vmax.f32 %v15504_v39, 0.0  ;;  %4027 = vst.msk [vmem:[%s5055_s15 + $0x25e0] sm:$0xff] %vm2813_vm0, %v2681_v11  ;;  %4029 = vst.msk [vmem:[%s5055_s15 + $0x25f0] sm:$0xff] %vm2813_vm0, %v2683_v15  ;;  %v15505_v33 = vld [vmem:[#allocation1162_spill] sm:$0xff]  ;;  %v15506_v32 = vld [vmem:[#allocation1163_spill] sm:$0xff] }
 0x599   : > { %4028 = vst.msk [vmem:[%s5055_s15 + $0x25e8] sm:$0x3f] %vm2815_vm1, %v2682_v13  ;;  %v2688_v20 = vmax.f32 %v15505_v33, 0.0  ;;  %v2689_v31 = vmax.f32 %v15506_v32, 0.0  ;;  %v15507_v30 = vld [vmem:[#allocation1164_spill] sm:$0xff]  ;;  %v15508_v21 = vld [vmem:[#allocation1165_spill] sm:$0xff] }
 0x59a   : > { %v2690_v25 = vmax.f32 %v15507_v30, 0.0  ;;  %v2691_v23 = vmax.f32 %v15508_v21, 0.0  ;;  %4030 = vst.msk [vmem:[%s5055_s15 + $0x25f8] sm:$0x3f] %vm2815_vm1, %v2684_v17  ;;  %4032 = vst.msk [vmem:[%s5055_s15 + $0x2608] sm:$0x3f] %vm2815_vm1, %v2686_v19 }
 0x59b   : > { %4031 = vst.msk [vmem:[%s5055_s15 + $0x2600] sm:$0xff] %vm2813_vm0, %v2685_v46  ;;  %4033 = vst.msk [vmem:[%s5055_s15 + $0x2610] sm:$0xff] %vm2813_vm0, %v2687_v38  ;;  %v15509_v22 = vld [vmem:[#allocation1166_spill] sm:$0xff]  ;;  %v15510_v44 = vld [vmem:[#allocation1167_spill] sm:$0xff] }
 0x59c   : > { %v2692_v45 = vmax.f32 %v15509_v22, 0.0  ;;  %v2693_v43 = vmax.f32 %v15510_v44, 0.0  ;;  %v15511_v63 = vld [vmem:[#allocation1168_spill] sm:$0xff]  ;;  %v15512_v52 = vld [vmem:[#allocation1169_spill] sm:$0xff]  ;;  %4034 = vst.msk [vmem:[%s5055_s15 + $0x2618] sm:$0x3f] %vm2815_vm1, %v2688_v20 }
 0x59d   : > { %v2694_v53 = vmax.f32 %v15511_v63, 0.0  ;;  %v2695_v51 = vmax.f32 %v15512_v52, 0.0  ;;  %4035 = vst.msk [vmem:[%s5055_s15 + $0x2620] sm:$0xff] %vm2813_vm0, %v2689_v31  ;;  %4037 = vst.msk [vmem:[%s5055_s15 + $0x2630] sm:$0xff] %vm2813_vm0, %v2691_v23  ;;  %v15513_v61 = vld [vmem:[#allocation1170_spill] sm:$0xff]  ;;  %v15514_v59 = vld [vmem:[#allocation1171_spill] sm:$0xff] }
 0x59e   : > { %4036 = vst.msk [vmem:[%s5055_s15 + $0x2628] sm:$0x3f] %vm2815_vm1, %v2690_v25  ;;  %v2696_v60 = vmax.f32 %v15513_v61, 0.0  ;;  %v2697_v58 = vmax.f32 %v15514_v59, 0.0  ;;  %v15515_v54 = vld [vmem:[#allocation1172_spill] sm:$0xff]  ;;  %v15516_v26 = vld [vmem:[#allocation1173_spill] sm:$0xff] }
 0x59f   : > { %v2698_v57 = vmax.f32 %v15515_v54, 0.0  ;;  %v2699_v42 = vmax.f32 %v15516_v26, 0.0  ;;  %4038 = vst.msk [vmem:[%s5055_s15 + $0x2638] sm:$0x3f] %vm2815_vm1, %v2692_v45  ;;  %4040 = vst.msk [vmem:[%s5055_s15 + $0x2648] sm:$0x3f] %vm2815_vm1, %v2694_v53 }
 0x5a0   : > { %4039 = vst.msk [vmem:[%s5055_s15 + $0x2640] sm:$0xff] %vm2813_vm0, %v2693_v43  ;;  %4041 = vst.msk [vmem:[%s5055_s15 + $0x2650] sm:$0xff] %vm2813_vm0, %v2695_v51  ;;  %v15517_v27 = vld [vmem:[#allocation1174_spill] sm:$0xff]  ;;  %v15518_v48 = vld [vmem:[#allocation1175_spill] sm:$0xff] }
 0x5a1   : > { %v2700_v28 = vmax.f32 %v15517_v27, 0.0  ;;  %v2701_v37 = vmax.f32 %v15518_v48, 0.0  ;;  %v15519_v29 = vld [vmem:[#allocation1176_spill] sm:$0xff]  ;;  %v15520_v40 = vld [vmem:[#allocation1177_spill] sm:$0xff]  ;;  %4042 = vst.msk [vmem:[%s5055_s15 + $0x2658] sm:$0x3f] %vm2815_vm1, %v2696_v60 }
 0x5a2   : > { %v2702_v49 = vmax.f32 %v15519_v29, 0.0  ;;  %v2703_v34 = vmax.f32 %v15520_v40, 0.0  ;;  %4043 = vst.msk [vmem:[%s5055_s15 + $0x2660] sm:$0xff] %vm2813_vm0, %v2697_v58  ;;  %4045 = vst.msk [vmem:[%s5055_s15 + $0x2670] sm:$0xff] %vm2813_vm0, %v2699_v42  ;;  %v15521_v56 = vld [vmem:[#allocation1178_spill] sm:$0xff]  ;;  %v15522_v35 = vld [vmem:[#allocation1179_spill] sm:$0xff] }
 0x5a3   : > { %4044 = vst.msk [vmem:[%s5055_s15 + $0x2668] sm:$0x3f] %vm2815_vm1, %v2698_v57  ;;  %v2704_v50 = vmax.f32 %v15521_v56, 0.0  ;;  %v2705_v55 = vmax.f32 %v15522_v35, 0.0  ;;  %v15523_v36 = vld [vmem:[#allocation1180_spill] sm:$0xff]  ;;  %v15524_v1 = vld [vmem:[#allocation1181_spill] sm:$0xff] }
 0x5a4   : > { %v2706_v0 = vmax.f32 %v15523_v36, 0.0  ;;  %v2707_v24 = vmax.f32 %v15524_v1, 0.0  ;;  %4046 = vst.msk [vmem:[%s5055_s15 + $0x2678] sm:$0x3f] %vm2815_vm1, %v2700_v28  ;;  %4048 = vst.msk [vmem:[%s5055_s15 + $0x2688] sm:$0x3f] %vm2815_vm1, %v2702_v49 }
 0x5a5   : > { %4047 = vst.msk [vmem:[%s5055_s15 + $0x2680] sm:$0xff] %vm2813_vm0, %v2701_v37  ;;  %4049 = vst.msk [vmem:[%s5055_s15 + $0x2690] sm:$0xff] %vm2813_vm0, %v2703_v34  ;;  %v15525_v41 = vld [vmem:[#allocation1182_spill] sm:$0xff]  ;;  %v15526_v3 = vld [vmem:[#allocation1183_spill] sm:$0xff] }
 0x5a6   : > { %v2708_v2 = vmax.f32 %v15525_v41, 0.0  ;;  %v2709_v4 = vmax.f32 %v15526_v3, 0.0  ;;  %v15527_v5 = vld [vmem:[#allocation1184_spill] sm:$0xff]  ;;  %v15528_v7 = vld [vmem:[#allocation1185_spill] sm:$0xff]  ;;  %4050 = vst.msk [vmem:[%s5055_s15 + $0x2698] sm:$0x3f] %vm2815_vm1, %v2704_v50 }
 0x5a7   : > { %v2710_v6 = vmax.f32 %v15527_v5, 0.0  ;;  %v2711_v8 = vmax.f32 %v15528_v7, 0.0  ;;  %4051 = vst.msk [vmem:[%s5055_s15 + $0x26a0] sm:$0xff] %vm2813_vm0, %v2705_v55  ;;  %4053 = vst.msk [vmem:[%s5055_s15 + $0x26b0] sm:$0xff] %vm2813_vm0, %v2707_v24  ;;  %v15529_v9 = vld [vmem:[#allocation1186_spill] sm:$0xff]  ;;  %v15530_v11 = vld [vmem:[#allocation1187_spill] sm:$0xff] }
 0x5a8   : > { %4052 = vst.msk [vmem:[%s5055_s15 + $0x26a8] sm:$0x3f] %vm2815_vm1, %v2706_v0  ;;  %v2712_v10 = vmax.f32 %v15529_v9, 0.0  ;;  %v2713_v12 = vmax.f32 %v15530_v11, 0.0  ;;  %v15531_v13 = vld [vmem:[#allocation1188_spill] sm:$0xff]  ;;  %v15532_v15 = vld [vmem:[#allocation1189_spill] sm:$0xff] }
 0x5a9   : > { %v2714_v14 = vmax.f32 %v15531_v13, 0.0  ;;  %v2715_v16 = vmax.f32 %v15532_v15, 0.0  ;;  %4054 = vst.msk [vmem:[%s5055_s15 + $0x26b8] sm:$0x3f] %vm2815_vm1, %v2708_v2  ;;  %4056 = vst.msk [vmem:[%s5055_s15 + $0x26c8] sm:$0x3f] %vm2815_vm1, %v2710_v6 }
 0x5aa   : > { %4055 = vst.msk [vmem:[%s5055_s15 + $0x26c0] sm:$0xff] %vm2813_vm0, %v2709_v4  ;;  %4057 = vst.msk [vmem:[%s5055_s15 + $0x26d0] sm:$0xff] %vm2813_vm0, %v2711_v8  ;;  %v15533_v17 = vld [vmem:[#allocation1190_spill] sm:$0xff]  ;;  %v15534_v46 = vld [vmem:[#allocation1191_spill] sm:$0xff] }
 0x5ab   : > { %v2716_v47 = vmax.f32 %v15533_v17, 0.0  ;;  %v2717_v18 = vmax.f32 %v15534_v46, 0.0  ;;  %v15535_v19 = vld [vmem:[#allocation1192_spill] sm:$0xff]  ;;  %v15536_v38 = vld [vmem:[#allocation1193_spill] sm:$0xff]  ;;  %4058 = vst.msk [vmem:[%s5055_s15 + $0x26d8] sm:$0x3f] %vm2815_vm1, %v2712_v10 }
 0x5ac   : > { %v2718_v39 = vmax.f32 %v15535_v19, 0.0  ;;  %v2719_v33 = vmax.f32 %v15536_v38, 0.0  ;;  %4059 = vst.msk [vmem:[%s5055_s15 + $0x26e0] sm:$0xff] %vm2813_vm0, %v2713_v12  ;;  %4061 = vst.msk [vmem:[%s5055_s15 + $0x26f0] sm:$0xff] %vm2813_vm0, %v2715_v16  ;;  %v15537_v20 = vld [vmem:[#allocation1194_spill] sm:$0xff]  ;;  %v15538_v31 = vld [vmem:[#allocation1195_spill] sm:$0xff] }
 0x5ad   : > { %4060 = vst.msk [vmem:[%s5055_s15 + $0x26e8] sm:$0x3f] %vm2815_vm1, %v2714_v14  ;;  %v2720_v32 = vmax.f32 %v15537_v20, 0.0  ;;  %v2721_v30 = vmax.f32 %v15538_v31, 0.0  ;;  %v15539_v25 = vld [vmem:[#allocation1196_spill] sm:$0xff]  ;;  %v15540_v23 = vld [vmem:[#allocation1197_spill] sm:$0xff] }
 0x5ae   : > { %v2722_v21 = vmax.f32 %v15539_v25, 0.0  ;;  %v2723_v22 = vmax.f32 %v15540_v23, 0.0  ;;  %4062 = vst.msk [vmem:[%s5055_s15 + $0x26f8] sm:$0x3f] %vm2815_vm1, %v2716_v47  ;;  %4064 = vst.msk [vmem:[%s5055_s15 + $0x2708] sm:$0x3f] %vm2815_vm1, %v2718_v39 }
 0x5af   : > { %4063 = vst.msk [vmem:[%s5055_s15 + $0x2700] sm:$0xff] %vm2813_vm0, %v2717_v18  ;;  %4065 = vst.msk [vmem:[%s5055_s15 + $0x2710] sm:$0xff] %vm2813_vm0, %v2719_v33  ;;  %v15541_v45 = vld [vmem:[#allocation1198_spill] sm:$0xff]  ;;  %v15542_v43 = vld [vmem:[#allocation1199_spill] sm:$0xff] }
 0x5b0   : > { %v2724_v44 = vmax.f32 %v15541_v45, 0.0  ;;  %v2725_v63 = vmax.f32 %v15542_v43, 0.0  ;;  %v15543_v53 = vld [vmem:[#allocation1200_spill] sm:$0xff]  ;;  %v15544_v51 = vld [vmem:[#allocation1201_spill] sm:$0xff]  ;;  %4066 = vst.msk [vmem:[%s5055_s15 + $0x2718] sm:$0x3f] %vm2815_vm1, %v2720_v32 }
 0x5b1   : > { %v2726_v52 = vmax.f32 %v15543_v53, 0.0  ;;  %v2727_v61 = vmax.f32 %v15544_v51, 0.0  ;;  %4067 = vst.msk [vmem:[%s5055_s15 + $0x2720] sm:$0xff] %vm2813_vm0, %v2721_v30  ;;  %4069 = vst.msk [vmem:[%s5055_s15 + $0x2730] sm:$0xff] %vm2813_vm0, %v2723_v22  ;;  %v15545_v60 = vld [vmem:[#allocation1202_spill] sm:$0xff]  ;;  %v15546_v58 = vld [vmem:[#allocation1203_spill] sm:$0xff] }
 0x5b2   : > { %4068 = vst.msk [vmem:[%s5055_s15 + $0x2728] sm:$0x3f] %vm2815_vm1, %v2722_v21  ;;  %v2728_v59 = vmax.f32 %v15545_v60, 0.0  ;;  %v2729_v54 = vmax.f32 %v15546_v58, 0.0  ;;  %v15547_v57 = vld [vmem:[#allocation1204_spill] sm:$0xff]  ;;  %v15548_v42 = vld [vmem:[#allocation1205_spill] sm:$0xff] }
 0x5b3   : > { %v2730_v26 = vmax.f32 %v15547_v57, 0.0  ;;  %v2731_v27 = vmax.f32 %v15548_v42, 0.0  ;;  %4070 = vst.msk [vmem:[%s5055_s15 + $0x2738] sm:$0x3f] %vm2815_vm1, %v2724_v44  ;;  %4072 = vst.msk [vmem:[%s5055_s15 + $0x2748] sm:$0x3f] %vm2815_vm1, %v2726_v52 }
 0x5b4   : > { %4071 = vst.msk [vmem:[%s5055_s15 + $0x2740] sm:$0xff] %vm2813_vm0, %v2725_v63  ;;  %4073 = vst.msk [vmem:[%s5055_s15 + $0x2750] sm:$0xff] %vm2813_vm0, %v2727_v61  ;;  %v15549_v28 = vld [vmem:[#allocation1206_spill] sm:$0xff]  ;;  %v15550_v37 = vld [vmem:[#allocation1207_spill] sm:$0xff] }
 0x5b5   : > { %v2732_v48 = vmax.f32 %v15549_v28, 0.0  ;;  %v2733_v29 = vmax.f32 %v15550_v37, 0.0  ;;  %v15551_v49 = vld [vmem:[#allocation1208_spill] sm:$0xff]  ;;  %v15552_v34 = vld [vmem:[#allocation1209_spill] sm:$0xff]  ;;  %4074 = vst.msk [vmem:[%s5055_s15 + $0x2758] sm:$0x3f] %vm2815_vm1, %v2728_v59 }
 0x5b6   : > { %v2734_v40 = vmax.f32 %v15551_v49, 0.0  ;;  %v2735_v56 = vmax.f32 %v15552_v34, 0.0  ;;  %4075 = vst.msk [vmem:[%s5055_s15 + $0x2760] sm:$0xff] %vm2813_vm0, %v2729_v54  ;;  %4077 = vst.msk [vmem:[%s5055_s15 + $0x2770] sm:$0xff] %vm2813_vm0, %v2731_v27  ;;  %v15553_v50 = vld [vmem:[#allocation1210_spill] sm:$0xff]  ;;  %v15554_v55 = vld [vmem:[#allocation1211_spill] sm:$0xff] }
 0x5b7   : > { %4076 = vst.msk [vmem:[%s5055_s15 + $0x2768] sm:$0x3f] %vm2815_vm1, %v2730_v26  ;;  %v2736_v35 = vmax.f32 %v15553_v50, 0.0  ;;  %v2737_v36 = vmax.f32 %v15554_v55, 0.0  ;;  %v15555_v0 = vld [vmem:[#allocation1212_spill] sm:$0xff]  ;;  %v15556_v24 = vld [vmem:[#allocation1213_spill] sm:$0xff] }
 0x5b8   : > { %v2738_v1 = vmax.f32 %v15555_v0, 0.0  ;;  %v2739_v41 = vmax.f32 %v15556_v24, 0.0  ;;  %4078 = vst.msk [vmem:[%s5055_s15 + $0x2778] sm:$0x3f] %vm2815_vm1, %v2732_v48  ;;  %4080 = vst.msk [vmem:[%s5055_s15 + $0x2788] sm:$0x3f] %vm2815_vm1, %v2734_v40 }
 0x5b9   : > { %4079 = vst.msk [vmem:[%s5055_s15 + $0x2780] sm:$0xff] %vm2813_vm0, %v2733_v29  ;;  %4081 = vst.msk [vmem:[%s5055_s15 + $0x2790] sm:$0xff] %vm2813_vm0, %v2735_v56  ;;  %v15557_v2 = vld [vmem:[#allocation1214_spill] sm:$0xff]  ;;  %v15558_v4 = vld [vmem:[#allocation1215_spill] sm:$0xff] }
 0x5ba   : > { %v2740_v3 = vmax.f32 %v15557_v2, 0.0  ;;  %v2741_v5 = vmax.f32 %v15558_v4, 0.0  ;;  %v15559_v6 = vld [vmem:[#allocation1216_spill] sm:$0xff]  ;;  %v15560_v8 = vld [vmem:[#allocation1217_spill] sm:$0xff]  ;;  %4082 = vst.msk [vmem:[%s5055_s15 + $0x2798] sm:$0x3f] %vm2815_vm1, %v2736_v35 }
 0x5bb   : > { %v2742_v7 = vmax.f32 %v15559_v6, 0.0  ;;  %v2743_v9 = vmax.f32 %v15560_v8, 0.0  ;;  %4083 = vst.msk [vmem:[%s5055_s15 + $0x27a0] sm:$0xff] %vm2813_vm0, %v2737_v36  ;;  %4085 = vst.msk [vmem:[%s5055_s15 + $0x27b0] sm:$0xff] %vm2813_vm0, %v2739_v41  ;;  %v15561_v10 = vld [vmem:[#allocation1218_spill] sm:$0xff]  ;;  %v15562_v12 = vld [vmem:[#allocation1219_spill] sm:$0xff] }
 0x5bc   : > { %4084 = vst.msk [vmem:[%s5055_s15 + $0x27a8] sm:$0x3f] %vm2815_vm1, %v2738_v1  ;;  %v2744_v11 = vmax.f32 %v15561_v10, 0.0  ;;  %v2745_v13 = vmax.f32 %v15562_v12, 0.0  ;;  %v15563_v14 = vld [vmem:[#allocation1220_spill] sm:$0xff]  ;;  %v15564_v16 = vld [vmem:[#allocation1221_spill] sm:$0xff] }
 0x5bd   : > { %v2746_v15 = vmax.f32 %v15563_v14, 0.0  ;;  %v2747_v17 = vmax.f32 %v15564_v16, 0.0  ;;  %4086 = vst.msk [vmem:[%s5055_s15 + $0x27b8] sm:$0x3f] %vm2815_vm1, %v2740_v3  ;;  %4088 = vst.msk [vmem:[%s5055_s15 + $0x27c8] sm:$0x3f] %vm2815_vm1, %v2742_v7 }
 0x5be   : > { %4087 = vst.msk [vmem:[%s5055_s15 + $0x27c0] sm:$0xff] %vm2813_vm0, %v2741_v5  ;;  %4089 = vst.msk [vmem:[%s5055_s15 + $0x27d0] sm:$0xff] %vm2813_vm0, %v2743_v9  ;;  %v15565_v47 = vld [vmem:[#allocation1222_spill] sm:$0xff]  ;;  %v15566_v18 = vld [vmem:[#allocation1223_spill] sm:$0xff] }
 0x5bf   : > { %v2748_v46 = vmax.f32 %v15565_v47, 0.0  ;;  %v2749_v19 = vmax.f32 %v15566_v18, 0.0  ;;  %v15567_v39 = vld [vmem:[#allocation1224_spill] sm:$0xff]  ;;  %v15568_v33 = vld [vmem:[#allocation1225_spill] sm:$0xff]  ;;  %4090 = vst.msk [vmem:[%s5055_s15 + $0x27d8] sm:$0x3f] %vm2815_vm1, %v2744_v11 }
 0x5c0   : > { %v2750_v38 = vmax.f32 %v15567_v39, 0.0  ;;  %v2751_v20 = vmax.f32 %v15568_v33, 0.0  ;;  %4091 = vst.msk [vmem:[%s5055_s15 + $0x27e0] sm:$0xff] %vm2813_vm0, %v2745_v13  ;;  %4093 = vst.msk [vmem:[%s5055_s15 + $0x27f0] sm:$0xff] %vm2813_vm0, %v2747_v17  ;;  %v15569_v32 = vld [vmem:[#allocation1226_spill] sm:$0xff]  ;;  %v15570_v30 = vld [vmem:[#allocation1227_spill] sm:$0xff] }
 0x5c1   : > { %4092 = vst.msk [vmem:[%s5055_s15 + $0x27e8] sm:$0x3f] %vm2815_vm1, %v2746_v15  ;;  %v2752_v31 = vmax.f32 %v15569_v32, 0.0  ;;  %v2753_v25 = vmax.f32 %v15570_v30, 0.0  ;;  %v15571_v21 = vld [vmem:[#allocation1228_spill] sm:$0xff]  ;;  %v15572_v22 = vld [vmem:[#allocation1229_spill] sm:$0xff] }
 0x5c2   : > { %v2754_v23 = vmax.f32 %v15571_v21, 0.0  ;;  %v2755_v45 = vmax.f32 %v15572_v22, 0.0  ;;  %4094 = vst.msk [vmem:[%s5055_s15 + $0x27f8] sm:$0x3f] %vm2815_vm1, %v2748_v46  ;;  %4096 = vst.msk [vmem:[%s5055_s15 + $0x2808] sm:$0x3f] %vm2815_vm1, %v2750_v38 }
 0x5c3   : > { %4095 = vst.msk [vmem:[%s5055_s15 + $0x2800] sm:$0xff] %vm2813_vm0, %v2749_v19  ;;  %4097 = vst.msk [vmem:[%s5055_s15 + $0x2810] sm:$0xff] %vm2813_vm0, %v2751_v20  ;;  %v15573_v44 = vld [vmem:[#allocation1230_spill] sm:$0xff]  ;;  %v15574_v63 = vld [vmem:[#allocation1231_spill] sm:$0xff] }
 0x5c4   : > { %v2756_v43 = vmax.f32 %v15573_v44, 0.0  ;;  %v2757_v53 = vmax.f32 %v15574_v63, 0.0  ;;  %v15575_v52 = vld [vmem:[#allocation1232_spill] sm:$0xff]  ;;  %v15576_v61 = vld [vmem:[#allocation1233_spill] sm:$0xff]  ;;  %4098 = vst.msk [vmem:[%s5055_s15 + $0x2818] sm:$0x3f] %vm2815_vm1, %v2752_v31 }
 0x5c5   : > { %v2758_v51 = vmax.f32 %v15575_v52, 0.0  ;;  %v2759_v60 = vmax.f32 %v15576_v61, 0.0  ;;  %4099 = vst.msk [vmem:[%s5055_s15 + $0x2820] sm:$0xff] %vm2813_vm0, %v2753_v25  ;;  %4101 = vst.msk [vmem:[%s5055_s15 + $0x2830] sm:$0xff] %vm2813_vm0, %v2755_v45  ;;  %v15577_v59 = vld [vmem:[#allocation1234_spill] sm:$0xff]  ;;  %v15578_v54 = vld [vmem:[#allocation1235_spill] sm:$0xff] }
 0x5c6   : > { %4100 = vst.msk [vmem:[%s5055_s15 + $0x2828] sm:$0x3f] %vm2815_vm1, %v2754_v23  ;;  %v2760_v58 = vmax.f32 %v15577_v59, 0.0  ;;  %v2761_v57 = vmax.f32 %v15578_v54, 0.0  ;;  %v15579_v26 = vld [vmem:[#allocation1236_spill] sm:$0xff]  ;;  %v15580_v27 = vld [vmem:[#allocation1237_spill] sm:$0xff] }
 0x5c7   : > { %v2762_v42 = vmax.f32 %v15579_v26, 0.0  ;;  %v2763_v28 = vmax.f32 %v15580_v27, 0.0  ;;  %4102 = vst.msk [vmem:[%s5055_s15 + $0x2838] sm:$0x3f] %vm2815_vm1, %v2756_v43  ;;  %4104 = vst.msk [vmem:[%s5055_s15 + $0x2848] sm:$0x3f] %vm2815_vm1, %v2758_v51 }
 0x5c8   : > { %4103 = vst.msk [vmem:[%s5055_s15 + $0x2840] sm:$0xff] %vm2813_vm0, %v2757_v53  ;;  %4105 = vst.msk [vmem:[%s5055_s15 + $0x2850] sm:$0xff] %vm2813_vm0, %v2759_v60  ;;  %v15581_v48 = vld [vmem:[#allocation1238_spill] sm:$0xff]  ;;  %v15582_v29 = vld [vmem:[#allocation1239_spill] sm:$0xff] }
 0x5c9   : > { %v2764_v37 = vmax.f32 %v15581_v48, 0.0  ;;  %v2765_v49 = vmax.f32 %v15582_v29, 0.0  ;;  %v15583_v40 = vld [vmem:[#allocation1240_spill] sm:$0xff]  ;;  %v15584_v56 = vld [vmem:[#allocation1241_spill] sm:$0xff]  ;;  %4106 = vst.msk [vmem:[%s5055_s15 + $0x2858] sm:$0x3f] %vm2815_vm1, %v2760_v58 }
 0x5ca   : > { %v2766_v34 = vmax.f32 %v15583_v40, 0.0  ;;  %v2767_v50 = vmax.f32 %v15584_v56, 0.0  ;;  %4107 = vst.msk [vmem:[%s5055_s15 + $0x2860] sm:$0xff] %vm2813_vm0, %v2761_v57  ;;  %4109 = vst.msk [vmem:[%s5055_s15 + $0x2870] sm:$0xff] %vm2813_vm0, %v2763_v28  ;;  %v15585_v35 = vld [vmem:[#allocation1242_spill] sm:$0xff]  ;;  %v15586_v36 = vld [vmem:[#allocation1243_spill] sm:$0xff] }
 0x5cb   : > { %4108 = vst.msk [vmem:[%s5055_s15 + $0x2868] sm:$0x3f] %vm2815_vm1, %v2762_v42  ;;  %v2768_v55 = vmax.f32 %v15585_v35, 0.0  ;;  %v2769_v0 = vmax.f32 %v15586_v36, 0.0  ;;  %v15587_v1 = vld [vmem:[#allocation1244_spill] sm:$0xff]  ;;  %v15588_v41 = vld [vmem:[#allocation1245_spill] sm:$0xff] }
 0x5cc   : > { %v2770_v24 = vmax.f32 %v15587_v1, 0.0  ;;  %v2771_v2 = vmax.f32 %v15588_v41, 0.0  ;;  %4110 = vst.msk [vmem:[%s5055_s15 + $0x2878] sm:$0x3f] %vm2815_vm1, %v2764_v37  ;;  %4112 = vst.msk [vmem:[%s5055_s15 + $0x2888] sm:$0x3f] %vm2815_vm1, %v2766_v34 }
 0x5cd   : > { %4111 = vst.msk [vmem:[%s5055_s15 + $0x2880] sm:$0xff] %vm2813_vm0, %v2765_v49  ;;  %4113 = vst.msk [vmem:[%s5055_s15 + $0x2890] sm:$0xff] %vm2813_vm0, %v2767_v50  ;;  %v15589_v3 = vld [vmem:[#allocation1246_spill] sm:$0xff]  ;;  %v15590_v5 = vld [vmem:[#allocation1247_spill] sm:$0xff] }
 0x5ce   : > { %v2772_v4 = vmax.f32 %v15589_v3, 0.0  ;;  %v2773_v6 = vmax.f32 %v15590_v5, 0.0  ;;  %v15591_v7 = vld [vmem:[#allocation1248_spill] sm:$0xff]  ;;  %v15592_v9 = vld [vmem:[#allocation1249_spill] sm:$0xff]  ;;  %4114 = vst.msk [vmem:[%s5055_s15 + $0x2898] sm:$0x3f] %vm2815_vm1, %v2768_v55 }
 0x5cf   : > { %v2774_v8 = vmax.f32 %v15591_v7, 0.0  ;;  %v2775_v10 = vmax.f32 %v15592_v9, 0.0  ;;  %4115 = vst.msk [vmem:[%s5055_s15 + $0x28a0] sm:$0xff] %vm2813_vm0, %v2769_v0  ;;  %4117 = vst.msk [vmem:[%s5055_s15 + $0x28b0] sm:$0xff] %vm2813_vm0, %v2771_v2  ;;  %v15593_v11 = vld [vmem:[#allocation1250_spill] sm:$0xff]  ;;  %v15594_v13 = vld [vmem:[#allocation1251_spill] sm:$0xff] }
 0x5d0   : > { %4116 = vst.msk [vmem:[%s5055_s15 + $0x28a8] sm:$0x3f] %vm2815_vm1, %v2770_v24  ;;  %v2776_v12 = vmax.f32 %v15593_v11, 0.0  ;;  %v2777_v14 = vmax.f32 %v15594_v13, 0.0  ;;  %v15595_v15 = vld [vmem:[#allocation1252_spill] sm:$0xff]  ;;  %v15596_v17 = vld [vmem:[#allocation1253_spill] sm:$0xff] }
 0x5d1   : > { %v2778_v16 = vmax.f32 %v15595_v15, 0.0  ;;  %v2779_v47 = vmax.f32 %v15596_v17, 0.0  ;;  %4118 = vst.msk [vmem:[%s5055_s15 + $0x28b8] sm:$0x3f] %vm2815_vm1, %v2772_v4  ;;  %4120 = vst.msk [vmem:[%s5055_s15 + $0x28c8] sm:$0x3f] %vm2815_vm1, %v2774_v8 }
 0x5d2   : > { %4119 = vst.msk [vmem:[%s5055_s15 + $0x28c0] sm:$0xff] %vm2813_vm0, %v2773_v6  ;;  %4121 = vst.msk [vmem:[%s5055_s15 + $0x28d0] sm:$0xff] %vm2813_vm0, %v2775_v10  ;;  %v15597_v46 = vld [vmem:[#allocation1254_spill] sm:$0xff]  ;;  %v15598_v19 = vld [vmem:[#allocation1255_spill] sm:$0xff] }
 0x5d3   : > { %v2780_v18 = vmax.f32 %v15597_v46, 0.0  ;;  %v2781_v39 = vmax.f32 %v15598_v19, 0.0  ;;  %v15599_v38 = vld [vmem:[#allocation1256_spill] sm:$0xff]  ;;  %v15600_v20 = vld [vmem:[#allocation1257_spill] sm:$0xff]  ;;  %4122 = vst.msk [vmem:[%s5055_s15 + $0x28d8] sm:$0x3f] %vm2815_vm1, %v2776_v12 }
 0x5d4   : > { %v2782_v33 = vmax.f32 %v15599_v38, 0.0  ;;  %v2783_v32 = vmax.f32 %v15600_v20, 0.0  ;;  %4123 = vst.msk [vmem:[%s5055_s15 + $0x28e0] sm:$0xff] %vm2813_vm0, %v2777_v14  ;;  %4125 = vst.msk [vmem:[%s5055_s15 + $0x28f0] sm:$0xff] %vm2813_vm0, %v2779_v47  ;;  %v15601_v31 = vld [vmem:[#allocation1258_spill] sm:$0xff]  ;;  %v15602_v25 = vld [vmem:[#allocation1259_spill] sm:$0xff] }
 0x5d5   : > { %4124 = vst.msk [vmem:[%s5055_s15 + $0x28e8] sm:$0x3f] %vm2815_vm1, %v2778_v16  ;;  %v2784_v30 = vmax.f32 %v15601_v31, 0.0  ;;  %v2785_v21 = vmax.f32 %v15602_v25, 0.0  ;;  %v15603_v23 = vld [vmem:[#allocation1260_spill] sm:$0xff]  ;;  %v15604_v45 = vld [vmem:[#allocation1261_spill] sm:$0xff] }
 0x5d6   : > { %v2786_v22 = vmax.f32 %v15603_v23, 0.0  ;;  %v2787_v44 = vmax.f32 %v15604_v45, 0.0  ;;  %4126 = vst.msk [vmem:[%s5055_s15 + $0x28f8] sm:$0x3f] %vm2815_vm1, %v2780_v18  ;;  %4128 = vst.msk [vmem:[%s5055_s15 + $0x2908] sm:$0x3f] %vm2815_vm1, %v2782_v33 }
 0x5d7   : > { %4127 = vst.msk [vmem:[%s5055_s15 + $0x2900] sm:$0xff] %vm2813_vm0, %v2781_v39  ;;  %4129 = vst.msk [vmem:[%s5055_s15 + $0x2910] sm:$0xff] %vm2813_vm0, %v2783_v32  ;;  %v15605_v43 = vld [vmem:[#allocation1262_spill] sm:$0xff]  ;;  %v15606_v53 = vld [vmem:[#allocation1263_spill] sm:$0xff]  ;;  %v2810_v16 = vmax.f32 %v8496_v62, 0.0 }
 0x5d8   : > { %v2788_v63 = vmax.f32 %v15605_v43, 0.0  ;;  %v2789_v52 = vmax.f32 %v15606_v53, 0.0  ;;  %v15607_v51 = vld [vmem:[#allocation1264_spill] sm:$0xff]  ;;  %v15608_v60 = vld [vmem:[#allocation1265_spill] sm:$0xff]  ;;  %4130 = vst.msk [vmem:[%s5055_s15 + $0x2918] sm:$0x3f] %vm2815_vm1, %v2784_v30 }
 0x5d9   : > { %v2790_v61 = vmax.f32 %v15607_v51, 0.0  ;;  %v2791_v59 = vmax.f32 %v15608_v60, 0.0  ;;  %4131 = vst.msk [vmem:[%s5055_s15 + $0x2920] sm:$0xff] %vm2813_vm0, %v2785_v21  ;;  %4133 = vst.msk [vmem:[%s5055_s15 + $0x2930] sm:$0xff] %vm2813_vm0, %v2787_v44  ;;  %v15609_v58 = vld [vmem:[#allocation1266_spill] sm:$0xff]  ;;  %v15610_v57 = vld [vmem:[#allocation1267_spill] sm:$0xff] }
 0x5da   : > { %4132 = vst.msk [vmem:[%s5055_s15 + $0x2928] sm:$0x3f] %vm2815_vm1, %v2786_v22  ;;  %v2792_v54 = vmax.f32 %v15609_v58, 0.0  ;;  %v2793_v26 = vmax.f32 %v15610_v57, 0.0  ;;  %v15611_v42 = vld [vmem:[#allocation1268_spill] sm:$0xff]  ;;  %v15612_v28 = vld [vmem:[#allocation1269_spill] sm:$0xff] }
 0x5db   : > { %v2794_v27 = vmax.f32 %v15611_v42, 0.0  ;;  %v2795_v48 = vmax.f32 %v15612_v28, 0.0  ;;  %4134 = vst.msk [vmem:[%s5055_s15 + $0x2938] sm:$0x3f] %vm2815_vm1, %v2788_v63  ;;  %4136 = vst.msk [vmem:[%s5055_s15 + $0x2948] sm:$0x3f] %vm2815_vm1, %v2790_v61 }
 0x5dc   : > { %4135 = vst.msk [vmem:[%s5055_s15 + $0x2940] sm:$0xff] %vm2813_vm0, %v2789_v52  ;;  %4137 = vst.msk [vmem:[%s5055_s15 + $0x2950] sm:$0xff] %vm2813_vm0, %v2791_v59  ;;  %v15613_v37 = vld [vmem:[#allocation1270_spill] sm:$0xff]  ;;  %v15614_v49 = vld [vmem:[#allocation1271_spill] sm:$0xff] }
 0x5dd   : > { %v2796_v29 = vmax.f32 %v15613_v37, 0.0  ;;  %v2797_v40 = vmax.f32 %v15614_v49, 0.0  ;;  %v15615_v34 = vld [vmem:[#allocation1272_spill] sm:$0xff]  ;;  %v15616_v50 = vld [vmem:[#allocation1273_spill] sm:$0xff]  ;;  %4138 = vst.msk [vmem:[%s5055_s15 + $0x2958] sm:$0x3f] %vm2815_vm1, %v2792_v54 }
 0x5de   : > { %v2798_v56 = vmax.f32 %v15615_v34, 0.0  ;;  %v2799_v35 = vmax.f32 %v15616_v50, 0.0  ;;  %4139 = vst.msk [vmem:[%s5055_s15 + $0x2960] sm:$0xff] %vm2813_vm0, %v2793_v26  ;;  %4141 = vst.msk [vmem:[%s5055_s15 + $0x2970] sm:$0xff] %vm2813_vm0, %v2795_v48  ;;  %v15617_v55 = vld [vmem:[#allocation1274_spill] sm:$0xff]  ;;  %v15618_v0 = vld [vmem:[#allocation1275_spill] sm:$0xff] }
 0x5df   : > { %4140 = vst.msk [vmem:[%s5055_s15 + $0x2968] sm:$0x3f] %vm2815_vm1, %v2794_v27  ;;  %v2800_v36 = vmax.f32 %v15617_v55, 0.0  ;;  %v2801_v1 = vmax.f32 %v15618_v0, 0.0  ;;  %v15619_v24 = vld [vmem:[#allocation1276_spill] sm:$0xff]  ;;  %v15620_v2 = vld [vmem:[#allocation1277_spill] sm:$0xff] }
 0x5e0   : > { %v2802_v41 = vmax.f32 %v15619_v24, 0.0  ;;  %v2803_v3 = vmax.f32 %v15620_v2, 0.0  ;;  %4142 = vst.msk [vmem:[%s5055_s15 + $0x2978] sm:$0x3f] %vm2815_vm1, %v2796_v29  ;;  %4144 = vst.msk [vmem:[%s5055_s15 + $0x2988] sm:$0x3f] %vm2815_vm1, %v2798_v56 }
 0x5e1   : > { %4143 = vst.msk [vmem:[%s5055_s15 + $0x2980] sm:$0xff] %vm2813_vm0, %v2797_v40  ;;  %4145 = vst.msk [vmem:[%s5055_s15 + $0x2990] sm:$0xff] %vm2813_vm0, %v2799_v35  ;;  %v15621_v4 = vld [vmem:[#allocation1278_spill] sm:$0xff]  ;;  %v15622_v6 = vld [vmem:[#allocation1279_spill] sm:$0xff] }
 0x5e2   : > { %v2804_v5 = vmax.f32 %v15621_v4, 0.0  ;;  %v2805_v7 = vmax.f32 %v15622_v6, 0.0  ;;  %v15623_v8 = vld [vmem:[#allocation1280_spill] sm:$0xff]  ;;  %v15624_v10 = vld [vmem:[#allocation1281_spill] sm:$0xff]  ;;  %4146 = vst.msk [vmem:[%s5055_s15 + $0x2998] sm:$0x3f] %vm2815_vm1, %v2800_v36 }
 0x5e3   : > { %v2806_v9 = vmax.f32 %v15623_v8, 0.0  ;;  %v2807_v11 = vmax.f32 %v15624_v10, 0.0  ;;  %4147 = vst.msk [vmem:[%s5055_s15 + $0x29a0] sm:$0xff] %vm2813_vm0, %v2801_v1  ;;  %4149 = vst.msk [vmem:[%s5055_s15 + $0x29b0] sm:$0xff] %vm2813_vm0, %v2803_v3  ;;  %v15625_v12 = vld [vmem:[#allocation1282_spill] sm:$0xff]  ;;  %v15626_v14 = vld [vmem:[#allocation1283_spill] sm:$0xff] }
 0x5e4   : > { %4148 = vst.msk [vmem:[%s5055_s15 + $0x29a8] sm:$0x3f] %vm2815_vm1, %v2802_v41  ;;  %v2808_v13 = vmax.f32 %v15625_v12, 0.0  ;;  %v2809_v15 = vmax.f32 %v15626_v14, 0.0  ;;  %v15627_v17 = vld [vmem:[#allocation1285_spill] sm:$0xff]  ;;  %v15628_v46 = vld [vmem:[#allocation1286_spill] sm:$0xff] }
 0x5e5   : > { %v2811_v47 = vmax.f32 %v15627_v17, 0.0  ;;  %4150 = vst.msk [vmem:[%s5055_s15 + $0x29b8] sm:$0x3f] %vm2815_vm1, %v2804_v5  ;;  %4152 = vst.msk [vmem:[%s5055_s15 + $0x29c8] sm:$0x3f] %vm2815_vm1, %v2806_v9  ;;  %v2812_v18 = vmax.f32 %v15628_v46, 0.0 }
 0x5e6   : > { %4151 = vst.msk [vmem:[%s5055_s15 + $0x29c0] sm:$0xff] %vm2813_vm0, %v2805_v7  ;;  %4153 = vst.msk [vmem:[%s5055_s15 + $0x29d0] sm:$0xff] %vm2813_vm0, %v2807_v11 }
 0x5e7   : > { %4154 = vst.msk [vmem:[%s5055_s15 + $0x29d8] sm:$0x3f] %vm2815_vm1, %v2808_v13  ;;  %4156 = vst.msk [vmem:[%s5055_s15 + $0x29e8] sm:$0x3f] %vm2815_vm1, %v2810_v16 }
 0x5e8   : > { %4155 = vst.msk [vmem:[%s5055_s15 + $0x29e0] sm:$0xff] %vm2813_vm0, %v2809_v15  ;;  %4157 = vst.msk [vmem:[%s5055_s15 + $0x29f0] sm:$0xff] %vm2813_vm0, %v2811_v47 }
 0x5e9   : > { %4158 = vst.msk [vmem:[%s5055_s15 + $0x29f8] sm:$0x3f] %vm2815_vm1, %v2812_v18 }
 0x5ea PF: > { %s11_s6 = sadd.s32 1, %s4248_s6  }
 0x5eb   : > { %p8_p4 = scmp.ge.s32.totalorder %s11_s6, 4  }
 0x5ed   :  { %10 = sbr.rel (!%p8_p4) target bundleno = 1 (0x1), region = 54 }

</bundles_post_ra>
